<compile_context>
chip_gen: v5e
topology: v5e:2x2
jax: 0.10.0
libtpu: 0.0.40
codegen_flags: <defaults>
</compile_context>

<pallas_src>
import functools

import jax
import jax.numpy as jnp
from jax.experimental import pallas as pl
from jax.experimental.pallas import tpu as pltpu

_BN_EPS = 1e-5
_LANE = 128


def _round_up(x, m):
    return ((x + m - 1) // m) * m


def _vmem_limit_bytes():
    """Generation-aware scoped-VMEM limit (headroom for Mosaic scratch)."""
    cap = 128 * 1024 * 1024
    try:
        info = pltpu.get_tpu_info()
        cap = int(getattr(info, "vmem_capacity_bytes", cap))
    except Exception:
        pass
    # ~41 MiB on v7x (64 MiB physical), ~83 MiB on v5e/v6e (128 MiB physical).
    return max(32 * 1024 * 1024, min(int(cap * 0.65), 100 * 1024 * 1024))


def _maybe_buffered(block_shape, index_map, depth):
    """BlockSpec with depth-deep pipelining if this JAX version supports it."""
    if hasattr(pl, "Buffered"):
        try:
            return pl.BlockSpec(block_shape, index_map,
                                pipeline_mode=pl.Buffered(depth))
        except Exception:
            pass
    return pl.BlockSpec(block_shape, index_map)


# --------------------------------------------------------------------------
# Conv3x3 (im2col matmul) + bias + ReLU + BatchNorm2d (per-branch batch stats)
# Grid: (branch, row_tile).  Branch output stays VMEM-resident (f32 scratch),
# BN stats accumulate across row tiles, finalize normalizes + stores.
# --------------------------------------------------------------------------
def _conv_relu_bn_kernel(p_ref, w_ref, b_ref, g_ref, be_ref, o_ref,
                         y_ref, sum_ref, ssq_ref):
    t = pl.program_id(1)
    tile_rows = p_ref.shape[0]
    rpb = o_ref.shape[0]            # rows per siamese branch (static)

    @pl.when(t == 0)
    def _():
        sum_ref[...] = jnp.zeros_like(sum_ref)
        ssq_ref[...] = jnp.zeros_like(ssq_ref)

    # One matmul per row tile: (tile_rows, 9*Cin) x (9*Cin, Cout_pad), f32 acc.
    y = jnp.dot(p_ref[...], w_ref[...], preferred_element_type=jnp.float32)
    y = jnp.maximum(y + b_ref[...], 0.0)          # conv bias + ReLU

    # Keep post-ReLU tile resident in VMEM; accumulate per-channel BN stats.
    row0 = pl.multiple_of(t * tile_rows, tile_rows)
    y_ref[pl.ds(row0, tile_rows), :] = y
    sum_ref[...] += jnp.sum(y, axis=0, keepdims=True)
    ssq_ref[...] += jnp.sum(y * y, axis=0, keepdims=True)

    @pl.when(t == pl.num_programs(1) - 1)
    def _():
        # BatchNorm2d training-mode stats over this branch (biased variance).
        inv = 1.0 / rpb
        mean = sum_ref[...] * inv
        var = jnp.maximum(ssq_ref[...] * inv - mean * mean, 0.0)
        scale = jax.lax.rsqrt(var + _BN_EPS) * g_ref[...]
        shift = be_ref[...] - mean * scale
        o_ref[...] = (y_ref[...] * scale + shift).astype(o_ref.dtype)


def _pick_conv_tile(rpb, vmem_limit):
    # Largest multiple-of-8 divisor of rows-per-branch under the cap.
    cap = 4096 if vmem_limit >= 64 * 1024 * 1024 else 2048
    t = (min(cap, rpb) // 8) * 8
    while t >= 8:
        if rpb % t == 0:
            return t
        t -= 8
    return rpb  # tiny shapes: one tile per branch


def conv_relu_bn(x_nhwc, w_hwio, b, gamma, beta, num_branches, vmem_limit):
    """ReflectionPad2d(1) -> Conv2d(3x3) -> ReLU -> BatchNorm2d, NHWC layout.

    Output lane dim padded to 128 inside the kernel; sliced back here.
    """
    n, h, w, cin = x_nhwc.shape
    cout = w_hwio.shape[-1]
    cout_p = _round_up(cout, _LANE)
    rpb = (n // num_branches) * h * w            # rows per siamese branch
    tile_rows = _pick_conv_tile(rpb, vmem_limit)
    nt = rpb // tile_rows
    kdim = 9 * cin

    # ReflectionPad2d(1) (edge not repeated) + im2col slab, bf16, built with
    # plain-JAX glue.
    # TODO(synk): move im2col in-kernel (halo DMA + in-VMEM taps) to cut the
    # ~9x HBM inflation of this patches slab (biggest remaining conv-stage
    # HBM-traffic item, matters most on v5e).
    xp = jnp.pad(x_nhwc, ((0, 0), (1, 1), (1, 1), (0, 0)), mode="reflect")
    patches = jnp.concatenate(
        [xp[:, kh:kh + h, kw:kw + w, :] for kh in range(3) for kw in range(3)],
        axis=-1,
    ).reshape(n * h * w, kdim).astype(jnp.bfloat16)

    w_flat = jnp.pad(w_hwio.reshape(kdim, cout),
                     ((0, 0), (0, cout_p - cout))).astype(jnp.bfloat16)
    b_p = jnp.pad(b, ((0, 0), (0, cout_p - cout))).astype(jnp.float32)
    g_p = jnp.pad(gamma, ((0, 0), (0, cout_p - cout))).astype(jnp.float32)
    be_p = jnp.pad(beta, ((0, 0), (0, cout_p - cout))).astype(jnp.float32)

    out = pl.pallas_call(
        _conv_relu_bn_kernel,
        out_shape=jax.ShapeDtypeStruct((n * h * w, cout_p), jnp.bfloat16),
        grid=(num_branches, nt),
        in_specs=[
            pl.BlockSpec((tile_rows, kdim), lambda bi, t: (bi * nt + t, 0)),
            pl.BlockSpec((kdim, cout_p), lambda bi, t: (0, 0)),
            pl.BlockSpec((1, cout_p), lambda bi, t: (0, 0)),
            pl.BlockSpec((1, cout_p), lambda bi, t: (0, 0)),
            pl.BlockSpec((1, cout_p), lambda bi, t: (0, 0)),
        ],
        # Whole-branch output block stays resident across the row-tile axis and
        # is written once in the BN finalize step.
        out_specs=pl.BlockSpec((rpb, cout_p), lambda bi, t: (bi, 0)),
        scratch_shapes=[
            pltpu.VMEM((rpb, cout_p), jnp.float32),  # post-ReLU activations
            pltpu.VMEM((1, cout_p), jnp.float32),    # per-channel sum
            pltpu.VMEM((1, cout_p), jnp.float32),    # per-channel sum of sq
        ],
        compiler_params=pltpu.CompilerParams(
            dimension_semantics=("parallel", "arbitrary"),
            vmem_limit_bytes=vmem_limit,
        ),
    )(patches, w_flat, b_p, g_p, be_p)
    return out[:, :cout].reshape(n, h, w, cout)


# --------------------------------------------------------------------------
# 3-layer MLP, K-tiled over the (huge) first-layer feature axis
# --------------------------------------------------------------------------
def _mlp_kernel(x_ref, w1_ref, b1_ref, w2_ref, b2_ref, w3_ref, b3_ref,
                o_ref, acc_ref):
    k = pl.program_id(0)

    @pl.when(k == 0)
    def _():
        acc_ref[...] = jnp.zeros_like(acc_ref)

    # Accumulate layer-1 partial products over the K (feature) axis.
    acc_ref[...] += jnp.dot(x_ref[...], w1_ref[...],
                            preferred_element_type=jnp.float32)

    @pl.when(k == pl.num_programs(0) - 1)
    def _():
        h1 = jnp.maximum(acc_ref[...] + b1_ref[...], 0.0)
        h2 = jnp.dot(h1.astype(jnp.bfloat16), w2_ref[...],
                     preferred_element_type=jnp.float32) + b2_ref[...]
        h2 = jnp.maximum(h2, 0.0)
        o_ref[...] = jnp.dot(h2.astype(jnp.bfloat16), w3_ref[...],
                             preferred_element_type=jnp.float32) + b3_ref[...]


def _pick_tk(feat_p, vmem_limit):
    # Generation-aware ceiling; tk is a 128-multiple divisor of feat_p so no
    # padded-K DMA waste (feat = 24*160*60 = 1800*128 -> tk=9216/15360).
    cap = 16384 if vmem_limit >= 64 * 1024 * 1024 else 9216
    if feat_p <= cap:
        return feat_p
    units = feat_p // _LANE
    best = 1
    for d in range(1, cap // _LANE + 1):
        if units % d == 0:
            best = d
    return best * _LANE


def mlp(x, w1, b1, w2, b2, w3, b3, vmem_limit):
    m, feat = x.shape
    h1d, h2d, dout = w1.shape[1], w2.shape[1], w3.shape[1]
    h1p = _round_up(h1d, _LANE)
    h2p = _round_up(h2d, _LANE)
    dout_p = _round_up(dout, _LANE)

    feat_p = _round_up(feat, _LANE)
    tk = _pick_tk(feat_p, vmem_limit)
    nk = feat_p // tk

    # Zero padding keeps the math exact (padded K-rows / lanes contribute 0).
    xb = jnp.pad(x, ((0, 0), (0, feat_p - feat))).astype(jnp.bfloat16)
    w1p = jnp.pad(w1, ((0, feat_p - feat), (0, h1p - h1d))).astype(jnp.bfloat16)
    b1p = jnp.pad(b1, ((0, 0), (0, h1p - h1d))).astype(jnp.float32)
    w2p = jnp.pad(w2, ((0, h1p - h1d), (0, h2p - h2d))).astype(jnp.bfloat16)
    b2p = jnp.pad(b2, ((0, 0), (0, h2p - h2d))).astype(jnp.float32)
    w3p = jnp.pad(w3, ((0, h2p - h2d), (0, dout_p - dout))).astype(jnp.bfloat16)
    b3p = jnp.pad(b3, ((0, 0), (0, dout_p - dout))).astype(jnp.float32)

    # Deep-buffer the streamed w1 K-tiles only when the grid is long enough.
    if nk >= 3:
        w1_spec = _maybe_buffered((tk, h1p), lambda k: (k, 0), 3)
    else:
        w1_spec = pl.BlockSpec((tk, h1p), lambda k: (k, 0))

    out = pl.pallas_call(
        _mlp_kernel,
        out_shape=jax.ShapeDtypeStruct((m, dout_p), jnp.float32),
        grid=(nk,),
        in_specs=[
            pl.BlockSpec((m, tk), lambda k: (0, k)),       # x K-tile
            w1_spec,                                       # w1 K-tile (streamed)
            pl.BlockSpec((1, h1p), lambda k: (0, 0)),
            pl.BlockSpec((h1p, h2p), lambda k: (0, 0)),
            pl.BlockSpec((1, h2p), lambda k: (0, 0)),
            pl.BlockSpec((h2p, dout_p), lambda k: (0, 0)),
            pl.BlockSpec((1, dout_p), lambda k: (0, 0)),
        ],
        out_specs=pl.BlockSpec((m, dout_p), lambda k: (0, 0)),
        scratch_shapes=[pltpu.VMEM((m, h1p), jnp.float32)],
        compiler_params=pltpu.CompilerParams(
            dimension_semantics=("arbitrary",),
            vmem_limit_bytes=vmem_limit,
        ),
    )(xb, w1p, b1p, w2p, b2p, w3p, b3p)
    return out[:, :dout]


# --------------------------------------------------------------------------
# Siamese forward: both branches fused into one batch (shared weights),
# BatchNorm statistics computed PER BRANCH (matches PyTorch training mode).
# --------------------------------------------------------------------------
def siamese_forward(input0, input1, params):
    n = input0.shape[0]
    vmem_limit = _vmem_limit_bytes()
    x = jnp.concatenate([input0, input1], axis=0)      # (2N, C, H, W)
    x = jnp.transpose(x, (0, 2, 3, 1))                 # NCHW -> NHWC
    for (w, b, g, be) in params["conv"]:
        x = conv_relu_bn(x, w, b, g, be, num_branches=2, vmem_limit=vmem_limit)
    # Back to NCHW before flatten so ordering matches PyTorch .view(N, -1).
    x = jnp.transpose(x, (0, 3, 1, 2)).reshape(x.shape[0], -1)
    w1, b1, w2, b2, w3, b3 = params["fc"]
    out = mlp(x, w1, b1, w2, b2, w3, b3, vmem_limit)
    return out[:n], out[n:]


def init_params(key, h, w):
    # Deterministic synthetic parameters (shapes follow the PyTorch module,
    # with the original 160x60 spatial size scaled down to h x w).
    ks = jax.random.split(key, 18)

    def nrm(k, shape, scale):
        return jax.random.normal(k, shape, dtype=jnp.float32) * scale

    conv = []
    idx = 0
    for cin, cout in [(3, 12), (12, 24), (24, 24)]:
        wt = nrm(ks[idx], (3, 3, cin, cout), 0.1); idx += 1        # HWIO
        b = nrm(ks[idx], (1, cout), 0.01); idx += 1                # conv bias
        gamma = 1.0 + nrm(ks[idx], (1, cout), 0.01); idx += 1      # BN weight
        beta = nrm(ks[idx], (1, cout), 0.01); idx += 1             # BN bias
        conv.append((wt, b, gamma, beta))

    feat = 24 * h * w  # analog of 24 * 160 * 60
    fc = []
    for din, dout in [(feat, 500), (500, 500), (500, 18)]:
        wt = nrm(ks[idx], (din, dout), 0.02); idx += 1             # (in, out)
        bb = nrm(ks[idx], (1, dout), 0.01); idx += 1
        fc.extend([wt, bb])

    return {"conv": conv, "fc": tuple(fc)}


if __name__ == "__main__":
    key = jax.random.PRNGKey(0)
    k_in0, k_in1, k_par = jax.random.split(key, 3)

    N, C, H, W = 2, 3, 16, 8  # small stand-in for the module's 3x160x60 inputs
    input0 = jax.random.normal(k_in0, (N, C, H, W), dtype=jnp.float32)
    input1 = jax.random.normal(k_in1, (N, C, H, W), dtype=jnp.float32)
    params = init_params(k_par, H, W)

    fwd = jax.jit(functools.partial(siamese_forward, params=params))
    out0, out1 = fwd(input0, input1)
    jax.block_until_ready((out0, out1))

    assert out0.shape == (N, 18) and out1.shape == (N, 18)
    assert out0.dtype == jnp.float32 and out1.dtype == jnp.float32
    print("KERNEL_OK")
</pallas_src>

<mosaic_0001>
module attributes {stable_mosaic.version = 11 : i64} {
  func.func @_conv_relu_bn_kernel(%arg0: i32, %arg1: i32, %arg2: memref<256x27xbf16, #tpu.memory_space<vmem>>, %arg3: memref<27x128xbf16, #tpu.memory_space<vmem>>, %arg4: memref<1x128xf32, #tpu.memory_space<vmem>>, %arg5: memref<1x128xf32, #tpu.memory_space<vmem>>, %arg6: memref<1x128xf32, #tpu.memory_space<vmem>>, %arg7: memref<256x128xbf16, #tpu.memory_space<vmem>>, %arg8: memref<256x128xf32, #tpu.memory_space<vmem>>, %arg9: memref<1x128xf32, #tpu.memory_space<vmem>>, %arg10: memref<1x128xf32, #tpu.memory_space<vmem>>) attributes {dimension_semantics = [#tpu.dimension_semantics<parallel>, #tpu.dimension_semantics<arbitrary>], iteration_bounds = array<i64: 2, 1>, scalar_prefetch = 0 : i64, scratch_operands = 3 : i64, tpu.core_type = #tpu.core_type<tc>, window_params = [{transform_indices = @transform_0, window_bounds = array<i64: 256, 27>}, {pipeline_mode = #tpu.pipeline_mode<synchronous>, transform_indices = @transform_1, window_bounds = array<i64: 27, 128>}, {pipeline_mode = #tpu.pipeline_mode<synchronous>, transform_indices = @transform_2, window_bounds = array<i64: 1, 128>}, {pipeline_mode = #tpu.pipeline_mode<synchronous>, transform_indices = @transform_3, window_bounds = array<i64: 1, 128>}, {pipeline_mode = #tpu.pipeline_mode<synchronous>, transform_indices = @transform_4, window_bounds = array<i64: 1, 128>}, {transform_indices = @transform_5, window_bounds = array<i64: 256, 128>}]} {
    %c0_i32 = arith.constant 0 : i32
    %0 = arith.cmpi eq, %arg1, %c0_i32 : i32
    %1 = arith.extui %0 : i1 to i32
    %c0_i32_0 = arith.constant 0 : i32
    %2 = arith.cmpi ne, %1, %c0_i32_0 : i32
    scf.if %2 {
      %cst_20 = arith.constant 0.000000e+00 : f32
      %29 = vector.broadcast %cst_20 : f32 to vector<1x128xf32>
      %c0_21 = arith.constant 0 : index
      %c0_22 = arith.constant 0 : index
      %30 = vector.load %arg9[%c0_21, %c0_22] : memref<1x128xf32, #tpu.memory_space<vmem>>, vector<1x128xf32>
      tpu.vector_store %arg9[%c0_21, %c0_22], %29 {strides = array<i32>} : memref<1x128xf32, #tpu.memory_space<vmem>>, vector<1x128xf32>,
      %cst_23 = arith.constant 0.000000e+00 : f32
      %31 = vector.broadcast %cst_23 : f32 to vector<1x128xf32>
      %c0_24 = arith.constant 0 : index
      %c0_25 = arith.constant 0 : index
      %32 = vector.load %arg10[%c0_24, %c0_25] : memref<1x128xf32, #tpu.memory_space<vmem>>, vector<1x128xf32>
      tpu.vector_store %arg10[%c0_24, %c0_25], %31 {strides = array<i32>} : memref<1x128xf32, #tpu.memory_space<vmem>>, vector<1x128xf32>,
    } else {
    }
    %c0 = arith.constant 0 : index
    %c0_1 = arith.constant 0 : index
    %3 = vector.load %arg2[%c0, %c0_1] : memref<256x27xbf16, #tpu.memory_space<vmem>>, vector<256x27xbf16>
    %c0_2 = arith.constant 0 : index
    %c0_3 = arith.constant 0 : index
    %4 = vector.load %arg3[%c0_2, %c0_3] : memref<27x128xbf16, #tpu.memory_space<vmem>>, vector<27x128xbf16>
    %cst = arith.constant dense<0.000000e+00> : vector<256x128xf32>
    %5 = tpu.matmul %3, %4, %cst {dimension_numbers = #tpu.dot_dimension_numbers<[1], [0], [0], [1], [0, 0, 1, 1], [], []>} : vector<256x27xbf16>, vector<27x128xbf16>, vector<256x128xf32> -> vector<256x128xf32>
    %c0_4 = arith.constant 0 : index
    %c0_5 = arith.constant 0 : index
    %6 = vector.load %arg4[%c0_4, %c0_5] : memref<1x128xf32, #tpu.memory_space<vmem>>, vector<1x128xf32>
    %7 = vector.broadcast %6 : vector<1x128xf32> to vector<256x128xf32>
    %8 = arith.addf %5, %7 : vector<256x128xf32>
    %cst_6 = arith.constant 0.000000e+00 : f32
    %9 = vector.broadcast %cst_6 : f32 to vector<256x128xf32>
    %10 = arith.maximumf %8, %9 : vector<256x128xf32>
    %c256_i32 = arith.constant 256 : i32
    %11 = arith.muli %arg1, %c256_i32 : i32
    %12 = tpu.assume_multiple %11, 256 : i32
    %13 = arith.index_cast %12 : i32 to index
    %c0_7 = arith.constant 0 : index
    %14 = vector.load %arg8[%13, %c0_7] : memref<256x128xf32, #tpu.memory_space<vmem>>, vector<256x128xf32>
    tpu.vector_store %arg8[%13, %c0_7], %10 {strides = array<i32>} : memref<256x128xf32, #tpu.memory_space<vmem>>, vector<256x128xf32>,
    %c0_8 = arith.constant 0 : index
    %c0_9 = arith.constant 0 : index
    %15 = vector.load %arg9[%c0_8, %c0_9] : memref<1x128xf32, #tpu.memory_space<vmem>>, vector<1x128xf32>
    %cst_10 = arith.constant dense<0.000000e+00> : vector<128xf32>
    %16 = vector.multi_reduction <add>, %10, %cst_10 [0] : vector<256x128xf32> to vector<128xf32>
    %17 = vector.shape_cast %16 : vector<128xf32> to vector<1x128xf32>
    %18 = arith.addf %15, %17 : vector<1x128xf32>
    %c0_11 = arith.constant 0 : index
    %c0_12 = arith.constant 0 : index
    %19 = vector.load %arg9[%c0_11, %c0_12] : memref<1x128xf32, #tpu.memory_space<vmem>>, vector<1x128xf32>
    tpu.vector_store %arg9[%c0_11, %c0_12], %18 {strides = array<i32>} : memref<1x128xf32, #tpu.memory_space<vmem>>, vector<1x128xf32>,
    %c0_13 = arith.constant 0 : index
    %c0_14 = arith.constant 0 : index
    %20 = vector.load %arg10[%c0_13, %c0_14] : memref<1x128xf32, #tpu.memory_space<vmem>>, vector<1x128xf32>
    %21 = arith.mulf %10, %10 : vector<256x128xf32>
    %cst_15 = arith.constant dense<0.000000e+00> : vector<128xf32>
    %22 = vector.multi_reduction <add>, %21, %cst_15 [0] : vector<256x128xf32> to vector<128xf32>
    %23 = vector.shape_cast %22 : vector<128xf32> to vector<1x128xf32>
    %24 = arith.addf %20, %23 : vector<1x128xf32>
    %c0_16 = arith.constant 0 : index
    %c0_17 = arith.constant 0 : index
    %25 = vector.load %arg10[%c0_16, %c0_17] : memref<1x128xf32, #tpu.memory_space<vmem>>, vector<1x128xf32>
    tpu.vector_store %arg10[%c0_16, %c0_17], %24 {strides = array<i32>} : memref<1x128xf32, #tpu.memory_space<vmem>>, vector<1x128xf32>,
    %c0_i32_18 = arith.constant 0 : i32
    %26 = arith.cmpi eq, %arg1, %c0_i32_18 : i32
    %27 = arith.extui %26 : i1 to i32
    %c0_i32_19 = arith.constant 0 : i32
    %28 = arith.cmpi ne, %27, %c0_i32_19 : i32
    scf.if %28 {
      %c0_20 = arith.constant 0 : index
      %c0_21 = arith.constant 0 : index
      %29 = vector.load %arg9[%c0_20, %c0_21] : memref<1x128xf32, #tpu.memory_space<vmem>>, vector<1x128xf32>
      %cst_22 = arith.constant 3.906250e-03 : f32
      %30 = vector.broadcast %cst_22 : f32 to vector<1x128xf32>
      %31 = arith.mulf %29, %30 : vector<1x128xf32>
      %c0_23 = arith.constant 0 : index
      %c0_24 = arith.constant 0 : index
      %32 = vector.load %arg10[%c0_23, %c0_24] : memref<1x128xf32, #tpu.memory_space<vmem>>, vector<1x128xf32>
      %cst_25 = arith.constant 3.906250e-03 : f32
      %33 = vector.broadcast %cst_25 : f32 to vector<1x128xf32>
      %34 = arith.mulf %32, %33 : vector<1x128xf32>
      %35 = arith.mulf %31, %31 : vector<1x128xf32>
      %36 = arith.subf %34, %35 : vector<1x128xf32>
      %cst_26 = arith.constant 0.000000e+00 : f32
      %37 = vector.broadcast %cst_26 : f32 to vector<1x128xf32>
      %38 = arith.maximumf %36, %37 : vector<1x128xf32>
      %cst_27 = arith.constant 9.99999974E-6 : f32
      %39 = vector.broadcast %cst_27 : f32 to vector<1x128xf32>
      %40 = arith.addf %38, %39 : vector<1x128xf32>
      %41 = math.rsqrt %40 : vector<1x128xf32>
      %c0_28 = arith.constant 0 : index
      %c0_29 = arith.constant 0 : index
      %42 = vector.load %arg5[%c0_28, %c0_29] : memref<1x128xf32, #tpu.memory_space<vmem>>, vector<1x128xf32>
      %43 = arith.mulf %41, %42 : vector<1x128xf32>
      %c0_30 = arith.constant 0 : index
      %c0_31 = arith.constant 0 : index
      %44 = vector.load %arg6[%c0_30, %c0_31] : memref<1x128xf32, #tpu.memory_space<vmem>>, vector<1x128xf32>
      %45 = arith.mulf %31, %43 : vector<1x128xf32>
      %46 = arith.subf %44, %45 : vector<1x128xf32>
      %c0_32 = arith.constant 0 : index
      %c0_33 = arith.constant 0 : index
      %47 = vector.load %arg8[%c0_32, %c0_33] : memref<256x128xf32, #tpu.memory_space<vmem>>, vector<256x128xf32>
      %48 = vector.broadcast %43 : vector<1x128xf32> to vector<256x128xf32>
      %49 = arith.mulf %47, %48 : vector<256x128xf32>
      %50 = vector.broadcast %46 : vector<1x128xf32> to vector<256x128xf32>
      %51 = arith.addf %49, %50 : vector<256x128xf32>
      %52 = arith.truncf %51 : vector<256x128xf32> to vector<256x128xbf16>
      %c0_34 = arith.constant 0 : index
      %c0_35 = arith.constant 0 : index
      %53 = vector.load %arg7[%c0_34, %c0_35] : memref<256x128xbf16, #tpu.memory_space<vmem>>, vector<256x128xbf16>
      tpu.vector_store %arg7[%c0_34, %c0_35], %52 {strides = array<i32>} : memref<256x128xbf16, #tpu.memory_space<vmem>>, vector<256x128xbf16>,
    } else {
    }
    return
  }
  func.func @transform_0(%arg0: i32, %arg1: i32) -> (i32, i32) {
    %c1_i32 = arith.constant 1 : i32
    %0 = arith.muli %arg0, %c1_i32 : i32
    %1 = arith.addi %0, %arg1 : i32
    %c0_i32 = arith.constant 0 : i32
    %c0_i32_0 = arith.constant 0 : i32
    return %1, %c0_i32 : i32, i32
  }
  func.func @transform_1(%arg0: i32, %arg1: i32) -> (i32, i32) {
    %c0_i32 = arith.constant 0 : i32
    %c0_i32_0 = arith.constant 0 : i32
    %c0_i32_1 = arith.constant 0 : i32
    return %c0_i32, %c0_i32_0 : i32, i32
  }
  func.func @transform_2(%arg0: i32, %arg1: i32) -> (i32, i32) {
    %c0_i32 = arith.constant 0 : i32
    %c0_i32_0 = arith.constant 0 : i32
    %c0_i32_1 = arith.constant 0 : i32
    return %c0_i32, %c0_i32_0 : i32, i32
  }
  func.func @transform_3(%arg0: i32, %arg1: i32) -> (i32, i32) {
    %c0_i32 = arith.constant 0 : i32
    %c0_i32_0 = arith.constant 0 : i32
    %c0_i32_1 = arith.constant 0 : i32
    return %c0_i32, %c0_i32_0 : i32, i32
  }
  func.func @transform_4(%arg0: i32, %arg1: i32) -> (i32, i32) {
    %c0_i32 = arith.constant 0 : i32
    %c0_i32_0 = arith.constant 0 : i32
    %c0_i32_1 = arith.constant 0 : i32
    return %c0_i32, %c0_i32_0 : i32, i32
  }
  func.func @transform_5(%arg0: i32, %arg1: i32) -> (i32, i32) {
    %c0_i32 = arith.constant 0 : i32
    %c0_i32_0 = arith.constant 0 : i32
    return %arg0, %c0_i32 : i32, i32
  }
}

module attributes {stable_mosaic.version = 11 : i64} {
  func.func @_conv_relu_bn_kernel(%arg0: i32, %arg1: i32, %arg2: memref<256x108xbf16, #tpu.memory_space<vmem>>, %arg3: memref<108x128xbf16, #tpu.memory_space<vmem>>, %arg4: memref<1x128xf32, #tpu.memory_space<vmem>>, %arg5: memref<1x128xf32, #tpu.memory_space<vmem>>, %arg6: memref<1x128xf32, #tpu.memory_space<vmem>>, %arg7: memref<256x128xbf16, #tpu.memory_space<vmem>>, %arg8: memref<256x128xf32, #tpu.memory_space<vmem>>, %arg9: memref<1x128xf32, #tpu.memory_space<vmem>>, %arg10: memref<1x128xf32, #tpu.memory_space<vmem>>) attributes {dimension_semantics = [#tpu.dimension_semantics<parallel>, #tpu.dimension_semantics<arbitrary>], iteration_bounds = array<i64: 2, 1>, scalar_prefetch = 0 : i64, scratch_operands = 3 : i64, tpu.core_type = #tpu.core_type<tc>, window_params = [{transform_indices = @transform_0, window_bounds = array<i64: 256, 108>}, {pipeline_mode = #tpu.pipeline_mode<synchronous>, transform_indices = @transform_1, window_bounds = array<i64: 108, 128>}, {pipeline_mode = #tpu.pipeline_mode<synchronous>, transform_indices = @transform_2, window_bounds = array<i64: 1, 128>}, {pipeline_mode = #tpu.pipeline_mode<synchronous>, transform_indices = @transform_3, window_bounds = array<i64: 1, 128>}, {pipeline_mode = #tpu.pipeline_mode<synchronous>, transform_indices = @transform_4, window_bounds = array<i64: 1, 128>}, {transform_indices = @transform_5, window_bounds = array<i64: 256, 128>}]} {
    %c0_i32 = arith.constant 0 : i32
    %0 = arith.cmpi eq, %arg1, %c0_i32 : i32
    %1 = arith.extui %0 : i1 to i32
    %c0_i32_0 = arith.constant 0 : i32
    %2 = arith.cmpi ne, %1, %c0_i32_0 : i32
    scf.if %2 {
      %cst_20 = arith.constant 0.000000e+00 : f32
      %29 = vector.broadcast %cst_20 : f32 to vector<1x128xf32>
      %c0_21 = arith.constant 0 : index
      %c0_22 = arith.constant 0 : index
      %30 = vector.load %arg9[%c0_21, %c0_22] : memref<1x128xf32, #tpu.memory_space<vmem>>, vector<1x128xf32>
      tpu.vector_store %arg9[%c0_21, %c0_22], %29 {strides = array<i32>} : memref<1x128xf32, #tpu.memory_space<vmem>>, vector<1x128xf32>,
      %cst_23 = arith.constant 0.000000e+00 : f32
      %31 = vector.broadcast %cst_23 : f32 to vector<1x128xf32>
      %c0_24 = arith.constant 0 : index
      %c0_25 = arith.constant 0 : index
      %32 = vector.load %arg10[%c0_24, %c0_25] : memref<1x128xf32, #tpu.memory_space<vmem>>, vector<1x128xf32>
      tpu.vector_store %arg10[%c0_24, %c0_25], %31 {strides = array<i32>} : memref<1x128xf32, #tpu.memory_space<vmem>>, vector<1x128xf32>,
    } else {
    }
    %c0 = arith.constant 0 : index
    %c0_1 = arith.constant 0 : index
    %3 = vector.load %arg2[%c0, %c0_1] : memref<256x108xbf16, #tpu.memory_space<vmem>>, vector<256x108xbf16>
    %c0_2 = arith.constant 0 : index
    %c0_3 = arith.constant 0 : index
    %4 = vector.load %arg3[%c0_2, %c0_3] : memref<108x128xbf16, #tpu.memory_space<vmem>>, vector<108x128xbf16>
    %cst = arith.constant dense<0.000000e+00> : vector<256x128xf32>
    %5 = tpu.matmul %3, %4, %cst {dimension_numbers = #tpu.dot_dimension_numbers<[1], [0], [0], [1], [0, 0, 1, 1], [], []>} : vector<256x108xbf16>, vector<108x128xbf16>, vector<256x128xf32> -> vector<256x128xf32>
    %c0_4 = arith.constant 0 : index
    %c0_5 = arith.constant 0 : index
    %6 = vector.load %arg4[%c0_4, %c0_5] : memref<1x128xf32, #tpu.memory_space<vmem>>, vector<1x128xf32>
    %7 = vector.broadcast %6 : vector<1x128xf32> to vector<256x128xf32>
    %8 = arith.addf %5, %7 : vector<256x128xf32>
    %cst_6 = arith.constant 0.000000e+00 : f32
    %9 = vector.broadcast %cst_6 : f32 to vector<256x128xf32>
    %10 = arith.maximumf %8, %9 : vector<256x128xf32>
    %c256_i32 = arith.constant 256 : i32
    %11 = arith.muli %arg1, %c256_i32 : i32
    %12 = tpu.assume_multiple %11, 256 : i32
    %13 = arith.index_cast %12 : i32 to index
    %c0_7 = arith.constant 0 : index
    %14 = vector.load %arg8[%13, %c0_7] : memref<256x128xf32, #tpu.memory_space<vmem>>, vector<256x128xf32>
    tpu.vector_store %arg8[%13, %c0_7], %10 {strides = array<i32>} : memref<256x128xf32, #tpu.memory_space<vmem>>, vector<256x128xf32>,
    %c0_8 = arith.constant 0 : index
    %c0_9 = arith.constant 0 : index
    %15 = vector.load %arg9[%c0_8, %c0_9] : memref<1x128xf32, #tpu.memory_space<vmem>>, vector<1x128xf32>
    %cst_10 = arith.constant dense<0.000000e+00> : vector<128xf32>
    %16 = vector.multi_reduction <add>, %10, %cst_10 [0] : vector<256x128xf32> to vector<128xf32>
    %17 = vector.shape_cast %16 : vector<128xf32> to vector<1x128xf32>
    %18 = arith.addf %15, %17 : vector<1x128xf32>
    %c0_11 = arith.constant 0 : index
    %c0_12 = arith.constant 0 : index
    %19 = vector.load %arg9[%c0_11, %c0_12] : memref<1x128xf32, #tpu.memory_space<vmem>>, vector<1x128xf32>
    tpu.vector_store %arg9[%c0_11, %c0_12], %18 {strides = array<i32>} : memref<1x128xf32, #tpu.memory_space<vmem>>, vector<1x128xf32>,
    %c0_13 = arith.constant 0 : index
    %c0_14 = arith.constant 0 : index
    %20 = vector.load %arg10[%c0_13, %c0_14] : memref<1x128xf32, #tpu.memory_space<vmem>>, vector<1x128xf32>
    %21 = arith.mulf %10, %10 : vector<256x128xf32>
    %cst_15 = arith.constant dense<0.000000e+00> : vector<128xf32>
    %22 = vector.multi_reduction <add>, %21, %cst_15 [0] : vector<256x128xf32> to vector<128xf32>
    %23 = vector.shape_cast %22 : vector<128xf32> to vector<1x128xf32>
    %24 = arith.addf %20, %23 : vector<1x128xf32>
    %c0_16 = arith.constant 0 : index
    %c0_17 = arith.constant 0 : index
    %25 = vector.load %arg10[%c0_16, %c0_17] : memref<1x128xf32, #tpu.memory_space<vmem>>, vector<1x128xf32>
    tpu.vector_store %arg10[%c0_16, %c0_17], %24 {strides = array<i32>} : memref<1x128xf32, #tpu.memory_space<vmem>>, vector<1x128xf32>,
    %c0_i32_18 = arith.constant 0 : i32
    %26 = arith.cmpi eq, %arg1, %c0_i32_18 : i32
    %27 = arith.extui %26 : i1 to i32
    %c0_i32_19 = arith.constant 0 : i32
    %28 = arith.cmpi ne, %27, %c0_i32_19 : i32
    scf.if %28 {
      %c0_20 = arith.constant 0 : index
      %c0_21 = arith.constant 0 : index
      %29 = vector.load %arg9[%c0_20, %c0_21] : memref<1x128xf32, #tpu.memory_space<vmem>>, vector<1x128xf32>
      %cst_22 = arith.constant 3.906250e-03 : f32
      %30 = vector.broadcast %cst_22 : f32 to vector<1x128xf32>
      %31 = arith.mulf %29, %30 : vector<1x128xf32>
      %c0_23 = arith.constant 0 : index
      %c0_24 = arith.constant 0 : index
      %32 = vector.load %arg10[%c0_23, %c0_24] : memref<1x128xf32, #tpu.memory_space<vmem>>, vector<1x128xf32>
      %cst_25 = arith.constant 3.906250e-03 : f32
      %33 = vector.broadcast %cst_25 : f32 to vector<1x128xf32>
      %34 = arith.mulf %32, %33 : vector<1x128xf32>
      %35 = arith.mulf %31, %31 : vector<1x128xf32>
      %36 = arith.subf %34, %35 : vector<1x128xf32>
      %cst_26 = arith.constant 0.000000e+00 : f32
      %37 = vector.broadcast %cst_26 : f32 to vector<1x128xf32>
      %38 = arith.maximumf %36, %37 : vector<1x128xf32>
      %cst_27 = arith.constant 9.99999974E-6 : f32
      %39 = vector.broadcast %cst_27 : f32 to vector<1x128xf32>
      %40 = arith.addf %38, %39 : vector<1x128xf32>
      %41 = math.rsqrt %40 : vector<1x128xf32>
      %c0_28 = arith.constant 0 : index
      %c0_29 = arith.constant 0 : index
      %42 = vector.load %arg5[%c0_28, %c0_29] : memref<1x128xf32, #tpu.memory_space<vmem>>, vector<1x128xf32>
      %43 = arith.mulf %41, %42 : vector<1x128xf32>
      %c0_30 = arith.constant 0 : index
      %c0_31 = arith.constant 0 : index
      %44 = vector.load %arg6[%c0_30, %c0_31] : memref<1x128xf32, #tpu.memory_space<vmem>>, vector<1x128xf32>
      %45 = arith.mulf %31, %43 : vector<1x128xf32>
      %46 = arith.subf %44, %45 : vector<1x128xf32>
      %c0_32 = arith.constant 0 : index
      %c0_33 = arith.constant 0 : index
      %47 = vector.load %arg8[%c0_32, %c0_33] : memref<256x128xf32, #tpu.memory_space<vmem>>, vector<256x128xf32>
      %48 = vector.broadcast %43 : vector<1x128xf32> to vector<256x128xf32>
      %49 = arith.mulf %47, %48 : vector<256x128xf32>
      %50 = vector.broadcast %46 : vector<1x128xf32> to vector<256x128xf32>
      %51 = arith.addf %49, %50 : vector<256x128xf32>
      %52 = arith.truncf %51 : vector<256x128xf32> to vector<256x128xbf16>
      %c0_34 = arith.constant 0 : index
      %c0_35 = arith.constant 0 : index
      %53 = vector.load %arg7[%c0_34, %c0_35] : memref<256x128xbf16, #tpu.memory_space<vmem>>, vector<256x128xbf16>
      tpu.vector_store %arg7[%c0_34, %c0_35], %52 {strides = array<i32>} : memref<256x128xbf16, #tpu.memory_space<vmem>>, vector<256x128xbf16>,
    } else {
    }
    return
  }
  func.func @transform_0(%arg0: i32, %arg1: i32) -> (i32, i32) {
    %c1_i32 = arith.constant 1 : i32
    %0 = arith.muli %arg0, %c1_i32 : i32
    %1 = arith.addi %0, %arg1 : i32
    %c0_i32 = arith.constant 0 : i32
    %c0_i32_0 = arith.constant 0 : i32
    return %1, %c0_i32 : i32, i32
  }
  func.func @transform_1(%arg0: i32, %arg1: i32) -> (i32, i32) {
    %c0_i32 = arith.constant 0 : i32
    %c0_i32_0 = arith.constant 0 : i32
    %c0_i32_1 = arith.constant 0 : i32
    return %c0_i32, %c0_i32_0 : i32, i32
  }
  func.func @transform_2(%arg0: i32, %arg1: i32) -> (i32, i32) {
    %c0_i32 = arith.constant 0 : i32
    %c0_i32_0 = arith.constant 0 : i32
    %c0_i32_1 = arith.constant 0 : i32
    return %c0_i32, %c0_i32_0 : i32, i32
  }
  func.func @transform_3(%arg0: i32, %arg1: i32) -> (i32, i32) {
    %c0_i32 = arith.constant 0 : i32
    %c0_i32_0 = arith.constant 0 : i32
    %c0_i32_1 = arith.constant 0 : i32
    return %c0_i32, %c0_i32_0 : i32, i32
  }
  func.func @transform_4(%arg0: i32, %arg1: i32) -> (i32, i32) {
    %c0_i32 = arith.constant 0 : i32
    %c0_i32_0 = arith.constant 0 : i32
    %c0_i32_1 = arith.constant 0 : i32
    return %c0_i32, %c0_i32_0 : i32, i32
  }
  func.func @transform_5(%arg0: i32, %arg1: i32) -> (i32, i32) {
    %c0_i32 = arith.constant 0 : i32
    %c0_i32_0 = arith.constant 0 : i32
    return %arg0, %c0_i32 : i32, i32
  }
}

module attributes {stable_mosaic.version = 11 : i64} {
  func.func @_conv_relu_bn_kernel(%arg0: i32, %arg1: i32, %arg2: memref<256x216xbf16, #tpu.memory_space<vmem>>, %arg3: memref<216x128xbf16, #tpu.memory_space<vmem>>, %arg4: memref<1x128xf32, #tpu.memory_space<vmem>>, %arg5: memref<1x128xf32, #tpu.memory_space<vmem>>, %arg6: memref<1x128xf32, #tpu.memory_space<vmem>>, %arg7: memref<256x128xbf16, #tpu.memory_space<vmem>>, %arg8: memref<256x128xf32, #tpu.memory_space<vmem>>, %arg9: memref<1x128xf32, #tpu.memory_space<vmem>>, %arg10: memref<1x128xf32, #tpu.memory_space<vmem>>) attributes {dimension_semantics = [#tpu.dimension_semantics<parallel>, #tpu.dimension_semantics<arbitrary>], iteration_bounds = array<i64: 2, 1>, scalar_prefetch = 0 : i64, scratch_operands = 3 : i64, tpu.core_type = #tpu.core_type<tc>, window_params = [{transform_indices = @transform_0, window_bounds = array<i64: 256, 216>}, {pipeline_mode = #tpu.pipeline_mode<synchronous>, transform_indices = @transform_1, window_bounds = array<i64: 216, 128>}, {pipeline_mode = #tpu.pipeline_mode<synchronous>, transform_indices = @transform_2, window_bounds = array<i64: 1, 128>}, {pipeline_mode = #tpu.pipeline_mode<synchronous>, transform_indices = @transform_3, window_bounds = array<i64: 1, 128>}, {pipeline_mode = #tpu.pipeline_mode<synchronous>, transform_indices = @transform_4, window_bounds = array<i64: 1, 128>}, {transform_indices = @transform_5, window_bounds = array<i64: 256, 128>}]} {
    %c0_i32 = arith.constant 0 : i32
    %0 = arith.cmpi eq, %arg1, %c0_i32 : i32
    %1 = arith.extui %0 : i1 to i32
    %c0_i32_0 = arith.constant 0 : i32
    %2 = arith.cmpi ne, %1, %c0_i32_0 : i32
    scf.if %2 {
      %cst_20 = arith.constant 0.000000e+00 : f32
      %29 = vector.broadcast %cst_20 : f32 to vector<1x128xf32>
      %c0_21 = arith.constant 0 : index
      %c0_22 = arith.constant 0 : index
      %30 = vector.load %arg9[%c0_21, %c0_22] : memref<1x128xf32, #tpu.memory_space<vmem>>, vector<1x128xf32>
      tpu.vector_store %arg9[%c0_21, %c0_22], %29 {strides = array<i32>} : memref<1x128xf32, #tpu.memory_space<vmem>>, vector<1x128xf32>,
      %cst_23 = arith.constant 0.000000e+00 : f32
      %31 = vector.broadcast %cst_23 : f32 to vector<1x128xf32>
      %c0_24 = arith.constant 0 : index
      %c0_25 = arith.constant 0 : index
      %32 = vector.load %arg10[%c0_24, %c0_25] : memref<1x128xf32, #tpu.memory_space<vmem>>, vector<1x128xf32>
      tpu.vector_store %arg10[%c0_24, %c0_25], %31 {strides = array<i32>} : memref<1x128xf32, #tpu.memory_space<vmem>>, vector<1x128xf32>,
    } else {
    }
    %c0 = arith.constant 0 : index
    %c0_1 = arith.constant 0 : index
    %3 = vector.load %arg2[%c0, %c0_1] : memref<256x216xbf16, #tpu.memory_space<vmem>>, vector<256x216xbf16>
    %c0_2 = arith.constant 0 : index
    %c0_3 = arith.constant 0 : index
    %4 = vector.load %arg3[%c0_2, %c0_3] : memref<216x128xbf16, #tpu.memory_space<vmem>>, vector<216x128xbf16>
    %cst = arith.constant dense<0.000000e+00> : vector<256x128xf32>
    %5 = tpu.matmul %3, %4, %cst {dimension_numbers = #tpu.dot_dimension_numbers<[1], [0], [0], [1], [0, 0, 1, 1], [], []>} : vector<256x216xbf16>, vector<216x128xbf16>, vector<256x128xf32> -> vector<256x128xf32>
    %c0_4 = arith.constant 0 : index
    %c0_5 = arith.constant 0 : index
    %6 = vector.load %arg4[%c0_4, %c0_5] : memref<1x128xf32, #tpu.memory_space<vmem>>, vector<1x128xf32>
    %7 = vector.broadcast %6 : vector<1x128xf32> to vector<256x128xf32>
    %8 = arith.addf %5, %7 : vector<256x128xf32>
    %cst_6 = arith.constant 0.000000e+00 : f32
    %9 = vector.broadcast %cst_6 : f32 to vector<256x128xf32>
    %10 = arith.maximumf %8, %9 : vector<256x128xf32>
    %c256_i32 = arith.constant 256 : i32
    %11 = arith.muli %arg1, %c256_i32 : i32
    %12 = tpu.assume_multiple %11, 256 : i32
    %13 = arith.index_cast %12 : i32 to index
    %c0_7 = arith.constant 0 : index
    %14 = vector.load %arg8[%13, %c0_7] : memref<256x128xf32, #tpu.memory_space<vmem>>, vector<256x128xf32>
    tpu.vector_store %arg8[%13, %c0_7], %10 {strides = array<i32>} : memref<256x128xf32, #tpu.memory_space<vmem>>, vector<256x128xf32>,
    %c0_8 = arith.constant 0 : index
    %c0_9 = arith.constant 0 : index
    %15 = vector.load %arg9[%c0_8, %c0_9] : memref<1x128xf32, #tpu.memory_space<vmem>>, vector<1x128xf32>
    %cst_10 = arith.constant dense<0.000000e+00> : vector<128xf32>
    %16 = vector.multi_reduction <add>, %10, %cst_10 [0] : vector<256x128xf32> to vector<128xf32>
    %17 = vector.shape_cast %16 : vector<128xf32> to vector<1x128xf32>
    %18 = arith.addf %15, %17 : vector<1x128xf32>
    %c0_11 = arith.constant 0 : index
    %c0_12 = arith.constant 0 : index
    %19 = vector.load %arg9[%c0_11, %c0_12] : memref<1x128xf32, #tpu.memory_space<vmem>>, vector<1x128xf32>
    tpu.vector_store %arg9[%c0_11, %c0_12], %18 {strides = array<i32>} : memref<1x128xf32, #tpu.memory_space<vmem>>, vector<1x128xf32>,
    %c0_13 = arith.constant 0 : index
    %c0_14 = arith.constant 0 : index
    %20 = vector.load %arg10[%c0_13, %c0_14] : memref<1x128xf32, #tpu.memory_space<vmem>>, vector<1x128xf32>
    %21 = arith.mulf %10, %10 : vector<256x128xf32>
    %cst_15 = arith.constant dense<0.000000e+00> : vector<128xf32>
    %22 = vector.multi_reduction <add>, %21, %cst_15 [0] : vector<256x128xf32> to vector<128xf32>
    %23 = vector.shape_cast %22 : vector<128xf32> to vector<1x128xf32>
    %24 = arith.addf %20, %23 : vector<1x128xf32>
    %c0_16 = arith.constant 0 : index
    %c0_17 = arith.constant 0 : index
    %25 = vector.load %arg10[%c0_16, %c0_17] : memref<1x128xf32, #tpu.memory_space<vmem>>, vector<1x128xf32>
    tpu.vector_store %arg10[%c0_16, %c0_17], %24 {strides = array<i32>} : memref<1x128xf32, #tpu.memory_space<vmem>>, vector<1x128xf32>,
    %c0_i32_18 = arith.constant 0 : i32
    %26 = arith.cmpi eq, %arg1, %c0_i32_18 : i32
    %27 = arith.extui %26 : i1 to i32
    %c0_i32_19 = arith.constant 0 : i32
    %28 = arith.cmpi ne, %27, %c0_i32_19 : i32
    scf.if %28 {
      %c0_20 = arith.constant 0 : index
      %c0_21 = arith.constant 0 : index
      %29 = vector.load %arg9[%c0_20, %c0_21] : memref<1x128xf32, #tpu.memory_space<vmem>>, vector<1x128xf32>
      %cst_22 = arith.constant 3.906250e-03 : f32
      %30 = vector.broadcast %cst_22 : f32 to vector<1x128xf32>
      %31 = arith.mulf %29, %30 : vector<1x128xf32>
      %c0_23 = arith.constant 0 : index
      %c0_24 = arith.constant 0 : index
      %32 = vector.load %arg10[%c0_23, %c0_24] : memref<1x128xf32, #tpu.memory_space<vmem>>, vector<1x128xf32>
      %cst_25 = arith.constant 3.906250e-03 : f32
      %33 = vector.broadcast %cst_25 : f32 to vector<1x128xf32>
      %34 = arith.mulf %32, %33 : vector<1x128xf32>
      %35 = arith.mulf %31, %31 : vector<1x128xf32>
      %36 = arith.subf %34, %35 : vector<1x128xf32>
      %cst_26 = arith.constant 0.000000e+00 : f32
      %37 = vector.broadcast %cst_26 : f32 to vector<1x128xf32>
      %38 = arith.maximumf %36, %37 : vector<1x128xf32>
      %cst_27 = arith.constant 9.99999974E-6 : f32
      %39 = vector.broadcast %cst_27 : f32 to vector<1x128xf32>
      %40 = arith.addf %38, %39 : vector<1x128xf32>
      %41 = math.rsqrt %40 : vector<1x128xf32>
      %c0_28 = arith.constant 0 : index
      %c0_29 = arith.constant 0 : index
      %42 = vector.load %arg5[%c0_28, %c0_29] : memref<1x128xf32, #tpu.memory_space<vmem>>, vector<1x128xf32>
      %43 = arith.mulf %41, %42 : vector<1x128xf32>
      %c0_30 = arith.constant 0 : index
      %c0_31 = arith.constant 0 : index
      %44 = vector.load %arg6[%c0_30, %c0_31] : memref<1x128xf32, #tpu.memory_space<vmem>>, vector<1x128xf32>
      %45 = arith.mulf %31, %43 : vector<1x128xf32>
      %46 = arith.subf %44, %45 : vector<1x128xf32>
      %c0_32 = arith.constant 0 : index
      %c0_33 = arith.constant 0 : index
      %47 = vector.load %arg8[%c0_32, %c0_33] : memref<256x128xf32, #tpu.memory_space<vmem>>, vector<256x128xf32>
      %48 = vector.broadcast %43 : vector<1x128xf32> to vector<256x128xf32>
      %49 = arith.mulf %47, %48 : vector<256x128xf32>
      %50 = vector.broadcast %46 : vector<1x128xf32> to vector<256x128xf32>
      %51 = arith.addf %49, %50 : vector<256x128xf32>
      %52 = arith.truncf %51 : vector<256x128xf32> to vector<256x128xbf16>
      %c0_34 = arith.constant 0 : index
      %c0_35 = arith.constant 0 : index
      %53 = vector.load %arg7[%c0_34, %c0_35] : memref<256x128xbf16, #tpu.memory_space<vmem>>, vector<256x128xbf16>
      tpu.vector_store %arg7[%c0_34, %c0_35], %52 {strides = array<i32>} : memref<256x128xbf16, #tpu.memory_space<vmem>>, vector<256x128xbf16>,
    } else {
    }
    return
  }
  func.func @transform_0(%arg0: i32, %arg1: i32) -> (i32, i32) {
    %c1_i32 = arith.constant 1 : i32
    %0 = arith.muli %arg0, %c1_i32 : i32
    %1 = arith.addi %0, %arg1 : i32
    %c0_i32 = arith.constant 0 : i32
    %c0_i32_0 = arith.constant 0 : i32
    return %1, %c0_i32 : i32, i32
  }
  func.func @transform_1(%arg0: i32, %arg1: i32) -> (i32, i32) {
    %c0_i32 = arith.constant 0 : i32
    %c0_i32_0 = arith.constant 0 : i32
    %c0_i32_1 = arith.constant 0 : i32
    return %c0_i32, %c0_i32_0 : i32, i32
  }
  func.func @transform_2(%arg0: i32, %arg1: i32) -> (i32, i32) {
    %c0_i32 = arith.constant 0 : i32
    %c0_i32_0 = arith.constant 0 : i32
    %c0_i32_1 = arith.constant 0 : i32
    return %c0_i32, %c0_i32_0 : i32, i32
  }
  func.func @transform_3(%arg0: i32, %arg1: i32) -> (i32, i32) {
    %c0_i32 = arith.constant 0 : i32
    %c0_i32_0 = arith.constant 0 : i32
    %c0_i32_1 = arith.constant 0 : i32
    return %c0_i32, %c0_i32_0 : i32, i32
  }
  func.func @transform_4(%arg0: i32, %arg1: i32) -> (i32, i32) {
    %c0_i32 = arith.constant 0 : i32
    %c0_i32_0 = arith.constant 0 : i32
    %c0_i32_1 = arith.constant 0 : i32
    return %c0_i32, %c0_i32_0 : i32, i32
  }
  func.func @transform_5(%arg0: i32, %arg1: i32) -> (i32, i32) {
    %c0_i32 = arith.constant 0 : i32
    %c0_i32_0 = arith.constant 0 : i32
    return %arg0, %c0_i32 : i32, i32
  }
}

module attributes {stable_mosaic.version = 11 : i64} {
  func.func @_mlp_kernel(%arg0: i32, %arg1: memref<4x3072xbf16, #tpu.memory_space<vmem>>, %arg2: memref<3072x512xbf16, #tpu.memory_space<vmem>>, %arg3: memref<1x512xf32, #tpu.memory_space<vmem>>, %arg4: memref<512x512xbf16, #tpu.memory_space<vmem>>, %arg5: memref<1x512xf32, #tpu.memory_space<vmem>>, %arg6: memref<512x128xbf16, #tpu.memory_space<vmem>>, %arg7: memref<1x128xf32, #tpu.memory_space<vmem>>, %arg8: memref<4x128xf32, #tpu.memory_space<vmem>>, %arg9: memref<4x512xf32, #tpu.memory_space<vmem>>) attributes {dimension_semantics = [#tpu.dimension_semantics<arbitrary>], iteration_bounds = array<i64: 1>, scalar_prefetch = 0 : i64, scratch_operands = 1 : i64, tpu.core_type = #tpu.core_type<tc>, window_params = [{transform_indices = @transform_0, window_bounds = array<i64: 4, 3072>}, {transform_indices = @transform_1, window_bounds = array<i64: 3072, 512>}, {pipeline_mode = #tpu.pipeline_mode<synchronous>, transform_indices = @transform_2, window_bounds = array<i64: 1, 512>}, {pipeline_mode = #tpu.pipeline_mode<synchronous>, transform_indices = @transform_3, window_bounds = array<i64: 512, 512>}, {pipeline_mode = #tpu.pipeline_mode<synchronous>, transform_indices = @transform_4, window_bounds = array<i64: 1, 512>}, {pipeline_mode = #tpu.pipeline_mode<synchronous>, transform_indices = @transform_5, window_bounds = array<i64: 512, 128>}, {pipeline_mode = #tpu.pipeline_mode<synchronous>, transform_indices = @transform_6, window_bounds = array<i64: 1, 128>}, {pipeline_mode = #tpu.pipeline_mode<synchronous>, transform_indices = @transform_7, window_bounds = array<i64: 4, 128>}]} {
    %c0_i32 = arith.constant 0 : i32
    %0 = arith.cmpi eq, %arg0, %c0_i32 : i32
    %1 = arith.extui %0 : i1 to i32
    %c0_i32_0 = arith.constant 0 : i32
    %2 = arith.cmpi ne, %1, %c0_i32_0 : i32
    scf.if %2 {
      %cst_10 = arith.constant 0.000000e+00 : f32
      %12 = vector.broadcast %cst_10 : f32 to vector<4x512xf32>
      %c0_11 = arith.constant 0 : index
      %c0_12 = arith.constant 0 : index
      %13 = vector.load %arg9[%c0_11, %c0_12] : memref<4x512xf32, #tpu.memory_space<vmem>>, vector<4x512xf32>
      tpu.vector_store %arg9[%c0_11, %c0_12], %12 {strides = array<i32>} : memref<4x512xf32, #tpu.memory_space<vmem>>, vector<4x512xf32>,
    } else {
    }
    %c0 = arith.constant 0 : index
    %c0_1 = arith.constant 0 : index
    %3 = vector.load %arg9[%c0, %c0_1] : memref<4x512xf32, #tpu.memory_space<vmem>>, vector<4x512xf32>
    %c0_2 = arith.constant 0 : index
    %c0_3 = arith.constant 0 : index
    %4 = vector.load %arg1[%c0_2, %c0_3] : memref<4x3072xbf16, #tpu.memory_space<vmem>>, vector<4x3072xbf16>
    %c0_4 = arith.constant 0 : index
    %c0_5 = arith.constant 0 : index
    %5 = vector.load %arg2[%c0_4, %c0_5] : memref<3072x512xbf16, #tpu.memory_space<vmem>>, vector<3072x512xbf16>
    %cst = arith.constant dense<0.000000e+00> : vector<4x512xf32>
    %6 = tpu.matmul %4, %5, %cst {dimension_numbers = #tpu.dot_dimension_numbers<[1], [0], [0], [1], [0, 0, 1, 1], [], []>} : vector<4x3072xbf16>, vector<3072x512xbf16>, vector<4x512xf32> -> vector<4x512xf32>
    %7 = arith.addf %3, %6 : vector<4x512xf32>
    %c0_6 = arith.constant 0 : index
    %c0_7 = arith.constant 0 : index
    %8 = vector.load %arg9[%c0_6, %c0_7] : memref<4x512xf32, #tpu.memory_space<vmem>>, vector<4x512xf32>
    tpu.vector_store %arg9[%c0_6, %c0_7], %7 {strides = array<i32>} : memref<4x512xf32, #tpu.memory_space<vmem>>, vector<4x512xf32>,
    %c0_i32_8 = arith.constant 0 : i32
    %9 = arith.cmpi eq, %arg0, %c0_i32_8 : i32
    %10 = arith.extui %9 : i1 to i32
    %c0_i32_9 = arith.constant 0 : i32
    %11 = arith.cmpi ne, %10, %c0_i32_9 : i32
    scf.if %11 {
      %c0_10 = arith.constant 0 : index
      %c0_11 = arith.constant 0 : index
      %12 = vector.load %arg9[%c0_10, %c0_11] : memref<4x512xf32, #tpu.memory_space<vmem>>, vector<4x512xf32>
      %c0_12 = arith.constant 0 : index
      %c0_13 = arith.constant 0 : index
      %13 = vector.load %arg3[%c0_12, %c0_13] : memref<1x512xf32, #tpu.memory_space<vmem>>, vector<1x512xf32>
      %14 = vector.broadcast %13 : vector<1x512xf32> to vector<4x512xf32>
      %15 = arith.addf %12, %14 : vector<4x512xf32>
      %cst_14 = arith.constant 0.000000e+00 : f32
      %16 = vector.broadcast %cst_14 : f32 to vector<4x512xf32>
      %17 = arith.maximumf %15, %16 : vector<4x512xf32>
      %18 = arith.truncf %17 : vector<4x512xf32> to vector<4x512xbf16>
      %c0_15 = arith.constant 0 : index
      %c0_16 = arith.constant 0 : index
      %19 = vector.load %arg4[%c0_15, %c0_16] : memref<512x512xbf16, #tpu.memory_space<vmem>>, vector<512x512xbf16>
      %cst_17 = arith.constant dense<0.000000e+00> : vector<4x512xf32>
      %20 = tpu.matmul %18, %19, %cst_17 {dimension_numbers = #tpu.dot_dimension_numbers<[1], [0], [0], [1], [0, 0, 1, 1], [], []>} : vector<4x512xbf16>, vector<512x512xbf16>, vector<4x512xf32> -> vector<4x512xf32>
      %c0_18 = arith.constant 0 : index
      %c0_19 = arith.constant 0 : index
      %21 = vector.load %arg5[%c0_18, %c0_19] : memref<1x512xf32, #tpu.memory_space<vmem>>, vector<1x512xf32>
      %22 = vector.broadcast %21 : vector<1x512xf32> to vector<4x512xf32>
      %23 = arith.addf %20, %22 : vector<4x512xf32>
      %cst_20 = arith.constant 0.000000e+00 : f32
      %24 = vector.broadcast %cst_20 : f32 to vector<4x512xf32>
      %25 = arith.maximumf %23, %24 : vector<4x512xf32>
      %26 = arith.truncf %25 : vector<4x512xf32> to vector<4x512xbf16>
      %c0_21 = arith.constant 0 : index
      %c0_22 = arith.constant 0 : index
      %27 = vector.load %arg6[%c0_21, %c0_22] : memref<512x128xbf16, #tpu.memory_space<vmem>>, vector<512x128xbf16>
      %cst_23 = arith.constant dense<0.000000e+00> : vector<4x128xf32>
      %28 = tpu.matmul %26, %27, %cst_23 {dimension_numbers = #tpu.dot_dimension_numbers<[1], [0], [0], [1], [0, 0, 1, 1], [], []>} : vector<4x512xbf16>, vector<512x128xbf16>, vector<4x128xf32> -> vector<4x128xf32>
      %c0_24 = arith.constant 0 : index
      %c0_25 = arith.constant 0 : index
      %29 = vector.load %arg7[%c0_24, %c0_25] : memref<1x128xf32, #tpu.memory_space<vmem>>, vector<1x128xf32>
      %30 = vector.broadcast %29 : vector<1x128xf32> to vector<4x128xf32>
      %31 = arith.addf %28, %30 : vector<4x128xf32>
      %c0_26 = arith.constant 0 : index
      %c0_27 = arith.constant 0 : index
      %32 = vector.load %arg8[%c0_26, %c0_27] : memref<4x128xf32, #tpu.memory_space<vmem>>, vector<4x128xf32>
      tpu.vector_store %arg8[%c0_26, %c0_27], %31 {strides = array<i32>} : memref<4x128xf32, #tpu.memory_space<vmem>>, vector<4x128xf32>,
    } else {
    }
    return
  }
  func.func @transform_0(%arg0: i32) -> (i32, i32) {
    %c0_i32 = arith.constant 0 : i32
    %c0_i32_0 = arith.constant 0 : i32
    return %c0_i32, %arg0 : i32, i32
  }
  func.func @transform_1(%arg0: i32) -> (i32, i32) {
    %c0_i32 = arith.constant 0 : i32
    %c0_i32_0 = arith.constant 0 : i32
    return %arg0, %c0_i32 : i32, i32
  }
  func.func @transform_2(%arg0: i32) -> (i32, i32) {
    %c0_i32 = arith.constant 0 : i32
    %c0_i32_0 = arith.constant 0 : i32
    %c0_i32_1 = arith.constant 0 : i32
    return %c0_i32, %c0_i32_0 : i32, i32
  }
  func.func @transform_3(%arg0: i32) -> (i32, i32) {
    %c0_i32 = arith.constant 0 : i32
    %c0_i32_0 = arith.constant 0 : i32
    %c0_i32_1 = arith.constant 0 : i32
    return %c0_i32, %c0_i32_0 : i32, i32
  }
  func.func @transform_4(%arg0: i32) -> (i32, i32) {
    %c0_i32 = arith.constant 0 : i32
    %c0_i32_0 = arith.constant 0 : i32
    %c0_i32_1 = arith.constant 0 : i32
    return %c0_i32, %c0_i32_0 : i32, i32
  }
  func.func @transform_5(%arg0: i32) -> (i32, i32) {
    %c0_i32 = arith.constant 0 : i32
    %c0_i32_0 = arith.constant 0 : i32
    %c0_i32_1 = arith.constant 0 : i32
    return %c0_i32, %c0_i32_0 : i32, i32
  }
  func.func @transform_6(%arg0: i32) -> (i32, i32) {
    %c0_i32 = arith.constant 0 : i32
    %c0_i32_0 = arith.constant 0 : i32
    %c0_i32_1 = arith.constant 0 : i32
    return %c0_i32, %c0_i32_0 : i32, i32
  }
  func.func @transform_7(%arg0: i32) -> (i32, i32) {
    %c0_i32 = arith.constant 0 : i32
    %c0_i32_0 = arith.constant 0 : i32
    %c0_i32_1 = arith.constant 0 : i32
    return %c0_i32, %c0_i32_0 : i32, i32
  }
}

</mosaic_0001>

<bundles_post_ra>
// kernel: siamese_forward.4
= control target key start
LH: loop header
LB: loop body
LE: loop exit
PB: predicated region body
PF: predicated region fallthrough
CT: control target
= control target key end

     0   :  { %10 = vsyncpa [#allocation6], 0  ;;  %s2031_s0 = inlined_call_operand.vmem [shape: bf16[512,27], index: 0, kind: input, shape index: {}]   ;;  %s2032_s1 = inlined_call_operand.hbm [shape: bf16[27,128], index: 1, kind: input, shape index: {}]   ;;  %s2033_s2 = inlined_call_operand.hbm [shape: f32[1,128], index: 2, kind: input, shape index: {}]   ;;  %s2034_s3 = inlined_call_operand.hbm [shape: f32[1,128], index: 3, kind: input, shape index: {}]   ;;  %s2035_s4 = inlined_call_operand.hbm [shape: f32[1,128], index: 4, kind: input, shape index: {}]   ;;  %s2036_s5 = inlined_call_operand.vmem [shape: bf16[512,128], index: 5, kind: output, shape index: {}]  }
   0x1   :  { %11 = vsyncpa [#allocation8], 0 }
   0x2   :  { %12 = vsyncpa [#allocation11], 0  ;;  %s1561_s18 = smov 0   ;;  %s1563_s19 = smov 0  }
   0x3   :  { %s1565_s20 = smov 0  }
   0x4 LB: > { %s199_s23 = sshll.u32 %s2033_s2, 4  ;;  %s1069_s24 = sadd.s32 4294967295, %s1521_s20   ;;  %s1521_s20 = sphi %s1565_s20, %s18_s20   ;;  %s1517_s19 = sphi %s1563_s19, %s2041_s19   ;;  %s1513_s18 = sphi %s1561_s18, %s2040_s18   ;;  %s200_s23 = int_to_ptr.hbm [resolvable:$true] %s199_s23 }
   0x5   : > { %p1071_p0 = scmp.ge.s32.totalorder %s1521_s20, 1  ;;  %p173_p1 = scmp.lt.s32.totalorder %s1521_s20, 3 }
   0x6   : > { %p1582_p2 = scmp.eq.s32.totalorder %s1069_s24, 0  ;;  %s1523_s27 = smov [#allocation7]  }
   0x7   : > { %p1586_p3 = pnand %p1071_p0, %p173_p1  ;;  %s201_s28 = sshll.u32 %s1523_s27, 4  ;;  %s202_s28 = int_to_ptr.vmem [resolvable:$true] %s201_s28 }
   0x8   : > { %s30_s30 = sadd.s32 1, %s1517_s19  ;;  %s184_s8 = sshll.u32 %s2032_s1, 4  ;;  %s185_s8 = int_to_ptr.hbm [resolvable:$true] %s184_s8 }
   0x9   : > { %p1311_p4 = pneg %p1586_p3  ;;  %p32_p6 = scmp.ge.s32.totalorder %s30_s30, 2 }
   0xa   : > { %s1524_s9 = smov [#allocation5]   ;;  %s211_s13 = sshll.u32 %s2034_s3, 4  ;;  %s212_s13 = int_to_ptr.hbm [resolvable:$true] %s211_s13 }
   0xb   : > { %p1594_p5 = pnand %p1582_p2, %p1311_p4  ;;  %s2043_s30 = smov (%p32_p6, %s30_s30), 0 }
   0xc   : > { %s186_s10 = sshll.u32 %s1524_s9, 4  ;;  %s1525_s14 = smov 64   ;;  %s187_s10 = int_to_ptr.vmem [resolvable:$true] %s186_s10 }
   0xd   : > { %1317 = dma.hbm_to_vmem [thread:$0]  (!%p1594_p5), %s200_s23, 16, %s202_s28, [#allocation8]  }
   0xe   : > { %s1526_s15 = smov 4   ;;  %s1527_s16 = smov [#allocation9]  }
   0xf   : > { %1314 = dma.hbm_to_vmem [thread:$0]  (!%p1594_p5), %s185_s8, 256, %s187_s10, [#allocation6], %s1525_s14, %s1525_s14, %s1526_s15  }
  0x10   : > { %s213_s17 = sshll.u32 %s1527_s16, 4  ;;  %s223_s23 = sshll.u32 %s2035_s4, 4  ;;  %s214_s17 = int_to_ptr.vmem [resolvable:$true] %s213_s17  ;;  %s224_s23 = int_to_ptr.hbm [resolvable:$true] %s223_s23 }
  0x11   : > { %1320 = dma.hbm_to_vmem [thread:$0]  (!%p1594_p5), %s212_s13, 16, %s214_s17, [#allocation8]  }
  0x12   : > { %s1528_s24 = smov [#allocation10]   ;;  %249 = sbr.rel (%p1586_p3) target bundleno = 359 (0x167), region = 40 }
  0x13   : > { %s225_s27 = sshll.u32 %s1528_s24, 4  ;;  %s226_s27 = int_to_ptr.vmem [resolvable:$true] %s225_s27 }
  0x14   : > { %1323 = dma.hbm_to_vmem [thread:$0]  (!%p1594_p5), %s224_s23, 16, %s226_s27, [#allocation11]  }
  0x17   : > { %1500 = dma.done.wait (%p1582_p2), [#allocation6], 256  }
  0x18   : > { %1502 = vsyncadd (%p1582_p2), [#allocation6], 4294967040 }
  0x19   : > { %1504 = dma.done.wait (%p1582_p2), [#allocation8], 32  }
  0x1a   : > { %1506 = vsyncadd (%p1582_p2), [#allocation8], 4294967264 }
  0x1b   : > { %1508 = dma.done.wait (%p1582_p2), [#allocation11], 16  }
  0x1c   : > { %1510 = vsyncadd (%p1582_p2), [#allocation11], 4294967280  ;;  %s1082_s26 = sshll.u32 %s1513_s18, 5  ;;  %vm495_vm0 = vcmask 1044480   ;;  %vm496_vm1 = vcmask 1045504   ;;  %v1529_v0 = vmov 65535  }
  0x1d   : > { %p296_p7 = scmp.lt.s32.totalorder %s1082_s26, 63  ;;  %v497_v1 = vsel %vm495_vm0, 4294967295, %v1529_v0  ;;  %v1156_v2 = vld [vmem:[#allocation5 + $0x8] sm:$0xf]  ;;  %v1193_v3 = vld [vmem:[#allocation5 + $0x8] sm:$0x30] }
  0x1e   : > { %v498_v4 = vsel %vm496_vm1, %v497_v1, 0  ;;  %v1157_v5 = vor.u32 %v1193_v3, %v1156_v2  ;;  %v1192_v7 = vld [vmem:[#allocation5] sm:$0xff]  ;;  %vm446_vm2 = vcmask 220160   ;;  %v1683_v37 = vld [vmem:[#allocation7] ss:$0 sm:$0xff] }
  0x1f   : > { %s2045_s26 = smov (!%p296_p7, %s1082_s26), 63 }
  0x20   : > { %s1083_s28 = sshll.u32 %s2045_s26, 2  ;;  %v500_v6 = vand.u32 %v1157_v5, %v498_v4 }
  0x21   : > { %s1641_s29 = scalar_lea.vmem %s2031_s0, %s1083_s28  ;;  %s1966_s8 = scalar_lea.vmem %s2036_s5, %s1083_s28 }
  0x22   : > { %508 = vmatpush.bf16.msra.mxu0 %v500_v6  ;;  %1289 = vmatpush.bf16.msra.mxu1 %v500_v6  ;;  %v1176_v8 = vld [vmem:[%s1641_s29] sm:$0xff]  ;;  %v1177_v12 = vld [vmem:[%s1641_s29 + $0x8] sm:$0xff]  ;;  %v1178_v16 = vld [vmem:[%s1641_s29 + $0x10] sm:$0xff] }
  0x23   : > { %1290 = vmatpush.bf16.msra.mxu2 %v500_v6  ;;  %1291 = vmatpush.bf16.msra.mxu3 %v500_v6  ;;  %v1180_v9 = vld [vmem:[%s1641_s29 + $0x20] sm:$0xff]  ;;  %v1181_v13 = vld [vmem:[%s1641_s29 + $0x28] sm:$0xff]  ;;  %v1182_v17 = vld [vmem:[%s1641_s29 + $0x30] sm:$0xff] }
  0x24   : > { %v1184_v10 = vld [vmem:[%s1641_s29 + $0x40] sm:$0xff]  ;;  %v1185_v14 = vld [vmem:[%s1641_s29 + $0x48] sm:$0xff]  ;;  %v1186_v18 = vld [vmem:[%s1641_s29 + $0x50] sm:$0xff] }
  0x25   : > { %v1188_v11 = vld [vmem:[%s1641_s29 + $0x60] sm:$0xff]  ;;  %v1189_v15 = vld [vmem:[%s1641_s29 + $0x68] sm:$0xff]  ;;  %v1190_v19 = vld [vmem:[%s1641_s29 + $0x70] sm:$0xff] }
  0x26   : > { %509 = vmatpush.bf16.msra.mxu0 %v1192_v7  ;;  %1292 = vmatpush.bf16.msra.mxu1 %v1192_v7  ;;  %v1179_v20 = vld [vmem:[%s1641_s29 + $0x18] sm:$0xff] }
  0x27   : > { %1293 = vmatpush.bf16.msra.mxu2 %v1192_v7  ;;  %1294 = vmatpush.bf16.msra.mxu3 %v1192_v7  ;;  %v1183_v21 = vld [vmem:[%s1641_s29 + $0x38] sm:$0xff] }
  0x28   : > { %v1187_v22 = vld [vmem:[%s1641_s29 + $0x58] sm:$0xff] }
  0x29   : > { %1158 = vmatmul.msk.bf16.vlgmr.msra.gmra.mxu0 %vm446_vm2, %v1176_v8  ;;  %1162 = vmatmul.msk.bf16.vlgmr.msra.gmra.mxu1 %vm446_vm2, %v1180_v9  ;;  %v1191_v23 = vld [vmem:[%s1641_s29 + $0x78] sm:$0xff] }
  0x2a   : > { %1166 = vmatmul.msk.bf16.vlgmr.msra.gmra.mxu2 %vm446_vm2, %v1184_v10  ;;  %1170 = vmatmul.msk.bf16.vlgmr.msra.gmra.mxu3 %vm446_vm2, %v1188_v11 }
  0x39   : > { %1159 = vmatmul.msk.bf16.gmra.mxu0 %vm446_vm2, %v1177_v12  ;;  %1163 = vmatmul.msk.bf16.gmra.mxu1 %vm446_vm2, %v1181_v13 }
  0x3a   : > { %1167 = vmatmul.msk.bf16.gmra.mxu2 %vm446_vm2, %v1185_v14  ;;  %1171 = vmatmul.msk.bf16.gmra.mxu3 %vm446_vm2, %v1189_v15 }
  0x49   : > { %1160 = vmatmul.msk.bf16.gmra.mxu0 %vm446_vm2, %v1178_v16  ;;  %1164 = vmatmul.msk.bf16.gmra.mxu1 %vm446_vm2, %v1182_v17 }
  0x4a   : > { %1168 = vmatmul.msk.bf16.gmra.mxu2 %vm446_vm2, %v1186_v18  ;;  %1172 = vmatmul.msk.bf16.gmra.mxu3 %vm446_vm2, %v1190_v19 }
  0x59   : > { %1161 = vmatmul.msk.bf16.gmra.mxu0 %vm446_vm2, %v1179_v20  ;;  %1165 = vmatmul.msk.bf16.gmra.mxu1 %vm446_vm2, %v1183_v21 }
  0x5a   : > { %1169 = vmatmul.msk.bf16.gmra.mxu2 %vm446_vm2, %v1187_v22  ;;  %1173 = vmatmul.msk.bf16.gmra.mxu3 %vm446_vm2, %v1191_v23 }
  0xa6   : > { %v511_v24 = vpop.f32.mrf.mxu0  ;;  %v531_v25 = vpop.f32.mrf.mxu1 }
  0xa7   : > { %v512_v41 = vadd.f32 %v1683_v37, %v511_v24  ;;  %v532_v6 = vadd.f32 %v1683_v37, %v531_v25 }
  0xa9   : > { %v1695_v47 = vmax.f32 %v512_v41, 0.0  ;;  %v1740_v19 = vmax.f32 %v532_v6, 0.0 }
  0xab   : > { %v698_v54 = vmul.f32 %v1695_v47, %v1695_v47 }
  0xad   : > { %v1675_v28 = vpop.f32.mrf.mxu2  ;;  %v1679_v34 = vpop.f32.mrf.mxu3 }
  0xae   : > { %v513_v26 = vpop.f32.mrf.mxu0  ;;  %v533_v27 = vpop.f32.mrf.mxu1 }
  0xaf   : > { %v514_v40 = vadd.f32 %v1683_v37, %v513_v26  ;;  %v534_v10 = vadd.f32 %v1683_v37, %v533_v27 }
  0xb1   : > { %v1692_v45 = vmax.f32 %v514_v40, 0.0  ;;  %v1746_v24 = vmax.f32 %v534_v10, 0.0 }
  0xb3   : > { %v699_v51 = vmul.f32 %v1692_v45, %v1692_v45  ;;  %v658_v57 = vadd.f32 %v1692_v45, %v1695_v47 }
  0xb5   : > { %v1677_v31 = vpop.f32.mrf.mxu2  ;;  %v1685_v39 = vpop.f32.mrf.mxu3  ;;  %v730_v61 = vadd.f32 %v699_v51, %v698_v54 }
  0xb6   : > { %v516_v29 = vpop.f32.mrf.mxu0  ;;  %v536_v30 = vpop.f32.mrf.mxu1 }
  0xb7   : > { %v517_v43 = vadd.f32 %v1683_v37, %v516_v29  ;;  %v537_v17 = vadd.f32 %v1683_v37, %v536_v30 }
  0xb9   : > { %v1697_v48 = vmax.f32 %v517_v43, 0.0  ;;  %v1751_v29 = vmax.f32 %v537_v17, 0.0 }
  0xbb   : > { %v700_v58 = vmul.f32 %v1697_v48, %v1697_v48  ;;  %v659_v62 = vadd.f32 %v658_v57, %v1697_v48  ;;  %v708_v51 = vmul.f32 %v1751_v29, %v1751_v29 }
  0xbd   : > { %v1681_v36 = vpop.f32.mrf.mxu2  ;;  %v1707_v56 = vpop.f32.mrf.mxu3  ;;  %v731_v2 = vadd.f32 %v730_v61, %v700_v58 }
  0xbe   : > { %v518_v32 = vpop.f32.mrf.mxu0  ;;  %v538_v33 = vpop.f32.mrf.mxu1 }
  0xbf   : > { %v519_v46 = vadd.f32 %v1683_v37, %v518_v32  ;;  %v539_v23 = vadd.f32 %v1683_v37, %v538_v33  ;;  %v706_v32 = vmul.f32 %v1740_v19, %v1740_v19 }
  0xc1   : > { %v1702_v52 = vmax.f32 %v519_v46, 0.0  ;;  %v1757_v33 = vmax.f32 %v539_v23, 0.0 }
  0xc3   : > { %v701_v63 = vmul.f32 %v1702_v52, %v1702_v52  ;;  %v660_v3 = vadd.f32 %v659_v62, %v1702_v52  ;;  %v709_v58 = vmul.f32 %v1757_v33, %v1757_v33 }
  0xc5   : > { %v1690_v44 = vpop.f32.mrf.mxu2  ;;  %v732_v7 = vadd.f32 %v731_v2, %v701_v63  ;;  %v1738_v18 = vpop.f32.mrf.mxu3  ;;  %v552_v2 = vadd.f32 %v1683_v37, %v1675_v28  ;;  %v557_v28 = vadd.f32 %v1683_v37, %v1681_v36 }
  0xc6   : > { %v521_v35 = vpop.f32.mrf.mxu0  ;;  %v541_v38 = vpop.f32.mrf.mxu1 }
  0xc7   : > { %v522_v49 = vadd.f32 %v1683_v37, %v521_v35  ;;  %v542_v35 = vadd.f32 %v1683_v37, %v541_v38  ;;  %v1805_v36 = vmax.f32 %v557_v28, 0.0 }
  0xc9   : > { %v1713_v59 = vmax.f32 %v522_v49, 0.0  ;;  %v1765_v54 = vmax.f32 %v542_v35, 0.0 }
  0xcb   : > { %v702_v4 = vmul.f32 %v1713_v59, %v1713_v59  ;;  %v661_v8 = vadd.f32 %v660_v3, %v1713_v59  ;;  %v710_v3 = vmul.f32 %v1765_v54, %v1765_v54 }
  0xcd   : > { %v1721_v1 = vpop.f32.mrf.mxu2  ;;  %v733_v13 = vadd.f32 %v732_v7, %v702_v4 }
  0xce   : > { %v523_v42 = vpop.f32.mrf.mxu0  ;;  %v543_v50 = vpop.f32.mrf.mxu1  ;;  %v562_v35 = vadd.f32 %v1683_v37, %v1721_v1 }
  0xcf   : > { %v524_v53 = vadd.f32 %v1683_v37, %v523_v42  ;;  %v707_v42 = vmul.f32 %v1746_v24, %v1746_v24  ;;  %v544_v43 = vadd.f32 %v1683_v37, %v543_v50 }
  0xd1   : > { %v1719_v0 = vmax.f32 %v524_v53, 0.0  ;;  %v1773_v50 = vmax.f32 %v544_v43, 0.0 }
  0xd3   : > { %v703_v9 = vmul.f32 %v1719_v0, %v1719_v0  ;;  %v662_v14 = vadd.f32 %v661_v8, %v1719_v0  ;;  %v554_v8 = vadd.f32 %v1683_v37, %v1677_v31  ;;  %v711_v10 = vmul.f32 %v1773_v50, %v1773_v50 }
  0xd5   : > { %v734_v20 = vadd.f32 %v733_v13, %v703_v9  ;;  %v563_v30 = vpop.f32.mrf.mxu2  ;;  %v1798_v17 = vmax.f32 %v554_v8, 0.0 }
  0xd6   : > { %v526_v55 = vpop.f32.mrf.mxu0  ;;  %v546_v12 = vpop.f32.mrf.mxu1 }
  0xd7   : > { %v527_v60 = vadd.f32 %v1683_v37, %v526_v55  ;;  %v547_v57 = vadd.f32 %v1683_v37, %v546_v12 }
  0xd9   : > { %v1726_v5 = vmax.f32 %v527_v60, 0.0  ;;  %v1771_v60 = vpop.f32.mrf.mxu3  ;;  %v1781_v4 = vmax.f32 %v547_v57, 0.0 }
  0xdb   : > { %v704_v15 = vmul.f32 %v1726_v5, %v1726_v5  ;;  %v663_v21 = vadd.f32 %v662_v14, %v1726_v5  ;;  %v1793_v14 = vmax.f32 %v552_v2, 0.0  ;;  %v572_v2 = vadd.f32 %v1683_v37, %v1679_v34 }
  0xdc   : > { %v577_v34 = vadd.f32 %v1683_v37, %v1707_v56 }
  0xdd   : > { %v735_v25 = vadd.f32 %v734_v20, %v704_v15  ;;  %v566_v9 = vpop.f32.mrf.mxu2  ;;  %v559_v20 = vadd.f32 %v1683_v37, %v1690_v44 }
  0xde   : > { %v528_v11 = vpop.f32.mrf.mxu0  ;;  %v548_v53 = vpop.f32.mrf.mxu1  ;;  %v567_v57 = vadd.f32 %v1683_v37, %v566_v9  ;;  %v574_v9 = vadd.f32 %v1683_v37, %v1685_v39  ;;  %v1858_v56 = vmax.f32 %v577_v34, 0.0 }
  0xdf   : > { %v529_v16 = vadd.f32 %v1683_v37, %v528_v11  ;;  %v549_v63 = vadd.f32 %v1683_v37, %v548_v53 }
  0xe0   : > { %v1835_v8 = vmax.f32 %v567_v57, 0.0 }
  0xe1   : > { %v1743_v22 = vmax.f32 %v529_v16, 0.0  ;;  %v1789_v13 = vmax.f32 %v549_v63, 0.0  ;;  %v712_v16 = vmul.f32 %v1781_v4, %v1781_v4 }
  0xe2   : > { %v720_v39 = vmul.f32 %v1835_v8, %v1835_v8 }
  0xe3   : > { %v664_v26 = vadd.f32 %v663_v21, %v1743_v22  ;;  %v705_v27 = vmul.f32 %v1743_v22, %v1743_v22 }
  0xe5   : > { %v665_v40 = vadd.f32 %v664_v26, %v1740_v19  ;;  %v736_v41 = vadd.f32 %v735_v25, %v705_v27  ;;  %v713_v25 = vmul.f32 %v1789_v13, %v1789_v13  ;;  %v583_v26 = vpop.f32.mrf.mxu3  ;;  %v1530_v27 = vmov 0.0   ;;  %v568_v53 = vpop.f32.mrf.mxu2 }
  0xe6   : > { %313 = vst [vmem:[#allocation3] sm:$0x1] %v1530_v27 }
  0xe7   : > { %v666_v46 = vadd.f32 %v665_v40, %v1746_v24  ;;  %v737_v49 = vadd.f32 %v736_v41, %v706_v32  ;;  %v714_v32 = vmul.f32 %v1793_v14, %v1793_v14  ;;  %314 = vst [vmem:[#allocation4] sm:$0x1] %v1530_v27  ;;  %v1812_v41 = vmax.f32 %v559_v20, 0.0 }
  0xe9   : > { %v667_v38 = vadd.f32 %v666_v46, %v1751_v29  ;;  %v738_v55 = vadd.f32 %v737_v49, %v707_v42  ;;  %v715_v42 = vmul.f32 %v1798_v17, %v1798_v17  ;;  %v564_v49 = vadd.f32 %v1683_v37, %v563_v30 }
  0xea   : > { %v569_v30 = vadd.f32 %v1683_v37, %v568_v53  ;;  %v724_v53 = vmul.f32 %v1858_v56, %v1858_v56 }
  0xeb   : > { %v739_v61 = vadd.f32 %v738_v55, %v708_v51  ;;  %v668_v62 = vadd.f32 %v667_v38, %v1757_v33  ;;  %v716_v51 = vmul.f32 %v1805_v36, %v1805_v36  ;;  %v1820_v38 = vmax.f32 %v562_v35, 0.0 }
  0xed   : > { %v669_v6 = vadd.f32 %v668_v62, %v1765_v54  ;;  %v740_v7 = vadd.f32 %v739_v61, %v709_v58  ;;  %v717_v58 = vmul.f32 %v1812_v41, %v1812_v41  ;;  %v1826_v61 = vmax.f32 %v564_v49, 0.0 }
  0xef   : > { %v670_v11 = vadd.f32 %v669_v6, %v1773_v50  ;;  %v741_v12 = vadd.f32 %v740_v7, %v710_v3  ;;  %v718_v3 = vmul.f32 %v1820_v38, %v1820_v38 }
  0xf1   : > { %v671_v15 = vadd.f32 %v670_v11, %v1781_v4  ;;  %v742_v31 = vadd.f32 %v741_v12, %v711_v10  ;;  %v586_v10 = vpop.f32.mrf.mxu3  ;;  %v719_v12 = vmul.f32 %v1826_v61, %v1826_v61 }
  0xf3   : > { %v743_v21 = vadd.f32 %v742_v31, %v712_v16  ;;  %v672_v23 = vadd.f32 %v671_v15, %v1789_v13  ;;  %v1842_v15 = vmax.f32 %v569_v30, 0.0  ;;  %v1846_v16 = vmax.f32 %v572_v2, 0.0 }
  0xf5   : > { %v673_v40 = vadd.f32 %v672_v23, %v1793_v14  ;;  %v744_v44 = vadd.f32 %v743_v21, %v713_v25  ;;  %v579_v21 = vadd.f32 %v1683_v37, %v1738_v18  ;;  %v1853_v23 = vmax.f32 %v574_v9, 0.0 }
  0xf6   : > { %v722_v35 = vmul.f32 %v1846_v16, %v1846_v16 }
  0xf7   : > { %v674_v43 = vadd.f32 %v673_v40, %v1798_v17  ;;  %v745_v46 = vadd.f32 %v744_v44, %v714_v32  ;;  %v721_v32 = vmul.f32 %v1842_v15, %v1842_v15  ;;  %v582_v40 = vadd.f32 %v1683_v37, %v1771_v60 }
  0xf8   : > { %v1865_v18 = vmax.f32 %v579_v21, 0.0 }
  0xf9   : > { %v746_v1 = vadd.f32 %v745_v46, %v715_v42  ;;  %v675_v55 = vadd.f32 %v674_v43, %v1805_v36  ;;  %v723_v43 = vmul.f32 %v1853_v23, %v1853_v23 }
  0xfb   : > { %v676_v62 = vadd.f32 %v675_v55, %v1812_v41  ;;  %v747_v63 = vadd.f32 %v746_v1, %v716_v51  ;;  %v584_v51 = vadd.f32 %v1683_v37, %v583_v26  ;;  %v588_v1 = vpop.f32.mrf.mxu3  ;;  %v1873_v55 = vmax.f32 %v582_v40, 0.0 }
  0xfc   : > { %v589_v26 = vadd.f32 %v1683_v37, %v588_v1 }
  0xfd   : > { %v677_v6 = vadd.f32 %v676_v62, %v1820_v38  ;;  %v748_v7 = vadd.f32 %v747_v63, %v717_v58  ;;  %v587_v58 = vadd.f32 %v1683_v37, %v586_v10  ;;  %v725_v62 = vmul.f32 %v1865_v18, %v1865_v18 }
  0xfe   : > { %v1879_v63 = vmax.f32 %v584_v51, 0.0  ;;  %v657_v51 = vld [vmem:[#allocation3] sm:$0x1] }
  0xff   : > { %v678_v11 = vadd.f32 %v677_v6, %v1826_v61  ;;  %v749_v28 = vadd.f32 %v748_v7, %v718_v3  ;;  %v726_v3 = vmul.f32 %v1873_v55, %v1873_v55  ;;  %v1886_v9 = vmax.f32 %v587_v58, 0.0 }
 0x101   : > { %v750_v31 = vadd.f32 %v749_v28, %v719_v12  ;;  %v679_v20 = vadd.f32 %v678_v11, %v1835_v8  ;;  %v727_v11 = vmul.f32 %v1879_v63, %v1879_v63  ;;  %v1891_v28 = vmax.f32 %v589_v26, 0.0 }
 0x102   : > { %v728_v37 = vmul.f32 %v1886_v9, %v1886_v9 }
 0x103   : > { %v751_v25 = vadd.f32 %v750_v31, %v720_v39  ;;  %v680_v27 = vadd.f32 %v679_v20, %v1842_v15  ;;  %v729_v21 = vmul.f32 %v1891_v28, %v1891_v28 }
 0x105   : > { %v681_v44 = vadd.f32 %v680_v27, %v1846_v16  ;;  %v752_v42 = vadd.f32 %v751_v25, %v721_v32 }
 0x107   : > { %v682_v46 = vadd.f32 %v681_v44, %v1853_v23  ;;  %v753_v49 = vadd.f32 %v752_v42, %v722_v35 }
 0x109   : > { %v754_v60 = vadd.f32 %v753_v49, %v723_v43  ;;  %v683_v57 = vadd.f32 %v682_v46, %v1858_v56 }
 0x10b   : > { %v684_v30 = vadd.f32 %v683_v57, %v1865_v18  ;;  %v755_v2 = vadd.f32 %v754_v60, %v724_v53  ;;  %v697_v60 = vld [vmem:[#allocation4] sm:$0x1] }
 0x10d   : > { %v685_v6 = vadd.f32 %v684_v30, %v1873_v55  ;;  %v756_v7 = vadd.f32 %v755_v2, %v725_v62 }
 0x10f   : > { %v686_v10 = vadd.f32 %v685_v6, %v1879_v63  ;;  %v757_v12 = vadd.f32 %v756_v7, %v726_v3 }
 0x111   : > { %v758_v34 = vadd.f32 %v757_v12, %v727_v11  ;;  %v687_v31 = vadd.f32 %v686_v10, %v1886_v9 }
 0x113   : > { %v759_v20 = vadd.f32 %v758_v34, %v728_v37  ;;  %v688_v39 = vadd.f32 %v687_v31, %v1891_v28 }
 0x115   : > { %v689_v25 = vrot.slane %v688_v39, 4  ;;  %v760_v27 = vadd.f32 %v759_v20, %v729_v21  ;;  %v790_v21 = vld [vmem:[#allocation9] sm:$0x1] }
 0x117   : > { %v690_v32 = vadd.f32 %v689_v25, %v688_v39  ;;  %v761_v35 = vrot.slane %v760_v27, 4 }
 0x119   : > { %v691_v40 = vrot.slane %v690_v32, 2  ;;  %v762_v44 = vadd.f32 %v761_v35, %v760_v27  ;;  %v792_v35 = vld [vmem:[#allocation10] sm:$0x1] }
 0x11b   : > { %v692_v42 = vadd.f32 %v691_v40, %v690_v32  ;;  %v763_v43 = vrot.slane %v762_v44, 2 }
 0x11d   : > { %v693_v46 = vrot.slane %v692_v42, 1  ;;  %v764_v49 = vadd.f32 %v763_v43, %v762_v44 }
 0x11f   : > { %v694_v53 = vadd.f32 %v693_v46, %v692_v42  ;;  %v765_v1 = vrot.slane %v764_v49, 1 }
 0x121   : > { %v695_v57 = vadd.f32 %v694_v53, %v657_v51  ;;  %v766_v58 = vadd.f32 %v765_v1, %v764_v49 }
 0x123   : > { %696 = vst [vmem:[#allocation3] sm:$0x1] %v695_v57  ;;  %v767_v62 = vadd.f32 %v766_v58, %v697_v60 }
 0x125   : > { %768 = vst [vmem:[#allocation4] sm:$0x1] %v767_v62 }
 0x12a   : > { %v772_v30 = vld [vmem:[#allocation3] sm:$0x1] }
 0x12b   : > { %v773_v2 = vmul.f32 0.00390625, %v772_v30 }
 0x12c   : > { %v774_v26 = vld [vmem:[#allocation4] sm:$0x1] }
 0x12d   : > { %v775_v3 = vmul.f32 0.00390625, %v774_v26  ;;  %v776_v6 = vmul.f32 %v773_v2, %v773_v2 }
 0x12f   : > { %v777_v7 = vsub.f32 %v775_v3, %v776_v6 }
 0x131   : > { %v778_v10 = vmax.f32 %v777_v7, 0.0 }
 0x133   : > { %v779_v11 = vadd.f32 1e-05, %v778_v10 }
 0x135   : > { %1365 = vrsqrt.f32 %v779_v11  ;;  %vm786_vm4 = vweird.f32 %v779_v11 }
 0x13b   : > { %v1366_v12 = vpop.eup %1365 }
 0x13c   : > { %v781_v34 = vmul.f32 %v1366_v12, %v779_v11  ;;  %vm787_vm3 = vweird.f32 %v1366_v12 }
 0x13d   : > { %vm788_vm5 = vmor %vm786_vm4, %vm787_vm3 }
 0x13e   : > { %v782_v31 = vmul.f32 %v1366_v12, %v781_v34 }
 0x140   : > { %v783_v37 = vmul.f32 0.5, %v782_v31 }
 0x142   : > { %v784_v20 = vsub.f32 1.5, %v783_v37 }
 0x144   : > { %v785_v39 = vmul.f32 %v1366_v12, %v784_v20 }
 0x146   : > { %v789_v25 = vsel %vm788_vm5, %v1366_v12, %v785_v39 }
 0x147   : > { %v791_v27 = vmul.f32 %v790_v21, %v789_v25 }
 0x149   : > { %v793_v32 = vmul.f32 %v791_v27, %v773_v2  ;;  %v1899_v40 = vperm.slane %v791_v27, 0 }
 0x14b   : > { %v794_v44 = vsub.f32 %v792_v35, %v793_v32  ;;  %v830_v42 = vmul.f32 %v1899_v40, %v1695_v47  ;;  %v831_v43 = vmul.f32 %v1899_v40, %v1692_v45  ;;  %v832_v46 = vmul.f32 %v1899_v40, %v1697_v48 }
 0x14c   : > { %v833_v49 = vmul.f32 %v1899_v40, %v1702_v52  ;;  %v834_v51 = vmul.f32 %v1899_v40, %v1713_v59  ;;  %v835_v53 = vmul.f32 %v1899_v40, %v1719_v0  ;;  %v836_v47 = vmul.f32 %v1899_v40, %v1726_v5 }
 0x14d   : > { %v1913_v1 = vperm.slane %v794_v44, 0  ;;  %v837_v45 = vmul.f32 %v1899_v40, %v1743_v22  ;;  %v838_v48 = vmul.f32 %v1899_v40, %v1740_v19  ;;  %v839_v52 = vmul.f32 %v1899_v40, %v1746_v24 }
 0x14e   : > { %v840_v59 = vmul.f32 %v1899_v40, %v1751_v29  ;;  %v841_v0 = vmul.f32 %v1899_v40, %v1757_v33  ;;  %v842_v60 = vmul.f32 %v1899_v40, %v1765_v54  ;;  %v843_v5 = vmul.f32 %v1899_v40, %v1773_v50 }
 0x14f   : > { %v844_v22 = vmul.f32 %v1899_v40, %v1781_v4  ;;  %v845_v19 = vmul.f32 %v1899_v40, %v1789_v13  ;;  %v846_v24 = vmul.f32 %v1899_v40, %v1793_v14  ;;  %v847_v29 = vmul.f32 %v1899_v40, %v1798_v17 }
 0x150   : > { %v848_v33 = vmul.f32 %v1899_v40, %v1805_v36  ;;  %v849_v54 = vmul.f32 %v1899_v40, %v1812_v41  ;;  %v865_v50 = vadd.f32 %v1913_v1, %v830_v42  ;;  %v866_v4 = vadd.f32 %v1913_v1, %v831_v43 }
 0x151   : > { %v867_v57 = vadd.f32 %v1913_v1, %v832_v46  ;;  %v868_v13 = vadd.f32 %v1913_v1, %v833_v49  ;;  %v869_v14 = vadd.f32 %v1913_v1, %v834_v51  ;;  %v870_v58 = vadd.f32 %v1913_v1, %v835_v53 }
 0x152   : > { %v850_v17 = vmul.f32 %v1899_v40, %v1820_v38  ;;  %v851_v36 = vmul.f32 %v1899_v40, %v1826_v61  ;;  %v871_v41 = vadd.f32 %v1913_v1, %v836_v47  ;;  %v872_v62 = vadd.f32 %v1913_v1, %v837_v45 }
 0x153   : > { %v852_v30 = vmul.f32 %v1899_v40, %v1835_v8  ;;  %v853_v2 = vmul.f32 %v1899_v40, %v1842_v15  ;;  %v873_v26 = vadd.f32 %v1913_v1, %v838_v48  ;;  %v874_v3 = vadd.f32 %v1913_v1, %v839_v52 }
 0x154   : > { %v854_v38 = vmul.f32 %v1899_v40, %v1846_v16  ;;  %v875_v61 = vadd.f32 %v1913_v1, %v840_v59  ;;  %v876_v8 = vadd.f32 %v1913_v1, %v841_v0  ;;  %v877_v15 = vadd.f32 %v1913_v1, %v842_v60 }
 0x155   : > { %v878_v6 = vadd.f32 %v1913_v1, %v843_v5  ;;  %v1197_v7 = vpack.c.bf16 %v866_v4, %v865_v50  ;;  %v1202_v10 = vpack.c.bf16 %v868_v13, %v867_v57  ;;  %v1207_v11 = vpack.c.bf16 %v870_v58, %v869_v14 }
 0x156   : > { %v855_v12 = vmul.f32 %v1899_v40, %v1853_v23  ;;  %v879_v34 = vadd.f32 %v1913_v1, %v844_v22  ;;  %v880_v16 = vadd.f32 %v1913_v1, %v845_v19  ;;  %v1212_v31 = vpack.c.bf16 %v872_v62, %v871_v41 }
 0x157   : > { %v856_v37 = vmul.f32 %v1899_v40, %v1858_v56  ;;  %v881_v20 = vadd.f32 %v1913_v1, %v846_v24  ;;  %v882_v39 = vadd.f32 %v1913_v1, %v847_v29  ;;  %1198 = vst [vmem:[%s1966_s8] sm:$0xff] %v1197_v7   ;;  %v1217_v21 = vpack.c.bf16 %v874_v3, %v873_v26 }
 0x158   : > { %v857_v25 = vmul.f32 %v1899_v40, %v1865_v18  ;;  %v883_v23 = vadd.f32 %v1913_v1, %v848_v33  ;;  %v884_v27 = vadd.f32 %v1913_v1, %v849_v54  ;;  %1274 = vst [vmem:[%s1966_s8 + $0x8] sm:$0xff] %v1202_v10   ;;  %v1222_v32 = vpack.c.bf16 %v876_v8, %v875_v61 }
 0x159   : > { %v858_v56 = vmul.f32 %v1899_v40, %v1873_v55  ;;  %v885_v35 = vadd.f32 %v1913_v1, %v850_v17  ;;  %v886_v44 = vadd.f32 %v1913_v1, %v851_v36  ;;  %1275 = vst [vmem:[%s1966_s8 + $0x10] sm:$0xff] %v1207_v11   ;;  %v1227_v42 = vpack.c.bf16 %v878_v6, %v877_v15 }
 0x15a   : > { %v859_v18 = vmul.f32 %v1899_v40, %v1879_v63  ;;  %v887_v43 = vadd.f32 %v1913_v1, %v852_v30  ;;  %v888_v46 = vadd.f32 %v1913_v1, %v853_v2  ;;  %1276 = vst [vmem:[%s1966_s8 + $0x18] sm:$0xff] %v1212_v31   ;;  %v1232_v49 = vpack.c.bf16 %v880_v16, %v879_v34 }
 0x15b   : > { %v860_v55 = vmul.f32 %v1899_v40, %v1886_v9  ;;  %v889_v51 = vadd.f32 %v1913_v1, %v854_v38  ;;  %v890_v53 = vadd.f32 %v1913_v1, %v855_v12  ;;  %1277 = vst [vmem:[%s1966_s8 + $0x20] sm:$0xff] %v1217_v21   ;;  %v1237_v47 = vpack.c.bf16 %v882_v39, %v881_v20 }
 0x15c   : > { %v861_v63 = vmul.f32 %v1899_v40, %v1891_v28  ;;  %v891_v45 = vadd.f32 %v1913_v1, %v856_v37  ;;  %v892_v48 = vadd.f32 %v1913_v1, %v857_v25  ;;  %1278 = vst [vmem:[%s1966_s8 + $0x28] sm:$0xff] %v1222_v32   ;;  %v1242_v9 = vpack.c.bf16 %v884_v27, %v883_v23 }
 0x15d   : > { %v893_v52 = vadd.f32 %v1913_v1, %v858_v56  ;;  %v894_v59 = vadd.f32 %v1913_v1, %v859_v18  ;;  %1279 = vst [vmem:[%s1966_s8 + $0x30] sm:$0xff] %v1227_v42   ;;  %v1247_v0 = vpack.c.bf16 %v886_v44, %v885_v35  ;;  %v895_v28 = vadd.f32 %v1913_v1, %v860_v55 }
 0x15e   : > { %v896_v40 = vadd.f32 %v1913_v1, %v861_v63  ;;  %1280 = vst [vmem:[%s1966_s8 + $0x38] sm:$0xff] %v1232_v49   ;;  %v1252_v60 = vpack.c.bf16 %v888_v46, %v887_v43  ;;  %v1257_v5 = vpack.c.bf16 %v890_v53, %v889_v51  ;;  %v1262_v22 = vpack.c.bf16 %v892_v48, %v891_v45 }
 0x15f   : > { %1281 = vst [vmem:[%s1966_s8 + $0x40] sm:$0xff] %v1237_v47   ;;  %v1267_v19 = vpack.c.bf16 %v894_v59, %v893_v52 }
 0x160   : > { %1282 = vst [vmem:[%s1966_s8 + $0x48] sm:$0xff] %v1242_v9   ;;  %v1272_v24 = vpack.c.bf16 %v896_v40, %v895_v28 }
 0x161   : > { %1283 = vst [vmem:[%s1966_s8 + $0x50] sm:$0xff] %v1247_v0  }
 0x162   : > { %1284 = vst [vmem:[%s1966_s8 + $0x58] sm:$0xff] %v1252_v60  }
 0x163   : > { %1285 = vst [vmem:[%s1966_s8 + $0x60] sm:$0xff] %v1257_v5  }
 0x164   : > { %1286 = vst [vmem:[%s1966_s8 + $0x68] sm:$0xff] %v1262_v22  }
 0x165   : > { %1287 = vst [vmem:[%s1966_s8 + $0x70] sm:$0xff] %v1267_v19  }
 0x166   : > { %1288 = vst [vmem:[%s1966_s8 + $0x78] sm:$0xff] %v1272_v24  }
 0x167 PF: > { %s18_s20 = sadd.s32 1, %s1521_s20   ;;  %s2040_s18 = smov %s1517_s19 }
 0x168   : > { %p15_p8 = scmp.ge.s32.totalorder %s18_s20, 4   ;;  %s2041_s19 = smov %s2043_s30 }
 0x16a   :  { %17 = sbr.rel (!%p15_p8) target bundleno = 4 (0x4), region = 96 }
 0x16f   :  { %983 = vsyncpa [#allocation6], 1 }
 0x170   :  { %985 = vsyncpa [#allocation6 + $0x1], 1 }
 0x171   :  { %986 = vsyncpa [#allocation8], 1 }
 0x172   :  { %987 = vsyncpa [#allocation11], 1 }

// kernel: siamese_forward.5
= control target key start
LH: loop header
LB: loop body
LE: loop exit
PB: predicated region body
PF: predicated region fallthrough
CT: control target
= control target key end

     0   :  { %s1345_s18 = smov 0   ;;  %s1347_s19 = smov 0   ;;  %s1797_s0 = inlined_call_operand.vmem [shape: bf16[512,108], index: 0, kind: input, shape index: {}]   ;;  %s1798_s1 = inlined_call_operand.vmem [shape: bf16[108,128], index: 1, kind: input, shape index: {}]   ;;  %s1799_s2 = inlined_call_operand.vmem [shape: f32[1,128], index: 2, kind: input, shape index: {}]   ;;  %s1800_s3 = inlined_call_operand.vmem [shape: f32[1,128], index: 3, kind: input, shape index: {}]   ;;  %s1801_s4 = inlined_call_operand.vmem [shape: f32[1,128], index: 4, kind: input, shape index: {}]   ;;  %s1802_s5 = inlined_call_operand.vmem [shape: bf16[512,128], index: 5, kind: output, shape index: {}]  }
   0x1   :  { %s1349_s20 = smov 0  }
   0x2 LB: > { %s27_s21 = sadd.s32 1, %s1308_s19  ;;  %p1008_p0 = scmp.ge.s32.totalorder %s1312_s20, 1  ;;  %s1312_s20 = sphi %s1349_s20, %s15_s20   ;;  %s1308_s19 = sphi %s1347_s19, %s1804_s19   ;;  %s1304_s18 = sphi %s1345_s18, %s1803_s18  }
   0x3   : > { %p29_p1 = scmp.ge.s32.totalorder %s27_s21, 2  ;;  %p204_p2 = scmp.lt.s32.totalorder %s1312_s20, 3 }
   0x5   : > { %s1806_s21 = smov (%p29_p1, %s27_s21), 0  ;;  %p205_p3 = pnand %p1008_p0, %p204_p2 }
   0x6   : > { %s1009_s30 = sshll.u32 (!%p205_p3), %s1304_s18, 5 }
   0x7   : > { %208 = sbr.rel (%p205_p3) target bundleno = 361 (0x169), region = 40  ;;  %p235_p4 = scmp.lt.s32.totalorder (!%p205_p3), %s1009_s30, 63 }
   0xc   : > { %v1103_v0 = vld [vmem:[%s1798_s1 + $0x30] sm:$0xf]  ;;  %v1145_v1 = vld [vmem:[%s1798_s1 + $0x30] sm:$0x30]  ;;  %vm474_vm0 = vcmask 1045504   ;;  %v1144_v4 = vld [vmem:[%s1798_s1 + $0x28] sm:$0xff] }
   0xd   : > { %v1104_v2 = vor.u32 %v1145_v1, %v1103_v0  ;;  %v1143_v5 = vld [vmem:[%s1798_s1 + $0x20] sm:$0xff]  ;;  %v1142_v6 = vld [vmem:[%s1798_s1 + $0x18] sm:$0xff]  ;;  %v1141_v7 = vld [vmem:[%s1798_s1 + $0x10] sm:$0xff]  ;;  %s1808_s30 = smov (!%p235_p4, %s1009_s30), 63  ;;  %vm425_vm1 = vcmask 883712  }
   0xe   : > { %v1140_v8 = vld [vmem:[%s1798_s1 + $0x8] sm:$0xff]  ;;  %s1010_s12 = sshll.u32 %s1808_s30, 2  ;;  %v1139_v9 = vld [vmem:[%s1798_s1] sm:$0xff] }
   0xf   : > { %v476_v3 = vsel %vm474_vm0, %v1104_v2, 0  ;;  %s1398_s17 = scalar_lea.vmem %s1797_s0, %s1010_s12  ;;  %v1443_v39 = vld [vmem:[%s1799_s2] ss:$0 sm:$0xff]  ;;  %s1732_s29 = scalar_lea.vmem %s1802_s5, %s1010_s12 }
  0x10   : > { %479 = vmatpush.bf16.msra.mxu0 %v476_v3  ;;  %1241 = vmatpush.bf16.msra.mxu1 %v476_v3  ;;  %v1123_v10 = vld [vmem:[%s1398_s17] sm:$0xff]  ;;  %v1124_v14 = vld [vmem:[%s1398_s17 + $0x8] sm:$0xff]  ;;  %v1125_v18 = vld [vmem:[%s1398_s17 + $0x10] sm:$0xff] }
  0x11   : > { %1242 = vmatpush.bf16.msra.mxu2 %v476_v3  ;;  %1243 = vmatpush.bf16.msra.mxu3 %v476_v3  ;;  %v1127_v11 = vld [vmem:[%s1398_s17 + $0x20] sm:$0xff]  ;;  %v1128_v15 = vld [vmem:[%s1398_s17 + $0x28] sm:$0xff]  ;;  %v1129_v19 = vld [vmem:[%s1398_s17 + $0x30] sm:$0xff] }
  0x12   : > { %v1131_v12 = vld [vmem:[%s1398_s17 + $0x40] sm:$0xff]  ;;  %v1132_v16 = vld [vmem:[%s1398_s17 + $0x48] sm:$0xff]  ;;  %v1133_v20 = vld [vmem:[%s1398_s17 + $0x50] sm:$0xff] }
  0x13   : > { %v1135_v13 = vld [vmem:[%s1398_s17 + $0x60] sm:$0xff]  ;;  %v1136_v17 = vld [vmem:[%s1398_s17 + $0x68] sm:$0xff]  ;;  %v1137_v21 = vld [vmem:[%s1398_s17 + $0x70] sm:$0xff] }
  0x14   : > { %480 = vmatpush.bf16.msra.mxu0 %v1144_v4  ;;  %1244 = vmatpush.bf16.msra.mxu1 %v1144_v4  ;;  %v1126_v22 = vld [vmem:[%s1398_s17 + $0x18] sm:$0xff] }
  0x15   : > { %1245 = vmatpush.bf16.msra.mxu2 %v1144_v4  ;;  %1246 = vmatpush.bf16.msra.mxu3 %v1144_v4  ;;  %v1130_v23 = vld [vmem:[%s1398_s17 + $0x38] sm:$0xff] }
  0x16   : > { %v1134_v24 = vld [vmem:[%s1398_s17 + $0x58] sm:$0xff] }
  0x17   : > { %v1138_v25 = vld [vmem:[%s1398_s17 + $0x78] sm:$0xff] }
  0x18   : > { %481 = vmatpush.bf16.msra.mxu0 %v1143_v5  ;;  %1247 = vmatpush.bf16.msra.mxu1 %v1143_v5 }
  0x19   : > { %1248 = vmatpush.bf16.msra.mxu2 %v1143_v5  ;;  %1249 = vmatpush.bf16.msra.mxu3 %v1143_v5 }
  0x1c   : > { %482 = vmatpush.bf16.msra.mxu0 %v1142_v6  ;;  %1250 = vmatpush.bf16.msra.mxu1 %v1142_v6 }
  0x1d   : > { %1251 = vmatpush.bf16.msra.mxu2 %v1142_v6  ;;  %1252 = vmatpush.bf16.msra.mxu3 %v1142_v6 }
  0x20   : > { %483 = vmatpush.bf16.msra.mxu0 %v1141_v7  ;;  %1253 = vmatpush.bf16.msra.mxu1 %v1141_v7 }
  0x21   : > { %1254 = vmatpush.bf16.msra.mxu2 %v1141_v7  ;;  %1255 = vmatpush.bf16.msra.mxu3 %v1141_v7 }
  0x24   : > { %484 = vmatpush.bf16.msra.mxu0 %v1140_v8  ;;  %1256 = vmatpush.bf16.msra.mxu1 %v1140_v8 }
  0x25   : > { %1257 = vmatpush.bf16.msra.mxu2 %v1140_v8  ;;  %1258 = vmatpush.bf16.msra.mxu3 %v1140_v8 }
  0x28   : > { %485 = vmatpush.bf16.msra.mxu0 %v1139_v9  ;;  %1259 = vmatpush.bf16.msra.mxu1 %v1139_v9 }
  0x29   : > { %1260 = vmatpush.bf16.msra.mxu2 %v1139_v9  ;;  %1261 = vmatpush.bf16.msra.mxu3 %v1139_v9 }
  0x2b   : > { %1105 = vmatmul.msk.bf16.vlgmr.msra.gmra.mxu0 %vm425_vm1, %v1123_v10  ;;  %1109 = vmatmul.msk.bf16.vlgmr.msra.gmra.mxu1 %vm425_vm1, %v1127_v11 }
  0x2c   : > { %1113 = vmatmul.msk.bf16.vlgmr.msra.gmra.mxu2 %vm425_vm1, %v1131_v12  ;;  %1117 = vmatmul.msk.bf16.vlgmr.msra.gmra.mxu3 %vm425_vm1, %v1135_v13 }
  0x3b   : > { %1106 = vmatmul.msk.bf16.gmra.mxu0 %vm425_vm1, %v1124_v14  ;;  %1110 = vmatmul.msk.bf16.gmra.mxu1 %vm425_vm1, %v1128_v15 }
  0x3c   : > { %1114 = vmatmul.msk.bf16.gmra.mxu2 %vm425_vm1, %v1132_v16  ;;  %1118 = vmatmul.msk.bf16.gmra.mxu3 %vm425_vm1, %v1136_v17 }
  0x4b   : > { %1107 = vmatmul.msk.bf16.gmra.mxu0 %vm425_vm1, %v1125_v18  ;;  %1111 = vmatmul.msk.bf16.gmra.mxu1 %vm425_vm1, %v1129_v19 }
  0x4c   : > { %1115 = vmatmul.msk.bf16.gmra.mxu2 %vm425_vm1, %v1133_v20  ;;  %1119 = vmatmul.msk.bf16.gmra.mxu3 %vm425_vm1, %v1137_v21 }
  0x5b   : > { %1108 = vmatmul.msk.bf16.gmra.mxu0 %vm425_vm1, %v1126_v22  ;;  %1112 = vmatmul.msk.bf16.gmra.mxu1 %vm425_vm1, %v1130_v23 }
  0x5c   : > { %1116 = vmatmul.msk.bf16.gmra.mxu2 %vm425_vm1, %v1134_v24  ;;  %1120 = vmatmul.msk.bf16.gmra.mxu3 %vm425_vm1, %v1138_v25 }
  0xa8   : > { %v487_v26 = vpop.f32.mrf.mxu0  ;;  %v507_v27 = vpop.f32.mrf.mxu1 }
  0xa9   : > { %v488_v43 = vadd.f32 %v1443_v39, %v487_v26  ;;  %v508_v8 = vadd.f32 %v1443_v39, %v507_v27 }
  0xab   : > { %v1455_v49 = vmax.f32 %v488_v43, 0.0  ;;  %v1500_v21 = vmax.f32 %v508_v8, 0.0 }
  0xad   : > { %v674_v56 = vmul.f32 %v1455_v49, %v1455_v49 }
  0xaf   : > { %v1432_v30 = vpop.f32.mrf.mxu2  ;;  %v1436_v36 = vpop.f32.mrf.mxu3 }
  0xb0   : > { %v489_v28 = vpop.f32.mrf.mxu0  ;;  %v509_v29 = vpop.f32.mrf.mxu1 }
  0xb1   : > { %v490_v42 = vadd.f32 %v1443_v39, %v489_v28  ;;  %v510_v12 = vadd.f32 %v1443_v39, %v509_v29 }
  0xb3   : > { %v1452_v47 = vmax.f32 %v490_v42, 0.0  ;;  %v1506_v26 = vmax.f32 %v510_v12, 0.0 }
  0xb5   : > { %v675_v53 = vmul.f32 %v1452_v47, %v1452_v47  ;;  %v634_v59 = vadd.f32 %v1452_v47, %v1455_v49 }
  0xb7   : > { %v1434_v33 = vpop.f32.mrf.mxu2  ;;  %v1445_v41 = vpop.f32.mrf.mxu3  ;;  %v706_v63 = vadd.f32 %v675_v53, %v674_v56 }
  0xb8   : > { %v492_v31 = vpop.f32.mrf.mxu0  ;;  %v512_v32 = vpop.f32.mrf.mxu1 }
  0xb9   : > { %v493_v45 = vadd.f32 %v1443_v39, %v492_v31  ;;  %v513_v19 = vadd.f32 %v1443_v39, %v512_v32 }
  0xbb   : > { %v1457_v50 = vmax.f32 %v493_v45, 0.0  ;;  %v1511_v31 = vmax.f32 %v513_v19, 0.0 }
  0xbd   : > { %v676_v60 = vmul.f32 %v1457_v50, %v1457_v50  ;;  %v635_v0 = vadd.f32 %v634_v59, %v1457_v50  ;;  %v684_v53 = vmul.f32 %v1511_v31, %v1511_v31 }
  0xbf   : > { %v1438_v38 = vpop.f32.mrf.mxu2  ;;  %v1467_v58 = vpop.f32.mrf.mxu3  ;;  %v707_v4 = vadd.f32 %v706_v63, %v676_v60 }
  0xc0   : > { %v494_v34 = vpop.f32.mrf.mxu0  ;;  %v514_v35 = vpop.f32.mrf.mxu1 }
  0xc1   : > { %v495_v48 = vadd.f32 %v1443_v39, %v494_v34  ;;  %v515_v25 = vadd.f32 %v1443_v39, %v514_v35  ;;  %v682_v34 = vmul.f32 %v1500_v21, %v1500_v21 }
  0xc3   : > { %v1462_v54 = vmax.f32 %v495_v48, 0.0  ;;  %v1517_v35 = vmax.f32 %v515_v25, 0.0 }
  0xc5   : > { %v677_v1 = vmul.f32 %v1462_v54, %v1462_v54  ;;  %v636_v5 = vadd.f32 %v635_v0, %v1462_v54  ;;  %v685_v60 = vmul.f32 %v1517_v35, %v1517_v35 }
  0xc7   : > { %v1450_v46 = vpop.f32.mrf.mxu2  ;;  %v708_v9 = vadd.f32 %v707_v4, %v677_v1  ;;  %v1498_v20 = vpop.f32.mrf.mxu3  ;;  %v528_v4 = vadd.f32 %v1443_v39, %v1432_v30  ;;  %v533_v30 = vadd.f32 %v1443_v39, %v1438_v38 }
  0xc8   : > { %v497_v37 = vpop.f32.mrf.mxu0  ;;  %v517_v40 = vpop.f32.mrf.mxu1 }
  0xc9   : > { %v498_v51 = vadd.f32 %v1443_v39, %v497_v37  ;;  %v518_v37 = vadd.f32 %v1443_v39, %v517_v40  ;;  %v1565_v38 = vmax.f32 %v533_v30, 0.0 }
  0xcb   : > { %v1473_v61 = vmax.f32 %v498_v51, 0.0  ;;  %v1525_v56 = vmax.f32 %v518_v37, 0.0 }
  0xcd   : > { %v678_v6 = vmul.f32 %v1473_v61, %v1473_v61  ;;  %v637_v10 = vadd.f32 %v636_v5, %v1473_v61  ;;  %v686_v5 = vmul.f32 %v1525_v56, %v1525_v56 }
  0xcf   : > { %v1481_v3 = vpop.f32.mrf.mxu2  ;;  %v709_v15 = vadd.f32 %v708_v9, %v678_v6 }
  0xd0   : > { %v499_v44 = vpop.f32.mrf.mxu0  ;;  %v519_v52 = vpop.f32.mrf.mxu1  ;;  %v538_v37 = vadd.f32 %v1443_v39, %v1481_v3 }
  0xd1   : > { %v500_v55 = vadd.f32 %v1443_v39, %v499_v44  ;;  %v683_v44 = vmul.f32 %v1506_v26, %v1506_v26  ;;  %v520_v45 = vadd.f32 %v1443_v39, %v519_v52 }
  0xd3   : > { %v1479_v2 = vmax.f32 %v500_v55, 0.0  ;;  %v1533_v52 = vmax.f32 %v520_v45, 0.0 }
  0xd5   : > { %v679_v11 = vmul.f32 %v1479_v2, %v1479_v2  ;;  %v638_v16 = vadd.f32 %v637_v10, %v1479_v2  ;;  %v530_v10 = vadd.f32 %v1443_v39, %v1434_v33  ;;  %v687_v12 = vmul.f32 %v1533_v52, %v1533_v52 }
  0xd7   : > { %v710_v22 = vadd.f32 %v709_v15, %v679_v11  ;;  %v539_v32 = vpop.f32.mrf.mxu2  ;;  %v1558_v19 = vmax.f32 %v530_v10, 0.0 }
  0xd8   : > { %v502_v57 = vpop.f32.mrf.mxu0  ;;  %v522_v14 = vpop.f32.mrf.mxu1 }
  0xd9   : > { %v503_v62 = vadd.f32 %v1443_v39, %v502_v57  ;;  %v523_v59 = vadd.f32 %v1443_v39, %v522_v14 }
  0xdb   : > { %v1486_v7 = vmax.f32 %v503_v62, 0.0  ;;  %v1531_v62 = vpop.f32.mrf.mxu3  ;;  %v1541_v6 = vmax.f32 %v523_v59, 0.0 }
  0xdd   : > { %v680_v17 = vmul.f32 %v1486_v7, %v1486_v7  ;;  %v639_v23 = vadd.f32 %v638_v16, %v1486_v7  ;;  %v1553_v16 = vmax.f32 %v528_v4, 0.0  ;;  %v548_v4 = vadd.f32 %v1443_v39, %v1436_v36 }
  0xde   : > { %v553_v36 = vadd.f32 %v1443_v39, %v1467_v58 }
  0xdf   : > { %v711_v27 = vadd.f32 %v710_v22, %v680_v17  ;;  %v542_v11 = vpop.f32.mrf.mxu2  ;;  %v535_v22 = vadd.f32 %v1443_v39, %v1450_v46 }
  0xe0   : > { %v504_v13 = vpop.f32.mrf.mxu0  ;;  %v524_v55 = vpop.f32.mrf.mxu1  ;;  %v543_v59 = vadd.f32 %v1443_v39, %v542_v11  ;;  %v550_v11 = vadd.f32 %v1443_v39, %v1445_v41  ;;  %v1618_v58 = vmax.f32 %v553_v36, 0.0 }
  0xe1   : > { %v505_v18 = vadd.f32 %v1443_v39, %v504_v13  ;;  %v525_v1 = vadd.f32 %v1443_v39, %v524_v55 }
  0xe2   : > { %v1595_v10 = vmax.f32 %v543_v59, 0.0 }
  0xe3   : > { %v1503_v24 = vmax.f32 %v505_v18, 0.0  ;;  %v1549_v15 = vmax.f32 %v525_v1, 0.0  ;;  %v688_v18 = vmul.f32 %v1541_v6, %v1541_v6 }
  0xe4   : > { %v696_v41 = vmul.f32 %v1595_v10, %v1595_v10 }
  0xe5   : > { %v640_v28 = vadd.f32 %v639_v23, %v1503_v24  ;;  %v681_v29 = vmul.f32 %v1503_v24, %v1503_v24 }
  0xe7   : > { %v641_v42 = vadd.f32 %v640_v28, %v1500_v21  ;;  %v712_v43 = vadd.f32 %v711_v27, %v681_v29  ;;  %v689_v27 = vmul.f32 %v1549_v15, %v1549_v15  ;;  %v559_v28 = vpop.f32.mrf.mxu3  ;;  %v1314_v29 = vmov 0.0   ;;  %v544_v55 = vpop.f32.mrf.mxu2 }
  0xe8   : > { %252 = vst [vmem:[#allocation3] sm:$0x1] %v1314_v29 }
  0xe9   : > { %v642_v48 = vadd.f32 %v641_v42, %v1506_v26  ;;  %v713_v51 = vadd.f32 %v712_v43, %v682_v34  ;;  %v690_v34 = vmul.f32 %v1553_v16, %v1553_v16  ;;  %253 = vst [vmem:[#allocation4] sm:$0x1] %v1314_v29  ;;  %v1572_v43 = vmax.f32 %v535_v22, 0.0 }
  0xeb   : > { %v643_v40 = vadd.f32 %v642_v48, %v1511_v31  ;;  %v714_v57 = vadd.f32 %v713_v51, %v683_v44  ;;  %v691_v44 = vmul.f32 %v1558_v19, %v1558_v19  ;;  %v540_v51 = vadd.f32 %v1443_v39, %v539_v32 }
  0xec   : > { %v545_v32 = vadd.f32 %v1443_v39, %v544_v55  ;;  %v700_v55 = vmul.f32 %v1618_v58, %v1618_v58 }
  0xed   : > { %v715_v63 = vadd.f32 %v714_v57, %v684_v53  ;;  %v644_v0 = vadd.f32 %v643_v40, %v1517_v35  ;;  %v692_v53 = vmul.f32 %v1565_v38, %v1565_v38  ;;  %v1580_v40 = vmax.f32 %v538_v37, 0.0 }
  0xef   : > { %v645_v8 = vadd.f32 %v644_v0, %v1525_v56  ;;  %v716_v9 = vadd.f32 %v715_v63, %v685_v60  ;;  %v693_v60 = vmul.f32 %v1572_v43, %v1572_v43  ;;  %v1586_v63 = vmax.f32 %v540_v51, 0.0 }
  0xf1   : > { %v646_v13 = vadd.f32 %v645_v8, %v1533_v52  ;;  %v717_v14 = vadd.f32 %v716_v9, %v686_v5  ;;  %v694_v5 = vmul.f32 %v1580_v40, %v1580_v40 }
  0xf3   : > { %v647_v17 = vadd.f32 %v646_v13, %v1541_v6  ;;  %v718_v33 = vadd.f32 %v717_v14, %v687_v12  ;;  %v562_v12 = vpop.f32.mrf.mxu3  ;;  %v695_v14 = vmul.f32 %v1586_v63, %v1586_v63 }
  0xf5   : > { %v719_v23 = vadd.f32 %v718_v33, %v688_v18  ;;  %v648_v25 = vadd.f32 %v647_v17, %v1549_v15  ;;  %v1602_v17 = vmax.f32 %v545_v32, 0.0  ;;  %v1606_v18 = vmax.f32 %v548_v4, 0.0 }
  0xf7   : > { %v649_v42 = vadd.f32 %v648_v25, %v1553_v16  ;;  %v720_v46 = vadd.f32 %v719_v23, %v689_v27  ;;  %v555_v23 = vadd.f32 %v1443_v39, %v1498_v20  ;;  %v1613_v25 = vmax.f32 %v550_v11, 0.0 }
  0xf8   : > { %v698_v37 = vmul.f32 %v1606_v18, %v1606_v18 }
  0xf9   : > { %v650_v45 = vadd.f32 %v649_v42, %v1558_v19  ;;  %v721_v48 = vadd.f32 %v720_v46, %v690_v34  ;;  %v697_v34 = vmul.f32 %v1602_v17, %v1602_v17  ;;  %v558_v42 = vadd.f32 %v1443_v39, %v1531_v62 }
  0xfa   : > { %v1625_v20 = vmax.f32 %v555_v23, 0.0 }
  0xfb   : > { %v722_v3 = vadd.f32 %v721_v48, %v691_v44  ;;  %v651_v57 = vadd.f32 %v650_v45, %v1565_v38  ;;  %v699_v45 = vmul.f32 %v1613_v25, %v1613_v25 }
  0xfd   : > { %v652_v0 = vadd.f32 %v651_v57, %v1572_v43  ;;  %v723_v1 = vadd.f32 %v722_v3, %v692_v53  ;;  %v560_v53 = vadd.f32 %v1443_v39, %v559_v28  ;;  %v564_v3 = vpop.f32.mrf.mxu3  ;;  %v1633_v57 = vmax.f32 %v558_v42, 0.0 }
  0xfe   : > { %v565_v28 = vadd.f32 %v1443_v39, %v564_v3 }
  0xff   : > { %v653_v8 = vadd.f32 %v652_v0, %v1580_v40  ;;  %v724_v9 = vadd.f32 %v723_v1, %v693_v60  ;;  %v563_v60 = vadd.f32 %v1443_v39, %v562_v12  ;;  %v701_v0 = vmul.f32 %v1625_v20, %v1625_v20 }
 0x100   : > { %v1639_v1 = vmax.f32 %v560_v53, 0.0  ;;  %v633_v53 = vld [vmem:[#allocation3] sm:$0x1] }
 0x101   : > { %v654_v13 = vadd.f32 %v653_v8, %v1586_v63  ;;  %v725_v30 = vadd.f32 %v724_v9, %v694_v5  ;;  %v702_v5 = vmul.f32 %v1633_v57, %v1633_v57  ;;  %v1646_v11 = vmax.f32 %v563_v60, 0.0 }
 0x103   : > { %v726_v33 = vadd.f32 %v725_v30, %v695_v14  ;;  %v655_v22 = vadd.f32 %v654_v13, %v1595_v10  ;;  %v703_v13 = vmul.f32 %v1639_v1, %v1639_v1  ;;  %v1651_v30 = vmax.f32 %v565_v28, 0.0 }
 0x104   : > { %v704_v39 = vmul.f32 %v1646_v11, %v1646_v11 }
 0x105   : > { %v727_v27 = vadd.f32 %v726_v33, %v696_v41  ;;  %v656_v29 = vadd.f32 %v655_v22, %v1602_v17  ;;  %v705_v23 = vmul.f32 %v1651_v30, %v1651_v30 }
 0x107   : > { %v657_v46 = vadd.f32 %v656_v29, %v1606_v18  ;;  %v728_v44 = vadd.f32 %v727_v27, %v697_v34 }
 0x109   : > { %v658_v48 = vadd.f32 %v657_v46, %v1613_v25  ;;  %v729_v51 = vadd.f32 %v728_v44, %v698_v37 }
 0x10b   : > { %v730_v62 = vadd.f32 %v729_v51, %v699_v45  ;;  %v659_v59 = vadd.f32 %v658_v48, %v1618_v58 }
 0x10d   : > { %v660_v32 = vadd.f32 %v659_v59, %v1625_v20  ;;  %v731_v4 = vadd.f32 %v730_v62, %v700_v55  ;;  %v673_v62 = vld [vmem:[#allocation4] sm:$0x1] }
 0x10f   : > { %v661_v8 = vadd.f32 %v660_v32, %v1633_v57  ;;  %v732_v9 = vadd.f32 %v731_v4, %v701_v0 }
 0x111   : > { %v662_v12 = vadd.f32 %v661_v8, %v1639_v1  ;;  %v733_v14 = vadd.f32 %v732_v9, %v702_v5 }
 0x113   : > { %v734_v36 = vadd.f32 %v733_v14, %v703_v13  ;;  %v663_v33 = vadd.f32 %v662_v12, %v1646_v11 }
 0x115   : > { %v735_v22 = vadd.f32 %v734_v36, %v704_v39  ;;  %v664_v41 = vadd.f32 %v663_v33, %v1651_v30 }
 0x117   : > { %v665_v27 = vrot.slane %v664_v41, 4  ;;  %v736_v29 = vadd.f32 %v735_v22, %v705_v23  ;;  %v766_v23 = vld [vmem:[%s1800_s3] sm:$0x1] }
 0x119   : > { %v666_v34 = vadd.f32 %v665_v27, %v664_v41  ;;  %v737_v37 = vrot.slane %v736_v29, 4 }
 0x11b   : > { %v667_v42 = vrot.slane %v666_v34, 2  ;;  %v738_v46 = vadd.f32 %v737_v37, %v736_v29  ;;  %v768_v37 = vld [vmem:[%s1801_s4] sm:$0x1] }
 0x11d   : > { %v668_v44 = vadd.f32 %v667_v42, %v666_v34  ;;  %v739_v45 = vrot.slane %v738_v46, 2 }
 0x11f   : > { %v669_v48 = vrot.slane %v668_v44, 1  ;;  %v740_v51 = vadd.f32 %v739_v45, %v738_v46 }
 0x121   : > { %v670_v55 = vadd.f32 %v669_v48, %v668_v44  ;;  %v741_v3 = vrot.slane %v740_v51, 1 }
 0x123   : > { %v671_v59 = vadd.f32 %v670_v55, %v633_v53  ;;  %v742_v60 = vadd.f32 %v741_v3, %v740_v51 }
 0x125   : > { %672 = vst [vmem:[#allocation3] sm:$0x1] %v671_v59  ;;  %v743_v0 = vadd.f32 %v742_v60, %v673_v62 }
 0x127   : > { %744 = vst [vmem:[#allocation4] sm:$0x1] %v743_v0 }
 0x12c   : > { %v748_v32 = vld [vmem:[#allocation3] sm:$0x1] }
 0x12d   : > { %v749_v4 = vmul.f32 0.00390625, %v748_v32 }
 0x12e   : > { %v750_v28 = vld [vmem:[#allocation4] sm:$0x1] }
 0x12f   : > { %v751_v5 = vmul.f32 0.00390625, %v750_v28  ;;  %v752_v8 = vmul.f32 %v749_v4, %v749_v4 }
 0x131   : > { %v753_v9 = vsub.f32 %v751_v5, %v752_v8 }
 0x133   : > { %v754_v12 = vmax.f32 %v753_v9, 0.0 }
 0x135   : > { %v755_v13 = vadd.f32 1e-05, %v754_v12 }
 0x137   : > { %1288 = vrsqrt.f32 %v755_v13  ;;  %vm762_vm3 = vweird.f32 %v755_v13 }
 0x13d   : > { %v1289_v14 = vpop.eup %1288 }
 0x13e   : > { %v757_v36 = vmul.f32 %v1289_v14, %v755_v13  ;;  %vm763_vm2 = vweird.f32 %v1289_v14 }
 0x13f   : > { %vm764_vm4 = vmor %vm762_vm3, %vm763_vm2 }
 0x140   : > { %v758_v33 = vmul.f32 %v1289_v14, %v757_v36 }
 0x142   : > { %v759_v39 = vmul.f32 0.5, %v758_v33 }
 0x144   : > { %v760_v22 = vsub.f32 1.5, %v759_v39 }
 0x146   : > { %v761_v41 = vmul.f32 %v1289_v14, %v760_v22 }
 0x148   : > { %v765_v27 = vsel %vm764_vm4, %v1289_v14, %v761_v41 }
 0x149   : > { %v767_v29 = vmul.f32 %v766_v23, %v765_v27 }
 0x14b   : > { %v769_v34 = vmul.f32 %v767_v29, %v749_v4  ;;  %v1665_v42 = vperm.slane %v767_v29, 0 }
 0x14d   : > { %v770_v46 = vsub.f32 %v768_v37, %v769_v34  ;;  %v806_v44 = vmul.f32 %v1665_v42, %v1455_v49  ;;  %v807_v45 = vmul.f32 %v1665_v42, %v1452_v47  ;;  %v808_v48 = vmul.f32 %v1665_v42, %v1457_v50 }
 0x14e   : > { %v809_v51 = vmul.f32 %v1665_v42, %v1462_v54  ;;  %v810_v53 = vmul.f32 %v1665_v42, %v1473_v61  ;;  %v811_v55 = vmul.f32 %v1665_v42, %v1479_v2  ;;  %v812_v49 = vmul.f32 %v1665_v42, %v1486_v7 }
 0x14f   : > { %v1679_v3 = vperm.slane %v770_v46, 0  ;;  %v813_v47 = vmul.f32 %v1665_v42, %v1503_v24  ;;  %v814_v50 = vmul.f32 %v1665_v42, %v1500_v21  ;;  %v815_v54 = vmul.f32 %v1665_v42, %v1506_v26 }
 0x150   : > { %v816_v61 = vmul.f32 %v1665_v42, %v1511_v31  ;;  %v817_v2 = vmul.f32 %v1665_v42, %v1517_v35  ;;  %v818_v62 = vmul.f32 %v1665_v42, %v1525_v56  ;;  %v819_v7 = vmul.f32 %v1665_v42, %v1533_v52 }
 0x151   : > { %v820_v24 = vmul.f32 %v1665_v42, %v1541_v6  ;;  %v821_v21 = vmul.f32 %v1665_v42, %v1549_v15  ;;  %v822_v26 = vmul.f32 %v1665_v42, %v1553_v16  ;;  %v823_v31 = vmul.f32 %v1665_v42, %v1558_v19 }
 0x152   : > { %v824_v35 = vmul.f32 %v1665_v42, %v1565_v38  ;;  %v825_v56 = vmul.f32 %v1665_v42, %v1572_v43  ;;  %v841_v52 = vadd.f32 %v1679_v3, %v806_v44  ;;  %v842_v6 = vadd.f32 %v1679_v3, %v807_v45 }
 0x153   : > { %v843_v59 = vadd.f32 %v1679_v3, %v808_v48  ;;  %v844_v15 = vadd.f32 %v1679_v3, %v809_v51  ;;  %v845_v16 = vadd.f32 %v1679_v3, %v810_v53  ;;  %v846_v60 = vadd.f32 %v1679_v3, %v811_v55 }
 0x154   : > { %v826_v19 = vmul.f32 %v1665_v42, %v1580_v40  ;;  %v827_v38 = vmul.f32 %v1665_v42, %v1586_v63  ;;  %v847_v43 = vadd.f32 %v1679_v3, %v812_v49  ;;  %v848_v0 = vadd.f32 %v1679_v3, %v813_v47 }
 0x155   : > { %v828_v32 = vmul.f32 %v1665_v42, %v1595_v10  ;;  %v829_v4 = vmul.f32 %v1665_v42, %v1602_v17  ;;  %v849_v28 = vadd.f32 %v1679_v3, %v814_v50  ;;  %v850_v5 = vadd.f32 %v1679_v3, %v815_v54 }
 0x156   : > { %v830_v40 = vmul.f32 %v1665_v42, %v1606_v18  ;;  %v851_v63 = vadd.f32 %v1679_v3, %v816_v61  ;;  %v852_v10 = vadd.f32 %v1679_v3, %v817_v2  ;;  %v853_v17 = vadd.f32 %v1679_v3, %v818_v62 }
 0x157   : > { %v854_v8 = vadd.f32 %v1679_v3, %v819_v7  ;;  %v1149_v9 = vpack.c.bf16 %v842_v6, %v841_v52  ;;  %v1154_v12 = vpack.c.bf16 %v844_v15, %v843_v59  ;;  %v1159_v13 = vpack.c.bf16 %v846_v60, %v845_v16 }
 0x158   : > { %v831_v14 = vmul.f32 %v1665_v42, %v1613_v25  ;;  %v855_v36 = vadd.f32 %v1679_v3, %v820_v24  ;;  %v856_v18 = vadd.f32 %v1679_v3, %v821_v21  ;;  %v1164_v33 = vpack.c.bf16 %v848_v0, %v847_v43 }
 0x159   : > { %v832_v39 = vmul.f32 %v1665_v42, %v1618_v58  ;;  %v857_v22 = vadd.f32 %v1679_v3, %v822_v26  ;;  %v858_v41 = vadd.f32 %v1679_v3, %v823_v31  ;;  %1150 = vst [vmem:[%s1732_s29] sm:$0xff] %v1149_v9   ;;  %v1169_v23 = vpack.c.bf16 %v850_v5, %v849_v28 }
 0x15a   : > { %v833_v27 = vmul.f32 %v1665_v42, %v1625_v20  ;;  %v859_v25 = vadd.f32 %v1679_v3, %v824_v35  ;;  %v860_v29 = vadd.f32 %v1679_v3, %v825_v56  ;;  %1226 = vst [vmem:[%s1732_s29 + $0x8] sm:$0xff] %v1154_v12   ;;  %v1174_v34 = vpack.c.bf16 %v852_v10, %v851_v63 }
 0x15b   : > { %v834_v58 = vmul.f32 %v1665_v42, %v1633_v57  ;;  %v861_v37 = vadd.f32 %v1679_v3, %v826_v19  ;;  %v862_v46 = vadd.f32 %v1679_v3, %v827_v38  ;;  %1227 = vst [vmem:[%s1732_s29 + $0x10] sm:$0xff] %v1159_v13   ;;  %v1179_v44 = vpack.c.bf16 %v854_v8, %v853_v17 }
 0x15c   : > { %v835_v20 = vmul.f32 %v1665_v42, %v1639_v1  ;;  %v863_v45 = vadd.f32 %v1679_v3, %v828_v32  ;;  %v864_v48 = vadd.f32 %v1679_v3, %v829_v4  ;;  %1228 = vst [vmem:[%s1732_s29 + $0x18] sm:$0xff] %v1164_v33   ;;  %v1184_v51 = vpack.c.bf16 %v856_v18, %v855_v36 }
 0x15d   : > { %v836_v57 = vmul.f32 %v1665_v42, %v1646_v11  ;;  %v865_v53 = vadd.f32 %v1679_v3, %v830_v40  ;;  %v866_v55 = vadd.f32 %v1679_v3, %v831_v14  ;;  %1229 = vst [vmem:[%s1732_s29 + $0x20] sm:$0xff] %v1169_v23   ;;  %v1189_v49 = vpack.c.bf16 %v858_v41, %v857_v22 }
 0x15e   : > { %v837_v1 = vmul.f32 %v1665_v42, %v1651_v30  ;;  %v867_v47 = vadd.f32 %v1679_v3, %v832_v39  ;;  %v868_v50 = vadd.f32 %v1679_v3, %v833_v27  ;;  %1230 = vst [vmem:[%s1732_s29 + $0x28] sm:$0xff] %v1174_v34   ;;  %v1194_v11 = vpack.c.bf16 %v860_v29, %v859_v25 }
 0x15f   : > { %v869_v54 = vadd.f32 %v1679_v3, %v834_v58  ;;  %v870_v61 = vadd.f32 %v1679_v3, %v835_v20  ;;  %1231 = vst [vmem:[%s1732_s29 + $0x30] sm:$0xff] %v1179_v44   ;;  %v1199_v2 = vpack.c.bf16 %v862_v46, %v861_v37  ;;  %v871_v30 = vadd.f32 %v1679_v3, %v836_v57 }
 0x160   : > { %v872_v42 = vadd.f32 %v1679_v3, %v837_v1  ;;  %1232 = vst [vmem:[%s1732_s29 + $0x38] sm:$0xff] %v1184_v51   ;;  %v1204_v62 = vpack.c.bf16 %v864_v48, %v863_v45  ;;  %v1209_v7 = vpack.c.bf16 %v866_v55, %v865_v53  ;;  %v1214_v24 = vpack.c.bf16 %v868_v50, %v867_v47 }
 0x161   : > { %1233 = vst [vmem:[%s1732_s29 + $0x40] sm:$0xff] %v1189_v49   ;;  %v1219_v21 = vpack.c.bf16 %v870_v61, %v869_v54 }
 0x162   : > { %1234 = vst [vmem:[%s1732_s29 + $0x48] sm:$0xff] %v1194_v11   ;;  %v1224_v26 = vpack.c.bf16 %v872_v42, %v871_v30 }
 0x163   : > { %1235 = vst [vmem:[%s1732_s29 + $0x50] sm:$0xff] %v1199_v2  }
 0x164   : > { %1236 = vst [vmem:[%s1732_s29 + $0x58] sm:$0xff] %v1204_v62  }
 0x165   : > { %1237 = vst [vmem:[%s1732_s29 + $0x60] sm:$0xff] %v1209_v7  }
 0x166   : > { %1238 = vst [vmem:[%s1732_s29 + $0x68] sm:$0xff] %v1214_v24  }
 0x167   : > { %1239 = vst [vmem:[%s1732_s29 + $0x70] sm:$0xff] %v1219_v21  }
 0x168   : > { %1240 = vst [vmem:[%s1732_s29 + $0x78] sm:$0xff] %v1224_v26  }
 0x169 PF: > { %s15_s20 = sadd.s32 1, %s1312_s20   ;;  %s1803_s18 = smov %s1308_s19 }
 0x16a   : > { %p12_p5 = scmp.ge.s32.totalorder %s15_s20, 4   ;;  %s1804_s19 = smov %s1806_s21 }
 0x16c   :  { %14 = sbr.rel (!%p12_p5) target bundleno = 2 (0x2), region = 79 }

// kernel: siamese_forward.6
= control target key start
LH: loop header
LB: loop body
LE: loop exit
PB: predicated region body
PF: predicated region fallthrough
CT: control target
= control target key end

     0   :  { %s1659_s18 = smov 0   ;;  %s1661_s19 = smov 0   ;;  %s2207_s0 = inlined_call_operand.vmem [shape: bf16[512,216], index: 0, kind: input, shape index: {}]   ;;  %s2208_s1 = inlined_call_operand.vmem [shape: bf16[216,128], index: 1, kind: input, shape index: {}]   ;;  %s2209_s2 = inlined_call_operand.vmem [shape: f32[1,128], index: 2, kind: input, shape index: {}]   ;;  %s2210_s3 = inlined_call_operand.vmem [shape: f32[1,128], index: 3, kind: input, shape index: {}]   ;;  %s2211_s4 = inlined_call_operand.vmem [shape: f32[1,128], index: 4, kind: input, shape index: {}]   ;;  %s2212_s5 = inlined_call_operand.vmem [shape: bf16[512,128], index: 5, kind: output, shape index: {}]  }
   0x1   :  { %s1663_s20 = smov 0  }
   0x2 LB: > { %s27_s21 = sadd.s32 1, %s1622_s19  ;;  %p1217_p0 = scmp.ge.s32.totalorder %s1626_s20, 1  ;;  %s1626_s20 = sphi %s1663_s20, %s15_s20   ;;  %s1622_s19 = sphi %s1661_s19, %s2214_s19   ;;  %s1618_s18 = sphi %s1659_s18, %s2213_s18  }
   0x3   : > { %p29_p1 = scmp.ge.s32.totalorder %s27_s21, 2  ;;  %p205_p2 = scmp.lt.s32.totalorder %s1626_s20, 3 }
   0x5   : > { %s2216_s21 = smov (%p29_p1, %s27_s21), 0  ;;  %p206_p3 = pnand %p1217_p0, %p205_p2 }
   0x6   : > { %s1218_s28 = sshll.u32 (!%p206_p3), %s1618_s18, 5 }
   0x7   : > { %209 = sbr.rel (%p206_p3) target bundleno = 419 (0x1a3), region = 40  ;;  %p237_p4 = scmp.lt.s32.totalorder (!%p206_p3), %s1218_s28, 63 }
   0xc   : > { %v1461_v0 = vld [vmem:[%s2208_s1 + $0x38] sm:$0xff]  ;;  %v315_v1 = vld [vmem:[%s2208_s1 + $0x68] sm:$0xf]  ;;  %vm594_vm0 = vcmask 1043456   ;;  %v1460_v3 = vld [vmem:[%s2208_s1 + $0x30] sm:$0xff]  ;;  %s2218_s28 = smov (!%p237_p4, %s1218_s28), 63 }
   0xd   : > { %v517_v2 = vunpack.c.l.b16 %v315_v1  ;;  %598 = vmatpush.bf16.msra.mxu0 %v1461_v0  ;;  %1562 = vmatpush.bf16.msra.mxu2 %v1461_v0  ;;  %v1466_v6 = vld [vmem:[%s2208_s1 + $0x60] sm:$0xff]  ;;  %v1459_v7 = vld [vmem:[%s2208_s1 + $0x28] sm:$0xff]  ;;  %v1465_v8 = vld [vmem:[%s2208_s1 + $0x58] sm:$0xff]  ;;  %s1421_s16 = sshll.u32 %s2218_s28, 3  ;;  %vm545_vm1 = vcmask 719872   ;;  %s1222_s15 = sshll.u32 %s2218_s28, 2 }
   0xe   : > { %v1458_v9 = vld [vmem:[%s2208_s1 + $0x20] sm:$0xff]  ;;  %v1464_v10 = vld [vmem:[%s2208_s1 + $0x50] sm:$0xff]  ;;  %v1457_v11 = vld [vmem:[%s2208_s1 + $0x18] sm:$0xff]  ;;  %s1719_s26 = scalar_lea.vmem %s2207_s0, %s1421_s16  ;;  %s2142_s17 = scalar_lea.vmem %s2212_s5, %s1222_s15 }
   0xf   : > { %v531_v4 = vpack.c.b16 %v517_v2, %v517_v2  ;;  %v1463_v12 = vld [vmem:[%s2208_s1 + $0x48] sm:$0xff]  ;;  %v1456_v13 = vld [vmem:[%s2208_s1 + $0x10] sm:$0xff]  ;;  %v1462_v14 = vld [vmem:[%s2208_s1 + $0x40] sm:$0xff] }
  0x10   : > { %v1455_v15 = vld [vmem:[%s2208_s1 + $0x8] sm:$0xff]  ;;  %v1422_v16 = vld [vmem:[%s1719_s26 + $0x4] sm:$0xf]  ;;  %v1225_v20 = vld [vmem:[%s1719_s26] sm:$0xf] }
  0x11   : > { %v596_v5 = vsel %vm594_vm0, %v531_v4, 0  ;;  %599 = vmatpush.bf16.msra.mxu0 %v1460_v3  ;;  %1563 = vmatpush.bf16.msra.mxu2 %v1460_v3  ;;  %v1227_v17 = vld [vmem:[%s1719_s26 + $0x8] sm:$0xf0]  ;;  %v1454_v19 = vld [vmem:[%s2208_s1] sm:$0xff]  ;;  %v1423_v21 = vld [vmem:[%s1719_s26 + $0x4] sm:$0xf0] }
  0x12   : > { %689 = vmatpush.bf16.msra.mxu1 %v596_v5  ;;  %1570 = vmatpush.bf16.msra.mxu3 %v596_v5  ;;  %v1230_v18 = vor.u32 %v1422_v16, %v1227_v17  ;;  %v1289_v22 = vld [vmem:[%s1719_s26 + $0x80] sm:$0xf]  ;;  %v1439_v23 = vld [vmem:[%s1719_s26 + $0x84] sm:$0xf0]  ;;  %v1226_v24 = vor.u32 %v1423_v21, %v1225_v20  ;;  %v1440_v26 = vld [vmem:[%s1719_s26 + $0x94] sm:$0xf] }
  0x13   : > { %v1290_v25 = vor.u32 %v1439_v23, %v1289_v22  ;;  %v1299_v27 = vld [vmem:[%s1719_s26 + $0x98] sm:$0xf0]  ;;  %v1424_v29 = vld [vmem:[%s1719_s26 + $0x14] sm:$0xf]  ;;  %v1233_v32 = vld [vmem:[%s1719_s26 + $0x10] sm:$0xf] }
  0x14   : > { %v1302_v28 = vor.u32 %v1440_v26, %v1299_v27  ;;  %v1235_v30 = vld [vmem:[%s1719_s26 + $0x18] sm:$0xf0]  ;;  %v1425_v33 = vld [vmem:[%s1719_s26 + $0x14] sm:$0xf0]  ;;  %v1297_v34 = vld [vmem:[%s1719_s26 + $0x90] sm:$0xf] }
  0x15   : > { %600 = vmatpush.bf16.msra.mxu0 %v1459_v7  ;;  %1564 = vmatpush.bf16.msra.mxu2 %v1459_v7  ;;  %v1238_v31 = vor.u32 %v1424_v29, %v1235_v30  ;;  %v1441_v35 = vld [vmem:[%s1719_s26 + $0x94] sm:$0xf0]  ;;  %v1234_v36 = vor.u32 %v1425_v33, %v1233_v32  ;;  %v1442_v38 = vld [vmem:[%s1719_s26 + $0xa4] sm:$0xf]  ;;  %v1307_v39 = vld [vmem:[%s1719_s26 + $0xa8] sm:$0xf0] }
  0x16   : > { %690 = vmatpush.bf16.msra.mxu1 %v1466_v6  ;;  %1571 = vmatpush.bf16.msra.mxu3 %v1466_v6  ;;  %v1298_v37 = vor.u32 %v1441_v35, %v1297_v34  ;;  %v1310_v40 = vor.u32 %v1442_v38, %v1307_v39  ;;  %v1426_v41 = vld [vmem:[%s1719_s26 + $0x24] sm:$0xf]  ;;  %v1243_v42 = vld [vmem:[%s1719_s26 + $0x28] sm:$0xf0]  ;;  %v1241_v44 = vld [vmem:[%s1719_s26 + $0x20] sm:$0xf] }
  0x17   : > { %v1246_v43 = vor.u32 %v1426_v41, %v1243_v42  ;;  %v1427_v45 = vld [vmem:[%s1719_s26 + $0x24] sm:$0xf0]  ;;  %v1305_v46 = vld [vmem:[%s1719_s26 + $0xa0] sm:$0xf]  ;;  %v1444_v50 = vld [vmem:[%s1719_s26 + $0xb4] sm:$0xf] }
  0x18   : > { %v1443_v47 = vld [vmem:[%s1719_s26 + $0xa4] sm:$0xf0]  ;;  %v1242_v48 = vor.u32 %v1427_v45, %v1241_v44  ;;  %v1315_v51 = vld [vmem:[%s1719_s26 + $0xb8] sm:$0xf0]  ;;  %v1428_v53 = vld [vmem:[%s1719_s26 + $0x34] sm:$0xf] }
  0x19   : > { %601 = vmatpush.bf16.msra.mxu0 %v1458_v9  ;;  %1565 = vmatpush.bf16.msra.mxu2 %v1458_v9  ;;  %v1306_v49 = vor.u32 %v1443_v47, %v1305_v46  ;;  %v1318_v52 = vor.u32 %v1444_v50, %v1315_v51  ;;  %v1251_v54 = vld [vmem:[%s1719_s26 + $0x38] sm:$0xf0]  ;;  %v1249_v56 = vld [vmem:[%s1719_s26 + $0x30] sm:$0xf]  ;;  %v1429_v57 = vld [vmem:[%s1719_s26 + $0x34] sm:$0xf0] }
  0x1a   : > { %691 = vmatpush.bf16.msra.mxu1 %v1465_v8  ;;  %1572 = vmatpush.bf16.msra.mxu3 %v1465_v8  ;;  %v1254_v55 = vor.u32 %v1428_v53, %v1251_v54  ;;  %v1313_v58 = vld [vmem:[%s1719_s26 + $0xb0] sm:$0xf]  ;;  %v1445_v59 = vld [vmem:[%s1719_s26 + $0xb4] sm:$0xf0]  ;;  %v1250_v60 = vor.u32 %v1429_v57, %v1249_v56  ;;  %v1446_v62 = vld [vmem:[%s1719_s26 + $0xc4] sm:$0xf] }
  0x1b   : > { %v1314_v61 = vor.u32 %v1445_v59, %v1313_v58  ;;  %v1323_v63 = vld [vmem:[%s1719_s26 + $0xc8] sm:$0xf0]  ;;  %v1430_v1 = vld [vmem:[%s1719_s26 + $0x44] sm:$0xf]  ;;  %v1257_v4 = vld [vmem:[%s1719_s26 + $0x40] sm:$0xf] }
  0x1c   : > { %v1326_v0 = vor.u32 %v1446_v62, %v1323_v63  ;;  %v1259_v2 = vld [vmem:[%s1719_s26 + $0x48] sm:$0xf0]  ;;  %v1431_v5 = vld [vmem:[%s1719_s26 + $0x44] sm:$0xf0]  ;;  %v1321_v6 = vld [vmem:[%s1719_s26 + $0xc0] sm:$0xf] }
  0x1d   : > { %602 = vmatpush.bf16.msra.mxu0 %v1457_v11  ;;  %1566 = vmatpush.bf16.msra.mxu2 %v1457_v11  ;;  %v1262_v3 = vor.u32 %v1430_v1, %v1259_v2  ;;  %v1447_v7 = vld [vmem:[%s1719_s26 + $0xc4] sm:$0xf0]  ;;  %v1258_v8 = vor.u32 %v1431_v5, %v1257_v4  ;;  %v1331_v11 = vld [vmem:[%s1719_s26 + $0xd8] sm:$0xf0]  ;;  %v1265_v16 = vld [vmem:[%s1719_s26 + $0x50] sm:$0xf] }
  0x1e   : > { %692 = vmatpush.bf16.msra.mxu1 %v1464_v10  ;;  %1573 = vmatpush.bf16.msra.mxu3 %v1464_v10  ;;  %v1322_v9 = vor.u32 %v1447_v7, %v1321_v6  ;;  %v1448_v10 = vld [vmem:[%s1719_s26 + $0xd4] sm:$0xf]  ;;  %v1433_v17 = vld [vmem:[%s1719_s26 + $0x54] sm:$0xf0]  ;;  %v1434_v22 = vld [vmem:[%s1719_s26 + $0x64] sm:$0xf] }
  0x1f   : > { %v1266_v20 = vor.u32 %v1433_v17, %v1265_v16  ;;  %v1275_v23 = vld [vmem:[%s1719_s26 + $0x68] sm:$0xf0]  ;;  %v1435_v29 = vld [vmem:[%s1719_s26 + $0x64] sm:$0xf0]  ;;  %v1337_v30 = vld [vmem:[%s1719_s26 + $0xe0] sm:$0xf] }
  0x20   : > { %v1278_v26 = vor.u32 %v1434_v22, %v1275_v23  ;;  %v1436_v34 = vld [vmem:[%s1719_s26 + $0x74] sm:$0xf]  ;;  %v1283_v35 = vld [vmem:[%s1719_s26 + $0x78] sm:$0xf0]  ;;  %v1437_v41 = vld [vmem:[%s1719_s26 + $0x74] sm:$0xf0] }
  0x21   : > { %603 = vmatpush.bf16.msra.mxu0 %v1456_v13  ;;  %1567 = vmatpush.bf16.msra.mxu2 %v1456_v13  ;;  %v1432_v13 = vld [vmem:[%s1719_s26 + $0x54] sm:$0xf]  ;;  %v1286_v38 = vor.u32 %v1436_v34, %v1283_v35  ;;  %v1345_v42 = vld [vmem:[%s1719_s26 + $0xf0] sm:$0xf]  ;;  %v1438_v46 = vld [vmem:[%s1719_s26 + $0x84] sm:$0xf] }
  0x22   : > { %693 = vmatpush.bf16.msra.mxu1 %v1463_v12  ;;  %1574 = vmatpush.bf16.msra.mxu3 %v1463_v12  ;;  %v1334_v12 = vor.u32 %v1448_v10, %v1331_v11  ;;  %v1291_v47 = vld [vmem:[%s1719_s26 + $0x88] sm:$0xf0]  ;;  %v1812_v50 = vld [vmem:[%s2209_s2] ss:$0 sm:$0xff] }
  0x25   : > { %604 = vmatpush.bf16.msra.mxu0 %v1455_v15  ;;  %1568 = vmatpush.bf16.msra.mxu2 %v1455_v15 }
  0x26   : > { %694 = vmatpush.bf16.msra.mxu1 %v1462_v14  ;;  %1575 = vmatpush.bf16.msra.mxu3 %v1462_v14  ;;  %v1267_v14 = vld [vmem:[%s1719_s26 + $0x58] sm:$0xf0] }
  0x27   : > { %v1270_v15 = vor.u32 %v1432_v13, %v1267_v14 }
  0x29   : > { %1403 = vmatmul.msk.bf16.vlgmr.msra.gmra.mxu1 %vm545_vm1, %v1230_v18  ;;  %605 = vmatpush.bf16.msra.mxu0 %v1454_v19  ;;  %v1329_v18 = vld [vmem:[%s1719_s26 + $0xd0] sm:$0xf] }
  0x2a   : > { %1569 = vmatpush.bf16.msra.mxu2 %v1454_v19  ;;  %1412 = vmatmul.msk.bf16.vlgmr.msra.gmra.mxu3 %vm545_vm1, %v1302_v28  ;;  %v1449_v19 = vld [vmem:[%s1719_s26 + $0xd4] sm:$0xf0]  ;;  %v1273_v28 = vld [vmem:[%s1719_s26 + $0x60] sm:$0xf] }
  0x2b   : > { %v1330_v21 = vor.u32 %v1449_v19, %v1329_v18  ;;  %v1274_v32 = vor.u32 %v1435_v29, %v1273_v28 }
  0x2c   : > { %606 = vmatmul.bf16.vlgmr.msra.gmra.mxu0 %v1226_v24  ;;  %v1450_v24 = vld [vmem:[%s1719_s26 + $0xe4] sm:$0xf] }
  0x2d   : > { %646 = vmatmul.bf16.vlgmr.msra.gmra.mxu2 %v1290_v25  ;;  %v1339_v25 = vld [vmem:[%s1719_s26 + $0xe8] sm:$0xf0] }
  0x2e   : > { %v1342_v27 = vor.u32 %v1450_v24, %v1339_v25 }
  0x39   : > { %1404 = vmatmul.msk.bf16.gmra.mxu1 %vm545_vm1, %v1238_v31  ;;  %v1451_v31 = vld [vmem:[%s1719_s26 + $0xe4] sm:$0xf0] }
  0x3a   : > { %1413 = vmatmul.msk.bf16.gmra.mxu3 %vm545_vm1, %v1310_v40  ;;  %v1338_v33 = vor.u32 %v1451_v31, %v1337_v30  ;;  %v1281_v40 = vld [vmem:[%s1719_s26 + $0x70] sm:$0xf] }
  0x3b   : > { %v1282_v44 = vor.u32 %v1437_v41, %v1281_v40 }
  0x3c   : > { %611 = vmatmul.bf16.gmra.mxu0 %v1234_v36  ;;  %v1452_v36 = vld [vmem:[%s1719_s26 + $0xf4] sm:$0xf] }
  0x3d   : > { %651 = vmatmul.bf16.gmra.mxu2 %v1298_v37  ;;  %v1347_v37 = vld [vmem:[%s1719_s26 + $0xf8] sm:$0xf0] }
  0x3e   : > { %v1350_v39 = vor.u32 %v1452_v36, %v1347_v37 }
  0x49   : > { %1405 = vmatmul.msk.bf16.gmra.mxu1 %vm545_vm1, %v1246_v43  ;;  %v1453_v43 = vld [vmem:[%s1719_s26 + $0xf4] sm:$0xf0] }
  0x4a   : > { %1414 = vmatmul.msk.bf16.gmra.mxu3 %vm545_vm1, %v1318_v52  ;;  %v1346_v45 = vor.u32 %v1453_v43, %v1345_v42 }
  0x4c   : > { %616 = vmatmul.bf16.gmra.mxu0 %v1242_v48  ;;  %v1294_v48 = vor.u32 %v1438_v46, %v1291_v47 }
  0x4d   : > { %656 = vmatmul.bf16.gmra.mxu2 %v1306_v49 }
  0x59   : > { %1406 = vmatmul.msk.bf16.gmra.mxu1 %vm545_vm1, %v1254_v55 }
  0x5a   : > { %1415 = vmatmul.msk.bf16.gmra.mxu3 %vm545_vm1, %v1326_v0 }
  0x5c   : > { %621 = vmatmul.bf16.gmra.mxu0 %v1250_v60 }
  0x5d   : > { %661 = vmatmul.bf16.gmra.mxu2 %v1314_v61 }
  0x69   : > { %1407 = vmatmul.msk.bf16.gmra.mxu1 %vm545_vm1, %v1262_v3 }
  0x6a   : > { %1416 = vmatmul.msk.bf16.gmra.mxu3 %vm545_vm1, %v1334_v12 }
  0x6c   : > { %626 = vmatmul.bf16.gmra.mxu0 %v1258_v8 }
  0x6d   : > { %666 = vmatmul.bf16.gmra.mxu2 %v1322_v9 }
  0x79   : > { %1408 = vmatmul.msk.bf16.gmra.mxu1 %vm545_vm1, %v1270_v15 }
  0x7a   : > { %1417 = vmatmul.msk.bf16.gmra.mxu3 %vm545_vm1, %v1342_v27 }
  0x7c   : > { %631 = vmatmul.bf16.gmra.mxu0 %v1266_v20 }
  0x7d   : > { %671 = vmatmul.bf16.gmra.mxu2 %v1330_v21 }
  0x89   : > { %1409 = vmatmul.msk.bf16.gmra.mxu1 %vm545_vm1, %v1278_v26 }
  0x8a   : > { %1418 = vmatmul.msk.bf16.gmra.mxu3 %vm545_vm1, %v1350_v39 }
  0x8c   : > { %636 = vmatmul.bf16.gmra.mxu0 %v1274_v32 }
  0x8d   : > { %676 = vmatmul.bf16.gmra.mxu2 %v1338_v33 }
  0x99   : > { %1410 = vmatmul.msk.bf16.gmra.mxu1 %vm545_vm1, %v1286_v38 }
  0x9c   : > { %641 = vmatmul.bf16.gmra.mxu0 %v1282_v44 }
  0x9d   : > { %681 = vmatmul.bf16.gmra.mxu2 %v1346_v45 }
  0xa6   : > { %v696_v49 = vpop.f32.mrf.mxu1 }
  0xa9   : > { %1411 = vmatmul.msk.bf16.gmra.mxu1 %vm545_vm1, %v1294_v48  ;;  %v607_v51 = vpop.f32.mrf.mxu0 }
  0xaa   : > { %v608_v52 = vadd.f32 %v1812_v50, %v607_v51 }
  0xac   : > { %v697_v53 = vadd.f32 %v696_v49, %v608_v52 }
  0xad   : > { %v741_v1 = vpop.f32.mrf.mxu3 }
  0xae   : > { %v698_v54 = vpop.f32.mrf.mxu1  ;;  %v1856_v48 = vmax.f32 %v697_v53, 0.0 }
  0xb0   : > { %v1816_v55 = vpop.f32.mrf.mxu2 }
  0xb1   : > { %v609_v56 = vpop.f32.mrf.mxu0 }
  0xb2   : > { %v610_v57 = vadd.f32 %v1812_v50, %v609_v56 }
  0xb4   : > { %v699_v58 = vadd.f32 %v698_v54, %v610_v57 }
  0xb5   : > { %v743_v10 = vpop.f32.mrf.mxu3 }
  0xb6   : > { %v701_v59 = vpop.f32.mrf.mxu1  ;;  %v1853_v45 = vmax.f32 %v699_v58, 0.0 }
  0xb8   : > { %v1819_v60 = vpop.f32.mrf.mxu2  ;;  %v884_v52 = vmul.f32 %v1853_v45, %v1853_v45 }
  0xb9   : > { %v612_v61 = vpop.f32.mrf.mxu0 }
  0xba   : > { %v613_v62 = vadd.f32 %v1812_v50, %v612_v61  ;;  %v883_v61 = vmul.f32 %v1856_v48, %v1856_v48 }
  0xbc   : > { %v702_v63 = vadd.f32 %v701_v59, %v613_v62 }
  0xbd   : > { %v746_v20 = vpop.f32.mrf.mxu3 }
  0xbe   : > { %v703_v0 = vpop.f32.mrf.mxu1  ;;  %v1858_v49 = vmax.f32 %v702_v63, 0.0 }
  0xc0   : > { %v652_v2 = vpop.f32.mrf.mxu2  ;;  %v885_v53 = vmul.f32 %v1858_v49, %v1858_v49 }
  0xc1   : > { %v614_v3 = vpop.f32.mrf.mxu0  ;;  %v653_v4 = vadd.f32 %v1812_v50, %v652_v2  ;;  %v915_v2 = vadd.f32 %v884_v52, %v883_v61 }
  0xc2   : > { %v615_v5 = vadd.f32 %v1812_v50, %v614_v3 }
  0xc3   : > { %v1824_v6 = vadd.f32 %v741_v1, %v653_v4  ;;  %v843_v1 = vadd.f32 %v1853_v45, %v1856_v48 }
  0xc4   : > { %v704_v7 = vadd.f32 %v703_v0, %v615_v5 }
  0xc5   : > { %v1835_v26 = vpop.f32.mrf.mxu3 }
  0xc6   : > { %v706_v8 = vpop.f32.mrf.mxu1  ;;  %v1863_v54 = vmax.f32 %v704_v7, 0.0 }
  0xc8   : > { %v654_v9 = vpop.f32.mrf.mxu2  ;;  %v886_v3 = vmul.f32 %v1863_v54, %v1863_v54 }
  0xc9   : > { %v617_v11 = vpop.f32.mrf.mxu0  ;;  %v655_v12 = vadd.f32 %v1812_v50, %v654_v9 }
  0xca   : > { %v618_v13 = vadd.f32 %v1812_v50, %v617_v11  ;;  %v916_v11 = vadd.f32 %v915_v2, %v885_v53 }
  0xcb   : > { %v1828_v14 = vadd.f32 %v743_v10, %v655_v12  ;;  %v844_v10 = vadd.f32 %v843_v1, %v1858_v49 }
  0xcc   : > { %v707_v15 = vadd.f32 %v706_v8, %v618_v13 }
  0xcd   : > { %v1839_v31 = vpop.f32.mrf.mxu3 }
  0xce   : > { %v708_v16 = vpop.f32.mrf.mxu1  ;;  %v1872_v62 = vmax.f32 %v707_v15, 0.0 }
  0xd0   : > { %v657_v17 = vpop.f32.mrf.mxu2  ;;  %v887_v12 = vmul.f32 %v1872_v62, %v1872_v62 }
  0xd1   : > { %v619_v18 = vpop.f32.mrf.mxu0  ;;  %v658_v19 = vadd.f32 %v1812_v50, %v657_v17  ;;  %v845_v17 = vadd.f32 %v844_v10, %v1863_v54 }
  0xd2   : > { %v620_v46 = vadd.f32 %v1812_v50, %v619_v18  ;;  %v917_v18 = vadd.f32 %v916_v11, %v886_v3 }
  0xd3   : > { %v1831_v21 = vadd.f32 %v746_v20, %v658_v19 }
  0xd4   : > { %v709_v56 = vadd.f32 %v708_v16, %v620_v46 }
  0xd5   : > { %v1843_v35 = vpop.f32.mrf.mxu3 }
  0xd6   : > { %v711_v22 = vpop.f32.mrf.mxu1  ;;  %v1879_v4 = vmax.f32 %v709_v56, 0.0 }
  0xd8   : > { %v1833_v24 = vpop.f32.mrf.mxu2  ;;  %v888_v19 = vmul.f32 %v1879_v4, %v1879_v4 }
  0xd9   : > { %v622_v23 = vpop.f32.mrf.mxu0 }
  0xda   : > { %v623_v51 = vadd.f32 %v1812_v50, %v622_v23 }
  0xdc   : > { %v712_v63 = vadd.f32 %v711_v22, %v623_v51 }
  0xdd   : > { %v1847_v40 = vpop.f32.mrf.mxu3 }
  0xde   : > { %v713_v25 = vpop.f32.mrf.mxu1  ;;  %v1887_v13 = vmax.f32 %v712_v63, 0.0 }
  0xe0   : > { %v1837_v29 = vpop.f32.mrf.mxu2 }
  0xe1   : > { %v624_v27 = vpop.f32.mrf.mxu0 }
  0xe2   : > { %v625_v57 = vadd.f32 %v1812_v50, %v624_v27  ;;  %v846_v27 = vadd.f32 %v845_v17, %v1872_v62 }
  0xe4   : > { %v714_v5 = vadd.f32 %v713_v25, %v625_v57  ;;  %v847_v51 = vadd.f32 %v846_v27, %v1879_v4 }
  0xe5   : > { %v1851_v44 = vpop.f32.mrf.mxu3 }
  0xe6   : > { %v716_v28 = vpop.f32.mrf.mxu1  ;;  %v1893_v20 = vmax.f32 %v714_v5, 0.0  ;;  %v848_v53 = vadd.f32 %v847_v51, %v1887_v13 }
  0xe8   : > { %v1841_v33 = vpop.f32.mrf.mxu2 }
  0xe9   : > { %v627_v30 = vpop.f32.mrf.mxu0 }
  0xea   : > { %v628_v0 = vadd.f32 %v1812_v50, %v627_v30  ;;  %v918_v30 = vadd.f32 %v917_v18, %v887_v12 }
  0xec   : > { %v717_v15 = vadd.f32 %v716_v28, %v628_v0  ;;  %v889_v28 = vmul.f32 %v1887_v13, %v1887_v13  ;;  %v919_v56 = vadd.f32 %v918_v30, %v888_v19 }
  0xed   : > { %v1882_v9 = vpop.f32.mrf.mxu3 }
  0xee   : > { %v718_v32 = vpop.f32.mrf.mxu1  ;;  %v920_v0 = vadd.f32 %v919_v56, %v889_v28 }
  0xf0   : > { %v1845_v38 = vpop.f32.mrf.mxu2 }
  0xf1   : > { %v629_v34 = vpop.f32.mrf.mxu0 }
  0xf2   : > { %v630_v7 = vadd.f32 %v1812_v50, %v629_v34  ;;  %v1899_v34 = vmax.f32 %v717_v15, 0.0 }
  0xf4   : > { %v719_v22 = vadd.f32 %v718_v32, %v630_v7  ;;  %v890_v32 = vmul.f32 %v1893_v20, %v1893_v20 }
  0xf5   : > { %v1915_v2 = vpop.f32.mrf.mxu3 }
  0xf6   : > { %v721_v36 = vpop.f32.mrf.mxu1  ;;  %v921_v7 = vadd.f32 %v920_v0, %v890_v32 }
  0xf8   : > { %v1849_v42 = vpop.f32.mrf.mxu2 }
  0xf9   : > { %v632_v37 = vpop.f32.mrf.mxu0 }
  0xfa   : > { %v633_v16 = vadd.f32 %v1812_v50, %v632_v37 }
  0xfc   : > { %v722_v37 = vadd.f32 %v721_v36, %v633_v16  ;;  %v891_v36 = vmul.f32 %v1899_v34, %v1899_v34 }
  0xfe   : > { %v723_v39 = vpop.f32.mrf.mxu1  ;;  %v1913_v1 = vmax.f32 %v722_v37, 0.0  ;;  %v922_v15 = vadd.f32 %v921_v7, %v891_v36  ;;  %v648_v37 = vadd.f32 %v1812_v50, %v1816_v55 }
 0x100   : > { %v1866_v58 = vpop.f32.mrf.mxu2  ;;  %v893_v16 = vmul.f32 %v1913_v1, %v1913_v1 }
 0x101   : > { %v634_v41 = vpop.f32.mrf.mxu0 }
 0x102   : > { %v635_v23 = vadd.f32 %v1812_v50, %v634_v41  ;;  %v1907_v41 = vmax.f32 %v719_v22, 0.0 }
 0x104   : > { %v724_v57 = vadd.f32 %v723_v39, %v635_v23  ;;  %v892_v39 = vmul.f32 %v1907_v41, %v1907_v41 }
 0x106   : > { %v726_v43 = vpop.f32.mrf.mxu1  ;;  %v1921_v10 = vmax.f32 %v724_v57, 0.0  ;;  %v923_v19 = vadd.f32 %v922_v15, %v892_v39  ;;  %v650_v15 = vadd.f32 %v1812_v50, %v1819_v60  ;;  %v663_v60 = vadd.f32 %v1812_v50, %v1837_v29 }
 0x108   : > { %v1901_v46 = vpop.f32.mrf.mxu2  ;;  %v894_v22 = vmul.f32 %v1921_v10, %v1921_v10  ;;  %v924_v51 = vadd.f32 %v923_v19, %v893_v16 }
 0x109   : > { %v637_v47 = vpop.f32.mrf.mxu0 }
 0x10a   : > { %v638_v52 = vadd.f32 %v1812_v50, %v637_v47  ;;  %v849_v47 = vadd.f32 %v848_v53, %v1893_v20  ;;  %v925_v57 = vadd.f32 %v924_v51, %v894_v22  ;;  %v1944_v53 = vpop.f32.mrf.mxu3  ;;  %v1628_v51 = vmov 0.0  }
 0x10b   : > { %255 = vst [vmem:[#allocation3] sm:$0x1] %v1628_v51 }
 0x10c   : > { %v727_v3 = vadd.f32 %v726_v43, %v638_v52  ;;  %v850_v11 = vadd.f32 %v849_v47, %v1899_v34  ;;  %256 = vst [vmem:[#allocation4] sm:$0x1] %v1628_v51 }
 0x10e   : > { %v728_v59 = vpop.f32.mrf.mxu1  ;;  %v851_v17 = vadd.f32 %v850_v11, %v1907_v41  ;;  %v1927_v18 = vmax.f32 %v727_v3, 0.0 }
 0x110   : > { %v1931_v27 = vpop.f32.mrf.mxu2  ;;  %v852_v30 = vadd.f32 %v851_v17, %v1913_v1 }
 0x111   : > { %v639_v8 = vpop.f32.mrf.mxu0 }
 0x112   : > { %v640_v63 = vadd.f32 %v1812_v50, %v639_v8  ;;  %v853_v52 = vadd.f32 %v852_v30, %v1921_v10 }
 0x114   : > { %v729_v12 = vadd.f32 %v728_v59, %v640_v63  ;;  %v854_v63 = vadd.f32 %v853_v52, %v1927_v18 }
 0x116   : > { %v731_v25 = vpop.f32.mrf.mxu1  ;;  %v1934_v28 = vmax.f32 %v729_v12, 0.0 }
 0x118   : > { %v896_v0 = vmul.f32 %v1934_v28, %v1934_v28  ;;  %v855_v3 = vadd.f32 %v854_v63, %v1934_v28  ;;  %v679_v12 = vpop.f32.mrf.mxu2 }
 0x119   : > { %v642_v61 = vpop.f32.mrf.mxu0 }
 0x11a   : > { %v643_v5 = vadd.f32 %v1812_v50, %v642_v61 }
 0x11c   : > { %v732_v43 = vadd.f32 %v731_v25, %v643_v5  ;;  %v895_v25 = vmul.f32 %v1927_v18, %v1927_v18 }
 0x11e   : > { %v733_v8 = vpop.f32.mrf.mxu1  ;;  %v1942_v56 = vmax.f32 %v732_v43, 0.0  ;;  %v926_v47 = vadd.f32 %v925_v57, %v895_v25  ;;  %v660_v43 = vadd.f32 %v1812_v50, %v1833_v24  ;;  %v1975_v24 = vmax.f32 %v1828_v14, 0.0 }
 0x11f   : > { %v1988_v14 = vmax.f32 %v1831_v21, 0.0 }
 0x120   : > { %v897_v5 = vmul.f32 %v1942_v56, %v1942_v56  ;;  %v927_v7 = vadd.f32 %v926_v47, %v896_v0  ;;  %v856_v39 = vadd.f32 %v855_v3, %v1942_v56  ;;  %v668_v0 = vadd.f32 %v1812_v50, %v1845_v38 }
 0x121   : > { %v644_v23 = vpop.f32.mrf.mxu0  ;;  %v902_v47 = vmul.f32 %v1975_v24, %v1975_v24  ;;  %v670_v3 = vadd.f32 %v1812_v50, %v1849_v42 }
 0x122   : > { %v645_v59 = vadd.f32 %v1812_v50, %v644_v23  ;;  %v928_v16 = vadd.f32 %v927_v7, %v897_v5  ;;  %v682_v5 = vpop.f32.mrf.mxu2 }
 0x124   : > { %v734_v32 = vadd.f32 %v733_v8, %v645_v59  ;;  %v1967_v59 = vmax.f32 %v1824_v6, 0.0  ;;  %v665_v6 = vadd.f32 %v1812_v50, %v1841_v33 }
 0x126   : > { %v736_v61 = vpop.f32.mrf.mxu1  ;;  %v1949_v36 = vmax.f32 %v734_v32, 0.0  ;;  %v749_v32 = vadd.f32 %v1835_v26, %v660_v43  ;;  %v901_v29 = vmul.f32 %v1967_v59, %v1967_v59  ;;  %v752_v26 = vadd.f32 %v1839_v31, %v663_v60 }
 0x127   : > { %v737_v55 = vadd.f32 %v736_v61, %v648_v37  ;;  %v768_v37 = vpop.f32.mrf.mxu3  ;;  %v673_v31 = vadd.f32 %v1812_v50, %v1866_v58  ;;  %v759_v43 = vadd.f32 %v1851_v44, %v670_v3  ;;  %v678_v44 = vadd.f32 %v1812_v50, %v1931_v27 }
 0x128   : > { %v898_v8 = vmul.f32 %v1949_v36, %v1949_v36  ;;  %v857_v17 = vadd.f32 %v856_v39, %v1949_v36  ;;  %v1996_v7 = vmax.f32 %v749_v32, 0.0  ;;  %v754_v39 = vadd.f32 %v1843_v35, %v665_v6 }
 0x129   : > { %v1957_v11 = vmax.f32 %v737_v55, 0.0  ;;  %v675_v35 = vadd.f32 %v1812_v50, %v1901_v46  ;;  %v762_v51 = vadd.f32 %v1882_v9, %v673_v31  ;;  %v2024_v32 = vmax.f32 %v759_v43, 0.0 }
 0x12a   : > { %v929_v23 = vadd.f32 %v928_v16, %v898_v8  ;;  %v757_v8 = vadd.f32 %v1847_v40, %v668_v0  ;;  %v2005_v16 = vmax.f32 %v752_v26, 0.0  ;;  %v904_v40 = vmul.f32 %v1996_v7, %v1996_v7  ;;  %v684_v27 = vpop.f32.mrf.mxu2 }
 0x12b   : > { %v899_v22 = vmul.f32 %v1957_v11, %v1957_v11  ;;  %v858_v52 = vadd.f32 %v857_v17, %v1957_v11  ;;  %v764_v6 = vadd.f32 %v1915_v2, %v675_v35  ;;  %v2033_v0 = vmax.f32 %v762_v51, 0.0 }
 0x12c   : > { %v905_v60 = vmul.f32 %v2005_v16, %v2005_v16  ;;  %v767_v26 = vadd.f32 %v1944_v53, %v678_v44  ;;  %v683_v2 = vadd.f32 %v1812_v50, %v682_v5 }
 0x12d   : > { %v930_v57 = vadd.f32 %v929_v23, %v899_v22  ;;  %v2013_v22 = vmax.f32 %v754_v39, 0.0  ;;  %v2040_v3 = vmax.f32 %v764_v6, 0.0 }
 0x12e   : > { %v738_v19 = vpop.f32.mrf.mxu1  ;;  %v2046_v31 = vmax.f32 %v767_v26, 0.0 }
 0x12f   : > { %v739_v30 = vadd.f32 %v738_v19, %v650_v15  ;;  %v903_v15 = vmul.f32 %v1988_v14, %v1988_v14  ;;  %v771_v19 = vpop.f32.mrf.mxu3 }
 0x131   : > { %v1972_v25 = vmax.f32 %v739_v30, 0.0  ;;  %v2016_v30 = vmax.f32 %v757_v8, 0.0  ;;  %v909_v8 = vmul.f32 %v2033_v0, %v2033_v0 }
 0x133   : > { %v859_v61 = vadd.f32 %v858_v52, %v1972_v25  ;;  %v900_v63 = vmul.f32 %v1972_v25, %v1972_v25 }
 0x135   : > { %v860_v55 = vadd.f32 %v859_v61, %v1967_v59  ;;  %v931_v33 = vadd.f32 %v930_v57, %v900_v63  ;;  %v906_v57 = vmul.f32 %v2013_v22, %v2013_v22  ;;  %v680_v63 = vadd.f32 %v1812_v50, %v679_v12 }
 0x137   : > { %v861_v38 = vadd.f32 %v860_v55, %v1975_v24  ;;  %v932_v21 = vadd.f32 %v931_v33, %v901_v29  ;;  %v907_v29 = vmul.f32 %v2016_v30, %v2016_v30  ;;  %v769_v12 = vadd.f32 %v768_v37, %v680_v63  ;;  %v773_v53 = vpop.f32.mrf.mxu3 }
 0x139   : > { %v862_v42 = vadd.f32 %v861_v38, %v1988_v14  ;;  %v933_v17 = vadd.f32 %v932_v21, %v902_v47  ;;  %v908_v47 = vmul.f32 %v2024_v32, %v2024_v32  ;;  %v685_v21 = vadd.f32 %v1812_v50, %v684_v27 }
 0x13a   : > { %v2051_v43 = vmax.f32 %v769_v12, 0.0  ;;  %v911_v50 = vmul.f32 %v2046_v31, %v2046_v31 }
 0x13b   : > { %v863_v58 = vadd.f32 %v862_v42, %v1996_v7  ;;  %v934_v23 = vadd.f32 %v933_v17, %v903_v15  ;;  %v772_v42 = vadd.f32 %v771_v19, %v683_v2  ;;  %v910_v17 = vmul.f32 %v2040_v3, %v2040_v3 }
 0x13c   : > { %v912_v19 = vmul.f32 %v2051_v43, %v2051_v43 }
 0x13d   : > { %v864_v46 = vadd.f32 %v863_v58, %v2005_v16  ;;  %v935_v52 = vadd.f32 %v934_v23, %v904_v40  ;;  %v774_v40 = vadd.f32 %v773_v53, %v685_v21  ;;  %v2057_v51 = vmax.f32 %v772_v42, 0.0  ;;  %v842_v21 = vld [vmem:[#allocation3] sm:$0x1] }
 0x13f   : > { %v936_v61 = vadd.f32 %v935_v52, %v905_v60  ;;  %v865_v9 = vadd.f32 %v864_v46, %v2013_v22  ;;  %v2062_v46 = vmax.f32 %v774_v40, 0.0 }
 0x141   : > { %v866_v55 = vadd.f32 %v865_v9, %v2016_v30  ;;  %v937_v33 = vadd.f32 %v936_v61, %v906_v57  ;;  %v913_v57 = vmul.f32 %v2057_v51, %v2057_v51  ;;  %v914_v9 = vmul.f32 %v2062_v46, %v2062_v46 }
 0x143   : > { %v867_v39 = vadd.f32 %v866_v55, %v2024_v32  ;;  %v938_v38 = vadd.f32 %v937_v33, %v907_v29 }
 0x145   : > { %v868_v15 = vadd.f32 %v867_v39, %v2033_v0  ;;  %v939_v5 = vadd.f32 %v938_v38, %v908_v47 }
 0x147   : > { %v869_v37 = vadd.f32 %v868_v15, %v2040_v3  ;;  %v940_v35 = vadd.f32 %v939_v5, %v909_v8  ;;  %v882_v15 = vld [vmem:[#allocation4] sm:$0x1] }
 0x149   : > { %v870_v58 = vadd.f32 %v869_v37, %v2046_v31  ;;  %v941_v23 = vadd.f32 %v940_v35, %v910_v17 }
 0x14b   : > { %v871_v60 = vadd.f32 %v870_v58, %v2051_v43  ;;  %v942_v44 = vadd.f32 %v941_v23, %v911_v50 }
 0x14d   : > { %v943_v52 = vadd.f32 %v942_v44, %v912_v19  ;;  %v872_v6 = vadd.f32 %v871_v60, %v2057_v51 }
 0x14f   : > { %v944_v61 = vadd.f32 %v943_v52, %v913_v57  ;;  %v873_v63 = vadd.f32 %v872_v6, %v2062_v46 }
 0x151   : > { %v874_v29 = vrot.slane %v873_v63, 4  ;;  %v945_v27 = vadd.f32 %v944_v61, %v914_v9  ;;  %v975_v9 = vld [vmem:[%s2210_s3] sm:$0x1] }
 0x153   : > { %v875_v26 = vadd.f32 %v874_v29, %v873_v63  ;;  %v946_v55 = vrot.slane %v945_v27, 4 }
 0x155   : > { %v876_v33 = vrot.slane %v875_v26, 2  ;;  %v947_v2 = vadd.f32 %v946_v55, %v945_v27  ;;  %v977_v55 = vld [vmem:[%s2211_s4] sm:$0x1] }
 0x157   : > { %v877_v47 = vadd.f32 %v876_v33, %v875_v26  ;;  %v948_v12 = vrot.slane %v947_v2, 2 }
 0x159   : > { %v878_v39 = vrot.slane %v877_v47, 1  ;;  %v949_v38 = vadd.f32 %v948_v12, %v947_v2 }
 0x15b   : > { %v879_v8 = vadd.f32 %v878_v39, %v877_v47  ;;  %v950_v53 = vrot.slane %v949_v38, 1 }
 0x15d   : > { %v880_v5 = vadd.f32 %v879_v8, %v842_v21  ;;  %v951_v42 = vadd.f32 %v950_v53, %v949_v38 }
 0x15f   : > { %881 = vst [vmem:[#allocation3] sm:$0x1] %v880_v5  ;;  %v952_v17 = vadd.f32 %v951_v42, %v882_v15 }
 0x161   : > { %953 = vst [vmem:[#allocation4] sm:$0x1] %v952_v17 }
 0x166   : > { %v957_v37 = vld [vmem:[#allocation3] sm:$0x1] }
 0x167   : > { %v958_v35 = vmul.f32 0.00390625, %v957_v37 }
 0x168   : > { %v959_v40 = vld [vmem:[#allocation4] sm:$0x1] }
 0x169   : > { %v960_v50 = vmul.f32 0.00390625, %v959_v40  ;;  %v961_v58 = vmul.f32 %v958_v35, %v958_v35 }
 0x16b   : > { %v962_v23 = vsub.f32 %v960_v50, %v961_v58 }
 0x16d   : > { %v963_v60 = vmax.f32 %v962_v23, 0.0 }
 0x16f   : > { %v964_v19 = vadd.f32 1e-05, %v963_v60 }
 0x171   : > { %1602 = vrsqrt.f32 %v964_v19  ;;  %vm971_vm3 = vweird.f32 %v964_v19 }
 0x177   : > { %v1603_v44 = vpop.eup %1602 }
 0x178   : > { %v966_v52 = vmul.f32 %v1603_v44, %v964_v19  ;;  %vm972_vm2 = vweird.f32 %v1603_v44 }
 0x179   : > { %vm973_vm4 = vmor %vm971_vm3, %vm972_vm2 }
 0x17a   : > { %v967_v6 = vmul.f32 %v1603_v44, %v966_v52 }
 0x17c   : > { %v968_v57 = vmul.f32 0.5, %v967_v6 }
 0x17e   : > { %v969_v61 = vsub.f32 1.5, %v968_v57 }
 0x180   : > { %v970_v63 = vmul.f32 %v1603_v44, %v969_v61 }
 0x182   : > { %v974_v29 = vsel %vm973_vm4, %v1603_v44, %v970_v63 }
 0x183   : > { %v976_v27 = vmul.f32 %v975_v9, %v974_v29 }
 0x185   : > { %v978_v26 = vmul.f32 %v976_v27, %v958_v35  ;;  %v2076_v33 = vperm.slane %v976_v27, 0 }
 0x187   : > { %v979_v2 = vsub.f32 %v977_v55, %v978_v26  ;;  %v1015_v47 = vmul.f32 %v2076_v33, %v1856_v48  ;;  %v1016_v12 = vmul.f32 %v2076_v33, %v1853_v45  ;;  %v1017_v39 = vmul.f32 %v2076_v33, %v1858_v49 }
 0x188   : > { %v1018_v38 = vmul.f32 %v2076_v33, %v1863_v54  ;;  %v1019_v21 = vmul.f32 %v2076_v33, %v1872_v62  ;;  %v1020_v8 = vmul.f32 %v2076_v33, %v1879_v4  ;;  %v1021_v48 = vmul.f32 %v2076_v33, %v1887_v13 }
 0x189   : > { %v2090_v53 = vperm.slane %v979_v2, 0  ;;  %v1022_v45 = vmul.f32 %v2076_v33, %v1893_v20  ;;  %v1023_v49 = vmul.f32 %v2076_v33, %v1899_v34  ;;  %v1024_v54 = vmul.f32 %v2076_v33, %v1907_v41 }
 0x18a   : > { %v1025_v62 = vmul.f32 %v2076_v33, %v1913_v1  ;;  %v1026_v4 = vmul.f32 %v2076_v33, %v1921_v10  ;;  %v1027_v15 = vmul.f32 %v2076_v33, %v1927_v18  ;;  %v1028_v13 = vmul.f32 %v2076_v33, %v1934_v28 }
 0x18b   : > { %v1029_v20 = vmul.f32 %v2076_v33, %v1942_v56  ;;  %v1030_v34 = vmul.f32 %v2076_v33, %v1949_v36  ;;  %v1031_v41 = vmul.f32 %v2076_v33, %v1957_v11  ;;  %v1032_v1 = vmul.f32 %v2076_v33, %v1972_v25 }
 0x18c   : > { %v1033_v10 = vmul.f32 %v2076_v33, %v1967_v59  ;;  %v1034_v18 = vmul.f32 %v2076_v33, %v1975_v24  ;;  %v1050_v28 = vadd.f32 %v2090_v53, %v1015_v47  ;;  %v1051_v5 = vadd.f32 %v2090_v53, %v1016_v12 }
 0x18d   : > { %v1052_v56 = vadd.f32 %v2090_v53, %v1017_v39  ;;  %v1053_v36 = vadd.f32 %v2090_v53, %v1018_v38  ;;  %v1054_v11 = vadd.f32 %v2090_v53, %v1019_v21  ;;  %v1055_v42 = vadd.f32 %v2090_v53, %v1020_v8 }
 0x18e   : > { %v1035_v25 = vmul.f32 %v2076_v33, %v1988_v14  ;;  %v1036_v59 = vmul.f32 %v2076_v33, %v1996_v7  ;;  %v1056_v24 = vadd.f32 %v2090_v53, %v1021_v48  ;;  %v1057_v17 = vadd.f32 %v2090_v53, %v1022_v45 }
 0x18f   : > { %v1037_v37 = vmul.f32 %v2076_v33, %v2005_v16  ;;  %v1038_v35 = vmul.f32 %v2076_v33, %v2013_v22  ;;  %v1058_v40 = vadd.f32 %v2090_v53, %v1023_v49  ;;  %v1059_v50 = vadd.f32 %v2090_v53, %v1024_v54 }
 0x190   : > { %v1039_v14 = vmul.f32 %v2076_v33, %v2016_v30  ;;  %v1060_v7 = vadd.f32 %v2090_v53, %v1025_v62  ;;  %v1061_v16 = vadd.f32 %v2090_v53, %v1026_v4  ;;  %v1062_v58 = vadd.f32 %v2090_v53, %v1027_v15 }
 0x191   : > { %v1063_v22 = vadd.f32 %v2090_v53, %v1028_v13  ;;  %v1470_v23 = vpack.c.bf16 %v1051_v5, %v1050_v28  ;;  %v1475_v60 = vpack.c.bf16 %v1053_v36, %v1052_v56  ;;  %v1480_v19 = vpack.c.bf16 %v1055_v42, %v1054_v11 }
 0x192   : > { %v1040_v44 = vmul.f32 %v2076_v33, %v2024_v32  ;;  %v1064_v52 = vadd.f32 %v2090_v53, %v1029_v20  ;;  %v1065_v30 = vadd.f32 %v2090_v53, %v1030_v34  ;;  %v1485_v6 = vpack.c.bf16 %v1057_v17, %v1056_v24 }
 0x193   : > { %v1041_v57 = vmul.f32 %v2076_v33, %v2033_v0  ;;  %v1066_v61 = vadd.f32 %v2090_v53, %v1031_v41  ;;  %v1067_v63 = vadd.f32 %v2090_v53, %v1032_v1  ;;  %1471 = vst [vmem:[%s2142_s17] sm:$0xff] %v1470_v23   ;;  %v1490_v9 = vpack.c.bf16 %v1059_v50, %v1058_v40 }
 0x194   : > { %v1042_v29 = vmul.f32 %v2076_v33, %v2040_v3  ;;  %v1068_v32 = vadd.f32 %v2090_v53, %v1033_v10  ;;  %v1069_v27 = vadd.f32 %v2090_v53, %v1034_v18  ;;  %1547 = vst [vmem:[%s2142_s17 + $0x8] sm:$0xff] %v1475_v60   ;;  %v1495_v26 = vpack.c.bf16 %v1061_v16, %v1060_v7 }
 0x195   : > { %v1043_v0 = vmul.f32 %v2076_v33, %v2046_v31  ;;  %v1070_v55 = vadd.f32 %v2090_v53, %v1035_v25  ;;  %v1071_v2 = vadd.f32 %v2090_v53, %v1036_v59  ;;  %1548 = vst [vmem:[%s2142_s17 + $0x10] sm:$0xff] %v1480_v19   ;;  %v1500_v47 = vpack.c.bf16 %v1063_v22, %v1062_v58 }
 0x196   : > { %v1044_v3 = vmul.f32 %v2076_v33, %v2051_v43  ;;  %v1072_v12 = vadd.f32 %v2090_v53, %v1037_v37  ;;  %v1073_v39 = vadd.f32 %v2090_v53, %v1038_v35  ;;  %1549 = vst [vmem:[%s2142_s17 + $0x18] sm:$0xff] %v1485_v6   ;;  %v1505_v38 = vpack.c.bf16 %v1065_v30, %v1064_v52 }
 0x197   : > { %v1045_v31 = vmul.f32 %v2076_v33, %v2057_v51  ;;  %v1074_v21 = vadd.f32 %v2090_v53, %v1039_v14  ;;  %v1075_v8 = vadd.f32 %v2090_v53, %v1040_v44  ;;  %1550 = vst [vmem:[%s2142_s17 + $0x20] sm:$0xff] %v1490_v9   ;;  %v1510_v48 = vpack.c.bf16 %v1067_v63, %v1066_v61 }
 0x198   : > { %v1046_v43 = vmul.f32 %v2076_v33, %v2062_v46  ;;  %v1076_v45 = vadd.f32 %v2090_v53, %v1041_v57  ;;  %v1077_v49 = vadd.f32 %v2090_v53, %v1042_v29  ;;  %1551 = vst [vmem:[%s2142_s17 + $0x28] sm:$0xff] %v1495_v26   ;;  %v1515_v51 = vpack.c.bf16 %v1069_v27, %v1068_v32 }
 0x199   : > { %v1078_v54 = vadd.f32 %v2090_v53, %v1043_v0  ;;  %v1079_v62 = vadd.f32 %v2090_v53, %v1044_v3  ;;  %1552 = vst [vmem:[%s2142_s17 + $0x30] sm:$0xff] %v1500_v47   ;;  %v1520_v4 = vpack.c.bf16 %v1071_v2, %v1070_v55  ;;  %v1080_v46 = vadd.f32 %v2090_v53, %v1045_v31 }
 0x19a   : > { %v1081_v33 = vadd.f32 %v2090_v53, %v1046_v43  ;;  %1553 = vst [vmem:[%s2142_s17 + $0x38] sm:$0xff] %v1505_v38   ;;  %v1525_v15 = vpack.c.bf16 %v1073_v39, %v1072_v12  ;;  %v1530_v13 = vpack.c.bf16 %v1075_v8, %v1074_v21  ;;  %v1535_v20 = vpack.c.bf16 %v1077_v49, %v1076_v45 }
 0x19b   : > { %1554 = vst [vmem:[%s2142_s17 + $0x40] sm:$0xff] %v1510_v48   ;;  %v1540_v34 = vpack.c.bf16 %v1079_v62, %v1078_v54 }
 0x19c   : > { %1555 = vst [vmem:[%s2142_s17 + $0x48] sm:$0xff] %v1515_v51   ;;  %v1545_v41 = vpack.c.bf16 %v1081_v33, %v1080_v46 }
 0x19d   : > { %1556 = vst [vmem:[%s2142_s17 + $0x50] sm:$0xff] %v1520_v4  }
 0x19e   : > { %1557 = vst [vmem:[%s2142_s17 + $0x58] sm:$0xff] %v1525_v15  }
 0x19f   : > { %1558 = vst [vmem:[%s2142_s17 + $0x60] sm:$0xff] %v1530_v13  }
 0x1a0   : > { %1559 = vst [vmem:[%s2142_s17 + $0x68] sm:$0xff] %v1535_v20  }
 0x1a1   : > { %1560 = vst [vmem:[%s2142_s17 + $0x70] sm:$0xff] %v1540_v34  }
 0x1a2   : > { %1561 = vst [vmem:[%s2142_s17 + $0x78] sm:$0xff] %v1545_v41  }
 0x1a3 PF: > { %s15_s20 = sadd.s32 1, %s1626_s20   ;;  %s2213_s18 = smov %s1622_s19 }
 0x1a4   : > { %p12_p5 = scmp.ge.s32.totalorder %s15_s20, 4   ;;  %s2214_s19 = smov %s2216_s21 }
 0x1a6   :  { %14 = sbr.rel (!%p12_p5) target bundleno = 2 (0x2), region = 79 }

// kernel: siamese_forward.7
= control target key start
LH: loop header
LB: loop body
LE: loop exit
PB: predicated region body
PF: predicated region fallthrough
CT: control target
= control target key end

     0   :  { %vm5963_vm0 = vcmask 1043456   ;;  %s17779_s1 = inlined_call_operand.vmem [shape: bf16[3072,512], index: 1, kind: input, shape index: {}]   ;;  %s17780_s0 = inlined_call_operand.vmem [shape: bf16[4,3072], index: 0, kind: input, shape index: {}]   ;;  %s17781_s2 = inlined_call_operand.vmem [shape: f32[1,512], index: 2, kind: input, shape index: {}]   ;;  %s17782_s3 = inlined_call_operand.vmem [shape: bf16[512,512], index: 3, kind: input, shape index: {}]   ;;  %s17783_s4 = inlined_call_operand.vmem [shape: f32[1,512], index: 4, kind: input, shape index: {}]   ;;  %s17784_s5 = inlined_call_operand.vmem [shape: bf16[512,128], index: 5, kind: input, shape index: {}]   ;;  %s17785_s6 = inlined_call_operand.vmem [shape: f32[1,128], index: 6, kind: input, shape index: {}]   ;;  %s17786_s7 = inlined_call_operand.vmem [shape: f32[4,128], index: 7, kind: output, shape index: {}]  }
   0x1   :  { %v7435_v0 = vld [vmem:[%s17779_s1 + $0xe0] sm:$0xf]  ;;  %v11063_v1 = vld [vmem:[%s17779_s1 + $0xec] sm:$0xf0] }
   0x2   :  { %v7563_v2 = vld [vmem:[%s17779_s1 + $0x1e0] sm:$0xf]  ;;  %v7436_v3 = vor.u32 %v11063_v1, %v7435_v0  ;;  %v11095_v4 = vld [vmem:[%s17779_s1 + $0x1ec] sm:$0xf0] }
   0x3   :  { %v7691_v5 = vld [vmem:[%s17779_s1 + $0x2e0] sm:$0xf]  ;;  %v11127_v6 = vld [vmem:[%s17779_s1 + $0x2ec] sm:$0xf0]  ;;  %v7564_v7 = vor.u32 %v11095_v4, %v7563_v2 }
   0x4   :  { %v7692_v8 = vor.u32 %v11127_v6, %v7691_v5  ;;  %v7819_v9 = vld [vmem:[%s17779_s1 + $0x3e0] sm:$0xf]  ;;  %v11159_v10 = vld [vmem:[%s17779_s1 + $0x3ec] sm:$0xf0]  ;;  %4709 = vmatpush.bf16.msra.mxu0 %v7436_v3 }
   0x5   :  { %v7419_v11 = vld [vmem:[%s17779_s1 + $0xc0] sm:$0xf]  ;;  %v7820_v12 = vor.u32 %v11159_v10, %v7819_v9  ;;  %v11059_v13 = vld [vmem:[%s17779_s1 + $0xcc] sm:$0xf0]  ;;  %4722 = vmatpush.bf16.msra.mxu1 %v7564_v7 }
   0x6   :  { %v7547_v14 = vld [vmem:[%s17779_s1 + $0x1c0] sm:$0xf]  ;;  %v11091_v15 = vld [vmem:[%s17779_s1 + $0x1cc] sm:$0xf0]  ;;  %4735 = vmatpush.bf16.msra.mxu2 %v7692_v8  ;;  %v7420_v16 = vor.u32 %v11059_v13, %v7419_v11 }
   0x7   :  { %v7548_v17 = vor.u32 %v11091_v15, %v7547_v14  ;;  %v7675_v18 = vld [vmem:[%s17779_s1 + $0x2c0] sm:$0xf]  ;;  %v11123_v19 = vld [vmem:[%s17779_s1 + $0x2cc] sm:$0xf0]  ;;  %4748 = vmatpush.bf16.msra.mxu3 %v7820_v12 }
   0x8   :  { %v7803_v20 = vld [vmem:[%s17779_s1 + $0x3c0] sm:$0xf]  ;;  %v7676_v21 = vor.u32 %v11123_v19, %v7675_v18  ;;  %v11155_v22 = vld [vmem:[%s17779_s1 + $0x3cc] sm:$0xf0]  ;;  %4710 = vmatpush.bf16.msra.mxu0 %v7420_v16 }
   0x9   :  { %v7403_v23 = vld [vmem:[%s17779_s1 + $0xa0] sm:$0xf]  ;;  %v11055_v24 = vld [vmem:[%s17779_s1 + $0xac] sm:$0xf0]  ;;  %v7804_v25 = vor.u32 %v11155_v22, %v7803_v20  ;;  %4723 = vmatpush.bf16.msra.mxu1 %v7548_v17 }
   0xa   :  { %v7531_v26 = vld [vmem:[%s17779_s1 + $0x1a0] sm:$0xf]  ;;  %v11087_v27 = vld [vmem:[%s17779_s1 + $0x1ac] sm:$0xf0]  ;;  %v7404_v29 = vor.u32 %v11055_v24, %v7403_v23  ;;  %4736 = vmatpush.bf16.msra.mxu2 %v7676_v21 }
   0xb   :  { %v7659_v28 = vld [vmem:[%s17779_s1 + $0x2a0] sm:$0xf]  ;;  %v11119_v30 = vld [vmem:[%s17779_s1 + $0x2ac] sm:$0xf0]  ;;  %v7532_v33 = vor.u32 %v11087_v27, %v7531_v26  ;;  %4749 = vmatpush.bf16.msra.mxu3 %v7804_v25 }
   0xc   :  { %v7787_v31 = vld [vmem:[%s17779_s1 + $0x3a0] sm:$0xf]  ;;  %v11151_v32 = vld [vmem:[%s17779_s1 + $0x3ac] sm:$0xf0]  ;;  %v7660_v34 = vor.u32 %v11119_v30, %v7659_v28  ;;  %4711 = vmatpush.bf16.msra.mxu0 %v7404_v29 }
   0xd   :  { %v7387_v35 = vld [vmem:[%s17779_s1 + $0x80] sm:$0xf]  ;;  %v11051_v36 = vld [vmem:[%s17779_s1 + $0x8c] sm:$0xf0]  ;;  %v7788_v38 = vor.u32 %v11151_v32, %v7787_v31  ;;  %4724 = vmatpush.bf16.msra.mxu1 %v7532_v33 }
   0xe   :  { %v7515_v37 = vld [vmem:[%s17779_s1 + $0x180] sm:$0xf]  ;;  %v11083_v39 = vld [vmem:[%s17779_s1 + $0x18c] sm:$0xf0]  ;;  %v7388_v44 = vor.u32 %v11051_v36, %v7387_v35  ;;  %4737 = vmatpush.bf16.msra.mxu2 %v7660_v34 }
   0xf   :  { %v7643_v40 = vld [vmem:[%s17779_s1 + $0x280] sm:$0xf]  ;;  %v11115_v41 = vld [vmem:[%s17779_s1 + $0x28c] sm:$0xf0]  ;;  %v7516_v45 = vor.u32 %v11083_v39, %v7515_v37  ;;  %4750 = vmatpush.bf16.msra.mxu3 %v7788_v38 }
  0x10   :  { %v7771_v42 = vld [vmem:[%s17779_s1 + $0x380] sm:$0xf]  ;;  %v11147_v43 = vld [vmem:[%s17779_s1 + $0x38c] sm:$0xf0]  ;;  %v7644_v46 = vor.u32 %v11115_v41, %v7643_v40  ;;  %4712 = vmatpush.bf16.msra.mxu0 %v7388_v44 }
  0x11   :  { %v7371_v47 = vld [vmem:[%s17779_s1 + $0x60] sm:$0xf]  ;;  %v11047_v48 = vld [vmem:[%s17779_s1 + $0x6c] sm:$0xf0]  ;;  %v7772_v50 = vor.u32 %v11147_v43, %v7771_v42  ;;  %4725 = vmatpush.bf16.msra.mxu1 %v7516_v45 }
  0x12   :  { %v7499_v49 = vld [vmem:[%s17779_s1 + $0x160] sm:$0xf]  ;;  %v11079_v51 = vld [vmem:[%s17779_s1 + $0x16c] sm:$0xf0]  ;;  %v7372_v56 = vor.u32 %v11047_v48, %v7371_v47  ;;  %4738 = vmatpush.bf16.msra.mxu2 %v7644_v46 }
  0x13   :  { %v7627_v52 = vld [vmem:[%s17779_s1 + $0x260] sm:$0xf]  ;;  %v11111_v53 = vld [vmem:[%s17779_s1 + $0x26c] sm:$0xf0]  ;;  %v7500_v57 = vor.u32 %v11079_v51, %v7499_v49  ;;  %4751 = vmatpush.bf16.msra.mxu3 %v7772_v50 }
  0x14   :  { %v7755_v54 = vld [vmem:[%s17779_s1 + $0x360] sm:$0xf]  ;;  %v11143_v55 = vld [vmem:[%s17779_s1 + $0x36c] sm:$0xf0]  ;;  %v7628_v58 = vor.u32 %v11111_v53, %v7627_v52  ;;  %4713 = vmatpush.bf16.msra.mxu0 %v7372_v56 }
  0x15   :  { %v7355_v59 = vld [vmem:[%s17779_s1 + $0x40] sm:$0xf]  ;;  %v11043_v60 = vld [vmem:[%s17779_s1 + $0x4c] sm:$0xf0]  ;;  %v7756_v62 = vor.u32 %v11143_v55, %v7755_v54  ;;  %4726 = vmatpush.bf16.msra.mxu1 %v7500_v57 }
  0x16   :  { %v7483_v61 = vld [vmem:[%s17779_s1 + $0x140] sm:$0xf]  ;;  %v11075_v63 = vld [vmem:[%s17779_s1 + $0x14c] sm:$0xf0]  ;;  %v7356_v4 = vor.u32 %v11043_v60, %v7355_v59  ;;  %4739 = vmatpush.bf16.msra.mxu2 %v7628_v58 }
  0x17   :  { %v7611_v0 = vld [vmem:[%s17779_s1 + $0x240] sm:$0xf]  ;;  %v11107_v1 = vld [vmem:[%s17779_s1 + $0x24c] sm:$0xf0]  ;;  %v7484_v5 = vor.u32 %v11075_v63, %v7483_v61  ;;  %4752 = vmatpush.bf16.msra.mxu3 %v7756_v62 }
  0x18   :  { %v7739_v2 = vld [vmem:[%s17779_s1 + $0x340] sm:$0xf]  ;;  %v11139_v3 = vld [vmem:[%s17779_s1 + $0x34c] sm:$0xf0]  ;;  %v7612_v6 = vor.u32 %v11107_v1, %v7611_v0  ;;  %4714 = vmatpush.bf16.msra.mxu0 %v7356_v4 }
  0x19   :  { %v7339_v7 = vld [vmem:[%s17779_s1 + $0x20] sm:$0xf]  ;;  %v11039_v8 = vld [vmem:[%s17779_s1 + $0x2c] sm:$0xf0]  ;;  %v7740_v10 = vor.u32 %v11139_v3, %v7739_v2  ;;  %4727 = vmatpush.bf16.msra.mxu1 %v7484_v5 }
  0x1a   :  { %v7467_v9 = vld [vmem:[%s17779_s1 + $0x120] sm:$0xf]  ;;  %v11071_v11 = vld [vmem:[%s17779_s1 + $0x12c] sm:$0xf0]  ;;  %v7340_v16 = vor.u32 %v11039_v8, %v7339_v7  ;;  %4740 = vmatpush.bf16.msra.mxu2 %v7612_v6 }
  0x1b   :  { %v7595_v12 = vld [vmem:[%s17779_s1 + $0x220] sm:$0xf]  ;;  %v11103_v13 = vld [vmem:[%s17779_s1 + $0x22c] sm:$0xf0]  ;;  %v7468_v19 = vor.u32 %v11071_v11, %v7467_v9  ;;  %4753 = vmatpush.bf16.msra.mxu3 %v7740_v10 }
  0x1c   :  { %v7723_v14 = vld [vmem:[%s17779_s1 + $0x320] sm:$0xf]  ;;  %v11135_v15 = vld [vmem:[%s17779_s1 + $0x32c] sm:$0xf0]  ;;  %v7596_v20 = vor.u32 %v11103_v13, %v7595_v12  ;;  %4715 = vmatpush.bf16.msra.mxu0 %v7340_v16 }
  0x1d   :  { %v7323_v17 = vld [vmem:[%s17779_s1] sm:$0xf]  ;;  %v11035_v18 = vld [vmem:[%s17779_s1 + $0xc] sm:$0xf0]  ;;  %v7724_v24 = vor.u32 %v11135_v15, %v7723_v14  ;;  %4728 = vmatpush.bf16.msra.mxu1 %v7468_v19 }
  0x1e   :  { %v7451_v21 = vld [vmem:[%s17779_s1 + $0x100] sm:$0xf]  ;;  %v11067_v22 = vld [vmem:[%s17779_s1 + $0x10c] sm:$0xf0]  ;;  %v7324_v31 = vor.u32 %v11035_v18, %v7323_v17  ;;  %4741 = vmatpush.bf16.msra.mxu2 %v7596_v20 }
  0x1f   :  { %v7579_v23 = vld [vmem:[%s17779_s1 + $0x200] sm:$0xf]  ;;  %v11099_v25 = vld [vmem:[%s17779_s1 + $0x20c] sm:$0xf0]  ;;  %v7452_v35 = vor.u32 %v11067_v22, %v7451_v21  ;;  %4754 = vmatpush.bf16.msra.mxu3 %v7724_v24 }
  0x20   :  { %v7707_v26 = vld [vmem:[%s17779_s1 + $0x300] sm:$0xf]  ;;  %v11131_v27 = vld [vmem:[%s17779_s1 + $0x30c] sm:$0xf0]  ;;  %v7580_v36 = vor.u32 %v11099_v25, %v7579_v23  ;;  %4716 = vmatpush.bf16.msra.mxu0 %v7324_v31 }
  0x21   :  { %v7947_v28 = vld [vmem:[%s17779_s1 + $0x4e0] sm:$0xf]  ;;  %v11191_v29 = vld [vmem:[%s17779_s1 + $0x4ec] sm:$0xf0]  ;;  %v7708_v39 = vor.u32 %v11131_v27, %v7707_v26  ;;  %4729 = vmatpush.bf16.msra.mxu1 %v7452_v35 }
  0x22   :  { %v8075_v30 = vld [vmem:[%s17779_s1 + $0x5e0] sm:$0xf]  ;;  %v11223_v32 = vld [vmem:[%s17779_s1 + $0x5ec] sm:$0xf0]  ;;  %v7948_v40 = vor.u32 %v11191_v29, %v7947_v28  ;;  %4742 = vmatpush.bf16.msra.mxu2 %v7580_v36 }
  0x23   :  { %v8203_v33 = vld [vmem:[%s17779_s1 + $0x6e0] sm:$0xf]  ;;  %v11255_v34 = vld [vmem:[%s17779_s1 + $0x6ec] sm:$0xf0]  ;;  %v8076_v41 = vor.u32 %v11223_v32, %v8075_v30  ;;  %4755 = vmatpush.bf16.msra.mxu3 %v7708_v39 }
  0x24   :  { %v8331_v37 = vld [vmem:[%s17779_s1 + $0x7e0] sm:$0xf]  ;;  %v11287_v38 = vld [vmem:[%s17779_s1 + $0x7ec] sm:$0xf0]  ;;  %v8204_v42 = vor.u32 %v11255_v34, %v8203_v33  ;;  %4761 = vmatpush.bf16.msrb.mxu0 %v7948_v40 }
  0x25   :  { %v7931_v43 = vld [vmem:[%s17779_s1 + $0x4c0] sm:$0xf]  ;;  %v11187_v44 = vld [vmem:[%s17779_s1 + $0x4cc] sm:$0xf0]  ;;  %v8332_v46 = vor.u32 %v11287_v38, %v8331_v37  ;;  %4774 = vmatpush.bf16.msrb.mxu1 %v8076_v41 }
  0x26   :  { %v8059_v45 = vld [vmem:[%s17779_s1 + $0x5c0] sm:$0xf]  ;;  %v11219_v47 = vld [vmem:[%s17779_s1 + $0x5cc] sm:$0xf0]  ;;  %v7932_v52 = vor.u32 %v11187_v44, %v7931_v43  ;;  %4787 = vmatpush.bf16.msrb.mxu2 %v8204_v42 }
  0x27   :  { %v8187_v48 = vld [vmem:[%s17779_s1 + $0x6c0] sm:$0xf]  ;;  %v11251_v49 = vld [vmem:[%s17779_s1 + $0x6cc] sm:$0xf0]  ;;  %v8060_v55 = vor.u32 %v11219_v47, %v8059_v45  ;;  %4800 = vmatpush.bf16.msrb.mxu3 %v8332_v46 }
  0x28   :  { %v8315_v50 = vld [vmem:[%s17779_s1 + $0x7c0] sm:$0xf]  ;;  %v11283_v51 = vld [vmem:[%s17779_s1 + $0x7cc] sm:$0xf0]  ;;  %v8188_v56 = vor.u32 %v11251_v49, %v8187_v48  ;;  %4762 = vmatpush.bf16.msrb.mxu0 %v7932_v52 }
  0x29   :  { %v7915_v53 = vld [vmem:[%s17779_s1 + $0x4a0] sm:$0xf]  ;;  %v11183_v54 = vld [vmem:[%s17779_s1 + $0x4ac] sm:$0xf0]  ;;  %v8316_v60 = vor.u32 %v11283_v51, %v8315_v50  ;;  %4775 = vmatpush.bf16.msrb.mxu1 %v8060_v55 }
  0x2a   :  { %v8043_v57 = vld [vmem:[%s17779_s1 + $0x5a0] sm:$0xf]  ;;  %v11215_v58 = vld [vmem:[%s17779_s1 + $0x5ac] sm:$0xf0]  ;;  %v7916_v1 = vor.u32 %v11183_v54, %v7915_v53  ;;  %4788 = vmatpush.bf16.msrb.mxu2 %v8188_v56  ;;  %v35_v53 = vld [vmem:[%s17780_s0 + $0x8] sm:$0xff] }
  0x2b   :  { %v34_v59 = vld [vmem:[%s17780_s0] sm:$0xff]  ;;  %v11247_v62 = vld [vmem:[%s17779_s1 + $0x6ac] sm:$0xf0]  ;;  %v8044_v3 = vor.u32 %v11215_v58, %v8043_v57  ;;  %4801 = vmatpush.bf16.msrb.mxu3 %v8316_v60  ;;  %812 = vst [vmem:[#allocation1 + $0x20] ss:$4 sm:$0xff] %v35_v53 }
  0x2c   :  { %v8171_v61 = vld [vmem:[%s17779_s1 + $0x6a0] sm:$0xf]  ;;  %809 = vst [vmem:[#allocation1] ss:$4 sm:$0xff] %v34_v59  ;;  %v11279_v0 = vld [vmem:[%s17779_s1 + $0x7ac] sm:$0xf0]  ;;  %4763 = vmatpush.bf16.msrb.mxu0 %v7916_v1 }
  0x2d   :  { %v8299_v63 = vld [vmem:[%s17779_s1 + $0x7a0] sm:$0xf]  ;;  %v8172_v4 = vor.u32 %v11247_v62, %v8171_v61  ;;  %v11179_v5 = vld [vmem:[%s17779_s1 + $0x48c] sm:$0xf0]  ;;  %4776 = vmatpush.bf16.msrb.mxu1 %v8044_v3 }
  0x2e   :  { %v7899_v2 = vld [vmem:[%s17779_s1 + $0x480] sm:$0xf]  ;;  %v11211_v7 = vld [vmem:[%s17779_s1 + $0x58c] sm:$0xf0]  ;;  %v8300_v8 = vor.u32 %v11279_v0, %v8299_v63 }
  0x2f   :  { %v8027_v6 = vld [vmem:[%s17779_s1 + $0x580] sm:$0xf]  ;;  %v11243_v10 = vld [vmem:[%s17779_s1 + $0x68c] sm:$0xf0]  ;;  %v7900_v15 = vor.u32 %v11179_v5, %v7899_v2  ;;  %4789 = vmatpush.bf16.msrb.mxu2 %v8172_v4 }
  0x30   :  { %v8155_v9 = vld [vmem:[%s17779_s1 + $0x680] sm:$0xf]  ;;  %v11275_v12 = vld [vmem:[%s17779_s1 + $0x78c] sm:$0xf0]  ;;  %v8028_v21 = vor.u32 %v11211_v7, %v8027_v6  ;;  %4802 = vmatpush.bf16.msrb.mxu3 %v8300_v8 }
  0x31   :  { %v8283_v11 = vld [vmem:[%s17779_s1 + $0x780] sm:$0xf]  ;;  %v11175_v14 = vld [vmem:[%s17779_s1 + $0x46c] sm:$0xf0]  ;;  %v8156_v22 = vor.u32 %v11243_v10, %v8155_v9  ;;  %4764 = vmatpush.bf16.msrb.mxu0 %v7900_v15 }
  0x32   :  { %v7883_v13 = vld [vmem:[%s17779_s1 + $0x460] sm:$0xf]  ;;  %v11207_v17 = vld [vmem:[%s17779_s1 + $0x56c] sm:$0xf0]  ;;  %v8284_v25 = vor.u32 %v11275_v12, %v8283_v11  ;;  %4777 = vmatpush.bf16.msrb.mxu1 %v8028_v21 }
  0x33   :  { %v8011_v16 = vld [vmem:[%s17779_s1 + $0x560] sm:$0xf]  ;;  %v11239_v19 = vld [vmem:[%s17779_s1 + $0x66c] sm:$0xf0]  ;;  %v7884_v30 = vor.u32 %v11175_v14, %v7883_v13  ;;  %4790 = vmatpush.bf16.msrb.mxu2 %v8156_v22 }
  0x34   :  { %v8139_v18 = vld [vmem:[%s17779_s1 + $0x660] sm:$0xf]  ;;  %v36_v20 = vld [vmem:[%s17780_s0 + $0x10] sm:$0xff]  ;;  %v12340_v26 = vld.sshfl [vmem:[#allocation1 + $0x18] sm:$0xff pattern:$0x73625140]  ;;  %v8012_v31 = vor.u32 %v11207_v17, %v8011_v16  ;;  %4803 = vmatpush.bf16.msrb.mxu3 %v8284_v25 }
  0x35   :  { %v12335_v23 = vld.sshfl [vmem:[#allocation1 + $0x10] sm:$0xff pattern:$0x73625140]  ;;  %v12337_v24 = vld.sshfl [vmem:[#allocation1] sm:$0xff pattern:$0x73625140]  ;;  %4756 = vmatmul.bf16.vlgmr.msra.gmra.mxu3 %v12340_v26  ;;  %v8140_v32 = vor.u32 %v11239_v19, %v8139_v18  ;;  %4765 = vmatpush.bf16.msrb.mxu0 %v7884_v30 }
  0x36   :  { %4743 = vmatmul.bf16.vlgmr.msra.gmra.mxu2 %v12335_v23  ;;  %v12342_v27 = vld.sshfl [vmem:[#allocation1 + $0x8] sm:$0xff pattern:$0x73625140]  ;;  %v8267_v28 = vld [vmem:[%s17779_s1 + $0x760] sm:$0xf]  ;;  %4717 = vmatmul.bf16.vlgmr.msra.gmra.mxu0 %v12337_v24  ;;  %v37_v16 = vld [vmem:[%s17780_s0 + $0x18] sm:$0xff] }
  0x37   :  { %v11271_v29 = vld [vmem:[%s17779_s1 + $0x76c] sm:$0xf0]  ;;  %822 = vst [vmem:[#allocation1] ss:$4 sm:$0xff] %v36_v20  ;;  %4730 = vmatmul.bf16.vlgmr.msra.gmra.mxu1 %v12342_v27  ;;  %v7867_v33 = vld [vmem:[%s17779_s1 + $0x440] sm:$0xf]  ;;  %4791 = vmatpush.bf16.msrb.mxu2 %v8140_v32 }
  0x38   :  { %v11171_v34 = vld [vmem:[%s17779_s1 + $0x44c] sm:$0xf0]  ;;  %v7995_v35 = vld [vmem:[%s17779_s1 + $0x540] sm:$0xf]  ;;  %v8268_v36 = vor.u32 %v11271_v29, %v8267_v28  ;;  %4778 = vmatpush.bf16.msrb.mxu1 %v8012_v31 }
  0x39   :  { %v11203_v37 = vld [vmem:[%s17779_s1 + $0x54c] sm:$0xf0]  ;;  %v8123_v38 = vld [vmem:[%s17779_s1 + $0x640] sm:$0xf]  ;;  %v7868_v42 = vor.u32 %v11171_v34, %v7867_v33 }
  0x3a   :  { %v11235_v39 = vld [vmem:[%s17779_s1 + $0x64c] sm:$0xf0]  ;;  %v8251_v40 = vld [vmem:[%s17779_s1 + $0x740] sm:$0xf]  ;;  %v7996_v45 = vor.u32 %v11203_v37, %v7995_v35  ;;  %4804 = vmatpush.bf16.msrb.mxu3 %v8268_v36 }
  0x3b   :  { %v11267_v41 = vld [vmem:[%s17779_s1 + $0x74c] sm:$0xf0]  ;;  %v7851_v43 = vld [vmem:[%s17779_s1 + $0x420] sm:$0xf]  ;;  %v8124_v46 = vor.u32 %v11235_v39, %v8123_v38  ;;  %4766 = vmatpush.bf16.msrb.mxu0 %v7868_v42 }
  0x3c   :  { %v11167_v44 = vld [vmem:[%s17779_s1 + $0x42c] sm:$0xf0]  ;;  %v7979_v47 = vld [vmem:[%s17779_s1 + $0x520] sm:$0xf]  ;;  %v8252_v50 = vor.u32 %v11267_v41, %v8251_v40  ;;  %4779 = vmatpush.bf16.msrb.mxu1 %v7996_v45 }
  0x3d   :  { %v11199_v48 = vld [vmem:[%s17779_s1 + $0x52c] sm:$0xf0]  ;;  %v8107_v49 = vld [vmem:[%s17779_s1 + $0x620] sm:$0xf]  ;;  %v7852_v56 = vor.u32 %v11167_v44, %v7851_v43  ;;  %4792 = vmatpush.bf16.msrb.mxu2 %v8124_v46 }
  0x3e   :  { %v11231_v51 = vld [vmem:[%s17779_s1 + $0x62c] sm:$0xf0]  ;;  %v8235_v52 = vld [vmem:[%s17779_s1 + $0x720] sm:$0xf]  ;;  %v7980_v60 = vor.u32 %v11199_v48, %v7979_v47  ;;  %4805 = vmatpush.bf16.msrb.mxu3 %v8252_v50 }
  0x3f   :  { %v11263_v54 = vld [vmem:[%s17779_s1 + $0x72c] sm:$0xf0]  ;;  %v7835_v55 = vld [vmem:[%s17779_s1 + $0x400] sm:$0xf]  ;;  %v8108_v61 = vor.u32 %v11231_v51, %v8107_v49  ;;  %4767 = vmatpush.bf16.msrb.mxu0 %v7852_v56 }
  0x40   :  { %v11163_v57 = vld [vmem:[%s17779_s1 + $0x40c] sm:$0xf0]  ;;  %v7963_v58 = vld [vmem:[%s17779_s1 + $0x500] sm:$0xf]  ;;  %v8236_v1 = vor.u32 %v11263_v54, %v8235_v52  ;;  %4780 = vmatpush.bf16.msrb.mxu1 %v7980_v60 }
  0x41   :  { %v11195_v59 = vld [vmem:[%s17779_s1 + $0x50c] sm:$0xf0]  ;;  %v8091_v62 = vld [vmem:[%s17779_s1 + $0x600] sm:$0xf]  ;;  %v7836_v8 = vor.u32 %v11163_v57, %v7835_v55  ;;  %4793 = vmatpush.bf16.msrb.mxu2 %v8108_v61 }
  0x42   :  { %v11227_v63 = vld [vmem:[%s17779_s1 + $0x60c] sm:$0xf0]  ;;  %v8219_v0 = vld [vmem:[%s17779_s1 + $0x700] sm:$0xf]  ;;  %v7964_v12 = vor.u32 %v11195_v59, %v7963_v58  ;;  %4806 = vmatpush.bf16.msrb.mxu3 %v8236_v1 }
  0x43   :  { %v11259_v2 = vld [vmem:[%s17779_s1 + $0x70c] sm:$0xf0]  ;;  %v8459_v3 = vld [vmem:[%s17779_s1 + $0x8e0] sm:$0xf]  ;;  %v8092_v13 = vor.u32 %v11227_v63, %v8091_v62  ;;  %4768 = vmatpush.bf16.msrb.mxu0 %v7836_v8 }
  0x44   :  { %v11319_v4 = vld [vmem:[%s17779_s1 + $0x8ec] sm:$0xf0]  ;;  %v8587_v5 = vld [vmem:[%s17779_s1 + $0x9e0] sm:$0xf]  ;;  %v8220_v17 = vor.u32 %v11259_v2, %v8219_v0  ;;  %4781 = vmatpush.bf16.msrb.mxu1 %v7964_v12 }
  0x45   :  { %v11351_v6 = vld [vmem:[%s17779_s1 + $0x9ec] sm:$0xf0]  ;;  %v8715_v7 = vld [vmem:[%s17779_s1 + $0xae0] sm:$0xf]  ;;  %v8460_v18 = vor.u32 %v11319_v4, %v8459_v3  ;;  %4794 = vmatpush.bf16.msrb.mxu2 %v8092_v13 }
  0x46   :  { %v11383_v9 = vld [vmem:[%s17779_s1 + $0xaec] sm:$0xf0]  ;;  %v8843_v10 = vld [vmem:[%s17779_s1 + $0xbe0] sm:$0xf]  ;;  %v8588_v25 = vor.u32 %v11351_v6, %v8587_v5  ;;  %4807 = vmatpush.bf16.msrb.mxu3 %v8220_v17 }
  0x47   :  { %v11415_v11 = vld [vmem:[%s17779_s1 + $0xbec] sm:$0xf0]  ;;  %v8443_v14 = vld [vmem:[%s17779_s1 + $0x8c0] sm:$0xf]  ;;  %v8716_v28 = vor.u32 %v11383_v9, %v8715_v7  ;;  %4813 = vmatpush.bf16.msra.mxu0 %v8460_v18 }
  0x48   :  { %v11315_v15 = vld [vmem:[%s17779_s1 + $0x8cc] sm:$0xf0]  ;;  %v8571_v19 = vld [vmem:[%s17779_s1 + $0x9c0] sm:$0xf]  ;;  %v8844_v31 = vor.u32 %v11415_v11, %v8843_v10  ;;  %4826 = vmatpush.bf16.msra.mxu1 %v8588_v25 }
  0x49   :  { %v11347_v20 = vld [vmem:[%s17779_s1 + $0x9cc] sm:$0xf0]  ;;  %v12469_v22 = vld.sshfl [vmem:[#allocation1 + $0x20] sm:$0xff pattern:$0x73625140]  ;;  %v8444_v36 = vor.u32 %v11315_v15, %v8443_v14  ;;  %4839 = vmatpush.bf16.msra.mxu2 %v8716_v28 }
  0x4a   :  { %v12467_v21 = vld.sshfl [vmem:[#allocation1 + $0x30] sm:$0xff pattern:$0x73625140]  ;;  %v12471_v29 = vld.sshfl [vmem:[#allocation1 + $0x38] sm:$0xff pattern:$0x73625140]  ;;  %v8572_v37 = vor.u32 %v11347_v20, %v8571_v19  ;;  %4852 = vmatpush.bf16.msra.mxu3 %v8844_v31  ;;  %4769 = vmatmul.bf16.vlgmr.msrb.gmra.mxu0 %v12469_v22 }
  0x4b   :  { %v12473_v30 = vld.sshfl [vmem:[#allocation1 + $0x28] sm:$0xff pattern:$0x73625140]  ;;  %v8699_v32 = vld [vmem:[%s17779_s1 + $0xac0] sm:$0xf]  ;;  %4795 = vmatmul.bf16.vlgmr.msrb.gmra.mxu2 %v12467_v21  ;;  %4808 = vmatmul.bf16.vlgmr.msrb.gmra.mxu3 %v12471_v29 }
  0x4c   :  { %v11379_v33 = vld [vmem:[%s17779_s1 + $0xacc] sm:$0xf0]  ;;  %824 = vst [vmem:[#allocation1 + $0x20] ss:$4 sm:$0xff] %v37_v16  ;;  %v8827_v34 = vld [vmem:[%s17779_s1 + $0xbc0] sm:$0xf]  ;;  %4814 = vmatpush.bf16.msra.mxu0 %v8444_v36  ;;  %4782 = vmatmul.bf16.vlgmr.msrb.gmra.mxu1 %v12473_v30 }
  0x4d   :  { %v11411_v35 = vld [vmem:[%s17779_s1 + $0xbcc] sm:$0xf0]  ;;  %v8700_v38 = vor.u32 %v11379_v33, %v8699_v32  ;;  %v8427_v39 = vld [vmem:[%s17779_s1 + $0x8a0] sm:$0xf]  ;;  %4827 = vmatpush.bf16.msra.mxu1 %v8572_v37 }
  0x4e   :  { %v11311_v40 = vld [vmem:[%s17779_s1 + $0x8ac] sm:$0xf0]  ;;  %v8555_v41 = vld [vmem:[%s17779_s1 + $0x9a0] sm:$0xf]  ;;  %v8828_v42 = vor.u32 %v11411_v35, %v8827_v34 }
  0x4f   :  { %v11343_v43 = vld [vmem:[%s17779_s1 + $0x9ac] sm:$0xf0]  ;;  %v8683_v44 = vld [vmem:[%s17779_s1 + $0xaa0] sm:$0xf]  ;;  %v8428_v48 = vor.u32 %v11311_v40, %v8427_v39  ;;  %4840 = vmatpush.bf16.msra.mxu2 %v8700_v38 }
  0x50   :  { %v11375_v45 = vld [vmem:[%s17779_s1 + $0xaac] sm:$0xf0]  ;;  %v8811_v46 = vld [vmem:[%s17779_s1 + $0xba0] sm:$0xf]  ;;  %v8556_v49 = vor.u32 %v11343_v43, %v8555_v41  ;;  %4853 = vmatpush.bf16.msra.mxu3 %v8828_v42 }
  0x51   :  { %v11407_v47 = vld [vmem:[%s17779_s1 + $0xbac] sm:$0xf0]  ;;  %v8684_v50 = vor.u32 %v11375_v45, %v8683_v44  ;;  %v8411_v51 = vld [vmem:[%s17779_s1 + $0x880] sm:$0xf]  ;;  %4815 = vmatpush.bf16.msra.mxu0 %v8428_v48 }
  0x52   :  { %v11307_v52 = vld [vmem:[%s17779_s1 + $0x88c] sm:$0xf0]  ;;  %v8539_v53 = vld [vmem:[%s17779_s1 + $0x980] sm:$0xf]  ;;  %v8812_v54 = vor.u32 %v11407_v47, %v8811_v46  ;;  %4828 = vmatpush.bf16.msra.mxu1 %v8556_v49 }
  0x53   :  { %v11339_v55 = vld [vmem:[%s17779_s1 + $0x98c] sm:$0xf0]  ;;  %v8667_v56 = vld [vmem:[%s17779_s1 + $0xa80] sm:$0xf]  ;;  %v8412_v60 = vor.u32 %v11307_v52, %v8411_v51  ;;  %4841 = vmatpush.bf16.msra.mxu2 %v8684_v50 }
  0x54   :  { %v11371_v57 = vld [vmem:[%s17779_s1 + $0xa8c] sm:$0xf0]  ;;  %v8795_v58 = vld [vmem:[%s17779_s1 + $0xb80] sm:$0xf]  ;;  %v8540_v0 = vor.u32 %v11339_v55, %v8539_v53  ;;  %4854 = vmatpush.bf16.msra.mxu3 %v8812_v54 }
  0x55   :  { %v11403_v59 = vld [vmem:[%s17779_s1 + $0xb8c] sm:$0xf0]  ;;  %v8395_v61 = vld [vmem:[%s17779_s1 + $0x860] sm:$0xf]  ;;  %v8668_v1 = vor.u32 %v11371_v57, %v8667_v56  ;;  %4816 = vmatpush.bf16.msra.mxu0 %v8412_v60 }
  0x56   :  { %v11303_v62 = vld [vmem:[%s17779_s1 + $0x86c] sm:$0xf0]  ;;  %v8523_v63 = vld [vmem:[%s17779_s1 + $0x960] sm:$0xf]  ;;  %v8796_v5 = vor.u32 %v11403_v59, %v8795_v58  ;;  %4829 = vmatpush.bf16.msra.mxu1 %v8540_v0 }
  0x57   :  { %v11335_v2 = vld [vmem:[%s17779_s1 + $0x96c] sm:$0xf0]  ;;  %v8651_v3 = vld [vmem:[%s17779_s1 + $0xa60] sm:$0xf]  ;;  %v8396_v12 = vor.u32 %v11303_v62, %v8395_v61  ;;  %4842 = vmatpush.bf16.msra.mxu2 %v8668_v1 }
  0x58   :  { %v11367_v4 = vld [vmem:[%s17779_s1 + $0xa6c] sm:$0xf0]  ;;  %v8779_v6 = vld [vmem:[%s17779_s1 + $0xb60] sm:$0xf]  ;;  %v8524_v15 = vor.u32 %v11335_v2, %v8523_v63  ;;  %4855 = vmatpush.bf16.msra.mxu3 %v8796_v5 }
  0x59   :  { %v11399_v7 = vld [vmem:[%s17779_s1 + $0xb6c] sm:$0xf0]  ;;  %v38_v8 = vld [vmem:[%s17780_s0 + $0x20] sm:$0xff]  ;;  %v12573_v13 = vld.sshfl [vmem:[#allocation1 + $0x8] sm:$0xff pattern:$0x73625140]  ;;  %v8652_v16 = vor.u32 %v11367_v4, %v8651_v3  ;;  %4817 = vmatpush.bf16.msra.mxu0 %v8396_v12 }
  0x5a   :  { %v8379_v9 = vld [vmem:[%s17779_s1 + $0x840] sm:$0xf]  ;;  %v12571_v11 = vld.sshfl [vmem:[#allocation1 + $0x10] sm:$0xff pattern:$0x73625140]  ;;  %v8780_v19 = vor.u32 %v11399_v7, %v8779_v6  ;;  %4830 = vmatpush.bf16.msra.mxu1 %v8524_v15 }
  0x5b   :  { %v12569_v10 = vld.sshfl [vmem:[#allocation1] sm:$0xff pattern:$0x73625140]  ;;  %v12575_v14 = vld.sshfl [vmem:[#allocation1 + $0x18] sm:$0xff pattern:$0x73625140]  ;;  %4843 = vmatpush.bf16.msra.mxu2 %v8652_v16 }
  0x5c   :  { %v11299_v17 = vld [vmem:[%s17779_s1 + $0x84c] sm:$0xf0]  ;;  %v8507_v18 = vld [vmem:[%s17779_s1 + $0x940] sm:$0xf]  ;;  %834 = vst [vmem:[#allocation1] ss:$4 sm:$0xff] %v38_v8  ;;  %4856 = vmatpush.bf16.msra.mxu3 %v8780_v19 }
  0x5d   :  { %v11331_v20 = vld [vmem:[%s17779_s1 + $0x94c] sm:$0xf0]  ;;  %v8635_v25 = vld [vmem:[%s17779_s1 + $0xa40] sm:$0xf]  ;;  %v8380_v33 = vor.u32 %v11299_v17, %v8379_v9 }
  0x5e   :  { %v11363_v28 = vld [vmem:[%s17779_s1 + $0xa4c] sm:$0xf0]  ;;  %v8763_v31 = vld [vmem:[%s17779_s1 + $0xb40] sm:$0xf]  ;;  %v8508_v34 = vor.u32 %v11331_v20, %v8507_v18 }
  0x5f   :  { %v11395_v32 = vld [vmem:[%s17779_s1 + $0xb4c] sm:$0xf0]  ;;  %v8636_v35 = vor.u32 %v11363_v28, %v8635_v25  ;;  %v8363_v36 = vld [vmem:[%s17779_s1 + $0x820] sm:$0xf]  ;;  %4818 = vmatpush.bf16.msra.mxu0 %v8380_v33 }
  0x60   :  { %v11295_v37 = vld [vmem:[%s17779_s1 + $0x82c] sm:$0xf0]  ;;  %v8491_v38 = vld [vmem:[%s17779_s1 + $0x920] sm:$0xf]  ;;  %v8764_v39 = vor.u32 %v11395_v32, %v8763_v31  ;;  %4831 = vmatpush.bf16.msra.mxu1 %v8508_v34 }
  0x61   :  { %v11327_v40 = vld [vmem:[%s17779_s1 + $0x92c] sm:$0xf0]  ;;  %v8619_v41 = vld [vmem:[%s17779_s1 + $0xa20] sm:$0xf]  ;;  %v8364_v45 = vor.u32 %v11295_v37, %v8363_v36  ;;  %4844 = vmatpush.bf16.msra.mxu2 %v8636_v35 }
  0x62   :  { %v11359_v42 = vld [vmem:[%s17779_s1 + $0xa2c] sm:$0xf0]  ;;  %v8747_v43 = vld [vmem:[%s17779_s1 + $0xb20] sm:$0xf]  ;;  %v8492_v48 = vor.u32 %v11327_v40, %v8491_v38  ;;  %4857 = vmatpush.bf16.msra.mxu3 %v8764_v39 }
  0x63   :  { %v11391_v44 = vld [vmem:[%s17779_s1 + $0xb2c] sm:$0xf0]  ;;  %v8347_v46 = vld [vmem:[%s17779_s1 + $0x800] sm:$0xf]  ;;  %v8620_v49 = vor.u32 %v11359_v42, %v8619_v41  ;;  %4819 = vmatpush.bf16.msra.mxu0 %v8364_v45 }
  0x64   :  { %v11291_v47 = vld [vmem:[%s17779_s1 + $0x80c] sm:$0xf0]  ;;  %v8475_v50 = vld [vmem:[%s17779_s1 + $0x900] sm:$0xf]  ;;  %v8748_v53 = vor.u32 %v11391_v44, %v8747_v43  ;;  %4832 = vmatpush.bf16.msra.mxu1 %v8492_v48  ;;  %v39_v48 = vld [vmem:[%s17780_s0 + $0x28] sm:$0xff] }
  0x65   :  { %v11323_v51 = vld [vmem:[%s17779_s1 + $0x90c] sm:$0xf0]  ;;  %v8603_v52 = vld [vmem:[%s17779_s1 + $0xa00] sm:$0xf]  ;;  %v8348_v60 = vor.u32 %v11291_v47, %v8347_v46  ;;  %4845 = vmatpush.bf16.msra.mxu2 %v8620_v49 }
  0x66   :  { %v11355_v54 = vld [vmem:[%s17779_s1 + $0xa0c] sm:$0xf0]  ;;  %v8731_v55 = vld [vmem:[%s17779_s1 + $0xb00] sm:$0xf]  ;;  %v8476_v0 = vor.u32 %v11323_v51, %v8475_v50  ;;  %4858 = vmatpush.bf16.msra.mxu3 %v8748_v53 }
  0x67   :  { %v11387_v56 = vld [vmem:[%s17779_s1 + $0xb0c] sm:$0xf0]  ;;  %v8971_v57 = vld [vmem:[%s17779_s1 + $0xce0] sm:$0xf]  ;;  %v8604_v1 = vor.u32 %v11355_v54, %v8603_v52  ;;  %4820 = vmatpush.bf16.msra.mxu0 %v8348_v60 }
  0x68   :  { %v11447_v58 = vld [vmem:[%s17779_s1 + $0xcec] sm:$0xf0]  ;;  %v9099_v59 = vld [vmem:[%s17779_s1 + $0xde0] sm:$0xf]  ;;  %v8732_v4 = vor.u32 %v11387_v56, %v8731_v55  ;;  %4833 = vmatpush.bf16.msra.mxu1 %v8476_v0 }
  0x69   :  { %v11479_v61 = vld [vmem:[%s17779_s1 + $0xdec] sm:$0xf0]  ;;  %v9227_v62 = vld [vmem:[%s17779_s1 + $0xee0] sm:$0xf]  ;;  %v8972_v5 = vor.u32 %v11447_v58, %v8971_v57  ;;  %4846 = vmatpush.bf16.msra.mxu2 %v8604_v1 }
  0x6a   :  { %v11511_v63 = vld [vmem:[%s17779_s1 + $0xeec] sm:$0xf0]  ;;  %v9355_v2 = vld [vmem:[%s17779_s1 + $0xfe0] sm:$0xf]  ;;  %v9100_v6 = vor.u32 %v11479_v61, %v9099_v59  ;;  %4859 = vmatpush.bf16.msra.mxu3 %v8732_v4  ;;  %4821 = vmatmul.bf16.vlgmr.msra.gmra.mxu0 %v12569_v10 }
  0x6b   :  { %v11543_v3 = vld [vmem:[%s17779_s1 + $0xfec] sm:$0xf0]  ;;  %v9228_v7 = vor.u32 %v11511_v63, %v9227_v62  ;;  %v8955_v8 = vld [vmem:[%s17779_s1 + $0xcc0] sm:$0xf]  ;;  %4865 = vmatpush.bf16.msrb.mxu0 %v8972_v5  ;;  %4834 = vmatmul.bf16.vlgmr.msra.gmra.mxu1 %v12573_v13 }
  0x6c   :  { %v11443_v9 = vld [vmem:[%s17779_s1 + $0xccc] sm:$0xf0]  ;;  %v9083_v12 = vld [vmem:[%s17779_s1 + $0xdc0] sm:$0xf]  ;;  %v9356_v15 = vor.u32 %v11543_v3, %v9355_v2  ;;  %4878 = vmatpush.bf16.msrb.mxu1 %v9100_v6  ;;  %4847 = vmatmul.bf16.vlgmr.msra.gmra.mxu2 %v12571_v11 }
  0x6d   :  { %v11475_v16 = vld [vmem:[%s17779_s1 + $0xdcc] sm:$0xf0]  ;;  %v9211_v17 = vld [vmem:[%s17779_s1 + $0xec0] sm:$0xf]  ;;  %v8956_v25 = vor.u32 %v11443_v9, %v8955_v8  ;;  %4891 = vmatpush.bf16.msrb.mxu2 %v9228_v7  ;;  %4860 = vmatmul.bf16.vlgmr.msra.gmra.mxu3 %v12575_v14 }
  0x6e   :  { %v11507_v18 = vld [vmem:[%s17779_s1 + $0xecc] sm:$0xf0]  ;;  %v9339_v19 = vld [vmem:[%s17779_s1 + $0xfc0] sm:$0xf]  ;;  %v9084_v31 = vor.u32 %v11475_v16, %v9083_v12  ;;  %4904 = vmatpush.bf16.msrb.mxu3 %v9356_v15 }
  0x6f   :  { %v11539_v20 = vld [vmem:[%s17779_s1 + $0xfcc] sm:$0xf0]  ;;  %v8939_v28 = vld [vmem:[%s17779_s1 + $0xca0] sm:$0xf]  ;;  %v9212_v32 = vor.u32 %v11507_v18, %v9211_v17  ;;  %4866 = vmatpush.bf16.msrb.mxu0 %v8956_v25 }
  0x70   :  { %v11439_v33 = vld [vmem:[%s17779_s1 + $0xcac] sm:$0xf0]  ;;  %v9067_v34 = vld [vmem:[%s17779_s1 + $0xda0] sm:$0xf]  ;;  %v9340_v36 = vor.u32 %v11539_v20, %v9339_v19  ;;  %4879 = vmatpush.bf16.msrb.mxu1 %v9084_v31 }
  0x71   :  { %v11471_v35 = vld [vmem:[%s17779_s1 + $0xdac] sm:$0xf0]  ;;  %v9195_v37 = vld [vmem:[%s17779_s1 + $0xea0] sm:$0xf]  ;;  %v8940_v43 = vor.u32 %v11439_v33, %v8939_v28  ;;  %4892 = vmatpush.bf16.msrb.mxu2 %v9212_v32 }
  0x72   :  { %v11503_v38 = vld [vmem:[%s17779_s1 + $0xeac] sm:$0xf0]  ;;  %v9323_v39 = vld [vmem:[%s17779_s1 + $0xfa0] sm:$0xf]  ;;  %v9068_v49 = vor.u32 %v11471_v35, %v9067_v34  ;;  %4905 = vmatpush.bf16.msrb.mxu3 %v9340_v36 }
  0x73   :  { %v11535_v40 = vld [vmem:[%s17779_s1 + $0xfac] sm:$0xf0]  ;;  %v8923_v41 = vld [vmem:[%s17779_s1 + $0xc80] sm:$0xf]  ;;  %v9196_v50 = vor.u32 %v11503_v38, %v9195_v37  ;;  %4867 = vmatpush.bf16.msrb.mxu0 %v8940_v43 }
  0x74   :  { %v11435_v42 = vld [vmem:[%s17779_s1 + $0xc8c] sm:$0xf0]  ;;  %v9051_v44 = vld [vmem:[%s17779_s1 + $0xd80] sm:$0xf]  ;;  %v9324_v53 = vor.u32 %v11535_v40, %v9323_v39  ;;  %4880 = vmatpush.bf16.msrb.mxu1 %v9068_v49 }
  0x75   :  { %v11467_v45 = vld [vmem:[%s17779_s1 + $0xd8c] sm:$0xf0]  ;;  %v9179_v46 = vld [vmem:[%s17779_s1 + $0xe80] sm:$0xf]  ;;  %v8924_v58 = vor.u32 %v11435_v42, %v8923_v41  ;;  %4893 = vmatpush.bf16.msrb.mxu2 %v9196_v50 }
  0x76   :  { %v11499_v47 = vld [vmem:[%s17779_s1 + $0xe8c] sm:$0xf0]  ;;  %v12743_v51 = vld.sshfl [vmem:[#allocation1 + $0x20] sm:$0xff pattern:$0x73625140]  ;;  %v9052_v59 = vor.u32 %v11467_v45, %v9051_v44  ;;  %4906 = vmatpush.bf16.msrb.mxu3 %v9324_v53 }
  0x77   :  { %v12745_v52 = vld.sshfl [vmem:[#allocation1 + $0x30] sm:$0xff pattern:$0x73625140]  ;;  %v12747_v54 = vld.sshfl [vmem:[#allocation1 + $0x28] sm:$0xff pattern:$0x73625140]  ;;  %v9180_v60 = vor.u32 %v11499_v47, %v9179_v46  ;;  %4868 = vmatpush.bf16.msrb.mxu0 %v8924_v58 }
  0x78   :  { %v12749_v55 = vld.sshfl [vmem:[#allocation1 + $0x38] sm:$0xff pattern:$0x73625140]  ;;  %v9307_v56 = vld [vmem:[%s17779_s1 + $0xf80] sm:$0xf]  ;;  %4881 = vmatpush.bf16.msrb.mxu1 %v9052_v59 }
  0x79   :  { %v11531_v57 = vld [vmem:[%s17779_s1 + $0xf8c] sm:$0xf0]  ;;  %836 = vst [vmem:[#allocation1 + $0x20] ss:$4 sm:$0xff] %v39_v48  ;;  %v8907_v61 = vld [vmem:[%s17779_s1 + $0xc60] sm:$0xf]  ;;  %4894 = vmatpush.bf16.msrb.mxu2 %v9180_v60 }
  0x7a   :  { %v11431_v62 = vld [vmem:[%s17779_s1 + $0xc6c] sm:$0xf0]  ;;  %v9035_v63 = vld [vmem:[%s17779_s1 + $0xd60] sm:$0xf]  ;;  %v9308_v0 = vor.u32 %v11531_v57, %v9307_v56 }
  0x7b   :  { %v11463_v1 = vld [vmem:[%s17779_s1 + $0xd6c] sm:$0xf0]  ;;  %v9163_v2 = vld [vmem:[%s17779_s1 + $0xe60] sm:$0xf]  ;;  %v8908_v6 = vor.u32 %v11431_v62, %v8907_v61 }
  0x7c   :  { %v11495_v3 = vld [vmem:[%s17779_s1 + $0xe6c] sm:$0xf0]  ;;  %v9291_v4 = vld [vmem:[%s17779_s1 + $0xf60] sm:$0xf]  ;;  %v9036_v7 = vor.u32 %v11463_v1, %v9035_v63  ;;  %4907 = vmatpush.bf16.msrb.mxu3 %v9308_v0 }
  0x7d   :  { %v11527_v5 = vld [vmem:[%s17779_s1 + $0xf6c] sm:$0xf0]  ;;  %v9164_v8 = vor.u32 %v11495_v3, %v9163_v2  ;;  %v8891_v9 = vld [vmem:[%s17779_s1 + $0xc40] sm:$0xf]  ;;  %4869 = vmatpush.bf16.msrb.mxu0 %v8908_v6 }
  0x7e   :  { %v11427_v12 = vld [vmem:[%s17779_s1 + $0xc4c] sm:$0xf0]  ;;  %v9019_v15 = vld [vmem:[%s17779_s1 + $0xd40] sm:$0xf]  ;;  %v9292_v16 = vor.u32 %v11527_v5, %v9291_v4  ;;  %4882 = vmatpush.bf16.msrb.mxu1 %v9036_v7 }
  0x7f   :  { %v11459_v17 = vld [vmem:[%s17779_s1 + $0xd4c] sm:$0xf0]  ;;  %v9147_v18 = vld [vmem:[%s17779_s1 + $0xe40] sm:$0xf]  ;;  %v8892_v28 = vor.u32 %v11427_v12, %v8891_v9  ;;  %4895 = vmatpush.bf16.msrb.mxu2 %v9164_v8 }
  0x80   :  { %v11491_v19 = vld [vmem:[%s17779_s1 + $0xe4c] sm:$0xf0]  ;;  %v9275_v20 = vld [vmem:[%s17779_s1 + $0xf40] sm:$0xf]  ;;  %v9020_v31 = vor.u32 %v11459_v17, %v9019_v15  ;;  %4908 = vmatpush.bf16.msrb.mxu3 %v9292_v16 }
  0x81   :  { %v11523_v25 = vld [vmem:[%s17779_s1 + $0xf4c] sm:$0xf0]  ;;  %v9148_v32 = vor.u32 %v11491_v19, %v9147_v18  ;;  %v8875_v33 = vld [vmem:[%s17779_s1 + $0xc20] sm:$0xf]  ;;  %4870 = vmatpush.bf16.msrb.mxu0 %v8892_v28 }
  0x82   :  { %v11423_v34 = vld [vmem:[%s17779_s1 + $0xc2c] sm:$0xf0]  ;;  %v9003_v35 = vld [vmem:[%s17779_s1 + $0xd20] sm:$0xf]  ;;  %v9276_v36 = vor.u32 %v11523_v25, %v9275_v20  ;;  %4883 = vmatpush.bf16.msrb.mxu1 %v9020_v31 }
  0x83   :  { %v11455_v37 = vld [vmem:[%s17779_s1 + $0xd2c] sm:$0xf0]  ;;  %v9131_v38 = vld [vmem:[%s17779_s1 + $0xe20] sm:$0xf]  ;;  %v8876_v42 = vor.u32 %v11423_v34, %v8875_v33  ;;  %4896 = vmatpush.bf16.msrb.mxu2 %v9148_v32 }
  0x84   :  { %v11487_v39 = vld [vmem:[%s17779_s1 + $0xe2c] sm:$0xf0]  ;;  %v9259_v40 = vld [vmem:[%s17779_s1 + $0xf20] sm:$0xf]  ;;  %v9004_v45 = vor.u32 %v11455_v37, %v9003_v35  ;;  %4909 = vmatpush.bf16.msrb.mxu3 %v9276_v36 }
  0x85   :  { %v11519_v41 = vld [vmem:[%s17779_s1 + $0xf2c] sm:$0xf0]  ;;  %v8859_v43 = vld [vmem:[%s17779_s1 + $0xc00] sm:$0xf]  ;;  %v9132_v46 = vor.u32 %v11487_v39, %v9131_v38  ;;  %4871 = vmatpush.bf16.msrb.mxu0 %v8876_v42 }
  0x86   :  { %v11419_v44 = vld [vmem:[%s17779_s1 + $0xc0c] sm:$0xf0]  ;;  %v8987_v47 = vld [vmem:[%s17779_s1 + $0xd00] sm:$0xf]  ;;  %v9260_v50 = vor.u32 %v11519_v41, %v9259_v40  ;;  %4884 = vmatpush.bf16.msrb.mxu1 %v9004_v45 }
  0x87   :  { %v11451_v48 = vld [vmem:[%s17779_s1 + $0xd0c] sm:$0xf0]  ;;  %v9115_v49 = vld [vmem:[%s17779_s1 + $0xe00] sm:$0xf]  ;;  %v8860_v61 = vor.u32 %v11419_v44, %v8859_v43  ;;  %4897 = vmatpush.bf16.msrb.mxu2 %v9132_v46 }
  0x88   :  { %v11483_v53 = vld [vmem:[%s17779_s1 + $0xe0c] sm:$0xf0]  ;;  %v9243_v56 = vld [vmem:[%s17779_s1 + $0xf00] sm:$0xf]  ;;  %v8988_v1 = vor.u32 %v11451_v48, %v8987_v47  ;;  %4910 = vmatpush.bf16.msrb.mxu3 %v9260_v50 }
  0x89   :  { %v11515_v57 = vld [vmem:[%s17779_s1 + $0xf0c] sm:$0xf0]  ;;  %v9483_v58 = vld [vmem:[%s17779_s1 + $0x10e0] sm:$0xf]  ;;  %v9116_v2 = vor.u32 %v11483_v53, %v9115_v49  ;;  %4872 = vmatpush.bf16.msrb.mxu0 %v8860_v61 }
  0x8a   :  { %v11575_v59 = vld [vmem:[%s17779_s1 + $0x10ec] sm:$0xf0]  ;;  %v9611_v60 = vld [vmem:[%s17779_s1 + $0x11e0] sm:$0xf]  ;;  %v9244_v5 = vor.u32 %v11515_v57, %v9243_v56  ;;  %4885 = vmatpush.bf16.msrb.mxu1 %v8988_v1 }
  0x8b   :  { %v11607_v62 = vld [vmem:[%s17779_s1 + $0x11ec] sm:$0xf0]  ;;  %v9739_v63 = vld [vmem:[%s17779_s1 + $0x12e0] sm:$0xf]  ;;  %v9484_v6 = vor.u32 %v11575_v59, %v9483_v58  ;;  %4898 = vmatpush.bf16.msrb.mxu2 %v9116_v2 }
  0x8c   :  { %v11639_v0 = vld [vmem:[%s17779_s1 + $0x12ec] sm:$0xf0]  ;;  %v9867_v3 = vld [vmem:[%s17779_s1 + $0x13e0] sm:$0xf]  ;;  %v9612_v7 = vor.u32 %v11607_v62, %v9611_v60  ;;  %4911 = vmatpush.bf16.msrb.mxu3 %v9244_v5  ;;  %4873 = vmatmul.bf16.vlgmr.msrb.gmra.mxu0 %v12743_v51 }
  0x8d   :  { %v11671_v4 = vld [vmem:[%s17779_s1 + $0x13ec] sm:$0xf0]  ;;  %v9740_v8 = vor.u32 %v11639_v0, %v9739_v63  ;;  %v9467_v9 = vld [vmem:[%s17779_s1 + $0x10c0] sm:$0xf]  ;;  %4917 = vmatpush.bf16.msra.mxu0 %v9484_v6  ;;  %4886 = vmatmul.bf16.vlgmr.msrb.gmra.mxu1 %v12747_v54 }
  0x8e   :  { %v11571_v12 = vld [vmem:[%s17779_s1 + $0x10cc] sm:$0xf0]  ;;  %v9595_v15 = vld [vmem:[%s17779_s1 + $0x11c0] sm:$0xf]  ;;  %v9868_v16 = vor.u32 %v11671_v4, %v9867_v3  ;;  %4930 = vmatpush.bf16.msra.mxu1 %v9612_v7  ;;  %4899 = vmatmul.bf16.vlgmr.msrb.gmra.mxu2 %v12745_v52 }
  0x8f   :  { %v11603_v17 = vld [vmem:[%s17779_s1 + $0x11cc] sm:$0xf0]  ;;  %v9723_v18 = vld [vmem:[%s17779_s1 + $0x12c0] sm:$0xf]  ;;  %v9468_v28 = vor.u32 %v11571_v12, %v9467_v9  ;;  %4943 = vmatpush.bf16.msra.mxu2 %v9740_v8  ;;  %4912 = vmatmul.bf16.vlgmr.msrb.gmra.mxu3 %v12749_v55 }
  0x90   :  { %v11635_v19 = vld [vmem:[%s17779_s1 + $0x12cc] sm:$0xf0]  ;;  %v9851_v20 = vld [vmem:[%s17779_s1 + $0x13c0] sm:$0xf]  ;;  %v9596_v31 = vor.u32 %v11603_v17, %v9595_v15  ;;  %4956 = vmatpush.bf16.msra.mxu3 %v9868_v16 }
  0x91   :  { %v11667_v25 = vld [vmem:[%s17779_s1 + $0x13cc] sm:$0xf0]  ;;  %v9724_v32 = vor.u32 %v11635_v19, %v9723_v18  ;;  %v9451_v33 = vld [vmem:[%s17779_s1 + $0x10a0] sm:$0xf]  ;;  %4918 = vmatpush.bf16.msra.mxu0 %v9468_v28 }
  0x92   :  { %v11567_v34 = vld [vmem:[%s17779_s1 + $0x10ac] sm:$0xf0]  ;;  %v9579_v35 = vld [vmem:[%s17779_s1 + $0x11a0] sm:$0xf]  ;;  %v9852_v36 = vor.u32 %v11667_v25, %v9851_v20  ;;  %4931 = vmatpush.bf16.msra.mxu1 %v9596_v31 }
  0x93   :  { %v11599_v37 = vld [vmem:[%s17779_s1 + $0x11ac] sm:$0xf0]  ;;  %v9707_v38 = vld [vmem:[%s17779_s1 + $0x12a0] sm:$0xf]  ;;  %v9452_v42 = vor.u32 %v11567_v34, %v9451_v33  ;;  %4944 = vmatpush.bf16.msra.mxu2 %v9724_v32 }
  0x94   :  { %v11631_v39 = vld [vmem:[%s17779_s1 + $0x12ac] sm:$0xf0]  ;;  %v9835_v40 = vld [vmem:[%s17779_s1 + $0x13a0] sm:$0xf]  ;;  %v9580_v43 = vor.u32 %v11599_v37, %v9579_v35  ;;  %4957 = vmatpush.bf16.msra.mxu3 %v9852_v36 }
  0x95   :  { %v11663_v41 = vld [vmem:[%s17779_s1 + $0x13ac] sm:$0xf0]  ;;  %v9708_v44 = vor.u32 %v11631_v39, %v9707_v38  ;;  %v9435_v45 = vld [vmem:[%s17779_s1 + $0x1080] sm:$0xf]  ;;  %4919 = vmatpush.bf16.msra.mxu0 %v9452_v42 }
  0x96   :  { %v11563_v46 = vld [vmem:[%s17779_s1 + $0x108c] sm:$0xf0]  ;;  %v9563_v47 = vld [vmem:[%s17779_s1 + $0x1180] sm:$0xf]  ;;  %v9836_v48 = vor.u32 %v11663_v41, %v9835_v40  ;;  %4932 = vmatpush.bf16.msra.mxu1 %v9580_v43 }
  0x97   :  { %v11595_v49 = vld [vmem:[%s17779_s1 + $0x118c] sm:$0xf0]  ;;  %v9691_v50 = vld [vmem:[%s17779_s1 + $0x1280] sm:$0xf]  ;;  %v9436_v58 = vor.u32 %v11563_v46, %v9435_v45  ;;  %4945 = vmatpush.bf16.msra.mxu2 %v9708_v44 }
  0x98   :  { %v11627_v53 = vld [vmem:[%s17779_s1 + $0x128c] sm:$0xf0]  ;;  %v9819_v56 = vld [vmem:[%s17779_s1 + $0x1380] sm:$0xf]  ;;  %v9564_v59 = vor.u32 %v11595_v49, %v9563_v47  ;;  %4958 = vmatpush.bf16.msra.mxu3 %v9836_v48 }
  0x99   :  { %v11659_v57 = vld [vmem:[%s17779_s1 + $0x138c] sm:$0xf0]  ;;  %v9692_v60 = vor.u32 %v11627_v53, %v9691_v50  ;;  %v9419_v61 = vld [vmem:[%s17779_s1 + $0x1060] sm:$0xf]  ;;  %4920 = vmatpush.bf16.msra.mxu0 %v9436_v58 }
  0x9a   :  { %v11559_v62 = vld [vmem:[%s17779_s1 + $0x106c] sm:$0xf0]  ;;  %v9547_v63 = vld [vmem:[%s17779_s1 + $0x1160] sm:$0xf]  ;;  %v9820_v0 = vor.u32 %v11659_v57, %v9819_v56  ;;  %4933 = vmatpush.bf16.msra.mxu1 %v9564_v59 }
  0x9b   :  { %v11591_v1 = vld [vmem:[%s17779_s1 + $0x116c] sm:$0xf0]  ;;  %v9675_v2 = vld [vmem:[%s17779_s1 + $0x1260] sm:$0xf]  ;;  %v9420_v6 = vor.u32 %v11559_v62, %v9419_v61  ;;  %4946 = vmatpush.bf16.msra.mxu2 %v9692_v60 }
  0x9c   :  { %v11623_v3 = vld [vmem:[%s17779_s1 + $0x126c] sm:$0xf0]  ;;  %v9803_v4 = vld [vmem:[%s17779_s1 + $0x1360] sm:$0xf]  ;;  %v9548_v7 = vor.u32 %v11591_v1, %v9547_v63  ;;  %4959 = vmatpush.bf16.msra.mxu3 %v9820_v0 }
  0x9d   :  { %v11655_v5 = vld [vmem:[%s17779_s1 + $0x136c] sm:$0xf0]  ;;  %v9676_v8 = vor.u32 %v11623_v3, %v9675_v2  ;;  %v9403_v9 = vld [vmem:[%s17779_s1 + $0x1040] sm:$0xf]  ;;  %4921 = vmatpush.bf16.msra.mxu0 %v9420_v6 }
  0x9e   :  { %v11555_v12 = vld [vmem:[%s17779_s1 + $0x104c] sm:$0xf0]  ;;  %v9531_v15 = vld [vmem:[%s17779_s1 + $0x1140] sm:$0xf]  ;;  %v9804_v16 = vor.u32 %v11655_v5, %v9803_v4  ;;  %4934 = vmatpush.bf16.msra.mxu1 %v9548_v7 }
  0x9f   :  { %v11587_v17 = vld [vmem:[%s17779_s1 + $0x114c] sm:$0xf0]  ;;  %v9659_v18 = vld [vmem:[%s17779_s1 + $0x1240] sm:$0xf]  ;;  %v9404_v28 = vor.u32 %v11555_v12, %v9403_v9  ;;  %4947 = vmatpush.bf16.msra.mxu2 %v9676_v8 }
  0xa0   :  { %v11619_v19 = vld [vmem:[%s17779_s1 + $0x124c] sm:$0xf0]  ;;  %v9787_v20 = vld [vmem:[%s17779_s1 + $0x1340] sm:$0xf]  ;;  %v9532_v31 = vor.u32 %v11587_v17, %v9531_v15  ;;  %4960 = vmatpush.bf16.msra.mxu3 %v9804_v16 }
  0xa1   :  { %v11651_v25 = vld [vmem:[%s17779_s1 + $0x134c] sm:$0xf0]  ;;  %v9660_v32 = vor.u32 %v11619_v19, %v9659_v18  ;;  %v9387_v33 = vld [vmem:[%s17779_s1 + $0x1020] sm:$0xf]  ;;  %4922 = vmatpush.bf16.msra.mxu0 %v9404_v28 }
  0xa2   :  { %v11551_v34 = vld [vmem:[%s17779_s1 + $0x102c] sm:$0xf0]  ;;  %v9515_v35 = vld [vmem:[%s17779_s1 + $0x1120] sm:$0xf]  ;;  %v9788_v36 = vor.u32 %v11651_v25, %v9787_v20  ;;  %4935 = vmatpush.bf16.msra.mxu1 %v9532_v31 }
  0xa3   :  { %v11583_v37 = vld [vmem:[%s17779_s1 + $0x112c] sm:$0xf0]  ;;  %v9643_v38 = vld [vmem:[%s17779_s1 + $0x1220] sm:$0xf]  ;;  %v9388_v42 = vor.u32 %v11551_v34, %v9387_v33  ;;  %4948 = vmatpush.bf16.msra.mxu2 %v9660_v32 }
  0xa4   :  { %v11615_v39 = vld [vmem:[%s17779_s1 + $0x122c] sm:$0xf0]  ;;  %v9771_v40 = vld [vmem:[%s17779_s1 + $0x1320] sm:$0xf]  ;;  %v9516_v45 = vor.u32 %v11583_v37, %v9515_v35  ;;  %4961 = vmatpush.bf16.msra.mxu3 %v9788_v36 }
  0xa5   :  { %v11647_v41 = vld [vmem:[%s17779_s1 + $0x132c] sm:$0xf0]  ;;  %v9371_v43 = vld [vmem:[%s17779_s1 + $0x1000] sm:$0xf]  ;;  %v9644_v46 = vor.u32 %v11615_v39, %v9643_v38  ;;  %4923 = vmatpush.bf16.msra.mxu0 %v9388_v42 }
  0xa6   :  { %v11547_v44 = vld [vmem:[%s17779_s1 + $0x100c] sm:$0xf0]  ;;  %v9499_v47 = vld [vmem:[%s17779_s1 + $0x1100] sm:$0xf]  ;;  %v9772_v50 = vor.u32 %v11647_v41, %v9771_v40  ;;  %4936 = vmatpush.bf16.msra.mxu1 %v9516_v45 }
  0xa7   :  { %v11579_v48 = vld [vmem:[%s17779_s1 + $0x110c] sm:$0xf0]  ;;  %v9627_v49 = vld [vmem:[%s17779_s1 + $0x1200] sm:$0xf]  ;;  %v9372_v61 = vor.u32 %v11547_v44, %v9371_v43  ;;  %4949 = vmatpush.bf16.msra.mxu2 %v9644_v46 }
  0xa8   :  { %v11611_v53 = vld [vmem:[%s17779_s1 + $0x120c] sm:$0xf0]  ;;  %v9755_v56 = vld [vmem:[%s17779_s1 + $0x1300] sm:$0xf]  ;;  %v9500_v1 = vor.u32 %v11579_v48, %v9499_v47  ;;  %4962 = vmatpush.bf16.msra.mxu3 %v9772_v50 }
  0xa9   :  { %v11643_v57 = vld [vmem:[%s17779_s1 + $0x130c] sm:$0xf0]  ;;  %v9995_v58 = vld [vmem:[%s17779_s1 + $0x14e0] sm:$0xf]  ;;  %v9628_v2 = vor.u32 %v11611_v53, %v9627_v49  ;;  %4924 = vmatpush.bf16.msra.mxu0 %v9372_v61 }
  0xaa   :  { %v11703_v59 = vld [vmem:[%s17779_s1 + $0x14ec] sm:$0xf0]  ;;  %v10123_v60 = vld [vmem:[%s17779_s1 + $0x15e0] sm:$0xf]  ;;  %v9756_v5 = vor.u32 %v11643_v57, %v9755_v56  ;;  %4937 = vmatpush.bf16.msra.mxu1 %v9500_v1 }
  0xab   :  { %v11735_v62 = vld [vmem:[%s17779_s1 + $0x15ec] sm:$0xf0]  ;;  %v10251_v63 = vld [vmem:[%s17779_s1 + $0x16e0] sm:$0xf]  ;;  %v9996_v6 = vor.u32 %v11703_v59, %v9995_v58  ;;  %4950 = vmatpush.bf16.msra.mxu2 %v9628_v2 }
  0xac   :  { %v11767_v0 = vld [vmem:[%s17779_s1 + $0x16ec] sm:$0xf0]  ;;  %v10379_v3 = vld [vmem:[%s17779_s1 + $0x17e0] sm:$0xf]  ;;  %v10124_v7 = vor.u32 %v11735_v62, %v10123_v60  ;;  %4963 = vmatpush.bf16.msra.mxu3 %v9756_v5 }
  0xad   :  { %v11799_v4 = vld [vmem:[%s17779_s1 + $0x17ec] sm:$0xf0]  ;;  %v10252_v8 = vor.u32 %v11767_v0, %v10251_v63  ;;  %v837_v9 = vld.sshfl [vmem:[#allocation1] sm:$0xff pattern:$0x73625140]  ;;  %4969 = vmatpush.bf16.msrb.mxu0 %v9996_v6 }
  0xae   :  { %v9979_v12 = vld [vmem:[%s17779_s1 + $0x14c0] sm:$0xf]  ;;  %v11699_v15 = vld [vmem:[%s17779_s1 + $0x14cc] sm:$0xf0]  ;;  %v10380_v17 = vor.u32 %v11799_v4, %v10379_v3  ;;  %4982 = vmatpush.bf16.msrb.mxu1 %v10124_v7  ;;  %4925 = vmatmul.bf16.vlgmr.msra.gmra.mxu0 %v837_v9 }
  0xaf   :  { %v10107_v16 = vld [vmem:[%s17779_s1 + $0x15c0] sm:$0xf]  ;;  %v839_v18 = vld.sshfl [vmem:[#allocation1 + $0x10] sm:$0xff pattern:$0x73625140]  ;;  %v9980_v34 = vor.u32 %v11699_v15, %v9979_v12  ;;  %4995 = vmatpush.bf16.msrb.mxu2 %v10252_v8 }
  0xb0   :  { %v11731_v19 = vld [vmem:[%s17779_s1 + $0x15cc] sm:$0xf0]  ;;  %v10235_v20 = vld [vmem:[%s17779_s1 + $0x16c0] sm:$0xf]  ;;  %5008 = vmatpush.bf16.msrb.mxu3 %v10380_v17  ;;  %4951 = vmatmul.bf16.vlgmr.msra.gmra.mxu2 %v839_v18 }
  0xb1   :  { %v11763_v25 = vld [vmem:[%s17779_s1 + $0x16cc] sm:$0xf0]  ;;  %v10363_v28 = vld [vmem:[%s17779_s1 + $0x17c0] sm:$0xf]  ;;  %v10108_v35 = vor.u32 %v11731_v19, %v10107_v16  ;;  %4970 = vmatpush.bf16.msrb.mxu0 %v9980_v34 }
  0xb2   :  { %v11795_v31 = vld [vmem:[%s17779_s1 + $0x17cc] sm:$0xf0]  ;;  %v838_v32 = vld.sshfl [vmem:[#allocation1 + $0x8] sm:$0xff pattern:$0x73625140]  ;;  %v10236_v36 = vor.u32 %v11763_v25, %v10235_v20 }
  0xb3   :  { %v840_v33 = vld.sshfl [vmem:[#allocation1 + $0x18] sm:$0xff pattern:$0x73625140]  ;;  %v9963_v37 = vld [vmem:[%s17779_s1 + $0x14a0] sm:$0xf]  ;;  %v10364_v40 = vor.u32 %v11795_v31, %v10363_v28  ;;  %4938 = vmatmul.bf16.vlgmr.msra.gmra.mxu1 %v838_v32 }
  0xb4   :  { %v11695_v38 = vld [vmem:[%s17779_s1 + $0x14ac] sm:$0xf0]  ;;  %v10091_v39 = vld [vmem:[%s17779_s1 + $0x15a0] sm:$0xf]  ;;  %4964 = vmatmul.bf16.vlgmr.msra.gmra.mxu3 %v840_v33  ;;  %4983 = vmatpush.bf16.msrb.mxu1 %v10108_v35  ;;  %v4718_v35 = vpop.f32.mrf.mxu0 }
  0xb5   :  { %v11727_v41 = vld [vmem:[%s17779_s1 + $0x15ac] sm:$0xf0]  ;;  %v10219_v42 = vld [vmem:[%s17779_s1 + $0x16a0] sm:$0xf]  ;;  %v9964_v46 = vor.u32 %v11695_v38, %v9963_v37  ;;  %4996 = vmatpush.bf16.msrb.mxu2 %v10236_v36  ;;  %5009 = vmatpush.bf16.msrb.mxu3 %v10364_v40 }
  0xb6   :  { %v11759_v43 = vld [vmem:[%s17779_s1 + $0x16ac] sm:$0xf0]  ;;  %v10347_v44 = vld [vmem:[%s17779_s1 + $0x17a0] sm:$0xf]  ;;  %v10092_v47 = vor.u32 %v11727_v41, %v10091_v39  ;;  %v4731_v41 = vpop.f32.mrf.mxu1 }
  0xb7   :  { %v11791_v45 = vld [vmem:[%s17779_s1 + $0x17ac] sm:$0xf0]  ;;  %v10220_v48 = vor.u32 %v11759_v43, %v10219_v42  ;;  %v9947_v49 = vld [vmem:[%s17779_s1 + $0x1480] sm:$0xf]  ;;  %4971 = vmatpush.bf16.msrb.mxu0 %v9964_v46  ;;  %v4732_v46 = vadd.f32 %v4731_v41, %v4718_v35  ;;  %v11057_v35 = vld [vmem:[%s17779_s1 + $0xc4] sm:$0xf] }
  0xb8   :  { %v11691_v50 = vld [vmem:[%s17779_s1 + $0x148c] sm:$0xf0]  ;;  %v10075_v53 = vld [vmem:[%s17779_s1 + $0x1580] sm:$0xf]  ;;  %v10348_v56 = vor.u32 %v11791_v45, %v10347_v44  ;;  %4984 = vmatpush.bf16.msrb.mxu1 %v10092_v47  ;;  %v11121_v41 = vld [vmem:[%s17779_s1 + $0x2c4] sm:$0xf] }
  0xb9   :  { %v11723_v57 = vld [vmem:[%s17779_s1 + $0x158c] sm:$0xf0]  ;;  %v10203_v58 = vld [vmem:[%s17779_s1 + $0x1680] sm:$0xf]  ;;  %v9948_v62 = vor.u32 %v11691_v50, %v9947_v49  ;;  %4997 = vmatpush.bf16.msrb.mxu2 %v10220_v48 }
  0xba   :  { %v11755_v59 = vld [vmem:[%s17779_s1 + $0x168c] sm:$0xf0]  ;;  %v10331_v60 = vld [vmem:[%s17779_s1 + $0x1780] sm:$0xf]  ;;  %v10076_v63 = vor.u32 %v11723_v57, %v10075_v53  ;;  %5010 = vmatpush.bf16.msrb.mxu3 %v10348_v56 }
  0xbb   :  { %v11787_v61 = vld [vmem:[%s17779_s1 + $0x178c] sm:$0xf0]  ;;  %v10204_v0 = vor.u32 %v11755_v59, %v10203_v58  ;;  %v9931_v1 = vld [vmem:[%s17779_s1 + $0x1460] sm:$0xf]  ;;  %4972 = vmatpush.bf16.msrb.mxu0 %v9948_v62 }
  0xbc   :  { %v11687_v2 = vld [vmem:[%s17779_s1 + $0x146c] sm:$0xf0]  ;;  %v10059_v3 = vld [vmem:[%s17779_s1 + $0x1560] sm:$0xf]  ;;  %v10332_v4 = vor.u32 %v11787_v61, %v10331_v60  ;;  %4985 = vmatpush.bf16.msrb.mxu1 %v10076_v63  ;;  %v4744_v61 = vpop.f32.mrf.mxu2 }
  0xbd   :  { %v11719_v5 = vld [vmem:[%s17779_s1 + $0x156c] sm:$0xf0]  ;;  %v10187_v6 = vld [vmem:[%s17779_s1 + $0x1660] sm:$0xf]  ;;  %v9932_v12 = vor.u32 %v11687_v2, %v9931_v1  ;;  %4998 = vmatpush.bf16.msrb.mxu2 %v10204_v0  ;;  %v4745_v2 = vadd.f32 %v4744_v61, %v4732_v46  ;;  %v11117_v61 = vld [vmem:[%s17779_s1 + $0x2a4] sm:$0xf] }
  0xbe   :  { %v11751_v7 = vld [vmem:[%s17779_s1 + $0x166c] sm:$0xf0]  ;;  %v10315_v8 = vld [vmem:[%s17779_s1 + $0x1760] sm:$0xf]  ;;  %v10060_v15 = vor.u32 %v11719_v5, %v10059_v3  ;;  %5011 = vmatpush.bf16.msrb.mxu3 %v10332_v4  ;;  %v4757_v3 = vpop.f32.mrf.mxu3  ;;  %v11061_v4 = vld [vmem:[%s17779_s1 + $0xe4] sm:$0xf] }
  0xbf   :  { %v11783_v9 = vld [vmem:[%s17779_s1 + $0x176c] sm:$0xf0]  ;;  %v10188_v16 = vor.u32 %v11751_v7, %v10187_v6  ;;  %v9915_v17 = vld [vmem:[%s17779_s1 + $0x1440] sm:$0xf]  ;;  %4973 = vmatpush.bf16.msrb.mxu0 %v9932_v12  ;;  %v7437_v5 = vld [vmem:[%s17779_s1 + $0xf0] sm:$0xf0] }
  0xc0   :  { %v11683_v18 = vld [vmem:[%s17779_s1 + $0x144c] sm:$0xf0]  ;;  %v10043_v19 = vld [vmem:[%s17779_s1 + $0x1540] sm:$0xf]  ;;  %v10316_v20 = vor.u32 %v11783_v9, %v10315_v8  ;;  %4986 = vmatpush.bf16.msrb.mxu1 %v10060_v15  ;;  %v11093_v6 = vld [vmem:[%s17779_s1 + $0x1e4] sm:$0xf]  ;;  %v13259_v15 = vadd.f32 %v4757_v3, %v4745_v2 }
  0xc1   :  { %v11715_v25 = vld [vmem:[%s17779_s1 + $0x154c] sm:$0xf0]  ;;  %v10171_v28 = vld [vmem:[%s17779_s1 + $0x1640] sm:$0xf]  ;;  %v9916_v34 = vor.u32 %v11683_v18, %v9915_v17  ;;  %4999 = vmatpush.bf16.msrb.mxu2 %v10188_v16  ;;  %v7565_v8 = vld [vmem:[%s17779_s1 + $0x1f0] sm:$0xf0]  ;;  %v4720_v16 = vpop.f32.mrf.mxu0 }
  0xc2   :  { %v11747_v31 = vld [vmem:[%s17779_s1 + $0x164c] sm:$0xf0]  ;;  %v10299_v32 = vld [vmem:[%s17779_s1 + $0x1740] sm:$0xf]  ;;  %v10044_v36 = vor.u32 %v11715_v25, %v10043_v19  ;;  %5012 = vmatpush.bf16.msrb.mxu3 %v10316_v20  ;;  %v11125_v9 = vld [vmem:[%s17779_s1 + $0x2e4] sm:$0xf]  ;;  %v4733_v25 = vpop.f32.mrf.mxu1 }
  0xc3   :  { %v11779_v33 = vld [vmem:[%s17779_s1 + $0x174c] sm:$0xf0]  ;;  %v10172_v37 = vor.u32 %v11747_v31, %v10171_v28  ;;  %v9899_v38 = vld [vmem:[%s17779_s1 + $0x1420] sm:$0xf]  ;;  %4974 = vmatpush.bf16.msrb.mxu0 %v9916_v34  ;;  %v7693_v12 = vld [vmem:[%s17779_s1 + $0x2f0] sm:$0xf0]  ;;  %v7440_v31 = vor.u32 %v11061_v4, %v7437_v5 }
  0xc4   :  { %v11679_v39 = vld [vmem:[%s17779_s1 + $0x142c] sm:$0xf0]  ;;  %v10027_v40 = vld [vmem:[%s17779_s1 + $0x1520] sm:$0xf]  ;;  %v10300_v42 = vor.u32 %v11779_v33, %v10299_v32  ;;  %4987 = vmatpush.bf16.msrb.mxu1 %v10044_v36  ;;  %v11157_v19 = vld [vmem:[%s17779_s1 + $0x3e4] sm:$0xf]  ;;  %v7568_v32 = vor.u32 %v11093_v6, %v7565_v8  ;;  %v7696_v33 = vor.u32 %v11125_v9, %v7693_v12 }
  0xc5   :  { %v11711_v43 = vld [vmem:[%s17779_s1 + $0x152c] sm:$0xf0]  ;;  %v10155_v44 = vld [vmem:[%s17779_s1 + $0x1620] sm:$0xf]  ;;  %v9900_v49 = vor.u32 %v11679_v39, %v9899_v38  ;;  %5000 = vmatpush.bf16.msrb.mxu2 %v10172_v37  ;;  %v7821_v20 = vld [vmem:[%s17779_s1 + $0x3f0] sm:$0xf0] }
  0xc6   :  { %v11743_v45 = vld [vmem:[%s17779_s1 + $0x162c] sm:$0xf0]  ;;  %v10283_v47 = vld [vmem:[%s17779_s1 + $0x1720] sm:$0xf]  ;;  %v10028_v56 = vor.u32 %v11711_v43, %v10027_v40  ;;  %5013 = vmatpush.bf16.msrb.mxu3 %v10300_v42  ;;  %v7421_v36 = vld [vmem:[%s17779_s1 + $0xd0] sm:$0xf0]  ;;  %v7824_v38 = vor.u32 %v11157_v19, %v7821_v20 }
  0xc7   :  { %v11775_v48 = vld [vmem:[%s17779_s1 + $0x172c] sm:$0xf0]  ;;  %v9883_v50 = vld [vmem:[%s17779_s1 + $0x1400] sm:$0xf]  ;;  %v10156_v57 = vor.u32 %v11743_v45, %v10155_v44  ;;  %4975 = vmatpush.bf16.msrb.mxu0 %v9900_v49  ;;  %v11089_v37 = vld [vmem:[%s17779_s1 + $0x1c4] sm:$0xf]  ;;  %v4746_v45 = vpop.f32.mrf.mxu2  ;;  %v4759_v49 = vpop.f32.mrf.mxu3 }
  0xc8   :  { %v11675_v53 = vld [vmem:[%s17779_s1 + $0x140c] sm:$0xf0]  ;;  %v10011_v58 = vld [vmem:[%s17779_s1 + $0x1500] sm:$0xf]  ;;  %v10284_v62 = vor.u32 %v11775_v48, %v10283_v47  ;;  %4988 = vmatpush.bf16.msrb.mxu1 %v10028_v56  ;;  %v7549_v40 = vld [vmem:[%s17779_s1 + $0x1d0] sm:$0xf0]  ;;  %v7424_v48 = vor.u32 %v11057_v35, %v7421_v36 }
  0xc9   :  { %v11707_v59 = vld [vmem:[%s17779_s1 + $0x150c] sm:$0xf0]  ;;  %v10139_v60 = vld [vmem:[%s17779_s1 + $0x1600] sm:$0xf]  ;;  %v9884_v7 = vor.u32 %v11675_v53, %v9883_v50  ;;  %5001 = vmatpush.bf16.msrb.mxu2 %v10156_v57  ;;  %v7677_v42 = vld [vmem:[%s17779_s1 + $0x2d0] sm:$0xf0]  ;;  %v7552_v50 = vor.u32 %v11089_v37, %v7549_v40  ;;  %v4770_v19 = vpop.f32.mrf.mxu0 }
  0xca   :  { %v11739_v63 = vld [vmem:[%s17779_s1 + $0x160c] sm:$0xf0]  ;;  %v10267_v0 = vld [vmem:[%s17779_s1 + $0x1700] sm:$0xf]  ;;  %v10012_v17 = vor.u32 %v11707_v59, %v10011_v58  ;;  %5014 = vmatpush.bf16.msrb.mxu3 %v10284_v62  ;;  %v11153_v43 = vld [vmem:[%s17779_s1 + $0x3c4] sm:$0xf]  ;;  %v7680_v53 = vor.u32 %v11121_v41, %v7677_v42 }
  0xcb   :  { %v11771_v1 = vld [vmem:[%s17779_s1 + $0x170c] sm:$0xf0]  ;;  %v10140_v18 = vor.u32 %v11739_v63, %v10139_v60  ;;  %v841_v34 = vld.sshfl [vmem:[#allocation1 + $0x20] sm:$0xff pattern:$0x73625140]  ;;  %4976 = vmatpush.bf16.msrb.mxu0 %v9884_v7 }
  0xcc   :  { %v10268_v28 = vor.u32 %v11771_v1, %v10267_v0  ;;  %v843_v39 = vld.sshfl [vmem:[#allocation1 + $0x30] sm:$0xff pattern:$0x73625140]  ;;  %4989 = vmatpush.bf16.msrb.mxu1 %v10012_v17  ;;  %v842_v46 = vld.sshfl [vmem:[#allocation1 + $0x28] sm:$0xff pattern:$0x73625140] }
  0xcd   :  { %5002 = vmatpush.bf16.msrb.mxu2 %v10140_v18  ;;  %v7805_v44 = vld [vmem:[%s17779_s1 + $0x3d0] sm:$0xf0]  ;;  %v844_v47 = vld.sshfl [vmem:[#allocation1 + $0x38] sm:$0xff pattern:$0x73625140] }
  0xce   :  { %5015 = vmatpush.bf16.msrb.mxu3 %v10268_v28  ;;  %v11053_v56 = vld [vmem:[%s17779_s1 + $0xa4] sm:$0xf]  ;;  %v7405_v57 = vld [vmem:[%s17779_s1 + $0xb0] sm:$0xf0]  ;;  %4977 = vmatmul.bf16.vlgmr.msrb.gmra.mxu0 %v841_v34  ;;  %v7808_v59 = vor.u32 %v11153_v43, %v7805_v44  ;;  %v4783_v34 = vpop.f32.mrf.mxu1 }
  0xcf   :  { %5021 = vmatpush.bf16.msra.mxu0 %v7440_v31  ;;  %v11085_v58 = vld [vmem:[%s17779_s1 + $0x1a4] sm:$0xf]  ;;  %v7533_v60 = vld [vmem:[%s17779_s1 + $0x1b0] sm:$0xf0]  ;;  %4990 = vmatmul.bf16.vlgmr.msrb.gmra.mxu1 %v842_v46  ;;  %v7408_v1 = vor.u32 %v11053_v56, %v7405_v57  ;;  %v4809_v57 = vpop.f32.mrf.mxu3 }
  0xd0   :  { %5034 = vmatpush.bf16.msra.mxu1 %v7568_v32  ;;  %v7661_v62 = vld [vmem:[%s17779_s1 + $0x2b0] sm:$0xf0]  ;;  %5003 = vmatmul.bf16.vlgmr.msrb.gmra.mxu2 %v843_v39  ;;  %v11149_v63 = vld [vmem:[%s17779_s1 + $0x3a4] sm:$0xf]  ;;  %v7536_v2 = vor.u32 %v11085_v58, %v7533_v60 }
  0xd1   :  { %5047 = vmatpush.bf16.msra.mxu2 %v7696_v33  ;;  %v7789_v0 = vld [vmem:[%s17779_s1 + $0x3b0] sm:$0xf0]  ;;  %5016 = vmatmul.bf16.vlgmr.msrb.gmra.mxu3 %v844_v47  ;;  %v7664_v3 = vor.u32 %v11117_v61, %v7661_v62  ;;  %v11049_v4 = vld [vmem:[%s17779_s1 + $0x84] sm:$0xf]  ;;  %v4771_v33 = vadd.f32 %v4770_v19, %v13259_v15  ;;  %v4796_v47 = vpop.f32.mrf.mxu2  ;;  %v4772_v62 = vpop.f32.mrf.mxu0 }
  0xd2   :  { %5060 = vmatpush.bf16.msra.mxu3 %v7824_v38  ;;  %v7389_v5 = vld [vmem:[%s17779_s1 + $0x90] sm:$0xf0]  ;;  %v11081_v6 = vld [vmem:[%s17779_s1 + $0x184] sm:$0xf]  ;;  %v7792_v7 = vor.u32 %v11149_v63, %v7789_v0 }
  0xd3   :  { %5022 = vmatpush.bf16.msra.mxu0 %v7424_v48  ;;  %v7517_v8 = vld [vmem:[%s17779_s1 + $0x190] sm:$0xf0]  ;;  %v11113_v9 = vld [vmem:[%s17779_s1 + $0x284] sm:$0xf]  ;;  %v7392_v18 = vor.u32 %v11049_v4, %v7389_v5  ;;  %v4784_v40 = vadd.f32 %v4783_v34, %v4771_v33 }
  0xd4   :  { %5035 = vmatpush.bf16.msra.mxu1 %v7552_v50  ;;  %v7645_v12 = vld [vmem:[%s17779_s1 + $0x290] sm:$0xf0]  ;;  %v11145_v16 = vld [vmem:[%s17779_s1 + $0x384] sm:$0xf]  ;;  %v7520_v20 = vor.u32 %v11081_v6, %v7517_v8 }
  0xd5   :  { %5048 = vmatpush.bf16.msra.mxu2 %v7680_v53  ;;  %v7773_v17 = vld [vmem:[%s17779_s1 + $0x390] sm:$0xf0]  ;;  %v7648_v25 = vor.u32 %v11113_v9, %v7645_v12  ;;  %v11045_v28 = vld [vmem:[%s17779_s1 + $0x64] sm:$0xf]  ;;  %v4797_v56 = vadd.f32 %v4796_v47, %v4784_v40 }
  0xd6   :  { %5061 = vmatpush.bf16.msra.mxu3 %v7808_v59  ;;  %v7373_v31 = vld [vmem:[%s17779_s1 + $0x70] sm:$0xf0]  ;;  %v11077_v32 = vld [vmem:[%s17779_s1 + $0x164] sm:$0xf]  ;;  %v7776_v35 = vor.u32 %v11145_v16, %v7773_v17  ;;  %v4785_v4 = vpop.f32.mrf.mxu1 }
  0xd7   :  { %5023 = vmatpush.bf16.msra.mxu0 %v7408_v1  ;;  %v7501_v36 = vld [vmem:[%s17779_s1 + $0x170] sm:$0xf0]  ;;  %v11109_v37 = vld [vmem:[%s17779_s1 + $0x264] sm:$0xf]  ;;  %v7376_v41 = vor.u32 %v11045_v28, %v7373_v31  ;;  %v13388_v61 = vadd.f32 %v4809_v57, %v4797_v56 }
  0xd8   :  { %5036 = vmatpush.bf16.msra.mxu1 %v7536_v2  ;;  %v7629_v38 = vld [vmem:[%s17779_s1 + $0x270] sm:$0xf0]  ;;  %v11141_v39 = vld [vmem:[%s17779_s1 + $0x364] sm:$0xf]  ;;  %v7504_v42 = vor.u32 %v11077_v32, %v7501_v36 }
  0xd9   :  { %5049 = vmatpush.bf16.msra.mxu2 %v7664_v3  ;;  %v7757_v15 = vld [vmem:[%s17779_s1 + $0x370] sm:$0xf0]  ;;  %v7632_v43 = vor.u32 %v11109_v37, %v7629_v38  ;;  %v11041_v44 = vld [vmem:[%s17779_s1 + $0x44] sm:$0xf]  ;;  %v4798_v32 = vpop.f32.mrf.mxu2  ;;  %v4811_v37 = vpop.f32.mrf.mxu3 }
  0xda   :  { %5062 = vmatpush.bf16.msra.mxu3 %v7792_v7  ;;  %v7357_v45 = vld [vmem:[%s17779_s1 + $0x50] sm:$0xf0]  ;;  %v11073_v46 = vld [vmem:[%s17779_s1 + $0x144] sm:$0xf]  ;;  %v7760_v48 = vor.u32 %v11141_v39, %v7757_v15 }
  0xdb   :  { %5024 = vmatpush.bf16.msra.mxu0 %v7392_v18  ;;  %v7485_v49 = vld [vmem:[%s17779_s1 + $0x150] sm:$0xf0]  ;;  %v11105_v50 = vld [vmem:[%s17779_s1 + $0x244] sm:$0xf]  ;;  %v7360_v60 = vor.u32 %v11041_v44, %v7357_v45 }
  0xdc   :  { %5037 = vmatpush.bf16.msra.mxu1 %v7520_v20  ;;  %v7613_v53 = vld [vmem:[%s17779_s1 + $0x250] sm:$0xf0]  ;;  %v11137_v58 = vld [vmem:[%s17779_s1 + $0x344] sm:$0xf]  ;;  %v7488_v63 = vor.u32 %v11073_v46, %v7485_v49 }
  0xdd   :  { %5050 = vmatpush.bf16.msra.mxu2 %v7648_v25  ;;  %v7741_v59 = vld [vmem:[%s17779_s1 + $0x350] sm:$0xf0]  ;;  %v7616_v0 = vor.u32 %v11105_v50, %v7613_v53  ;;  %v11037_v1 = vld [vmem:[%s17779_s1 + $0x24] sm:$0xf] }
  0xde   :  { %5063 = vmatpush.bf16.msra.mxu3 %v7776_v35  ;;  %v7341_v2 = vld [vmem:[%s17779_s1 + $0x30] sm:$0xf0]  ;;  %v11069_v3 = vld [vmem:[%s17779_s1 + $0x124] sm:$0xf]  ;;  %v7744_v5 = vor.u32 %v11137_v58, %v7741_v59 }
  0xdf   :  { %5025 = vmatpush.bf16.msra.mxu0 %v7376_v41  ;;  %v7469_v6 = vld [vmem:[%s17779_s1 + $0x130] sm:$0xf0]  ;;  %v11101_v7 = vld [vmem:[%s17779_s1 + $0x224] sm:$0xf]  ;;  %v7344_v16 = vor.u32 %v11037_v1, %v7341_v2 }
  0xe0   :  { %5038 = vmatpush.bf16.msra.mxu1 %v7504_v42  ;;  %v7597_v8 = vld [vmem:[%s17779_s1 + $0x230] sm:$0xf0]  ;;  %v11133_v9 = vld [vmem:[%s17779_s1 + $0x324] sm:$0xf]  ;;  %v7472_v19 = vor.u32 %v11069_v3, %v7469_v6 }
  0xe1   :  { %5051 = vmatpush.bf16.msra.mxu2 %v7632_v43  ;;  %v7725_v12 = vld [vmem:[%s17779_s1 + $0x330] sm:$0xf0]  ;;  %v11033_v17 = vld [vmem:[%s17779_s1 + $0x4] sm:$0xf]  ;;  %v7600_v20 = vor.u32 %v11101_v7, %v7597_v8 }
  0xe2   :  { %5064 = vmatpush.bf16.msra.mxu3 %v7760_v48  ;;  %v7325_v18 = vld [vmem:[%s17779_s1 + $0x10] sm:$0xf0]  ;;  %v11065_v25 = vld [vmem:[%s17779_s1 + $0x104] sm:$0xf]  ;;  %v7728_v33 = vor.u32 %v11133_v9, %v7725_v12 }
  0xe3   :  { %5026 = vmatpush.bf16.msra.mxu0 %v7360_v60  ;;  %v7453_v28 = vld [vmem:[%s17779_s1 + $0x110] sm:$0xf0]  ;;  %v11097_v31 = vld [vmem:[%s17779_s1 + $0x204] sm:$0xf]  ;;  %v7328_v40 = vor.u32 %v11033_v17, %v7325_v18 }
  0xe4   :  { %5039 = vmatpush.bf16.msra.mxu1 %v7488_v63  ;;  %v7581_v34 = vld [vmem:[%s17779_s1 + $0x210] sm:$0xf0]  ;;  %v11129_v35 = vld [vmem:[%s17779_s1 + $0x304] sm:$0xf]  ;;  %v7456_v44 = vor.u32 %v11065_v25, %v7453_v28 }
  0xe5   :  { %5052 = vmatpush.bf16.msra.mxu2 %v7616_v0  ;;  %v7709_v36 = vld [vmem:[%s17779_s1 + $0x310] sm:$0xf0]  ;;  %v11189_v38 = vld [vmem:[%s17779_s1 + $0x4e4] sm:$0xf]  ;;  %v7584_v45 = vor.u32 %v11097_v31, %v7581_v34 }
  0xe6   :  { %5065 = vmatpush.bf16.msra.mxu3 %v7744_v5  ;;  %v7949_v39 = vld [vmem:[%s17779_s1 + $0x4f0] sm:$0xf0]  ;;  %v11221_v15 = vld [vmem:[%s17779_s1 + $0x5e4] sm:$0xf]  ;;  %v7712_v48 = vor.u32 %v11129_v35, %v7709_v36 }
  0xe7   :  { %5027 = vmatpush.bf16.msra.mxu0 %v7344_v16  ;;  %v8077_v41 = vld [vmem:[%s17779_s1 + $0x5f0] sm:$0xf0]  ;;  %v11253_v42 = vld [vmem:[%s17779_s1 + $0x6e4] sm:$0xf]  ;;  %v7952_v49 = vor.u32 %v11189_v38, %v7949_v39  ;;  %v4822_v37 = vpop.f32.mrf.mxu0 }
  0xe8   :  { %v8205_v43 = vld [vmem:[%s17779_s1 + $0x6f0] sm:$0xf0]  ;;  %5040 = vmatpush.bf16.msra.mxu1 %v7472_v19  ;;  %v11285_v46 = vld [vmem:[%s17779_s1 + $0x7e4] sm:$0xf]  ;;  %v8080_v50 = vor.u32 %v11221_v15, %v8077_v41  ;;  %v4823_v15 = vadd.f32 %v4822_v37, %v13388_v61  ;;  %v4835_v41 = vpop.f32.mrf.mxu1 }
  0xe9   :  { %5053 = vmatpush.bf16.msra.mxu2 %v7600_v20  ;;  %v8333_v47 = vld [vmem:[%s17779_s1 + $0x7f0] sm:$0xf0]  ;;  %v8208_v53 = vor.u32 %v11253_v42, %v8205_v43  ;;  %v11185_v56 = vld [vmem:[%s17779_s1 + $0x4c4] sm:$0xf] }
  0xea   :  { %5066 = vmatpush.bf16.msra.mxu3 %v7728_v33  ;;  %v7933_v57 = vld [vmem:[%s17779_s1 + $0x4d0] sm:$0xf0]  ;;  %v11217_v58 = vld [vmem:[%s17779_s1 + $0x5c4] sm:$0xf]  ;;  %v8336_v59 = vor.u32 %v11285_v46, %v8333_v47  ;;  %v4836_v47 = vadd.f32 %v4835_v41, %v4823_v15 }
  0xeb   :  { %5028 = vmatpush.bf16.msra.mxu0 %v7328_v40  ;;  %v8061_v60 = vld [vmem:[%s17779_s1 + $0x5d0] sm:$0xf0]  ;;  %v11249_v62 = vld [vmem:[%s17779_s1 + $0x6c4] sm:$0xf]  ;;  %v7936_v2 = vor.u32 %v11185_v56, %v7933_v57 }
  0xec   :  { %v8189_v63 = vld [vmem:[%s17779_s1 + $0x6d0] sm:$0xf0]  ;;  %5041 = vmatpush.bf16.msra.mxu1 %v7456_v44  ;;  %v11281_v0 = vld [vmem:[%s17779_s1 + $0x7c4] sm:$0xf]  ;;  %v8064_v3 = vor.u32 %v11217_v58, %v8061_v60 }
  0xed   :  { %5054 = vmatpush.bf16.msra.mxu2 %v7584_v45  ;;  %v8317_v1 = vld [vmem:[%s17779_s1 + $0x7d0] sm:$0xf0]  ;;  %v8192_v4 = vor.u32 %v11249_v62, %v8189_v63  ;;  %v11181_v5 = vld [vmem:[%s17779_s1 + $0x4a4] sm:$0xf] }
  0xee   :  { %5067 = vmatpush.bf16.msra.mxu3 %v7712_v48  ;;  %v7917_v6 = vld [vmem:[%s17779_s1 + $0x4b0] sm:$0xf0]  ;;  %v11213_v7 = vld [vmem:[%s17779_s1 + $0x5a4] sm:$0xf]  ;;  %v8320_v8 = vor.u32 %v11281_v0, %v8317_v1  ;;  %5029 = vmatmul.bf16.vlgmr.msra.gmra.mxu0 %v12337_v24 }
  0xef   :  { %5073 = vmatpush.bf16.msrb.mxu0 %v7952_v49  ;;  %v8045_v9 = vld [vmem:[%s17779_s1 + $0x5b0] sm:$0xf0]  ;;  %v11245_v12 = vld [vmem:[%s17779_s1 + $0x6a4] sm:$0xf]  ;;  %v7920_v19 = vor.u32 %v11181_v5, %v7917_v6  ;;  %5042 = vmatmul.bf16.vlgmr.msra.gmra.mxu1 %v12342_v27  ;;  %v4848_v1 = vpop.f32.mrf.mxu2 }
  0xf0   :  { %5086 = vmatpush.bf16.msrb.mxu1 %v8080_v50  ;;  %v8173_v16 = vld [vmem:[%s17779_s1 + $0x6b0] sm:$0xf0]  ;;  %5055 = vmatmul.bf16.vlgmr.msra.gmra.mxu2 %v12335_v23  ;;  %v11277_v17 = vld [vmem:[%s17779_s1 + $0x7a4] sm:$0xf]  ;;  %v8048_v20 = vor.u32 %v11213_v7, %v8045_v9  ;;  %v4849_v5 = vadd.f32 %v4848_v1, %v4836_v47  ;;  %v4861_v6 = vpop.f32.mrf.mxu3  ;;  %v4824_v9 = vpop.f32.mrf.mxu0 }
  0xf1   :  { %5099 = vmatpush.bf16.msrb.mxu2 %v8208_v53  ;;  %v8301_v18 = vld [vmem:[%s17779_s1 + $0x7b0] sm:$0xf0]  ;;  %5068 = vmatmul.bf16.vlgmr.msra.gmra.mxu3 %v12340_v26  ;;  %v8176_v25 = vor.u32 %v11245_v12, %v8173_v16  ;;  %v11177_v28 = vld [vmem:[%s17779_s1 + $0x484] sm:$0xf]  ;;  %v4837_v16 = vpop.f32.mrf.mxu1 }
  0xf2   :  { %5112 = vmatpush.bf16.msrb.mxu3 %v8336_v59  ;;  %v7901_v31 = vld [vmem:[%s17779_s1 + $0x490] sm:$0xf0]  ;;  %v11209_v32 = vld [vmem:[%s17779_s1 + $0x584] sm:$0xf]  ;;  %v8304_v33 = vor.u32 %v11277_v17, %v8301_v18  ;;  %v13587_v17 = vadd.f32 %v4861_v6, %v4849_v5 }
  0xf3   :  { %5074 = vmatpush.bf16.msrb.mxu0 %v7936_v2  ;;  %v8029_v34 = vld [vmem:[%s17779_s1 + $0x590] sm:$0xf0]  ;;  %v11241_v35 = vld [vmem:[%s17779_s1 + $0x684] sm:$0xf]  ;;  %v7904_v40 = vor.u32 %v11177_v28, %v7901_v31 }
  0xf4   :  { %5087 = vmatpush.bf16.msrb.mxu1 %v8064_v3  ;;  %v8157_v36 = vld [vmem:[%s17779_s1 + $0x690] sm:$0xf0]  ;;  %v11273_v38 = vld [vmem:[%s17779_s1 + $0x784] sm:$0xf]  ;;  %v8032_v42 = vor.u32 %v11209_v32, %v8029_v34 }
  0xf5   :  { %5100 = vmatpush.bf16.msrb.mxu2 %v8192_v4  ;;  %v8285_v39 = vld [vmem:[%s17779_s1 + $0x790] sm:$0xf0]  ;;  %v8160_v43 = vor.u32 %v11241_v35, %v8157_v36  ;;  %v11173_v44 = vld [vmem:[%s17779_s1 + $0x464] sm:$0xf] }
  0xf6   :  { %5113 = vmatpush.bf16.msrb.mxu3 %v8320_v8  ;;  %v7885_v45 = vld [vmem:[%s17779_s1 + $0x470] sm:$0xf0]  ;;  %v11205_v46 = vld [vmem:[%s17779_s1 + $0x564] sm:$0xf]  ;;  %v8288_v61 = vor.u32 %v11273_v38, %v8285_v39 }
  0xf7   :  { %5075 = vmatpush.bf16.msrb.mxu0 %v7920_v19  ;;  %v8013_v48 = vld [vmem:[%s17779_s1 + $0x570] sm:$0xf0]  ;;  %v11237_v49 = vld [vmem:[%s17779_s1 + $0x664] sm:$0xf]  ;;  %v7888_v57 = vor.u32 %v11173_v44, %v7885_v45  ;;  %v4850_v47 = vpop.f32.mrf.mxu2 }
  0xf8   :  { %5088 = vmatpush.bf16.msrb.mxu1 %v8048_v20  ;;  %v8141_v50 = vld [vmem:[%s17779_s1 + $0x670] sm:$0xf0]  ;;  %v11269_v53 = vld [vmem:[%s17779_s1 + $0x764] sm:$0xf]  ;;  %v8016_v58 = vor.u32 %v11205_v46, %v8013_v48 }
  0xf9   :  { %5101 = vmatpush.bf16.msrb.mxu2 %v8176_v25  ;;  %v8269_v56 = vld [vmem:[%s17779_s1 + $0x770] sm:$0xf0]  ;;  %v8144_v59 = vor.u32 %v11237_v49, %v8141_v50  ;;  %v11169_v60 = vld [vmem:[%s17779_s1 + $0x444] sm:$0xf] }
  0xfa   :  { %5114 = vmatpush.bf16.msrb.mxu3 %v8304_v33  ;;  %v7869_v62 = vld [vmem:[%s17779_s1 + $0x450] sm:$0xf0]  ;;  %v11201_v63 = vld [vmem:[%s17779_s1 + $0x544] sm:$0xf]  ;;  %v8272_v0 = vor.u32 %v11269_v53, %v8269_v56  ;;  %v4863_v53 = vpop.f32.mrf.mxu3 }
  0xfb   :  { %5076 = vmatpush.bf16.msrb.mxu0 %v7904_v40  ;;  %v7997_v2 = vld [vmem:[%s17779_s1 + $0x550] sm:$0xf0]  ;;  %v11233_v3 = vld [vmem:[%s17779_s1 + $0x644] sm:$0xf]  ;;  %v7872_v12 = vor.u32 %v11169_v60, %v7869_v62 }
  0xfc   :  { %5089 = vmatpush.bf16.msrb.mxu1 %v8032_v42  ;;  %v8125_v4 = vld [vmem:[%s17779_s1 + $0x650] sm:$0xf0]  ;;  %v11265_v7 = vld [vmem:[%s17779_s1 + $0x744] sm:$0xf]  ;;  %v8000_v18 = vor.u32 %v11201_v63, %v7997_v2 }
  0xfd   :  { %5102 = vmatpush.bf16.msrb.mxu2 %v8160_v43  ;;  %v8253_v8 = vld [vmem:[%s17779_s1 + $0x750] sm:$0xf0]  ;;  %v8128_v19 = vor.u32 %v11233_v3, %v8125_v4  ;;  %v11165_v20 = vld [vmem:[%s17779_s1 + $0x424] sm:$0xf] }
  0xfe   :  { %5115 = vmatpush.bf16.msrb.mxu3 %v8288_v61  ;;  %v7853_v25 = vld [vmem:[%s17779_s1 + $0x430] sm:$0xf0]  ;;  %v11197_v28 = vld [vmem:[%s17779_s1 + $0x524] sm:$0xf]  ;;  %v8256_v31 = vor.u32 %v11265_v7, %v8253_v8 }
  0xff   :  { %5077 = vmatpush.bf16.msrb.mxu0 %v7888_v57  ;;  %v7981_v32 = vld [vmem:[%s17779_s1 + $0x530] sm:$0xf0]  ;;  %v11229_v33 = vld [vmem:[%s17779_s1 + $0x624] sm:$0xf]  ;;  %v7856_v37 = vor.u32 %v11165_v20, %v7853_v25 }
 0x100   :  { %5090 = vmatpush.bf16.msrb.mxu1 %v8016_v58  ;;  %v8109_v34 = vld [vmem:[%s17779_s1 + $0x630] sm:$0xf0]  ;;  %v11261_v35 = vld [vmem:[%s17779_s1 + $0x724] sm:$0xf]  ;;  %v7984_v15 = vor.u32 %v11197_v28, %v7981_v32 }
 0x101   :  { %5103 = vmatpush.bf16.msrb.mxu2 %v8144_v59  ;;  %v8237_v36 = vld [vmem:[%s17779_s1 + $0x730] sm:$0xf0]  ;;  %v11161_v38 = vld [vmem:[%s17779_s1 + $0x404] sm:$0xf]  ;;  %v8112_v40 = vor.u32 %v11229_v33, %v8109_v34 }
 0x102   :  { %5116 = vmatpush.bf16.msrb.mxu3 %v8272_v0  ;;  %v7837_v39 = vld [vmem:[%s17779_s1 + $0x410] sm:$0xf0]  ;;  %v11193_v41 = vld [vmem:[%s17779_s1 + $0x504] sm:$0xf]  ;;  %v8240_v44 = vor.u32 %v11261_v35, %v8237_v36 }
 0x103   :  { %5078 = vmatpush.bf16.msrb.mxu0 %v7872_v12  ;;  %v7965_v42 = vld [vmem:[%s17779_s1 + $0x510] sm:$0xf0]  ;;  %v11225_v43 = vld [vmem:[%s17779_s1 + $0x604] sm:$0xf]  ;;  %v7840_v56 = vor.u32 %v11161_v38, %v7837_v39 }
 0x104   :  { %5091 = vmatpush.bf16.msrb.mxu1 %v8000_v18  ;;  %v8093_v45 = vld [vmem:[%s17779_s1 + $0x610] sm:$0xf0]  ;;  %v11257_v46 = vld [vmem:[%s17779_s1 + $0x704] sm:$0xf]  ;;  %v7968_v60 = vor.u32 %v11193_v41, %v7965_v42 }
 0x105   :  { %5104 = vmatpush.bf16.msrb.mxu2 %v8128_v19  ;;  %v8221_v61 = vld [vmem:[%s17779_s1 + $0x710] sm:$0xf0]  ;;  %v11317_v48 = vld [vmem:[%s17779_s1 + $0x8e4] sm:$0xf]  ;;  %v8096_v62 = vor.u32 %v11225_v43, %v8093_v45 }
 0x106   :  { %5117 = vmatpush.bf16.msrb.mxu3 %v8256_v31  ;;  %v8461_v49 = vld [vmem:[%s17779_s1 + $0x8f0] sm:$0xf0]  ;;  %v11349_v50 = vld [vmem:[%s17779_s1 + $0x9e4] sm:$0xf]  ;;  %v8224_v1 = vor.u32 %v11257_v46, %v8221_v61 }
 0x107   :  { %5079 = vmatpush.bf16.msrb.mxu0 %v7856_v37  ;;  %v8589_v57 = vld [vmem:[%s17779_s1 + $0x9f0] sm:$0xf0]  ;;  %v11381_v58 = vld [vmem:[%s17779_s1 + $0xae4] sm:$0xf]  ;;  %v8464_v2 = vor.u32 %v11317_v48, %v8461_v49 }
 0x108   :  { %v8717_v59 = vld [vmem:[%s17779_s1 + $0xaf0] sm:$0xf0]  ;;  %5092 = vmatpush.bf16.msrb.mxu1 %v7984_v15  ;;  %v11413_v63 = vld [vmem:[%s17779_s1 + $0xbe4] sm:$0xf]  ;;  %v8592_v3 = vor.u32 %v11349_v50, %v8589_v57 }
 0x109   :  { %5105 = vmatpush.bf16.msrb.mxu2 %v8112_v40  ;;  %v8845_v0 = vld [vmem:[%s17779_s1 + $0xbf0] sm:$0xf0]  ;;  %v8720_v4 = vor.u32 %v11381_v58, %v8717_v59  ;;  %v11313_v5 = vld [vmem:[%s17779_s1 + $0x8c4] sm:$0xf]  ;;  %v4874_v48 = vpop.f32.mrf.mxu0 }
 0x10a   :  { %5118 = vmatpush.bf16.msrb.mxu3 %v8240_v44  ;;  %v8445_v6 = vld [vmem:[%s17779_s1 + $0x8d0] sm:$0xf0]  ;;  %v11345_v7 = vld [vmem:[%s17779_s1 + $0x9c4] sm:$0xf]  ;;  %v8848_v8 = vor.u32 %v11413_v63, %v8845_v0  ;;  %v4875_v53 = vadd.f32 %v4874_v48, %v13587_v17  ;;  %v4887_v57 = vpop.f32.mrf.mxu1 }
 0x10b   :  { %5080 = vmatpush.bf16.msrb.mxu0 %v7840_v56  ;;  %v8573_v9 = vld [vmem:[%s17779_s1 + $0x9d0] sm:$0xf0]  ;;  %v11377_v12 = vld [vmem:[%s17779_s1 + $0xac4] sm:$0xf]  ;;  %v8448_v20 = vor.u32 %v11313_v5, %v8445_v6 }
 0x10c   :  { %v8701_v16 = vld [vmem:[%s17779_s1 + $0xad0] sm:$0xf0]  ;;  %5093 = vmatpush.bf16.msrb.mxu1 %v7968_v60  ;;  %v11409_v18 = vld [vmem:[%s17779_s1 + $0xbc4] sm:$0xf]  ;;  %v8576_v25 = vor.u32 %v11345_v7, %v8573_v9  ;;  %v4888_v0 = vadd.f32 %v4887_v57, %v4875_v53 }
 0x10d   :  { %5106 = vmatpush.bf16.msrb.mxu2 %v8096_v62  ;;  %v8829_v19 = vld [vmem:[%s17779_s1 + $0xbd0] sm:$0xf0]  ;;  %v8704_v28 = vor.u32 %v11377_v12, %v8701_v16  ;;  %v11309_v31 = vld [vmem:[%s17779_s1 + $0x8a4] sm:$0xf] }
 0x10e   :  { %5119 = vmatpush.bf16.msrb.mxu3 %v8224_v1  ;;  %v8429_v32 = vld [vmem:[%s17779_s1 + $0x8b0] sm:$0xf0]  ;;  %v11341_v33 = vld [vmem:[%s17779_s1 + $0x9a4] sm:$0xf]  ;;  %v8832_v34 = vor.u32 %v11409_v18, %v8829_v19  ;;  %5081 = vmatmul.bf16.vlgmr.msrb.gmra.mxu0 %v12469_v22 }
 0x10f   :  { %5125 = vmatpush.bf16.msra.mxu0 %v8464_v2  ;;  %v8557_v35 = vld [vmem:[%s17779_s1 + $0x9b0] sm:$0xf0]  ;;  %v11373_v36 = vld [vmem:[%s17779_s1 + $0xaa4] sm:$0xf]  ;;  %v8432_v15 = vor.u32 %v11309_v31, %v8429_v32  ;;  %5094 = vmatmul.bf16.vlgmr.msrb.gmra.mxu1 %v12473_v30 }
 0x110   :  { %5138 = vmatpush.bf16.msra.mxu1 %v8592_v3  ;;  %5107 = vmatmul.bf16.vlgmr.msrb.gmra.mxu2 %v12467_v21  ;;  %v8685_v37 = vld [vmem:[%s17779_s1 + $0xab0] sm:$0xf0]  ;;  %v11405_v38 = vld [vmem:[%s17779_s1 + $0xba4] sm:$0xf]  ;;  %v8560_v40 = vor.u32 %v11341_v33, %v8557_v35 }
 0x111   :  { %5151 = vmatpush.bf16.msra.mxu2 %v8720_v4  ;;  %5120 = vmatmul.bf16.vlgmr.msrb.gmra.mxu3 %v12471_v29  ;;  %v8813_v39 = vld [vmem:[%s17779_s1 + $0xbb0] sm:$0xf0]  ;;  %v8688_v41 = vor.u32 %v11373_v36, %v8685_v37  ;;  %v11305_v42 = vld [vmem:[%s17779_s1 + $0x884] sm:$0xf]  ;;  %v4900_v19 = vpop.f32.mrf.mxu2  ;;  %v4876_v35 = vpop.f32.mrf.mxu0 }
 0x112   :  { %5164 = vmatpush.bf16.msra.mxu3 %v8848_v8  ;;  %v8413_v43 = vld [vmem:[%s17779_s1 + $0x890] sm:$0xf0]  ;;  %v11337_v44 = vld [vmem:[%s17779_s1 + $0x984] sm:$0xf]  ;;  %v8816_v45 = vor.u32 %v11405_v38, %v8813_v39  ;;  %v4901_v31 = vadd.f32 %v4900_v19, %v4888_v0  ;;  %v4913_v32 = vpop.f32.mrf.mxu3  ;;  %v4889_v37 = vpop.f32.mrf.mxu1 }
 0x113   :  { %5126 = vmatpush.bf16.msra.mxu0 %v8448_v20  ;;  %v8541_v46 = vld [vmem:[%s17779_s1 + $0x990] sm:$0xf0]  ;;  %v11369_v61 = vld [vmem:[%s17779_s1 + $0xa84] sm:$0xf]  ;;  %v8416_v56 = vor.u32 %v11305_v42, %v8413_v43 }
 0x114   :  { %5139 = vmatpush.bf16.msra.mxu1 %v8576_v25  ;;  %v8669_v47 = vld [vmem:[%s17779_s1 + $0xa90] sm:$0xf0]  ;;  %v11401_v49 = vld [vmem:[%s17779_s1 + $0xb84] sm:$0xf]  ;;  %v8544_v58 = vor.u32 %v11337_v44, %v8541_v46  ;;  %v13786_v38 = vadd.f32 %v4913_v32, %v4901_v31 }
 0x115   :  { %5152 = vmatpush.bf16.msra.mxu2 %v8704_v28  ;;  %v8797_v50 = vld [vmem:[%s17779_s1 + $0xb90] sm:$0xf0]  ;;  %v8672_v59 = vor.u32 %v11369_v61, %v8669_v47  ;;  %v11301_v60 = vld [vmem:[%s17779_s1 + $0x864] sm:$0xf] }
 0x116   :  { %5165 = vmatpush.bf16.msra.mxu3 %v8832_v34  ;;  %v8397_v62 = vld [vmem:[%s17779_s1 + $0x870] sm:$0xf0]  ;;  %v11333_v63 = vld [vmem:[%s17779_s1 + $0x964] sm:$0xf]  ;;  %v8800_v17 = vor.u32 %v11401_v49, %v8797_v50 }
 0x117   :  { %5127 = vmatpush.bf16.msra.mxu0 %v8432_v15  ;;  %v8525_v1 = vld [vmem:[%s17779_s1 + $0x970] sm:$0xf0]  ;;  %v11365_v2 = vld [vmem:[%s17779_s1 + $0xa64] sm:$0xf]  ;;  %v8400_v6 = vor.u32 %v11301_v60, %v8397_v62 }
 0x118   :  { %5140 = vmatpush.bf16.msra.mxu1 %v8560_v40  ;;  %v8653_v3 = vld [vmem:[%s17779_s1 + $0xa70] sm:$0xf0]  ;;  %v11397_v4 = vld [vmem:[%s17779_s1 + $0xb64] sm:$0xf]  ;;  %v8528_v7 = vor.u32 %v11333_v63, %v8525_v1 }
 0x119   :  { %5153 = vmatpush.bf16.msra.mxu2 %v8688_v41  ;;  %v8781_v5 = vld [vmem:[%s17779_s1 + $0xb70] sm:$0xf0]  ;;  %v8656_v8 = vor.u32 %v11365_v2, %v8653_v3  ;;  %v11297_v9 = vld [vmem:[%s17779_s1 + $0x844] sm:$0xf]  ;;  %v4902_v0 = vpop.f32.mrf.mxu2 }
 0x11a   :  { %5166 = vmatpush.bf16.msra.mxu3 %v8816_v45  ;;  %v8381_v12 = vld [vmem:[%s17779_s1 + $0x850] sm:$0xf0]  ;;  %v11329_v16 = vld [vmem:[%s17779_s1 + $0x944] sm:$0xf]  ;;  %v8784_v18 = vor.u32 %v11397_v4, %v8781_v5  ;;  %v4915_v4 = vpop.f32.mrf.mxu3 }
 0x11b   :  { %5128 = vmatpush.bf16.msra.mxu0 %v8416_v56  ;;  %v8509_v20 = vld [vmem:[%s17779_s1 + $0x950] sm:$0xf0]  ;;  %v11361_v25 = vld [vmem:[%s17779_s1 + $0xa44] sm:$0xf]  ;;  %v8384_v36 = vor.u32 %v11297_v9, %v8381_v12 }
 0x11c   :  { %5141 = vmatpush.bf16.msra.mxu1 %v8544_v58  ;;  %v8637_v28 = vld [vmem:[%s17779_s1 + $0xa50] sm:$0xf0]  ;;  %v11393_v33 = vld [vmem:[%s17779_s1 + $0xb44] sm:$0xf]  ;;  %v8512_v39 = vor.u32 %v11329_v16, %v8509_v20 }
 0x11d   :  { %5154 = vmatpush.bf16.msra.mxu2 %v8672_v59  ;;  %v8765_v34 = vld [vmem:[%s17779_s1 + $0xb50] sm:$0xf0]  ;;  %v8640_v15 = vor.u32 %v11361_v25, %v8637_v28  ;;  %v11293_v40 = vld [vmem:[%s17779_s1 + $0x824] sm:$0xf] }
 0x11e   :  { %5167 = vmatpush.bf16.msra.mxu3 %v8800_v17  ;;  %v8365_v41 = vld [vmem:[%s17779_s1 + $0x830] sm:$0xf0]  ;;  %v11325_v42 = vld [vmem:[%s17779_s1 + $0x924] sm:$0xf]  ;;  %v8768_v43 = vor.u32 %v11393_v33, %v8765_v34 }
 0x11f   :  { %5129 = vmatpush.bf16.msra.mxu0 %v8400_v6  ;;  %v8493_v44 = vld [vmem:[%s17779_s1 + $0x930] sm:$0xf0]  ;;  %v11357_v45 = vld [vmem:[%s17779_s1 + $0xa24] sm:$0xf]  ;;  %v8368_v48 = vor.u32 %v11293_v40, %v8365_v41 }
 0x120   :  { %5142 = vmatpush.bf16.msra.mxu1 %v8528_v7  ;;  %v8621_v46 = vld [vmem:[%s17779_s1 + $0xa30] sm:$0xf0]  ;;  %v11389_v61 = vld [vmem:[%s17779_s1 + $0xb24] sm:$0xf]  ;;  %v8496_v53 = vor.u32 %v11325_v42, %v8493_v44 }
 0x121   :  { %5155 = vmatpush.bf16.msra.mxu2 %v8656_v8  ;;  %v8749_v47 = vld [vmem:[%s17779_s1 + $0xb30] sm:$0xf0]  ;;  %v11289_v49 = vld [vmem:[%s17779_s1 + $0x804] sm:$0xf]  ;;  %v8624_v56 = vor.u32 %v11357_v45, %v8621_v46 }
 0x122   :  { %5168 = vmatpush.bf16.msra.mxu3 %v8784_v18  ;;  %v8349_v50 = vld [vmem:[%s17779_s1 + $0x810] sm:$0xf0]  ;;  %v11321_v57 = vld [vmem:[%s17779_s1 + $0x904] sm:$0xf]  ;;  %v8752_v60 = vor.u32 %v11389_v61, %v8749_v47 }
 0x123   :  { %5130 = vmatpush.bf16.msra.mxu0 %v8384_v36  ;;  %v8477_v58 = vld [vmem:[%s17779_s1 + $0x910] sm:$0xf0]  ;;  %v11353_v59 = vld [vmem:[%s17779_s1 + $0xa04] sm:$0xf]  ;;  %v8352_v5 = vor.u32 %v11289_v49, %v8349_v50 }
 0x124   :  { %5143 = vmatpush.bf16.msra.mxu1 %v8512_v39  ;;  %v8605_v62 = vld [vmem:[%s17779_s1 + $0xa10] sm:$0xf0]  ;;  %v11385_v63 = vld [vmem:[%s17779_s1 + $0xb04] sm:$0xf]  ;;  %v8480_v9 = vor.u32 %v11321_v57, %v8477_v58 }
 0x125   :  { %5156 = vmatpush.bf16.msra.mxu2 %v8640_v15  ;;  %v8733_v17 = vld [vmem:[%s17779_s1 + $0xb10] sm:$0xf0]  ;;  %v11445_v1 = vld [vmem:[%s17779_s1 + $0xce4] sm:$0xf]  ;;  %v8608_v12 = vor.u32 %v11353_v59, %v8605_v62 }
 0x126   :  { %5169 = vmatpush.bf16.msra.mxu3 %v8768_v43  ;;  %v8973_v2 = vld [vmem:[%s17779_s1 + $0xcf0] sm:$0xf0]  ;;  %v11477_v3 = vld [vmem:[%s17779_s1 + $0xde4] sm:$0xf]  ;;  %v8736_v19 = vor.u32 %v11385_v63, %v8733_v17 }
 0x127   :  { %5131 = vmatpush.bf16.msra.mxu0 %v8368_v48  ;;  %v9101_v6 = vld [vmem:[%s17779_s1 + $0xdf0] sm:$0xf0]  ;;  %v11509_v7 = vld [vmem:[%s17779_s1 + $0xee4] sm:$0xf]  ;;  %v8976_v20 = vor.u32 %v11445_v1, %v8973_v2 }
 0x128   :  { %v9229_v8 = vld [vmem:[%s17779_s1 + $0xef0] sm:$0xf0]  ;;  %5144 = vmatpush.bf16.msra.mxu1 %v8496_v53  ;;  %v11541_v16 = vld [vmem:[%s17779_s1 + $0xfe4] sm:$0xf]  ;;  %v9104_v25 = vor.u32 %v11477_v3, %v9101_v6 }
 0x129   :  { %5157 = vmatpush.bf16.msra.mxu2 %v8624_v56  ;;  %v9357_v18 = vld [vmem:[%s17779_s1 + $0xff0] sm:$0xf0]  ;;  %v9232_v28 = vor.u32 %v11509_v7, %v9229_v8  ;;  %v11441_v31 = vld [vmem:[%s17779_s1 + $0xcc4] sm:$0xf] }
 0x12a   :  { %5170 = vmatpush.bf16.msra.mxu3 %v8752_v60  ;;  %v8957_v32 = vld [vmem:[%s17779_s1 + $0xcd0] sm:$0xf0]  ;;  %v11473_v33 = vld [vmem:[%s17779_s1 + $0xdc4] sm:$0xf]  ;;  %v9360_v34 = vor.u32 %v11541_v16, %v9357_v18 }
 0x12b   :  { %5132 = vmatpush.bf16.msra.mxu0 %v8352_v5  ;;  %v9085_v35 = vld [vmem:[%s17779_s1 + $0xdd0] sm:$0xf0]  ;;  %v11505_v36 = vld [vmem:[%s17779_s1 + $0xec4] sm:$0xf]  ;;  %v8960_v40 = vor.u32 %v11441_v31, %v8957_v32  ;;  %v4926_v1 = vpop.f32.mrf.mxu0 }
 0x12c   :  { %v9213_v37 = vld [vmem:[%s17779_s1 + $0xed0] sm:$0xf0]  ;;  %5145 = vmatpush.bf16.msra.mxu1 %v8480_v9  ;;  %v11537_v39 = vld [vmem:[%s17779_s1 + $0xfc4] sm:$0xf]  ;;  %v9088_v41 = vor.u32 %v11473_v33, %v9085_v35  ;;  %v4927_v4 = vadd.f32 %v4926_v1, %v13786_v38 }
 0x12d   :  { %5158 = vmatpush.bf16.msra.mxu2 %v8608_v12  ;;  %v9341_v15 = vld [vmem:[%s17779_s1 + $0xfd0] sm:$0xf0]  ;;  %v9216_v42 = vor.u32 %v11505_v36, %v9213_v37  ;;  %v11437_v43 = vld [vmem:[%s17779_s1 + $0xca4] sm:$0xf] }
 0x12e   :  { %5171 = vmatpush.bf16.msra.mxu3 %v8736_v19  ;;  %v8941_v44 = vld [vmem:[%s17779_s1 + $0xcb0] sm:$0xf0]  ;;  %v11469_v45 = vld [vmem:[%s17779_s1 + $0xda4] sm:$0xf]  ;;  %5133 = vmatmul.bf16.vlgmr.msra.gmra.mxu0 %v12569_v10  ;;  %v9344_v46 = vor.u32 %v11537_v39, %v9341_v15 }
 0x12f   :  { %5177 = vmatpush.bf16.msrb.mxu0 %v8976_v20  ;;  %v9069_v61 = vld [vmem:[%s17779_s1 + $0xdb0] sm:$0xf0]  ;;  %v11501_v47 = vld [vmem:[%s17779_s1 + $0xea4] sm:$0xf]  ;;  %5146 = vmatmul.bf16.vlgmr.msra.gmra.mxu1 %v12573_v13  ;;  %v8944_v53 = vor.u32 %v11437_v43, %v8941_v44 }
 0x130   :  { %5190 = vmatpush.bf16.msrb.mxu1 %v9104_v25  ;;  %v9197_v48 = vld [vmem:[%s17779_s1 + $0xeb0] sm:$0xf0]  ;;  %5159 = vmatmul.bf16.vlgmr.msra.gmra.mxu2 %v12571_v11  ;;  %v11533_v49 = vld [vmem:[%s17779_s1 + $0xfa4] sm:$0xf]  ;;  %v9072_v56 = vor.u32 %v11469_v45, %v9069_v61  ;;  %v4939_v6 = vpop.f32.mrf.mxu1 }
 0x131   :  { %5203 = vmatpush.bf16.msrb.mxu2 %v9232_v28  ;;  %v9325_v50 = vld [vmem:[%s17779_s1 + $0xfb0] sm:$0xf0]  ;;  %5172 = vmatmul.bf16.vlgmr.msra.gmra.mxu3 %v12575_v14  ;;  %v9200_v57 = vor.u32 %v11501_v47, %v9197_v48  ;;  %v11433_v58 = vld [vmem:[%s17779_s1 + $0xc84] sm:$0xf]  ;;  %v4940_v18 = vadd.f32 %v4939_v6, %v4927_v4 }
 0x132   :  { %5216 = vmatpush.bf16.msrb.mxu3 %v9360_v34  ;;  %v8925_v59 = vld [vmem:[%s17779_s1 + $0xc90] sm:$0xf0]  ;;  %v11465_v60 = vld [vmem:[%s17779_s1 + $0xd84] sm:$0xf]  ;;  %v9328_v62 = vor.u32 %v11533_v49, %v9325_v50 }
 0x133   :  { %5178 = vmatpush.bf16.msrb.mxu0 %v8960_v40  ;;  %v9053_v63 = vld [vmem:[%s17779_s1 + $0xd90] sm:$0xf0]  ;;  %v11497_v17 = vld [vmem:[%s17779_s1 + $0xe84] sm:$0xf]  ;;  %v8928_v5 = vor.u32 %v11433_v58, %v8925_v59  ;;  %v4952_v15 = vpop.f32.mrf.mxu2  ;;  %v4928_v61 = vpop.f32.mrf.mxu0 }
 0x134   :  { %5191 = vmatpush.bf16.msrb.mxu1 %v9088_v41  ;;  %v9181_v0 = vld [vmem:[%s17779_s1 + $0xe90] sm:$0xf0]  ;;  %v11529_v2 = vld [vmem:[%s17779_s1 + $0xf84] sm:$0xf]  ;;  %v9056_v7 = vor.u32 %v11465_v60, %v9053_v63  ;;  %v4953_v43 = vadd.f32 %v4952_v15, %v4940_v18 }
 0x135   :  { %5204 = vmatpush.bf16.msrb.mxu2 %v9216_v42  ;;  %v9309_v3 = vld [vmem:[%s17779_s1 + $0xf90] sm:$0xf0]  ;;  %v9184_v8 = vor.u32 %v11497_v17, %v9181_v0  ;;  %v11429_v9 = vld [vmem:[%s17779_s1 + $0xc64] sm:$0xf] }
 0x136   :  { %5217 = vmatpush.bf16.msrb.mxu3 %v9344_v46  ;;  %v8909_v12 = vld [vmem:[%s17779_s1 + $0xc70] sm:$0xf0]  ;;  %v11461_v16 = vld [vmem:[%s17779_s1 + $0xd64] sm:$0xf]  ;;  %v9312_v38 = vor.u32 %v11529_v2, %v9309_v3 }
 0x137   :  { %5179 = vmatpush.bf16.msrb.mxu0 %v8944_v53  ;;  %v9037_v19 = vld [vmem:[%s17779_s1 + $0xd70] sm:$0xf0]  ;;  %v11493_v20 = vld [vmem:[%s17779_s1 + $0xe64] sm:$0xf]  ;;  %v8912_v32 = vor.u32 %v11429_v9, %v8909_v12  ;;  %v4965_v44 = vpop.f32.mrf.mxu3 }
 0x138   :  { %5192 = vmatpush.bf16.msrb.mxu1 %v9072_v56  ;;  %v9165_v25 = vld [vmem:[%s17779_s1 + $0xe70] sm:$0xf0]  ;;  %v11525_v28 = vld [vmem:[%s17779_s1 + $0xf64] sm:$0xf]  ;;  %v9040_v33 = vor.u32 %v11461_v16, %v9037_v19  ;;  %v4941_v48 = vpop.f32.mrf.mxu1  ;;  %v13985_v49 = vadd.f32 %v4965_v44, %v4953_v43 }
 0x139   :  { %5205 = vmatpush.bf16.msrb.mxu2 %v9200_v57  ;;  %v9293_v31 = vld [vmem:[%s17779_s1 + $0xf70] sm:$0xf0]  ;;  %v9168_v34 = vor.u32 %v11493_v20, %v9165_v25  ;;  %v11425_v35 = vld [vmem:[%s17779_s1 + $0xc44] sm:$0xf] }
 0x13a   :  { %5218 = vmatpush.bf16.msrb.mxu3 %v9328_v62  ;;  %v8893_v36 = vld [vmem:[%s17779_s1 + $0xc50] sm:$0xf0]  ;;  %v11457_v37 = vld [vmem:[%s17779_s1 + $0xd44] sm:$0xf]  ;;  %v9296_v39 = vor.u32 %v11525_v28, %v9293_v31 }
 0x13b   :  { %5180 = vmatpush.bf16.msrb.mxu0 %v8928_v5  ;;  %v9021_v40 = vld [vmem:[%s17779_s1 + $0xd50] sm:$0xf0]  ;;  %v11489_v41 = vld [vmem:[%s17779_s1 + $0xe44] sm:$0xf]  ;;  %v8896_v47 = vor.u32 %v11425_v35, %v8893_v36  ;;  %v4954_v18 = vpop.f32.mrf.mxu2 }
 0x13c   :  { %5193 = vmatpush.bf16.msrb.mxu1 %v9056_v7  ;;  %v9149_v42 = vld [vmem:[%s17779_s1 + $0xe50] sm:$0xf0]  ;;  %v11521_v45 = vld [vmem:[%s17779_s1 + $0xf44] sm:$0xf]  ;;  %v9024_v50 = vor.u32 %v11457_v37, %v9021_v40 }
 0x13d   :  { %5206 = vmatpush.bf16.msrb.mxu2 %v9184_v8  ;;  %v9277_v46 = vld [vmem:[%s17779_s1 + $0xf50] sm:$0xf0]  ;;  %v9152_v53 = vor.u32 %v11489_v41, %v9149_v42  ;;  %v11421_v56 = vld [vmem:[%s17779_s1 + $0xc24] sm:$0xf] }
 0x13e   :  { %5219 = vmatpush.bf16.msrb.mxu3 %v9312_v38  ;;  %v8877_v57 = vld [vmem:[%s17779_s1 + $0xc30] sm:$0xf0]  ;;  %v11453_v58 = vld [vmem:[%s17779_s1 + $0xd24] sm:$0xf]  ;;  %v9280_v59 = vor.u32 %v11521_v45, %v9277_v46 }
 0x13f   :  { %5181 = vmatpush.bf16.msrb.mxu0 %v8912_v32  ;;  %v9005_v60 = vld [vmem:[%s17779_s1 + $0xd30] sm:$0xf0]  ;;  %v11485_v62 = vld [vmem:[%s17779_s1 + $0xe24] sm:$0xf]  ;;  %v8880_v1 = vor.u32 %v11421_v56, %v8877_v57  ;;  %v4967_v28 = vpop.f32.mrf.mxu3 }
 0x140   :  { %5194 = vmatpush.bf16.msrb.mxu1 %v9040_v33  ;;  %v9133_v63 = vld [vmem:[%s17779_s1 + $0xe30] sm:$0xf0]  ;;  %v11517_v17 = vld [vmem:[%s17779_s1 + $0xf24] sm:$0xf]  ;;  %v9008_v4 = vor.u32 %v11453_v58, %v9005_v60 }
 0x141   :  { %5207 = vmatpush.bf16.msrb.mxu2 %v9168_v34  ;;  %v9261_v0 = vld [vmem:[%s17779_s1 + $0xf30] sm:$0xf0]  ;;  %v11417_v2 = vld [vmem:[%s17779_s1 + $0xc04] sm:$0xf]  ;;  %v9136_v5 = vor.u32 %v11485_v62, %v9133_v63 }
 0x142   :  { %5220 = vmatpush.bf16.msrb.mxu3 %v9296_v39  ;;  %v8861_v3 = vld [vmem:[%s17779_s1 + $0xc10] sm:$0xf0]  ;;  %v11449_v6 = vld [vmem:[%s17779_s1 + $0xd04] sm:$0xf]  ;;  %v9264_v9 = vor.u32 %v11517_v17, %v9261_v0 }
 0x143   :  { %5182 = vmatpush.bf16.msrb.mxu0 %v8896_v47  ;;  %v8989_v7 = vld [vmem:[%s17779_s1 + $0xd10] sm:$0xf0]  ;;  %v11481_v8 = vld [vmem:[%s17779_s1 + $0xe04] sm:$0xf]  ;;  %v8864_v31 = vor.u32 %v11417_v2, %v8861_v3 }
 0x144   :  { %5195 = vmatpush.bf16.msrb.mxu1 %v9024_v50  ;;  %v9117_v12 = vld [vmem:[%s17779_s1 + $0xe10] sm:$0xf0]  ;;  %v11513_v16 = vld [vmem:[%s17779_s1 + $0xf04] sm:$0xf]  ;;  %v8992_v35 = vor.u32 %v11449_v6, %v8989_v7 }
 0x145   :  { %5208 = vmatpush.bf16.msrb.mxu2 %v9152_v53  ;;  %v9245_v38 = vld [vmem:[%s17779_s1 + $0xf10] sm:$0xf0]  ;;  %v11573_v19 = vld [vmem:[%s17779_s1 + $0x10e4] sm:$0xf]  ;;  %v9120_v36 = vor.u32 %v11481_v8, %v9117_v12 }
 0x146   :  { %5221 = vmatpush.bf16.msrb.mxu3 %v9280_v59  ;;  %v9485_v20 = vld [vmem:[%s17779_s1 + $0x10f0] sm:$0xf0]  ;;  %v11605_v25 = vld [vmem:[%s17779_s1 + $0x11e4] sm:$0xf]  ;;  %v9248_v15 = vor.u32 %v11513_v16, %v9245_v38 }
 0x147   :  { %5183 = vmatpush.bf16.msrb.mxu0 %v8880_v1  ;;  %v9613_v32 = vld [vmem:[%s17779_s1 + $0x11f0] sm:$0xf0]  ;;  %v11637_v33 = vld [vmem:[%s17779_s1 + $0x12e4] sm:$0xf]  ;;  %v9488_v40 = vor.u32 %v11573_v19, %v9485_v20 }
 0x148   :  { %v9741_v34 = vld [vmem:[%s17779_s1 + $0x12f0] sm:$0xf0]  ;;  %5196 = vmatpush.bf16.msrb.mxu1 %v9008_v4  ;;  %v11669_v37 = vld [vmem:[%s17779_s1 + $0x13e4] sm:$0xf]  ;;  %v9616_v41 = vor.u32 %v11605_v25, %v9613_v32 }
 0x149   :  { %5209 = vmatpush.bf16.msrb.mxu2 %v9136_v5  ;;  %v9869_v39 = vld [vmem:[%s17779_s1 + $0x13f0] sm:$0xf0]  ;;  %v9744_v42 = vor.u32 %v11637_v33, %v9741_v34  ;;  %v11569_v43 = vld [vmem:[%s17779_s1 + $0x10c4] sm:$0xf] }
 0x14a   :  { %5222 = vmatpush.bf16.msrb.mxu3 %v9264_v9  ;;  %v9469_v44 = vld [vmem:[%s17779_s1 + $0x10d0] sm:$0xf0]  ;;  %v11601_v45 = vld [vmem:[%s17779_s1 + $0x11c4] sm:$0xf]  ;;  %v9872_v46 = vor.u32 %v11669_v37, %v9869_v39 }
 0x14b   :  { %5184 = vmatpush.bf16.msrb.mxu0 %v8864_v31  ;;  %v9597_v61 = vld [vmem:[%s17779_s1 + $0x11d0] sm:$0xf0]  ;;  %v11633_v47 = vld [vmem:[%s17779_s1 + $0x12c4] sm:$0xf]  ;;  %v9472_v56 = vor.u32 %v11569_v43, %v9469_v44  ;;  %v4978_v19 = vpop.f32.mrf.mxu0 }
 0x14c   :  { %v9725_v48 = vld [vmem:[%s17779_s1 + $0x12d0] sm:$0xf0]  ;;  %5197 = vmatpush.bf16.msrb.mxu1 %v8992_v35  ;;  %v11665_v50 = vld [vmem:[%s17779_s1 + $0x13c4] sm:$0xf]  ;;  %v9600_v57 = vor.u32 %v11601_v45, %v9597_v61  ;;  %v4979_v28 = vadd.f32 %v4978_v19, %v13985_v49  ;;  %v4991_v32 = vpop.f32.mrf.mxu1 }
 0x14d   :  { %5210 = vmatpush.bf16.msrb.mxu2 %v9120_v36  ;;  %v9853_v53 = vld [vmem:[%s17779_s1 + $0x13d0] sm:$0xf0]  ;;  %v9728_v58 = vor.u32 %v11633_v47, %v9725_v48  ;;  %v11565_v59 = vld [vmem:[%s17779_s1 + $0x10a4] sm:$0xf] }
 0x14e   :  { %5223 = vmatpush.bf16.msrb.mxu3 %v9248_v15  ;;  %v9453_v60 = vld [vmem:[%s17779_s1 + $0x10b0] sm:$0xf0]  ;;  %v11597_v62 = vld [vmem:[%s17779_s1 + $0x11a4] sm:$0xf]  ;;  %5185 = vmatmul.bf16.vlgmr.msrb.gmra.mxu0 %v12743_v51  ;;  %v9856_v63 = vor.u32 %v11665_v50, %v9853_v53  ;;  %v4992_v39 = vadd.f32 %v4991_v32, %v4979_v28 }
 0x14f   :  { %5229 = vmatpush.bf16.msra.mxu0 %v9488_v40  ;;  %v9581_v17 = vld [vmem:[%s17779_s1 + $0x11b0] sm:$0xf0]  ;;  %v11629_v0 = vld [vmem:[%s17779_s1 + $0x12a4] sm:$0xf]  ;;  %5198 = vmatmul.bf16.vlgmr.msrb.gmra.mxu1 %v12747_v54  ;;  %v9456_v4 = vor.u32 %v11565_v59, %v9453_v60 }
 0x150   :  { %5242 = vmatpush.bf16.msra.mxu1 %v9616_v41  ;;  %v9709_v1 = vld [vmem:[%s17779_s1 + $0x12b0] sm:$0xf0]  ;;  %5211 = vmatmul.bf16.vlgmr.msrb.gmra.mxu2 %v12745_v52  ;;  %v11661_v2 = vld [vmem:[%s17779_s1 + $0x13a4] sm:$0xf]  ;;  %v9584_v5 = vor.u32 %v11597_v62, %v9581_v17 }
 0x151   :  { %5255 = vmatpush.bf16.msra.mxu2 %v9744_v42  ;;  %v9837_v3 = vld [vmem:[%s17779_s1 + $0x13b0] sm:$0xf0]  ;;  %5224 = vmatmul.bf16.vlgmr.msrb.gmra.mxu3 %v12749_v55  ;;  %v9712_v6 = vor.u32 %v11629_v0, %v9709_v1  ;;  %v11561_v7 = vld [vmem:[%s17779_s1 + $0x1084] sm:$0xf] }
 0x152   :  { %5268 = vmatpush.bf16.msra.mxu3 %v9872_v46  ;;  %v9437_v8 = vld [vmem:[%s17779_s1 + $0x1090] sm:$0xf0]  ;;  %v11593_v9 = vld [vmem:[%s17779_s1 + $0x1184] sm:$0xf]  ;;  %v9840_v12 = vor.u32 %v11661_v2, %v9837_v3 }
 0x153   :  { %5230 = vmatpush.bf16.msra.mxu0 %v9472_v56  ;;  %v9565_v16 = vld [vmem:[%s17779_s1 + $0x1190] sm:$0xf0]  ;;  %v11625_v38 = vld [vmem:[%s17779_s1 + $0x1284] sm:$0xf]  ;;  %v9440_v31 = vor.u32 %v11561_v7, %v9437_v8  ;;  %v5004_v53 = vpop.f32.mrf.mxu2  ;;  %v4980_v17 = vpop.f32.mrf.mxu0 }
 0x154   :  { %5243 = vmatpush.bf16.msra.mxu1 %v9600_v57  ;;  %v9693_v18 = vld [vmem:[%s17779_s1 + $0x1290] sm:$0xf0]  ;;  %v11657_v20 = vld [vmem:[%s17779_s1 + $0x1384] sm:$0xf]  ;;  %v9568_v33 = vor.u32 %v11593_v9, %v9565_v16  ;;  %v5005_v59 = vadd.f32 %v5004_v53, %v4992_v39  ;;  %v5017_v60 = vpop.f32.mrf.mxu3  ;;  %v4993_v1 = vpop.f32.mrf.mxu1 }
 0x155   :  { %5256 = vmatpush.bf16.msra.mxu2 %v9728_v58  ;;  %v9821_v25 = vld [vmem:[%s17779_s1 + $0x1390] sm:$0xf0]  ;;  %v9696_v34 = vor.u32 %v11625_v38, %v9693_v18  ;;  %v11557_v35 = vld [vmem:[%s17779_s1 + $0x1064] sm:$0xf] }
 0x156   :  { %5269 = vmatpush.bf16.msra.mxu3 %v9856_v63  ;;  %v9421_v36 = vld [vmem:[%s17779_s1 + $0x1070] sm:$0xf0]  ;;  %v11589_v37 = vld [vmem:[%s17779_s1 + $0x1164] sm:$0xf]  ;;  %v9824_v49 = vor.u32 %v11657_v20, %v9821_v25  ;;  %v14184_v2 = vadd.f32 %v5017_v60, %v5005_v59 }
 0x157   :  { %5231 = vmatpush.bf16.msra.mxu0 %v9456_v4  ;;  %v9549_v15 = vld [vmem:[%s17779_s1 + $0x1170] sm:$0xf0]  ;;  %v11621_v40 = vld [vmem:[%s17779_s1 + $0x1264] sm:$0xf]  ;;  %v9424_v44 = vor.u32 %v11557_v35, %v9421_v36 }
 0x158   :  { %5244 = vmatpush.bf16.msra.mxu1 %v9584_v5  ;;  %v9677_v41 = vld [vmem:[%s17779_s1 + $0x1270] sm:$0xf0]  ;;  %v11653_v42 = vld [vmem:[%s17779_s1 + $0x1364] sm:$0xf]  ;;  %v9552_v45 = vor.u32 %v11589_v37, %v9549_v15 }
 0x159   :  { %5257 = vmatpush.bf16.msra.mxu2 %v9712_v6  ;;  %v9805_v43 = vld [vmem:[%s17779_s1 + $0x1370] sm:$0xf0]  ;;  %v9680_v46 = vor.u32 %v11621_v40, %v9677_v41  ;;  %v11553_v61 = vld [vmem:[%s17779_s1 + $0x1044] sm:$0xf] }
 0x15a   :  { %5270 = vmatpush.bf16.msra.mxu3 %v9840_v12  ;;  %v9405_v47 = vld [vmem:[%s17779_s1 + $0x1050] sm:$0xf0]  ;;  %v11585_v48 = vld [vmem:[%s17779_s1 + $0x1144] sm:$0xf]  ;;  %v9808_v50 = vor.u32 %v11653_v42, %v9805_v43 }
 0x15b   :  { %5232 = vmatpush.bf16.msra.mxu0 %v9440_v31  ;;  %v9533_v56 = vld [vmem:[%s17779_s1 + $0x1150] sm:$0xf0]  ;;  %v11617_v57 = vld [vmem:[%s17779_s1 + $0x1244] sm:$0xf]  ;;  %v9408_v0 = vor.u32 %v11553_v61, %v9405_v47  ;;  %v5006_v39 = vpop.f32.mrf.mxu2 }
 0x15c   :  { %5245 = vmatpush.bf16.msra.mxu1 %v9568_v33  ;;  %v9661_v58 = vld [vmem:[%s17779_s1 + $0x1250] sm:$0xf0]  ;;  %v11649_v62 = vld [vmem:[%s17779_s1 + $0x1344] sm:$0xf]  ;;  %v9536_v3 = vor.u32 %v11585_v48, %v9533_v56  ;;  %v5019_v42 = vpop.f32.mrf.mxu3 }
 0x15d   :  { %5258 = vmatpush.bf16.msra.mxu2 %v9696_v34  ;;  %v9789_v63 = vld [vmem:[%s17779_s1 + $0x1350] sm:$0xf0]  ;;  %v9664_v4 = vor.u32 %v11617_v57, %v9661_v58  ;;  %v11549_v5 = vld [vmem:[%s17779_s1 + $0x1024] sm:$0xf] }
 0x15e   :  { %5271 = vmatpush.bf16.msra.mxu3 %v9824_v49  ;;  %v9389_v6 = vld [vmem:[%s17779_s1 + $0x1030] sm:$0xf0]  ;;  %v11581_v7 = vld [vmem:[%s17779_s1 + $0x1124] sm:$0xf]  ;;  %v9792_v8 = vor.u32 %v11649_v62, %v9789_v63 }
 0x15f   :  { %5233 = vmatpush.bf16.msra.mxu0 %v9424_v44  ;;  %v9517_v9 = vld [vmem:[%s17779_s1 + $0x1130] sm:$0xf0]  ;;  %v11613_v12 = vld [vmem:[%s17779_s1 + $0x1224] sm:$0xf]  ;;  %v9392_v19 = vor.u32 %v11549_v5, %v9389_v6 }
 0x160   :  { %5246 = vmatpush.bf16.msra.mxu1 %v9552_v45  ;;  %v9645_v16 = vld [vmem:[%s17779_s1 + $0x1230] sm:$0xf0]  ;;  %v11645_v38 = vld [vmem:[%s17779_s1 + $0x1324] sm:$0xf]  ;;  %v9520_v28 = vor.u32 %v11581_v7, %v9517_v9 }
 0x161   :  { %5259 = vmatpush.bf16.msra.mxu2 %v9680_v46  ;;  %v9773_v18 = vld [vmem:[%s17779_s1 + $0x1330] sm:$0xf0]  ;;  %v11545_v20 = vld [vmem:[%s17779_s1 + $0x1004] sm:$0xf]  ;;  %v9648_v31 = vor.u32 %v11613_v12, %v9645_v16 }
 0x162   :  { %5272 = vmatpush.bf16.msra.mxu3 %v9808_v50  ;;  %v9373_v25 = vld [vmem:[%s17779_s1 + $0x1010] sm:$0xf0]  ;;  %v11577_v32 = vld [vmem:[%s17779_s1 + $0x1104] sm:$0xf]  ;;  %v9776_v35 = vor.u32 %v11645_v38, %v9773_v18 }
 0x163   :  { %5234 = vmatpush.bf16.msra.mxu0 %v9408_v0  ;;  %v9501_v33 = vld [vmem:[%s17779_s1 + $0x1110] sm:$0xf0]  ;;  %v11609_v34 = vld [vmem:[%s17779_s1 + $0x1204] sm:$0xf]  ;;  %v9376_v43 = vor.u32 %v11545_v20, %v9373_v25 }
 0x164   :  { %5247 = vmatpush.bf16.msra.mxu1 %v9536_v3  ;;  %v9629_v36 = vld [vmem:[%s17779_s1 + $0x1210] sm:$0xf0]  ;;  %v11641_v37 = vld [vmem:[%s17779_s1 + $0x1304] sm:$0xf]  ;;  %v9504_v61 = vor.u32 %v11577_v32, %v9501_v33 }
 0x165   :  { %5260 = vmatpush.bf16.msra.mxu2 %v9664_v4  ;;  %v9757_v49 = vld [vmem:[%s17779_s1 + $0x1310] sm:$0xf0]  ;;  %v11701_v15 = vld [vmem:[%s17779_s1 + $0x14e4] sm:$0xf]  ;;  %v9632_v47 = vor.u32 %v11609_v34, %v9629_v36 }
 0x166   :  { %5273 = vmatpush.bf16.msra.mxu3 %v9792_v8  ;;  %v9997_v40 = vld [vmem:[%s17779_s1 + $0x14f0] sm:$0xf0]  ;;  %v11733_v41 = vld [vmem:[%s17779_s1 + $0x15e4] sm:$0xf]  ;;  %v9760_v53 = vor.u32 %v11641_v37, %v9757_v49 }
 0x167   :  { %5235 = vmatpush.bf16.msra.mxu0 %v9392_v19  ;;  %v10125_v44 = vld [vmem:[%s17779_s1 + $0x15f0] sm:$0xf0]  ;;  %v11765_v45 = vld [vmem:[%s17779_s1 + $0x16e4] sm:$0xf]  ;;  %v10000_v56 = vor.u32 %v11701_v15, %v9997_v40 }
 0x168   :  { %v10253_v46 = vld [vmem:[%s17779_s1 + $0x16f0] sm:$0xf0]  ;;  %5248 = vmatpush.bf16.msra.mxu1 %v9520_v28  ;;  %v11797_v48 = vld [vmem:[%s17779_s1 + $0x17e4] sm:$0xf]  ;;  %v10128_v57 = vor.u32 %v11733_v41, %v10125_v44 }
 0x169   :  { %5261 = vmatpush.bf16.msra.mxu2 %v9648_v31  ;;  %v10381_v50 = vld [vmem:[%s17779_s1 + $0x17f0] sm:$0xf0]  ;;  %v10256_v58 = vor.u32 %v11765_v45, %v10253_v46  ;;  %v11697_v59 = vld [vmem:[%s17779_s1 + $0x14c4] sm:$0xf] }
 0x16a   :  { %5274 = vmatpush.bf16.msra.mxu3 %v9776_v35  ;;  %v9981_v60 = vld [vmem:[%s17779_s1 + $0x14d0] sm:$0xf0]  ;;  %v11729_v62 = vld [vmem:[%s17779_s1 + $0x15c4] sm:$0xf]  ;;  %v10384_v63 = vor.u32 %v11797_v48, %v10381_v50 }
 0x16b   :  { %5236 = vmatpush.bf16.msra.mxu0 %v9376_v43  ;;  %v10109_v17 = vld [vmem:[%s17779_s1 + $0x15d0] sm:$0xf0]  ;;  %v11761_v0 = vld [vmem:[%s17779_s1 + $0x16c4] sm:$0xf]  ;;  %v9984_v5 = vor.u32 %v11697_v59, %v9981_v60  ;;  %v5030_v46 = vpop.f32.mrf.mxu0 }
 0x16c   :  { %v10237_v1 = vld [vmem:[%s17779_s1 + $0x16d0] sm:$0xf0]  ;;  %5249 = vmatpush.bf16.msra.mxu1 %v9504_v61  ;;  %v11793_v3 = vld [vmem:[%s17779_s1 + $0x17c4] sm:$0xf]  ;;  %v10112_v6 = vor.u32 %v11729_v62, %v10109_v17 }
 0x16d   :  { %5262 = vmatpush.bf16.msra.mxu2 %v9632_v47  ;;  %v10365_v4 = vld [vmem:[%s17779_s1 + $0x17d0] sm:$0xf0]  ;;  %v10240_v7 = vor.u32 %v11761_v0, %v10237_v1  ;;  %v11693_v8 = vld [vmem:[%s17779_s1 + $0x14a4] sm:$0xf] }
 0x16e   :  { %5275 = vmatpush.bf16.msra.mxu3 %v9760_v53  ;;  %v9965_v9 = vld [vmem:[%s17779_s1 + $0x14b0] sm:$0xf0]  ;;  %v11725_v12 = vld [vmem:[%s17779_s1 + $0x15a4] sm:$0xf]  ;;  %v10368_v38 = vor.u32 %v11793_v3, %v10365_v4 }
 0x16f   :  { %5281 = vmatpush.bf16.msrb.mxu0 %v10000_v56  ;;  %v14291_v16 = vld.sshfl [vmem:[#allocation1] sm:$0xff pattern:$0x73625140]  ;;  %v10093_v18 = vld [vmem:[%s17779_s1 + $0x15b0] sm:$0xf0]  ;;  %v9968_v34 = vor.u32 %v11693_v8, %v9965_v9  ;;  %v5043_v56 = vpop.f32.mrf.mxu1 }
 0x170   :  { %5294 = vmatpush.bf16.msrb.mxu1 %v10128_v57  ;;  %5237 = vmatmul.bf16.vlgmr.msra.gmra.mxu0 %v14291_v16  ;;  %v11757_v19 = vld [vmem:[%s17779_s1 + $0x16a4] sm:$0xf]  ;;  %v10221_v20 = vld [vmem:[%s17779_s1 + $0x16b0] sm:$0xf0]  ;;  %v10096_v35 = vor.u32 %v11725_v12, %v10093_v18  ;;  %v5044_v62 = vadd.f32 %v5043_v56, %v5030_v46 }
 0x171   :  { %5307 = vmatpush.bf16.msrb.mxu2 %v10256_v58  ;;  %v11963_v25 = vld.sshfl [vmem:[#allocation1 + $0x10] sm:$0xff pattern:$0x73625140]  ;;  %v14303_v28 = vld.sshfl [vmem:[#allocation1 + $0x8] sm:$0xff pattern:$0x73625140]  ;;  %v10224_v36 = vor.u32 %v11757_v19, %v10221_v20 }
 0x172   :  { %5320 = vmatpush.bf16.msrb.mxu3 %v10384_v63  ;;  %5263 = vmatmul.bf16.vlgmr.msra.gmra.mxu2 %v11963_v25  ;;  %v11789_v31 = vld [vmem:[%s17779_s1 + $0x17a4] sm:$0xf]  ;;  %v10349_v32 = vld [vmem:[%s17779_s1 + $0x17b0] sm:$0xf0] }
 0x173   :  { %5250 = vmatmul.bf16.vlgmr.msra.gmra.mxu1 %v14303_v28  ;;  %v11965_v33 = vld.sshfl [vmem:[#allocation1 + $0x18] sm:$0xff pattern:$0x73625140]  ;;  %5282 = vmatpush.bf16.msrb.mxu0 %v9984_v5  ;;  %v11689_v37 = vld [vmem:[%s17779_s1 + $0x1484] sm:$0xf]  ;;  %v10352_v15 = vor.u32 %v11789_v31, %v10349_v32 }
 0x174   :  { %5276 = vmatmul.bf16.vlgmr.msra.gmra.mxu3 %v11965_v33  ;;  %5295 = vmatpush.bf16.msrb.mxu1 %v10112_v6  ;;  %v9949_v49 = vld [vmem:[%s17779_s1 + $0x1490] sm:$0xf0]  ;;  %v11721_v39 = vld [vmem:[%s17779_s1 + $0x1584] sm:$0xf]  ;;  %v5069_v19 = vpop.f32.mrf.mxu3  ;;  %v5032_v33 = vpop.f32.mrf.mxu0 }
 0x175   :  { %5308 = vmatpush.bf16.msrb.mxu2 %v10240_v7  ;;  %v10077_v40 = vld [vmem:[%s17779_s1 + $0x1590] sm:$0xf0]  ;;  %v11753_v41 = vld [vmem:[%s17779_s1 + $0x1684] sm:$0xf]  ;;  %v9952_v45 = vor.u32 %v11689_v37, %v9949_v49  ;;  %v5056_v7 = vpop.f32.mrf.mxu2  ;;  %v7555_v33 = vld [vmem:[%s17779_s1 + $0x1c8] sm:$0xf] }
 0x176   :  { %5321 = vmatpush.bf16.msrb.mxu3 %v10368_v38  ;;  %v10205_v42 = vld [vmem:[%s17779_s1 + $0x1690] sm:$0xf0]  ;;  %v11785_v43 = vld [vmem:[%s17779_s1 + $0x1784] sm:$0xf]  ;;  %v10080_v61 = vor.u32 %v11721_v39, %v10077_v40  ;;  %v5057_v18 = vadd.f32 %v5056_v7, %v5044_v62 }
 0x177   :  { %v10333_v44 = vld [vmem:[%s17779_s1 + $0x1790] sm:$0xf0]  ;;  %5283 = vmatpush.bf16.msrb.mxu0 %v9968_v34  ;;  %v10208_v47 = vor.u32 %v11753_v41, %v10205_v42  ;;  %v11685_v48 = vld [vmem:[%s17779_s1 + $0x1464] sm:$0xf]  ;;  %v5045_v39 = vpop.f32.mrf.mxu1 }
 0x178   :  { %5296 = vmatpush.bf16.msrb.mxu1 %v10096_v35  ;;  %v9933_v50 = vld [vmem:[%s17779_s1 + $0x1470] sm:$0xf0]  ;;  %v11717_v53 = vld [vmem:[%s17779_s1 + $0x1564] sm:$0xf]  ;;  %v10336_v57 = vor.u32 %v11785_v43, %v10333_v44  ;;  %v14384_v32 = vadd.f32 %v5069_v19, %v5057_v18  ;;  %v11156_v39 = vld [vmem:[%s17779_s1 + $0x3d4] sm:$0xf0] }
 0x179   :  { %5309 = vmatpush.bf16.msrb.mxu2 %v10224_v36  ;;  %v10061_v58 = vld [vmem:[%s17779_s1 + $0x1570] sm:$0xf0]  ;;  %v11749_v59 = vld [vmem:[%s17779_s1 + $0x1664] sm:$0xf]  ;;  %v9936_v0 = vor.u32 %v11685_v48, %v9933_v50 }
 0x17a   :  { %5322 = vmatpush.bf16.msrb.mxu3 %v10352_v15  ;;  %v10189_v60 = vld [vmem:[%s17779_s1 + $0x1670] sm:$0xf0]  ;;  %v11781_v63 = vld [vmem:[%s17779_s1 + $0x1764] sm:$0xf]  ;;  %v10064_v1 = vor.u32 %v11717_v53, %v10061_v58 }
 0x17b   :  { %v10317_v17 = vld [vmem:[%s17779_s1 + $0x1770] sm:$0xf0]  ;;  %5284 = vmatpush.bf16.msrb.mxu0 %v9952_v45  ;;  %v10192_v3 = vor.u32 %v11749_v59, %v10189_v60  ;;  %v11681_v4 = vld [vmem:[%s17779_s1 + $0x1444] sm:$0xf] }
 0x17c   :  { %5297 = vmatpush.bf16.msrb.mxu1 %v10080_v61  ;;  %v9917_v5 = vld [vmem:[%s17779_s1 + $0x1450] sm:$0xf0]  ;;  %v11713_v6 = vld [vmem:[%s17779_s1 + $0x1544] sm:$0xf]  ;;  %v10320_v8 = vor.u32 %v11781_v63, %v10317_v17  ;;  %v5071_v63 = vpop.f32.mrf.mxu3  ;;  %v7443_v17 = vld [vmem:[%s17779_s1 + $0xe8] sm:$0xf] }
 0x17d   :  { %5310 = vmatpush.bf16.msrb.mxu2 %v10208_v47  ;;  %v10045_v9 = vld [vmem:[%s17779_s1 + $0x1550] sm:$0xf0]  ;;  %v11745_v12 = vld [vmem:[%s17779_s1 + $0x1644] sm:$0xf]  ;;  %v9920_v31 = vor.u32 %v11681_v4, %v9917_v5  ;;  %v11096_v4 = vld [vmem:[%s17779_s1 + $0x1f4] sm:$0xf0] }
 0x17e   :  { %5323 = vmatpush.bf16.msrb.mxu3 %v10336_v57  ;;  %v10173_v38 = vld [vmem:[%s17779_s1 + $0x1650] sm:$0xf0]  ;;  %v11777_v20 = vld [vmem:[%s17779_s1 + $0x1744] sm:$0xf]  ;;  %v10048_v34 = vor.u32 %v11713_v6, %v10045_v9  ;;  %v5058_v57 = vpop.f32.mrf.mxu2  ;;  %v7699_v5 = vld [vmem:[%s17779_s1 + $0x2e8] sm:$0xf] }
 0x17f   :  { %v10301_v25 = vld [vmem:[%s17779_s1 + $0x1750] sm:$0xf0]  ;;  %5285 = vmatpush.bf16.msrb.mxu0 %v9936_v0  ;;  %v10176_v35 = vor.u32 %v11745_v12, %v10173_v38  ;;  %v11677_v36 = vld [vmem:[%s17779_s1 + $0x1424] sm:$0xf]  ;;  %v11064_v0 = vld [vmem:[%s17779_s1 + $0xf4] sm:$0xf0] }
 0x180   :  { %5298 = vmatpush.bf16.msrb.mxu1 %v10064_v1  ;;  %v9901_v37 = vld [vmem:[%s17779_s1 + $0x1430] sm:$0xf0]  ;;  %v11709_v49 = vld [vmem:[%s17779_s1 + $0x1524] sm:$0xf]  ;;  %v10304_v15 = vor.u32 %v11777_v20, %v10301_v25  ;;  %v7571_v1 = vld [vmem:[%s17779_s1 + $0x1e8] sm:$0xf]  ;;  %v7444_v18 = vor.u32 %v11064_v0, %v7443_v17 }
 0x181   :  { %5311 = vmatpush.bf16.msrb.mxu2 %v10192_v3  ;;  %v10029_v40 = vld [vmem:[%s17779_s1 + $0x1530] sm:$0xf0]  ;;  %v11741_v41 = vld [vmem:[%s17779_s1 + $0x1624] sm:$0xf]  ;;  %v9904_v45 = vor.u32 %v11677_v36, %v9901_v37  ;;  %v11128_v6 = vld [vmem:[%s17779_s1 + $0x2f4] sm:$0xf0]  ;;  %v7572_v19 = vor.u32 %v11096_v4, %v7571_v1 }
 0x182   :  { %5324 = vmatpush.bf16.msrb.mxu3 %v10320_v8  ;;  %v10157_v42 = vld [vmem:[%s17779_s1 + $0x1630] sm:$0xf0]  ;;  %v11773_v43 = vld [vmem:[%s17779_s1 + $0x1724] sm:$0xf]  ;;  %v10032_v47 = vor.u32 %v11709_v49, %v10029_v40  ;;  %v7827_v9 = vld [vmem:[%s17779_s1 + $0x3e8] sm:$0xf]  ;;  %v7700_v20 = vor.u32 %v11128_v6, %v7699_v5 }
 0x183   :  { %v10285_v44 = vld [vmem:[%s17779_s1 + $0x1730] sm:$0xf0]  ;;  %5286 = vmatpush.bf16.msrb.mxu0 %v9920_v31  ;;  %v11673_v46 = vld [vmem:[%s17779_s1 + $0x1404] sm:$0xf]  ;;  %v10160_v48 = vor.u32 %v11741_v41, %v10157_v42  ;;  %v11160_v12 = vld [vmem:[%s17779_s1 + $0x3f4] sm:$0xf0] }
 0x184   :  { %v9885_v61 = vld [vmem:[%s17779_s1 + $0x1410] sm:$0xf0]  ;;  %5299 = vmatpush.bf16.msrb.mxu1 %v10048_v34  ;;  %v11705_v50 = vld [vmem:[%s17779_s1 + $0x1504] sm:$0xf]  ;;  %v10288_v58 = vor.u32 %v11773_v43, %v10285_v44  ;;  %v7427_v25 = vld [vmem:[%s17779_s1 + $0xc8] sm:$0xf]  ;;  %v7828_v34 = vor.u32 %v11160_v12, %v7827_v9 }
 0x185   :  { %5312 = vmatpush.bf16.msrb.mxu2 %v10176_v35  ;;  %v10013_v53 = vld [vmem:[%s17779_s1 + $0x1510] sm:$0xf0]  ;;  %v11737_v56 = vld [vmem:[%s17779_s1 + $0x1604] sm:$0xf]  ;;  %v9888_v3 = vor.u32 %v11673_v46, %v9885_v61  ;;  %v11060_v31 = vld [vmem:[%s17779_s1 + $0xd4] sm:$0xf0] }
 0x186   :  { %5325 = vmatpush.bf16.msrb.mxu3 %v10304_v15  ;;  %v10141_v59 = vld [vmem:[%s17779_s1 + $0x1610] sm:$0xf0]  ;;  %v11769_v60 = vld [vmem:[%s17779_s1 + $0x1704] sm:$0xf]  ;;  %v10016_v7 = vor.u32 %v11705_v50, %v10013_v53  ;;  %v11092_v35 = vld [vmem:[%s17779_s1 + $0x1d4] sm:$0xf0]  ;;  %v7428_v15 = vor.u32 %v11060_v31, %v7427_v25 }
 0x187   :  { %v10269_v62 = vld [vmem:[%s17779_s1 + $0x1710] sm:$0xf0]  ;;  %5287 = vmatpush.bf16.msrb.mxu0 %v9904_v45  ;;  %v10144_v8 = vor.u32 %v11737_v56, %v10141_v59  ;;  %v7683_v36 = vld [vmem:[%s17779_s1 + $0x2c8] sm:$0xf]  ;;  %v11124_v37 = vld [vmem:[%s17779_s1 + $0x2d4] sm:$0xf0]  ;;  %v7556_v40 = vor.u32 %v11092_v35, %v7555_v33 }
 0x188   :  { %5300 = vmatpush.bf16.msrb.mxu1 %v10032_v47  ;;  %v10272_v38 = vor.u32 %v11769_v60, %v10269_v62  ;;  %v7811_v49 = vld [vmem:[%s17779_s1 + $0x3c8] sm:$0xf]  ;;  %v7684_v41 = vor.u32 %v11124_v37, %v7683_v36  ;;  %v11056_v43 = vld [vmem:[%s17779_s1 + $0xb4] sm:$0xf0] }
 0x189   :  { %5313 = vmatpush.bf16.msrb.mxu2 %v10160_v48  ;;  %v7411_v42 = vld [vmem:[%s17779_s1 + $0xa8] sm:$0xf]  ;;  %v11966_v45 = vld.sshfl [vmem:[#allocation1 + $0x20] sm:$0xff pattern:$0x73625140]  ;;  %v7812_v46 = vor.u32 %v11156_v39, %v7811_v49 }
 0x18a   :  { %5326 = vmatpush.bf16.msrb.mxu3 %v10288_v58  ;;  %v7539_v44 = vld [vmem:[%s17779_s1 + $0x1a8] sm:$0xf]  ;;  %v11088_v61 = vld [vmem:[%s17779_s1 + $0x1b4] sm:$0xf0]  ;;  %v7412_v59 = vor.u32 %v11056_v43, %v7411_v42 }
 0x18b   :  { %5288 = vmatpush.bf16.msrb.mxu0 %v9888_v3  ;;  %v7667_v47 = vld [vmem:[%s17779_s1 + $0x2a8] sm:$0xf]  ;;  %v11120_v48 = vld [vmem:[%s17779_s1 + $0x2b4] sm:$0xf0]  ;;  %v7540_v60 = vor.u32 %v11088_v61, %v7539_v44  ;;  %v5082_v9 = vpop.f32.mrf.mxu0 }
 0x18c   :  { %5301 = vmatpush.bf16.msrb.mxu1 %v10016_v7  ;;  %v11967_v50 = vld.sshfl [vmem:[#allocation1 + $0x30] sm:$0xff pattern:$0x73625140]  ;;  %v11968_v53 = vld.sshfl [vmem:[#allocation1 + $0x28] sm:$0xff pattern:$0x73625140]  ;;  %v7668_v62 = vor.u32 %v11120_v48, %v7667_v47  ;;  %v5083_v25 = vadd.f32 %v5082_v9, %v14384_v32  ;;  %v5095_v31 = vpop.f32.mrf.mxu1 }
 0x18d   :  { %5314 = vmatpush.bf16.msrb.mxu2 %v10144_v8  ;;  %v7795_v56 = vld [vmem:[%s17779_s1 + $0x3a8] sm:$0xf]  ;;  %v11152_v57 = vld [vmem:[%s17779_s1 + $0x3b4] sm:$0xf0] }
 0x18e   :  { %5327 = vmatpush.bf16.msrb.mxu3 %v10272_v38  ;;  %5289 = vmatmul.bf16.vlgmr.msrb.gmra.mxu0 %v11966_v45  ;;  %v11969_v58 = vld.sshfl [vmem:[#allocation1 + $0x38] sm:$0xff pattern:$0x73625140]  ;;  %v7395_v63 = vld [vmem:[%s17779_s1 + $0x88] sm:$0xf]  ;;  %v7796_v1 = vor.u32 %v11152_v57, %v7795_v56  ;;  %v5096_v49 = vadd.f32 %v5095_v31, %v5083_v25 }
 0x18f   :  { %5333 = vmatpush.bf16.msra.mxu0 %v7444_v18  ;;  %5302 = vmatmul.bf16.vlgmr.msrb.gmra.mxu1 %v11968_v53  ;;  %v11052_v17 = vld [vmem:[%s17779_s1 + $0x94] sm:$0xf0]  ;;  %v7523_v0 = vld [vmem:[%s17779_s1 + $0x188] sm:$0xf] }
 0x190   :  { %5346 = vmatpush.bf16.msra.mxu1 %v7572_v19  ;;  %5315 = vmatmul.bf16.vlgmr.msrb.gmra.mxu2 %v11967_v50  ;;  %v11084_v3 = vld [vmem:[%s17779_s1 + $0x194] sm:$0xf0]  ;;  %v7651_v4 = vld [vmem:[%s17779_s1 + $0x288] sm:$0xf]  ;;  %v7396_v8 = vor.u32 %v11052_v17, %v7395_v63 }
 0x191   :  { %5359 = vmatpush.bf16.msra.mxu2 %v7700_v20  ;;  %5328 = vmatmul.bf16.vlgmr.msrb.gmra.mxu3 %v11969_v58  ;;  %v11116_v5 = vld [vmem:[%s17779_s1 + $0x294] sm:$0xf0]  ;;  %v7779_v6 = vld [vmem:[%s17779_s1 + $0x388] sm:$0xf]  ;;  %v7524_v12 = vor.u32 %v11084_v3, %v7523_v0 }
 0x192   :  { %5372 = vmatpush.bf16.msra.mxu3 %v7828_v34  ;;  %v11148_v7 = vld [vmem:[%s17779_s1 + $0x394] sm:$0xf0]  ;;  %v7652_v38 = vor.u32 %v11116_v5, %v7651_v4  ;;  %v7379_v18 = vld [vmem:[%s17779_s1 + $0x68] sm:$0xf] }
 0x193   :  { %5334 = vmatpush.bf16.msra.mxu0 %v7428_v15  ;;  %v11048_v19 = vld [vmem:[%s17779_s1 + $0x74] sm:$0xf0]  ;;  %v7507_v20 = vld [vmem:[%s17779_s1 + $0x168] sm:$0xf]  ;;  %v7780_v33 = vor.u32 %v11148_v7, %v7779_v6  ;;  %v5108_v44 = vpop.f32.mrf.mxu2 }
 0x194   :  { %5347 = vmatpush.bf16.msra.mxu1 %v7556_v40  ;;  %v11080_v34 = vld [vmem:[%s17779_s1 + $0x174] sm:$0xf0]  ;;  %v7635_v35 = vld [vmem:[%s17779_s1 + $0x268] sm:$0xf]  ;;  %v7380_v39 = vor.u32 %v11048_v19, %v7379_v18  ;;  %v5109_v48 = vadd.f32 %v5108_v44, %v5096_v49  ;;  %v5121_v50 = vpop.f32.mrf.mxu3 }
 0x195   :  { %5360 = vmatpush.bf16.msra.mxu2 %v7684_v41  ;;  %v11112_v36 = vld [vmem:[%s17779_s1 + $0x274] sm:$0xf0]  ;;  %v7763_v37 = vld [vmem:[%s17779_s1 + $0x368] sm:$0xf]  ;;  %v7508_v15 = vor.u32 %v11080_v34, %v7507_v20 }
 0x196   :  { %5373 = vmatpush.bf16.msra.mxu3 %v7812_v46  ;;  %v11144_v32 = vld [vmem:[%s17779_s1 + $0x374] sm:$0xf0]  ;;  %v7636_v40 = vor.u32 %v11112_v36, %v7635_v35  ;;  %v7363_v41 = vld [vmem:[%s17779_s1 + $0x48] sm:$0xf]  ;;  %v14579_v58 = vadd.f32 %v5121_v50, %v5109_v48 }
 0x197   :  { %5335 = vmatpush.bf16.msra.mxu0 %v7412_v59  ;;  %v11044_v42 = vld [vmem:[%s17779_s1 + $0x54] sm:$0xf0]  ;;  %v7491_v43 = vld [vmem:[%s17779_s1 + $0x148] sm:$0xf]  ;;  %v7764_v45 = vor.u32 %v11144_v32, %v7763_v37  ;;  %v5084_v59 = vpop.f32.mrf.mxu0 }
 0x198   :  { %5348 = vmatpush.bf16.msra.mxu1 %v7540_v60  ;;  %v11076_v46 = vld [vmem:[%s17779_s1 + $0x154] sm:$0xf0]  ;;  %v7619_v61 = vld [vmem:[%s17779_s1 + $0x248] sm:$0xf]  ;;  %v7364_v57 = vor.u32 %v11044_v42, %v7363_v41 }
 0x199   :  { %5361 = vmatpush.bf16.msra.mxu2 %v7668_v62  ;;  %v11108_v47 = vld [vmem:[%s17779_s1 + $0x254] sm:$0xf0]  ;;  %v7747_v53 = vld [vmem:[%s17779_s1 + $0x348] sm:$0xf]  ;;  %v7492_v60 = vor.u32 %v11076_v46, %v7491_v43 }
 0x19a   :  { %5374 = vmatpush.bf16.msra.mxu3 %v7796_v1  ;;  %v11140_v56 = vld [vmem:[%s17779_s1 + $0x354] sm:$0xf0]  ;;  %v7620_v62 = vor.u32 %v11108_v47, %v7619_v61  ;;  %v7347_v63 = vld [vmem:[%s17779_s1 + $0x28] sm:$0xf]  ;;  %v5097_v1 = vpop.f32.mrf.mxu1 }
 0x19b   :  { %5336 = vmatpush.bf16.msra.mxu0 %v7396_v8  ;;  %v11040_v17 = vld [vmem:[%s17779_s1 + $0x34] sm:$0xf0]  ;;  %v7475_v0 = vld [vmem:[%s17779_s1 + $0x128] sm:$0xf]  ;;  %v7748_v3 = vor.u32 %v11140_v56, %v7747_v53 }
 0x19c   :  { %5349 = vmatpush.bf16.msra.mxu1 %v7524_v12  ;;  %v11072_v4 = vld [vmem:[%s17779_s1 + $0x134] sm:$0xf0]  ;;  %v7603_v5 = vld [vmem:[%s17779_s1 + $0x228] sm:$0xf]  ;;  %v7348_v9 = vor.u32 %v11040_v17, %v7347_v63  ;;  %v5123_v32 = vpop.f32.mrf.mxu3 }
 0x19d   :  { %5362 = vmatpush.bf16.msra.mxu2 %v7652_v38  ;;  %v11104_v6 = vld [vmem:[%s17779_s1 + $0x234] sm:$0xf0]  ;;  %v7731_v7 = vld [vmem:[%s17779_s1 + $0x328] sm:$0xf]  ;;  %v7476_v18 = vor.u32 %v11072_v4, %v7475_v0 }
 0x19e   :  { %5375 = vmatpush.bf16.msra.mxu3 %v7780_v33  ;;  %v11136_v8 = vld [vmem:[%s17779_s1 + $0x334] sm:$0xf0]  ;;  %v7331_v12 = vld [vmem:[%s17779_s1 + $0x8] sm:$0xf]  ;;  %v7604_v19 = vor.u32 %v11104_v6, %v7603_v5  ;;  %v5110_v33 = vpop.f32.mrf.mxu2 }
 0x19f   :  { %5337 = vmatpush.bf16.msra.mxu0 %v7380_v39  ;;  %v11036_v38 = vld [vmem:[%s17779_s1 + $0x14] sm:$0xf0]  ;;  %v7459_v20 = vld [vmem:[%s17779_s1 + $0x108] sm:$0xf]  ;;  %v7732_v34 = vor.u32 %v11136_v8, %v7731_v7 }
 0x1a0   :  { %5350 = vmatpush.bf16.msra.mxu1 %v7508_v15  ;;  %v11068_v25 = vld [vmem:[%s17779_s1 + $0x114] sm:$0xf0]  ;;  %v7587_v31 = vld [vmem:[%s17779_s1 + $0x208] sm:$0xf] }
 0x1a1   :  { %5363 = vmatpush.bf16.msra.mxu2 %v7636_v40  ;;  %v11100_v35 = vld [vmem:[%s17779_s1 + $0x214] sm:$0xf0]  ;;  %v7715_v36 = vld [vmem:[%s17779_s1 + $0x308] sm:$0xf]  ;;  %v7332_v40 = vor.u32 %v11036_v38, %v7331_v12  ;;  %v7460_v44 = vor.u32 %v11068_v25, %v7459_v20 }
 0x1a2   :  { %5376 = vmatpush.bf16.msra.mxu3 %v7764_v45  ;;  %v11132_v37 = vld [vmem:[%s17779_s1 + $0x314] sm:$0xf0]  ;;  %v7955_v49 = vld [vmem:[%s17779_s1 + $0x4e8] sm:$0xf]  ;;  %v7588_v45 = vor.u32 %v11100_v35, %v7587_v31 }
 0x1a3   :  { %5338 = vmatpush.bf16.msra.mxu0 %v7364_v57  ;;  %v11192_v39 = vld [vmem:[%s17779_s1 + $0x4f4] sm:$0xf0]  ;;  %v8083_v15 = vld [vmem:[%s17779_s1 + $0x5e8] sm:$0xf]  ;;  %v7716_v47 = vor.u32 %v11132_v37, %v7715_v36 }
 0x1a4   :  { %5351 = vmatpush.bf16.msra.mxu1 %v7492_v60  ;;  %v11224_v41 = vld [vmem:[%s17779_s1 + $0x5f4] sm:$0xf0]  ;;  %v8211_v42 = vld [vmem:[%s17779_s1 + $0x6e8] sm:$0xf]  ;;  %v7956_v48 = vor.u32 %v11192_v39, %v7955_v49 }
 0x1a5   :  { %5364 = vmatpush.bf16.msra.mxu2 %v7620_v62  ;;  %v11256_v43 = vld [vmem:[%s17779_s1 + $0x6f4] sm:$0xf0]  ;;  %v8339_v46 = vld [vmem:[%s17779_s1 + $0x7e8] sm:$0xf]  ;;  %v8084_v50 = vor.u32 %v11224_v41, %v8083_v15 }
 0x1a6   :  { %5377 = vmatpush.bf16.msra.mxu3 %v7748_v3  ;;  %v11288_v61 = vld [vmem:[%s17779_s1 + $0x7f4] sm:$0xf0]  ;;  %v8212_v53 = vor.u32 %v11256_v43, %v8211_v42  ;;  %v7939_v56 = vld [vmem:[%s17779_s1 + $0x4c8] sm:$0xf] }
 0x1a7   :  { %5339 = vmatpush.bf16.msra.mxu0 %v7348_v9  ;;  %v11188_v57 = vld [vmem:[%s17779_s1 + $0x4d4] sm:$0xf0]  ;;  %v8067_v59 = vld [vmem:[%s17779_s1 + $0x5c8] sm:$0xf]  ;;  %v8340_v60 = vor.u32 %v11288_v61, %v8339_v46 }
 0x1a8   :  { %5352 = vmatpush.bf16.msra.mxu1 %v7476_v18  ;;  %v11220_v62 = vld [vmem:[%s17779_s1 + $0x5d4] sm:$0xf0]  ;;  %v8195_v63 = vld [vmem:[%s17779_s1 + $0x6c8] sm:$0xf]  ;;  %v7940_v3 = vor.u32 %v11188_v57, %v7939_v56 }
 0x1a9   :  { %5365 = vmatpush.bf16.msra.mxu2 %v7604_v19  ;;  %v11252_v17 = vld [vmem:[%s17779_s1 + $0x6d4] sm:$0xf0]  ;;  %v8323_v0 = vld [vmem:[%s17779_s1 + $0x7c8] sm:$0xf]  ;;  %v8068_v4 = vor.u32 %v11220_v62, %v8067_v59 }
 0x1aa   :  { %5378 = vmatpush.bf16.msra.mxu3 %v7732_v34  ;;  %v11284_v1 = vld [vmem:[%s17779_s1 + $0x7d4] sm:$0xf0]  ;;  %v8196_v5 = vor.u32 %v11252_v17, %v8195_v63  ;;  %v7923_v6 = vld [vmem:[%s17779_s1 + $0x4a8] sm:$0xf] }
 0x1ab   :  { %5340 = vmatpush.bf16.msra.mxu0 %v7332_v40  ;;  %v11184_v7 = vld [vmem:[%s17779_s1 + $0x4b4] sm:$0xf0]  ;;  %v8051_v8 = vld [vmem:[%s17779_s1 + $0x5a8] sm:$0xf]  ;;  %v8324_v9 = vor.u32 %v11284_v1, %v8323_v0  ;;  %v5134_v15 = vpop.f32.mrf.mxu0 }
 0x1ac   :  { %5353 = vmatpush.bf16.msra.mxu1 %v7460_v44  ;;  %v11216_v12 = vld [vmem:[%s17779_s1 + $0x5b4] sm:$0xf0]  ;;  %v8179_v38 = vld [vmem:[%s17779_s1 + $0x6a8] sm:$0xf]  ;;  %v7924_v25 = vor.u32 %v11184_v7, %v7923_v6  ;;  %v5135_v42 = vadd.f32 %v5134_v15, %v14579_v58  ;;  %v5147_v44 = vpop.f32.mrf.mxu1 }
 0x1ad   :  { %5366 = vmatpush.bf16.msra.mxu2 %v7588_v45  ;;  %v11248_v18 = vld [vmem:[%s17779_s1 + $0x6b4] sm:$0xf0]  ;;  %v8307_v19 = vld [vmem:[%s17779_s1 + $0x7a8] sm:$0xf]  ;;  %v8052_v31 = vor.u32 %v11216_v12, %v8051_v8 }
 0x1ae   :  { %5379 = vmatpush.bf16.msra.mxu3 %v7716_v47  ;;  %v11280_v20 = vld [vmem:[%s17779_s1 + $0x7b4] sm:$0xf0]  ;;  %5341 = vmatmul.bf16.vlgmr.msra.gmra.mxu0 %v12337_v24  ;;  %v8180_v33 = vor.u32 %v11248_v18, %v8179_v38  ;;  %v7907_v34 = vld [vmem:[%s17779_s1 + $0x488] sm:$0xf] }
 0x1af   :  { %5385 = vmatpush.bf16.msrb.mxu0 %v7956_v48  ;;  %5354 = vmatmul.bf16.vlgmr.msra.gmra.mxu1 %v12342_v27  ;;  %v11180_v35 = vld [vmem:[%s17779_s1 + $0x494] sm:$0xf0]  ;;  %v8035_v36 = vld [vmem:[%s17779_s1 + $0x588] sm:$0xf]  ;;  %v8308_v37 = vor.u32 %v11280_v20, %v8307_v19 }
 0x1b0   :  { %5398 = vmatpush.bf16.msrb.mxu1 %v8084_v50  ;;  %5367 = vmatmul.bf16.vlgmr.msra.gmra.mxu2 %v12335_v23  ;;  %v11212_v32 = vld [vmem:[%s17779_s1 + $0x594] sm:$0xf0]  ;;  %v8163_v49 = vld [vmem:[%s17779_s1 + $0x688] sm:$0xf]  ;;  %v7908_v43 = vor.u32 %v11180_v35, %v7907_v34  ;;  %v5148_v50 = vadd.f32 %v5147_v44, %v5135_v42 }
 0x1b1   :  { %5411 = vmatpush.bf16.msrb.mxu2 %v8212_v53  ;;  %5380 = vmatmul.bf16.vlgmr.msra.gmra.mxu3 %v12340_v26  ;;  %v11244_v39 = vld [vmem:[%s17779_s1 + $0x694] sm:$0xf0]  ;;  %v8291_v40 = vld [vmem:[%s17779_s1 + $0x788] sm:$0xf]  ;;  %v8036_v45 = vor.u32 %v11212_v32, %v8035_v36 }
 0x1b2   :  { %5424 = vmatpush.bf16.msrb.mxu3 %v8340_v60  ;;  %v11276_v41 = vld [vmem:[%s17779_s1 + $0x794] sm:$0xf0]  ;;  %v8164_v46 = vor.u32 %v11244_v39, %v8163_v49  ;;  %v7891_v61 = vld [vmem:[%s17779_s1 + $0x468] sm:$0xf] }
 0x1b3   :  { %5386 = vmatpush.bf16.msrb.mxu0 %v7940_v3  ;;  %v11176_v47 = vld [vmem:[%s17779_s1 + $0x474] sm:$0xf0]  ;;  %v8019_v48 = vld [vmem:[%s17779_s1 + $0x568] sm:$0xf]  ;;  %v8292_v58 = vor.u32 %v11276_v41, %v8291_v40  ;;  %v5136_v19 = vpop.f32.mrf.mxu0 }
 0x1b4   :  { %5399 = vmatpush.bf16.msrb.mxu1 %v8068_v4  ;;  %v11208_v53 = vld [vmem:[%s17779_s1 + $0x574] sm:$0xf0]  ;;  %v8147_v56 = vld [vmem:[%s17779_s1 + $0x668] sm:$0xf]  ;;  %v7892_v62 = vor.u32 %v11176_v47, %v7891_v61  ;;  %v5173_v12 = vpop.f32.mrf.mxu3 }
 0x1b5   :  { %5412 = vmatpush.bf16.msrb.mxu2 %v8196_v5  ;;  %v11240_v57 = vld [vmem:[%s17779_s1 + $0x674] sm:$0xf0]  ;;  %v8275_v59 = vld [vmem:[%s17779_s1 + $0x768] sm:$0xf]  ;;  %v8020_v63 = vor.u32 %v11208_v53, %v8019_v48  ;;  %v5160_v5 = vpop.f32.mrf.mxu2 }
 0x1b6   :  { %5425 = vmatpush.bf16.msrb.mxu3 %v8324_v9  ;;  %v11272_v60 = vld [vmem:[%s17779_s1 + $0x774] sm:$0xf0]  ;;  %v8148_v17 = vor.u32 %v11240_v57, %v8147_v56  ;;  %v7875_v0 = vld [vmem:[%s17779_s1 + $0x448] sm:$0xf]  ;;  %v5161_v9 = vadd.f32 %v5160_v5, %v5148_v50 }
 0x1b7   :  { %5387 = vmatpush.bf16.msrb.mxu0 %v7924_v25  ;;  %v11172_v1 = vld [vmem:[%s17779_s1 + $0x454] sm:$0xf0]  ;;  %v8003_v3 = vld [vmem:[%s17779_s1 + $0x548] sm:$0xf]  ;;  %v8276_v4 = vor.u32 %v11272_v60, %v8275_v59  ;;  %v5149_v25 = vpop.f32.mrf.mxu1 }
 0x1b8   :  { %5400 = vmatpush.bf16.msrb.mxu1 %v8052_v31  ;;  %v11204_v6 = vld [vmem:[%s17779_s1 + $0x554] sm:$0xf0]  ;;  %v8131_v7 = vld [vmem:[%s17779_s1 + $0x648] sm:$0xf]  ;;  %v7876_v20 = vor.u32 %v11172_v1, %v7875_v0  ;;  %v14778_v31 = vadd.f32 %v5173_v12, %v5161_v9 }
 0x1b9   :  { %5413 = vmatpush.bf16.msrb.mxu2 %v8180_v33  ;;  %v11236_v8 = vld [vmem:[%s17779_s1 + $0x654] sm:$0xf0]  ;;  %v8259_v38 = vld [vmem:[%s17779_s1 + $0x748] sm:$0xf]  ;;  %v8004_v33 = vor.u32 %v11204_v6, %v8003_v3 }
 0x1ba   :  { %5426 = vmatpush.bf16.msrb.mxu3 %v8308_v37  ;;  %v11268_v18 = vld [vmem:[%s17779_s1 + $0x754] sm:$0xf0]  ;;  %v8132_v34 = vor.u32 %v11236_v8, %v8131_v7  ;;  %v7859_v35 = vld [vmem:[%s17779_s1 + $0x428] sm:$0xf] }
 0x1bb   :  { %5388 = vmatpush.bf16.msrb.mxu0 %v7908_v43  ;;  %v11168_v36 = vld [vmem:[%s17779_s1 + $0x434] sm:$0xf0]  ;;  %v7987_v37 = vld [vmem:[%s17779_s1 + $0x528] sm:$0xf]  ;;  %v8260_v32 = vor.u32 %v11268_v18, %v8259_v38 }
 0x1bc   :  { %5401 = vmatpush.bf16.msrb.mxu1 %v8036_v45  ;;  %v11200_v49 = vld [vmem:[%s17779_s1 + $0x534] sm:$0xf0]  ;;  %v8115_v39 = vld [vmem:[%s17779_s1 + $0x628] sm:$0xf]  ;;  %v7860_v42 = vor.u32 %v11168_v36, %v7859_v35 }
 0x1bd   :  { %5414 = vmatpush.bf16.msrb.mxu2 %v8164_v46  ;;  %v11232_v15 = vld [vmem:[%s17779_s1 + $0x634] sm:$0xf0]  ;;  %v8243_v40 = vld [vmem:[%s17779_s1 + $0x728] sm:$0xf]  ;;  %v7988_v45 = vor.u32 %v11200_v49, %v7987_v37  ;;  %v5162_v57 = vpop.f32.mrf.mxu2 }
 0x1be   :  { %5427 = vmatpush.bf16.msrb.mxu3 %v8292_v58  ;;  %v11264_v41 = vld [vmem:[%s17779_s1 + $0x734] sm:$0xf0]  ;;  %v7843_v43 = vld [vmem:[%s17779_s1 + $0x408] sm:$0xf]  ;;  %v8116_v46 = vor.u32 %v11232_v15, %v8115_v39 }
 0x1bf   :  { %5389 = vmatpush.bf16.msrb.mxu0 %v7892_v62  ;;  %v11164_v44 = vld [vmem:[%s17779_s1 + $0x414] sm:$0xf0]  ;;  %v7971_v61 = vld [vmem:[%s17779_s1 + $0x508] sm:$0xf]  ;;  %v8244_v58 = vor.u32 %v11264_v41, %v8243_v40 }
 0x1c0   :  { %5402 = vmatpush.bf16.msrb.mxu1 %v8020_v63  ;;  %v11196_v47 = vld [vmem:[%s17779_s1 + $0x514] sm:$0xf0]  ;;  %v8099_v48 = vld [vmem:[%s17779_s1 + $0x608] sm:$0xf]  ;;  %v5175_v63 = vpop.f32.mrf.mxu3 }
 0x1c1   :  { %5415 = vmatpush.bf16.msrb.mxu2 %v8148_v17  ;;  %v11228_v50 = vld [vmem:[%s17779_s1 + $0x614] sm:$0xf0]  ;;  %v8227_v53 = vld [vmem:[%s17779_s1 + $0x708] sm:$0xf]  ;;  %v7844_v17 = vor.u32 %v11164_v44, %v7843_v43 }
 0x1c2   :  { %5428 = vmatpush.bf16.msrb.mxu3 %v8276_v4  ;;  %v11260_v56 = vld [vmem:[%s17779_s1 + $0x714] sm:$0xf0]  ;;  %v8467_v59 = vld [vmem:[%s17779_s1 + $0x8e8] sm:$0xf]  ;;  %v7972_v4 = vor.u32 %v11196_v47, %v7971_v61  ;;  %v8100_v5 = vor.u32 %v11228_v50, %v8099_v48 }
 0x1c3   :  { %5390 = vmatpush.bf16.msrb.mxu0 %v7876_v20  ;;  %v11320_v60 = vld [vmem:[%s17779_s1 + $0x8f4] sm:$0xf0]  ;;  %v8595_v62 = vld [vmem:[%s17779_s1 + $0x9e8] sm:$0xf]  ;;  %v8228_v8 = vor.u32 %v11260_v56, %v8227_v53 }
 0x1c4   :  { %5403 = vmatpush.bf16.msrb.mxu1 %v8004_v33  ;;  %v11352_v0 = vld [vmem:[%s17779_s1 + $0x9f4] sm:$0xf0]  ;;  %v8723_v1 = vld [vmem:[%s17779_s1 + $0xae8] sm:$0xf]  ;;  %v8468_v9 = vor.u32 %v11320_v60, %v8467_v59 }
 0x1c5   :  { %5416 = vmatpush.bf16.msrb.mxu2 %v8132_v34  ;;  %v11384_v3 = vld [vmem:[%s17779_s1 + $0xaf4] sm:$0xf0]  ;;  %v8851_v6 = vld [vmem:[%s17779_s1 + $0xbe8] sm:$0xf]  ;;  %v8596_v12 = vor.u32 %v11352_v0, %v8595_v62 }
 0x1c6   :  { %5429 = vmatpush.bf16.msrb.mxu3 %v8260_v32  ;;  %v11416_v7 = vld [vmem:[%s17779_s1 + $0xbf4] sm:$0xf0]  ;;  %v8724_v38 = vor.u32 %v11384_v3, %v8723_v1  ;;  %v8451_v18 = vld [vmem:[%s17779_s1 + $0x8c8] sm:$0xf] }
 0x1c7   :  { %5391 = vmatpush.bf16.msrb.mxu0 %v7860_v42  ;;  %v11316_v19 = vld [vmem:[%s17779_s1 + $0x8d4] sm:$0xf0]  ;;  %v8579_v20 = vld [vmem:[%s17779_s1 + $0x9c8] sm:$0xf]  ;;  %v8852_v25 = vor.u32 %v11416_v7, %v8851_v6 }
 0x1c8   :  { %5404 = vmatpush.bf16.msrb.mxu1 %v7988_v45  ;;  %v11348_v33 = vld [vmem:[%s17779_s1 + $0x9d4] sm:$0xf0]  ;;  %v8707_v34 = vld [vmem:[%s17779_s1 + $0xac8] sm:$0xf]  ;;  %v8452_v32 = vor.u32 %v11316_v19, %v8451_v18 }
 0x1c9   :  { %5417 = vmatpush.bf16.msrb.mxu2 %v8116_v46  ;;  %v11380_v35 = vld [vmem:[%s17779_s1 + $0xad4] sm:$0xf0]  ;;  %v8835_v36 = vld [vmem:[%s17779_s1 + $0xbc8] sm:$0xf]  ;;  %v8580_v49 = vor.u32 %v11348_v33, %v8579_v20 }
 0x1ca   :  { %5430 = vmatpush.bf16.msrb.mxu3 %v8244_v58  ;;  %v11412_v37 = vld [vmem:[%s17779_s1 + $0xbd4] sm:$0xf0]  ;;  %v8708_v39 = vor.u32 %v11380_v35, %v8707_v34  ;;  %v8435_v15 = vld [vmem:[%s17779_s1 + $0x8a8] sm:$0xf] }
 0x1cb   :  { %5392 = vmatpush.bf16.msrb.mxu0 %v7844_v17  ;;  %v11312_v40 = vld [vmem:[%s17779_s1 + $0x8b4] sm:$0xf0]  ;;  %v8563_v41 = vld [vmem:[%s17779_s1 + $0x9a8] sm:$0xf]  ;;  %v8836_v42 = vor.u32 %v11412_v37, %v8835_v36  ;;  %v14922_v63 = vpop.f32.mrf.mxu0 }
 0x1cc   :  { %5405 = vmatpush.bf16.msrb.mxu1 %v7972_v4  ;;  %v11344_v43 = vld [vmem:[%s17779_s1 + $0x9b4] sm:$0xf0]  ;;  %v8691_v44 = vld [vmem:[%s17779_s1 + $0xaa8] sm:$0xf]  ;;  %v8436_v47 = vor.u32 %v11312_v40, %v8435_v15  ;;  %v14930_v3 = vpop.f32.mrf.mxu1 }
 0x1cd   :  { %5418 = vmatpush.bf16.msrb.mxu2 %v8100_v5  ;;  %v11376_v45 = vld [vmem:[%s17779_s1 + $0xab4] sm:$0xf0]  ;;  %v8819_v46 = vld [vmem:[%s17779_s1 + $0xba8] sm:$0xf]  ;;  %v8564_v48 = vor.u32 %v11344_v43, %v8563_v41 }
 0x1ce   :  { %5431 = vmatpush.bf16.msrb.mxu3 %v8228_v8  ;;  %5393 = vmatmul.bf16.vlgmr.msrb.gmra.mxu0 %v12469_v22  ;;  %v11408_v61 = vld [vmem:[%s17779_s1 + $0xbb4] sm:$0xf0]  ;;  %v8692_v58 = vor.u32 %v11376_v45, %v8691_v44  ;;  %v8419_v50 = vld [vmem:[%s17779_s1 + $0x888] sm:$0xf] }
 0x1cf   :  { %5437 = vmatpush.bf16.msra.mxu0 %v8468_v9  ;;  %5406 = vmatmul.bf16.vlgmr.msrb.gmra.mxu1 %v12473_v30  ;;  %v11308_v53 = vld [vmem:[%s17779_s1 + $0x894] sm:$0xf0]  ;;  %v8547_v56 = vld [vmem:[%s17779_s1 + $0x988] sm:$0xf]  ;;  %v8820_v57 = vor.u32 %v11408_v61, %v8819_v46 }
 0x1d0   :  { %5450 = vmatpush.bf16.msra.mxu1 %v8596_v12  ;;  %5419 = vmatmul.bf16.vlgmr.msrb.gmra.mxu2 %v12467_v21  ;;  %v11340_v59 = vld [vmem:[%s17779_s1 + $0x994] sm:$0xf0]  ;;  %v8675_v60 = vld [vmem:[%s17779_s1 + $0xa88] sm:$0xf]  ;;  %v8420_v1 = vor.u32 %v11308_v53, %v8419_v50 }
 0x1d1   :  { %5463 = vmatpush.bf16.msra.mxu2 %v8724_v38  ;;  %5432 = vmatmul.bf16.vlgmr.msrb.gmra.mxu3 %v12471_v29  ;;  %v11372_v62 = vld [vmem:[%s17779_s1 + $0xa94] sm:$0xf0]  ;;  %v8803_v17 = vld [vmem:[%s17779_s1 + $0xb88] sm:$0xf]  ;;  %v8548_v4 = vor.u32 %v11340_v59, %v8547_v56 }
 0x1d2   :  { %5476 = vmatpush.bf16.msra.mxu3 %v8852_v25  ;;  %v11404_v0 = vld [vmem:[%s17779_s1 + $0xb94] sm:$0xf0]  ;;  %v8676_v5 = vor.u32 %v11372_v62, %v8675_v60  ;;  %v8403_v6 = vld [vmem:[%s17779_s1 + $0x868] sm:$0xf] }
 0x1d3   :  { %5438 = vmatpush.bf16.msra.mxu0 %v8452_v32  ;;  %v11304_v7 = vld [vmem:[%s17779_s1 + $0x874] sm:$0xf0]  ;;  %v8531_v8 = vld [vmem:[%s17779_s1 + $0x968] sm:$0xf]  ;;  %v8804_v9 = vor.u32 %v11404_v0, %v8803_v17  ;;  %v5188_v44 = vpop.f32.mrf.mxu0 }
 0x1d4   :  { %5451 = vmatpush.bf16.msra.mxu1 %v8580_v49  ;;  %v11336_v12 = vld [vmem:[%s17779_s1 + $0x974] sm:$0xf0]  ;;  %v8659_v38 = vld [vmem:[%s17779_s1 + $0xa68] sm:$0xf]  ;;  %v8404_v25 = vor.u32 %v11304_v7, %v8403_v6  ;;  %v14965_v49 = vpop.f32.mrf.mxu2  ;;  %v14976_v41 = vpop.f32.mrf.mxu3 }
 0x1d5   :  { %5464 = vmatpush.bf16.msra.mxu2 %v8708_v39  ;;  %v11368_v18 = vld [vmem:[%s17779_s1 + $0xa74] sm:$0xf0]  ;;  %v8787_v19 = vld [vmem:[%s17779_s1 + $0xb68] sm:$0xf]  ;;  %v8532_v33 = vor.u32 %v11336_v12, %v8531_v8  ;;  %v5201_v46 = vpop.f32.mrf.mxu1 }
 0x1d6   :  { %5477 = vmatpush.bf16.msra.mxu3 %v8836_v42  ;;  %v11400_v20 = vld [vmem:[%s17779_s1 + $0xb74] sm:$0xf0]  ;;  %v8660_v34 = vor.u32 %v11368_v18, %v8659_v38  ;;  %v8387_v35 = vld [vmem:[%s17779_s1 + $0x848] sm:$0xf] }
 0x1d7   :  { %5439 = vmatpush.bf16.msra.mxu0 %v8436_v47  ;;  %v11300_v36 = vld [vmem:[%s17779_s1 + $0x854] sm:$0xf0]  ;;  %v8515_v37 = vld [vmem:[%s17779_s1 + $0x948] sm:$0xf]  ;;  %v8788_v32 = vor.u32 %v11400_v20, %v8787_v19 }
 0x1d8   :  { %5452 = vmatpush.bf16.msra.mxu1 %v8564_v48  ;;  %v11332_v39 = vld [vmem:[%s17779_s1 + $0x954] sm:$0xf0]  ;;  %v8643_v15 = vld [vmem:[%s17779_s1 + $0xa48] sm:$0xf]  ;;  %v8388_v45 = vor.u32 %v11300_v36, %v8387_v35 }
 0x1d9   :  { %5465 = vmatpush.bf16.msra.mxu2 %v8692_v58  ;;  %v11364_v40 = vld [vmem:[%s17779_s1 + $0xa54] sm:$0xf0]  ;;  %v8771_v42 = vld [vmem:[%s17779_s1 + $0xb48] sm:$0xf]  ;;  %v8516_v61 = vor.u32 %v11332_v39, %v8515_v37 }
 0x1da   :  { %5478 = vmatpush.bf16.msra.mxu3 %v8820_v57  ;;  %v11396_v43 = vld [vmem:[%s17779_s1 + $0xb54] sm:$0xf0]  ;;  %v8644_v47 = vor.u32 %v11364_v40, %v8643_v15  ;;  %v8371_v48 = vld [vmem:[%s17779_s1 + $0x828] sm:$0xf] }
 0x1db   :  { %5440 = vmatpush.bf16.msra.mxu0 %v8420_v1  ;;  %v11296_v58 = vld [vmem:[%s17779_s1 + $0x834] sm:$0xf0]  ;;  %v8499_v50 = vld [vmem:[%s17779_s1 + $0x928] sm:$0xf]  ;;  %v8772_v53 = vor.u32 %v11396_v43, %v8771_v42 }
 0x1dc   :  { %5453 = vmatpush.bf16.msra.mxu1 %v8548_v4  ;;  %v11328_v56 = vld [vmem:[%s17779_s1 + $0x934] sm:$0xf0]  ;;  %v8627_v57 = vld [vmem:[%s17779_s1 + $0xa28] sm:$0xf]  ;;  %v8372_v17 = vor.u32 %v11296_v58, %v8371_v48  ;;  %v5214_v19 = vpop.f32.mrf.mxu2 }
 0x1dd   :  { %5466 = vmatpush.bf16.msra.mxu2 %v8676_v5  ;;  %v11360_v59 = vld [vmem:[%s17779_s1 + $0xa34] sm:$0xf0]  ;;  %v8755_v60 = vld [vmem:[%s17779_s1 + $0xb28] sm:$0xf]  ;;  %v8500_v4 = vor.u32 %v11328_v56, %v8499_v50 }
 0x1de   :  { %5479 = vmatpush.bf16.msra.mxu3 %v8804_v9  ;;  %v11392_v62 = vld [vmem:[%s17779_s1 + $0xb34] sm:$0xf0]  ;;  %v8355_v0 = vld [vmem:[%s17779_s1 + $0x808] sm:$0xf]  ;;  %v8628_v5 = vor.u32 %v11360_v59, %v8627_v57 }
 0x1df   :  { %5441 = vmatpush.bf16.msra.mxu0 %v8404_v25  ;;  %v11292_v1 = vld [vmem:[%s17779_s1 + $0x814] sm:$0xf0]  ;;  %v8483_v6 = vld [vmem:[%s17779_s1 + $0x908] sm:$0xf]  ;;  %v8756_v9 = vor.u32 %v11392_v62, %v8755_v60 }
 0x1e0   :  { %5454 = vmatpush.bf16.msra.mxu1 %v8532_v33  ;;  %v11324_v7 = vld [vmem:[%s17779_s1 + $0x914] sm:$0xf0]  ;;  %v8611_v8 = vld [vmem:[%s17779_s1 + $0xa08] sm:$0xf]  ;;  %v8356_v35 = vor.u32 %v11292_v1, %v8355_v0 }
 0x1e1   :  { %5467 = vmatpush.bf16.msra.mxu2 %v8660_v34  ;;  %v11356_v12 = vld [vmem:[%s17779_s1 + $0xa14] sm:$0xf0]  ;;  %v8739_v38 = vld [vmem:[%s17779_s1 + $0xb08] sm:$0xf]  ;;  %v5227_v34 = vpop.f32.mrf.mxu3  ;;  %v8484_v39 = vor.u32 %v11324_v7, %v8483_v6 }
 0x1e2   :  { %5480 = vmatpush.bf16.msra.mxu3 %v8788_v32  ;;  %v11388_v18 = vld [vmem:[%s17779_s1 + $0xb14] sm:$0xf0]  ;;  %v8979_v20 = vld [vmem:[%s17779_s1 + $0xce8] sm:$0xf]  ;;  %v8612_v15 = vor.u32 %v11356_v12, %v8611_v8 }
 0x1e3   :  { %5442 = vmatpush.bf16.msra.mxu0 %v8388_v45  ;;  %v11448_v25 = vld [vmem:[%s17779_s1 + $0xcf4] sm:$0xf0]  ;;  %v9107_v33 = vld [vmem:[%s17779_s1 + $0xde8] sm:$0xf]  ;;  %v8740_v43 = vor.u32 %v11388_v18, %v8739_v38 }
 0x1e4   :  { %5455 = vmatpush.bf16.msra.mxu1 %v8516_v61  ;;  %v11480_v36 = vld [vmem:[%s17779_s1 + $0xdf4] sm:$0xf0]  ;;  %v9235_v37 = vld [vmem:[%s17779_s1 + $0xee8] sm:$0xf]  ;;  %v8980_v44 = vor.u32 %v11448_v25, %v8979_v20 }
 0x1e5   :  { %5468 = vmatpush.bf16.msra.mxu2 %v8644_v47  ;;  %v11512_v32 = vld [vmem:[%s17779_s1 + $0xef4] sm:$0xf0]  ;;  %v9363_v40 = vld [vmem:[%s17779_s1 + $0xfe8] sm:$0xf]  ;;  %v9108_v45 = vor.u32 %v11480_v36, %v9107_v33 }
 0x1e6   :  { %5481 = vmatpush.bf16.msra.mxu3 %v8772_v53  ;;  %v11544_v42 = vld [vmem:[%s17779_s1 + $0xff4] sm:$0xf0]  ;;  %v9236_v46 = vor.u32 %v11512_v32, %v9235_v37  ;;  %v8963_v61 = vld [vmem:[%s17779_s1 + $0xcc8] sm:$0xf] }
 0x1e7   :  { %5443 = vmatpush.bf16.msra.mxu0 %v8372_v17  ;;  %v11444_v47 = vld [vmem:[%s17779_s1 + $0xcd4] sm:$0xf0]  ;;  %v9091_v48 = vld [vmem:[%s17779_s1 + $0xdc8] sm:$0xf]  ;;  %v9364_v58 = vor.u32 %v11544_v42, %v9363_v40 }
 0x1e8   :  { %5456 = vmatpush.bf16.msra.mxu1 %v8500_v4  ;;  %v11476_v50 = vld [vmem:[%s17779_s1 + $0xdd4] sm:$0xf0]  ;;  %v9219_v53 = vld [vmem:[%s17779_s1 + $0xec8] sm:$0xf]  ;;  %v8964_v60 = vor.u32 %v11444_v47, %v8963_v61 }
 0x1e9   :  { %5469 = vmatpush.bf16.msra.mxu2 %v8628_v5  ;;  %v11508_v56 = vld [vmem:[%s17779_s1 + $0xed4] sm:$0xf0]  ;;  %v9347_v57 = vld [vmem:[%s17779_s1 + $0xfc8] sm:$0xf]  ;;  %v9092_v62 = vor.u32 %v11476_v50, %v9091_v48 }
 0x1ea   :  { %5482 = vmatpush.bf16.msra.mxu3 %v8756_v9  ;;  %v11540_v59 = vld [vmem:[%s17779_s1 + $0xfd4] sm:$0xf0]  ;;  %v9220_v17 = vor.u32 %v11508_v56, %v9219_v53  ;;  %v8947_v0 = vld [vmem:[%s17779_s1 + $0xca8] sm:$0xf] }
 0x1eb   :  { %5444 = vmatpush.bf16.msra.mxu0 %v8356_v35  ;;  %v11440_v1 = vld [vmem:[%s17779_s1 + $0xcb4] sm:$0xf0]  ;;  %v9075_v4 = vld [vmem:[%s17779_s1 + $0xda8] sm:$0xf]  ;;  %v9348_v5 = vor.u32 %v11540_v59, %v9347_v57 }
 0x1ec   :  { %5457 = vmatpush.bf16.msra.mxu1 %v8484_v39  ;;  %v11472_v6 = vld [vmem:[%s17779_s1 + $0xdb4] sm:$0xf0]  ;;  %v9203_v7 = vld [vmem:[%s17779_s1 + $0xea8] sm:$0xf]  ;;  %v8948_v38 = vor.u32 %v11440_v1, %v8947_v0 }
 0x1ed   :  { %5470 = vmatpush.bf16.msra.mxu2 %v8612_v15  ;;  %v11504_v8 = vld [vmem:[%s17779_s1 + $0xeb4] sm:$0xf0]  ;;  %v9331_v9 = vld [vmem:[%s17779_s1 + $0xfa8] sm:$0xf]  ;;  %v9076_v18 = vor.u32 %v11472_v6, %v9075_v4  ;;  %v15126_v32 = vpop.f32.mrf.mxu0 }
 0x1ee   :  { %5483 = vmatpush.bf16.msra.mxu3 %v8740_v43  ;;  %5445 = vmatmul.bf16.vlgmr.msra.gmra.mxu0 %v12569_v10  ;;  %v11536_v12 = vld [vmem:[%s17779_s1 + $0xfb4] sm:$0xf0]  ;;  %v9204_v19 = vor.u32 %v11504_v8, %v9203_v7  ;;  %v8931_v20 = vld [vmem:[%s17779_s1 + $0xc88] sm:$0xf]  ;;  %v5187_v8 = vadd.f32 %v14922_v63, %v14778_v31 }
 0x1ef   :  { %5489 = vmatpush.bf16.msrb.mxu0 %v8980_v44  ;;  %5458 = vmatmul.bf16.vlgmr.msra.gmra.mxu1 %v12573_v13  ;;  %v11436_v25 = vld [vmem:[%s17779_s1 + $0xc94] sm:$0xf0]  ;;  %v9059_v33 = vld [vmem:[%s17779_s1 + $0xd88] sm:$0xf]  ;;  %v9332_v34 = vor.u32 %v11536_v12, %v9331_v9 }
 0x1f0   :  { %5502 = vmatpush.bf16.msrb.mxu1 %v9108_v45  ;;  %5471 = vmatmul.bf16.vlgmr.msra.gmra.mxu2 %v12571_v11  ;;  %v11468_v35 = vld [vmem:[%s17779_s1 + $0xd94] sm:$0xf0]  ;;  %v9187_v36 = vld [vmem:[%s17779_s1 + $0xe88] sm:$0xf]  ;;  %v8932_v40 = vor.u32 %v11436_v25, %v8931_v20  ;;  %v15134_v42 = vpop.f32.mrf.mxu1 }
 0x1f1   :  { %5515 = vmatpush.bf16.msrb.mxu2 %v9236_v46  ;;  %5484 = vmatmul.bf16.vlgmr.msra.gmra.mxu3 %v12575_v14  ;;  %v11500_v37 = vld [vmem:[%s17779_s1 + $0xe94] sm:$0xf0]  ;;  %v9315_v39 = vld [vmem:[%s17779_s1 + $0xf88] sm:$0xf]  ;;  %v9060_v43 = vor.u32 %v11468_v35, %v9059_v33 }
 0x1f2   :  { %5528 = vmatpush.bf16.msrb.mxu3 %v9364_v58  ;;  %v11532_v15 = vld [vmem:[%s17779_s1 + $0xf94] sm:$0xf0]  ;;  %v9188_v44 = vor.u32 %v11500_v37, %v9187_v36  ;;  %v8915_v45 = vld [vmem:[%s17779_s1 + $0xc68] sm:$0xf] }
 0x1f3   :  { %5490 = vmatpush.bf16.msrb.mxu0 %v8964_v60  ;;  %v11432_v46 = vld [vmem:[%s17779_s1 + $0xc74] sm:$0xf0]  ;;  %v9043_v61 = vld [vmem:[%s17779_s1 + $0xd68] sm:$0xf]  ;;  %v9316_v47 = vor.u32 %v11532_v15, %v9315_v39  ;;  %v5200_v15 = vadd.f32 %v14930_v3, %v5187_v8 }
 0x1f4   :  { %5503 = vmatpush.bf16.msrb.mxu1 %v9092_v62  ;;  %v11464_v48 = vld [vmem:[%s17779_s1 + $0xd74] sm:$0xf0]  ;;  %v9171_v58 = vld [vmem:[%s17779_s1 + $0xe68] sm:$0xf]  ;;  %v8916_v57 = vor.u32 %v11432_v46, %v8915_v45 }
 0x1f5   :  { %5516 = vmatpush.bf16.msrb.mxu2 %v9220_v17  ;;  %v11496_v50 = vld [vmem:[%s17779_s1 + $0xe74] sm:$0xf0]  ;;  %v9299_v53 = vld [vmem:[%s17779_s1 + $0xf68] sm:$0xf]  ;;  %v9044_v59 = vor.u32 %v11464_v48, %v9043_v61  ;;  %v15169_v4 = vpop.f32.mrf.mxu2  ;;  %v5213_v3 = vadd.f32 %v14965_v49, %v5200_v15 }
 0x1f6   :  { %5529 = vmatpush.bf16.msrb.mxu3 %v9348_v5  ;;  %v11528_v56 = vld [vmem:[%s17779_s1 + $0xf74] sm:$0xf0]  ;;  %v9172_v60 = vor.u32 %v11496_v50, %v9171_v58  ;;  %v8899_v62 = vld [vmem:[%s17779_s1 + $0xc48] sm:$0xf] }
 0x1f7   :  { %5491 = vmatpush.bf16.msrb.mxu0 %v8948_v38  ;;  %v11428_v17 = vld [vmem:[%s17779_s1 + $0xc54] sm:$0xf0]  ;;  %v9027_v0 = vld [vmem:[%s17779_s1 + $0xd48] sm:$0xf]  ;;  %v9300_v1 = vor.u32 %v11528_v56, %v9299_v53  ;;  %v15182_v9 = vpop.f32.mrf.mxu3  ;;  %v5226_v8 = vadd.f32 %v14976_v41, %v5213_v3 }
 0x1f8   :  { %5504 = vmatpush.bf16.msrb.mxu1 %v9076_v18  ;;  %v11460_v5 = vld [vmem:[%s17779_s1 + $0xd54] sm:$0xf0]  ;;  %v9155_v6 = vld [vmem:[%s17779_s1 + $0xe48] sm:$0xf]  ;;  %v5240_v18 = vpop.f32.mrf.mxu0  ;;  %v5253_v20 = vpop.f32.mrf.mxu1 }
 0x1f9   :  { %5517 = vmatpush.bf16.msrb.mxu2 %v9204_v19  ;;  %v11492_v7 = vld [vmem:[%s17779_s1 + $0xe54] sm:$0xf0]  ;;  %v9283_v12 = vld [vmem:[%s17779_s1 + $0xf48] sm:$0xf]  ;;  %v8900_v19 = vor.u32 %v11428_v17, %v8899_v62  ;;  %v9028_v25 = vor.u32 %v11460_v5, %v9027_v0 }
 0x1fa   :  { %5530 = vmatpush.bf16.msrb.mxu3 %v9332_v34  ;;  %v11524_v38 = vld [vmem:[%s17779_s1 + $0xf54] sm:$0xf0]  ;;  %v9156_v33 = vor.u32 %v11492_v7, %v9155_v6  ;;  %v8883_v31 = vld [vmem:[%s17779_s1 + $0xc28] sm:$0xf] }
 0x1fb   :  { %5492 = vmatpush.bf16.msrb.mxu0 %v8932_v40  ;;  %v11424_v63 = vld [vmem:[%s17779_s1 + $0xc34] sm:$0xf0]  ;;  %v9011_v34 = vld [vmem:[%s17779_s1 + $0xd28] sm:$0xf]  ;;  %v9284_v35 = vor.u32 %v11524_v38, %v9283_v12 }
 0x1fc   :  { %5505 = vmatpush.bf16.msrb.mxu1 %v9060_v43  ;;  %v11456_v36 = vld [vmem:[%s17779_s1 + $0xd34] sm:$0xf0]  ;;  %v9139_v37 = vld [vmem:[%s17779_s1 + $0xe28] sm:$0xf] }
 0x1fd   :  { %5518 = vmatpush.bf16.msrb.mxu2 %v9188_v44  ;;  %v11488_v39 = vld [vmem:[%s17779_s1 + $0xe34] sm:$0xf0]  ;;  %v9267_v40 = vld [vmem:[%s17779_s1 + $0xf28] sm:$0xf]  ;;  %v8884_v44 = vor.u32 %v11424_v63, %v8883_v31  ;;  %v9012_v61 = vor.u32 %v11456_v36, %v9011_v34 }
 0x1fe   :  { %5531 = vmatpush.bf16.msrb.mxu3 %v9316_v47  ;;  %v11520_v43 = vld [vmem:[%s17779_s1 + $0xf34] sm:$0xf0]  ;;  %v8867_v45 = vld [vmem:[%s17779_s1 + $0xc08] sm:$0xf]  ;;  %v9140_v47 = vor.u32 %v11488_v39, %v9139_v37 }
 0x1ff   :  { %5493 = vmatpush.bf16.msrb.mxu0 %v8916_v57  ;;  %v11420_v46 = vld [vmem:[%s17779_s1 + $0xc14] sm:$0xf0]  ;;  %v8995_v48 = vld [vmem:[%s17779_s1 + $0xd08] sm:$0xf]  ;;  %v9268_v53 = vor.u32 %v11520_v43, %v9267_v40  ;;  %v5279_v0 = vpop.f32.mrf.mxu3 }
 0x200   :  { %5506 = vmatpush.bf16.msrb.mxu1 %v9044_v59  ;;  %v11452_v58 = vld [vmem:[%s17779_s1 + $0xd14] sm:$0xf0]  ;;  %v9123_v50 = vld [vmem:[%s17779_s1 + $0xe08] sm:$0xf]  ;;  %v5266_v59 = vpop.f32.mrf.mxu2 }
 0x201   :  { %5519 = vmatpush.bf16.msrb.mxu2 %v9172_v60  ;;  %v11484_v49 = vld [vmem:[%s17779_s1 + $0xe14] sm:$0xf0]  ;;  %v9251_v56 = vld [vmem:[%s17779_s1 + $0xf08] sm:$0xf]  ;;  %v8996_v12 = vor.u32 %v11452_v58, %v8995_v48 }
 0x202   :  { %5532 = vmatpush.bf16.msrb.mxu3 %v9300_v1  ;;  %v11516_v57 = vld [vmem:[%s17779_s1 + $0xf14] sm:$0xf0]  ;;  %v9491_v60 = vld [vmem:[%s17779_s1 + $0x10e8] sm:$0xf]  ;;  %v8868_v1 = vor.u32 %v11420_v46, %v8867_v45  ;;  %v9124_v38 = vor.u32 %v11484_v49, %v9123_v50 }
 0x203   :  { %5494 = vmatpush.bf16.msrb.mxu0 %v8900_v19  ;;  %v11576_v62 = vld [vmem:[%s17779_s1 + $0x10f4] sm:$0xf0]  ;;  %v9619_v17 = vld [vmem:[%s17779_s1 + $0x11e8] sm:$0xf]  ;;  %v9252_v20 = vor.u32 %v11516_v57, %v9251_v56 }
 0x204   :  { %5507 = vmatpush.bf16.msrb.mxu1 %v9028_v25  ;;  %v11608_v5 = vld [vmem:[%s17779_s1 + $0x11f4] sm:$0xf0]  ;;  %v9747_v6 = vld [vmem:[%s17779_s1 + $0x12e8] sm:$0xf]  ;;  %v9492_v25 = vor.u32 %v11576_v62, %v9491_v60 }
 0x205   :  { %5520 = vmatpush.bf16.msrb.mxu2 %v9156_v33  ;;  %v11640_v7 = vld [vmem:[%s17779_s1 + $0x12f4] sm:$0xf0]  ;;  %v9875_v18 = vld [vmem:[%s17779_s1 + $0x13e8] sm:$0xf]  ;;  %v5239_v33 = vadd.f32 %v15126_v32, %v5226_v8  ;;  %v9620_v31 = vor.u32 %v11608_v5, %v9619_v17 }
 0x206   :  { %5533 = vmatpush.bf16.msrb.mxu3 %v9284_v35  ;;  %v11672_v19 = vld [vmem:[%s17779_s1 + $0x13f4] sm:$0xf0]  ;;  %v9748_v63 = vor.u32 %v11640_v7, %v9747_v6  ;;  %v9475_v41 = vld [vmem:[%s17779_s1 + $0x10c8] sm:$0xf] }
 0x207   :  { %5495 = vmatpush.bf16.msrb.mxu0 %v8884_v44  ;;  %v11572_v34 = vld [vmem:[%s17779_s1 + $0x10d4] sm:$0xf0]  ;;  %v9603_v35 = vld [vmem:[%s17779_s1 + $0x11c8] sm:$0xf]  ;;  %v9876_v36 = vor.u32 %v11672_v19, %v9875_v18  ;;  %v5252_v44 = vadd.f32 %v15134_v42, %v5239_v33 }
 0x208   :  { %5508 = vmatpush.bf16.msrb.mxu1 %v9012_v61  ;;  %v11604_v32 = vld [vmem:[%s17779_s1 + $0x11d4] sm:$0xf0]  ;;  %v9731_v37 = vld [vmem:[%s17779_s1 + $0x12c8] sm:$0xf]  ;;  %v9476_v43 = vor.u32 %v11572_v34, %v9475_v41 }
 0x209   :  { %5521 = vmatpush.bf16.msrb.mxu2 %v9140_v47  ;;  %v11636_v39 = vld [vmem:[%s17779_s1 + $0x12d4] sm:$0xf0]  ;;  %v9859_v15 = vld [vmem:[%s17779_s1 + $0x13c8] sm:$0xf]  ;;  %v9604_v45 = vor.u32 %v11604_v32, %v9603_v35 }
 0x20a   :  { %5534 = vmatpush.bf16.msrb.mxu3 %v9268_v53  ;;  %v11668_v40 = vld [vmem:[%s17779_s1 + $0x13d4] sm:$0xf0]  ;;  %v9732_v46 = vor.u32 %v11636_v39, %v9731_v37  ;;  %v9459_v3 = vld [vmem:[%s17779_s1 + $0x10a8] sm:$0xf]  ;;  %v5265_v53 = vadd.f32 %v15169_v4, %v5252_v44 }
 0x20b   :  { %5496 = vmatpush.bf16.msrb.mxu0 %v8868_v1  ;;  %v11568_v61 = vld [vmem:[%s17779_s1 + $0x10b4] sm:$0xf0]  ;;  %v9587_v47 = vld [vmem:[%s17779_s1 + $0x11a8] sm:$0xf]  ;;  %v9860_v42 = vor.u32 %v11668_v40, %v9859_v15  ;;  %v5290_v8 = vpop.f32.mrf.mxu0 }
 0x20c   :  { %5509 = vmatpush.bf16.msrb.mxu1 %v8996_v12  ;;  %v11600_v48 = vld [vmem:[%s17779_s1 + $0x11b4] sm:$0xf0]  ;;  %v9715_v58 = vld [vmem:[%s17779_s1 + $0x12a8] sm:$0xf]  ;;  %v9460_v57 = vor.u32 %v11568_v61, %v9459_v3  ;;  %v5278_v7 = vadd.f32 %v15182_v9, %v5265_v53  ;;  %v5303_v19 = vpop.f32.mrf.mxu1 }
 0x20d   :  { %5522 = vmatpush.bf16.msrb.mxu2 %v9124_v38  ;;  %v11632_v50 = vld [vmem:[%s17779_s1 + $0x12b4] sm:$0xf0]  ;;  %v9843_v49 = vld [vmem:[%s17779_s1 + $0x13a8] sm:$0xf]  ;;  %v9588_v59 = vor.u32 %v11600_v48, %v9587_v47 }
 0x20e   :  { %5535 = vmatpush.bf16.msrb.mxu3 %v9252_v20  ;;  %5497 = vmatmul.bf16.vlgmr.msrb.gmra.mxu0 %v12743_v51  ;;  %v11664_v56 = vld [vmem:[%s17779_s1 + $0x13b4] sm:$0xf0]  ;;  %v9716_v4 = vor.u32 %v11632_v50, %v9715_v58  ;;  %v9443_v60 = vld [vmem:[%s17779_s1 + $0x1088] sm:$0xf]  ;;  %v5977_v20 = vld [vmem:[%s17781_s2] sm:$0xf] }
 0x20f   :  { %5541 = vmatpush.bf16.msra.mxu0 %v9492_v25  ;;  %5510 = vmatmul.bf16.vlgmr.msrb.gmra.mxu1 %v12747_v54  ;;  %v11564_v62 = vld [vmem:[%s17779_s1 + $0x1094] sm:$0xf0]  ;;  %v9571_v17 = vld [vmem:[%s17779_s1 + $0x1188] sm:$0xf]  ;;  %v9844_v0 = vor.u32 %v11664_v56, %v9843_v49  ;;  %v5291_v25 = vadd.f32 %v5290_v8, %v5278_v7  ;;  %v5980_v15 = vperm.slane %v5977_v20, 1  ;;  %v5979_v56 = vperm.slane %v5977_v20, 0 }
 0x210   :  { %5554 = vmatpush.bf16.msra.mxu1 %v9620_v31  ;;  %5523 = vmatmul.bf16.vlgmr.msrb.gmra.mxu2 %v12745_v52  ;;  %v11596_v1 = vld [vmem:[%s17779_s1 + $0x1194] sm:$0xf0]  ;;  %v9699_v5 = vld [vmem:[%s17779_s1 + $0x1288] sm:$0xf]  ;;  %v9444_v18 = vor.u32 %v11564_v62, %v9443_v60 }
 0x211   :  { %5567 = vmatpush.bf16.msra.mxu2 %v9748_v63  ;;  %5536 = vmatmul.bf16.vlgmr.msrb.gmra.mxu3 %v12749_v55  ;;  %v11628_v6 = vld [vmem:[%s17779_s1 + $0x1294] sm:$0xf0]  ;;  %v9827_v12 = vld [vmem:[%s17779_s1 + $0x1388] sm:$0xf]  ;;  %v9572_v9 = vor.u32 %v11596_v1, %v9571_v17 }
 0x212   :  { %5580 = vmatpush.bf16.msra.mxu3 %v9876_v36  ;;  %v11660_v38 = vld [vmem:[%s17779_s1 + $0x1394] sm:$0xf0]  ;;  %v9700_v33 = vor.u32 %v11628_v6, %v9699_v5  ;;  %v9427_v31 = vld [vmem:[%s17779_s1 + $0x1068] sm:$0xf] }
 0x213   :  { %5542 = vmatpush.bf16.msra.mxu0 %v9476_v43  ;;  %v11560_v63 = vld [vmem:[%s17779_s1 + $0x1074] sm:$0xf0]  ;;  %v9555_v41 = vld [vmem:[%s17779_s1 + $0x1168] sm:$0xf]  ;;  %v9828_v34 = vor.u32 %v11660_v38, %v9827_v12  ;;  %v5304_v43 = vadd.f32 %v5303_v19, %v5291_v25  ;;  %v5292_v60 = vpop.f32.mrf.mxu0 }
 0x214   :  { %5555 = vmatpush.bf16.msra.mxu1 %v9604_v45  ;;  %v11592_v35 = vld [vmem:[%s17779_s1 + $0x1174] sm:$0xf0]  ;;  %v9683_v36 = vld [vmem:[%s17779_s1 + $0x1268] sm:$0xf]  ;;  %v9428_v40 = vor.u32 %v11560_v63, %v9427_v31  ;;  %v5329_v49 = vpop.f32.mrf.mxu3  ;;  %v5305_v17 = vpop.f32.mrf.mxu1 }
 0x215   :  { %5568 = vmatpush.bf16.msra.mxu2 %v9732_v46  ;;  %v11624_v32 = vld [vmem:[%s17779_s1 + $0x1274] sm:$0xf0]  ;;  %v9811_v37 = vld [vmem:[%s17779_s1 + $0x1368] sm:$0xf]  ;;  %v9556_v44 = vor.u32 %v11592_v35, %v9555_v41 }
 0x216   :  { %5581 = vmatpush.bf16.msra.mxu3 %v9860_v42  ;;  %v11656_v39 = vld [vmem:[%s17779_s1 + $0x1374] sm:$0xf0]  ;;  %v9684_v45 = vor.u32 %v11624_v32, %v9683_v36  ;;  %v9411_v46 = vld [vmem:[%s17779_s1 + $0x1048] sm:$0xf]  ;;  %v5316_v42 = vpop.f32.mrf.mxu2 }
 0x217   :  { %5543 = vmatpush.bf16.msra.mxu0 %v9460_v57  ;;  %v11556_v3 = vld [vmem:[%s17779_s1 + $0x1054] sm:$0xf0]  ;;  %v9539_v61 = vld [vmem:[%s17779_s1 + $0x1148] sm:$0xf]  ;;  %v9812_v47 = vor.u32 %v11656_v39, %v9811_v37  ;;  %v5317_v53 = vadd.f32 %v5316_v42, %v5304_v43  ;;  %v5983_v57 = vrot.slane %v5980_v15, 4 }
 0x218   :  { %5556 = vmatpush.bf16.msra.mxu1 %v9588_v59  ;;  %v11588_v48 = vld [vmem:[%s17779_s1 + $0x1154] sm:$0xf0]  ;;  %v9667_v58 = vld [vmem:[%s17779_s1 + $0x1248] sm:$0xf]  ;;  %v9412_v62 = vor.u32 %v11556_v3, %v9411_v46 }
 0x219   :  { %5569 = vmatpush.bf16.msra.mxu2 %v9716_v4  ;;  %v11620_v50 = vld [vmem:[%s17779_s1 + $0x1254] sm:$0xf0]  ;;  %v9795_v59 = vld [vmem:[%s17779_s1 + $0x1348] sm:$0xf]  ;;  %v9540_v1 = vor.u32 %v11588_v48, %v9539_v61  ;;  %v5985_v25 = vsel %vm5963_vm0, %v5979_v56, %v5983_v57 }
 0x21a   :  { %5582 = vmatpush.bf16.msra.mxu3 %v9844_v0  ;;  %v11652_v4 = vld [vmem:[%s17779_s1 + $0x1354] sm:$0xf0]  ;;  %v5330_v0 = vadd.f32 %v5329_v49, %v5317_v53  ;;  %v9668_v5 = vor.u32 %v11620_v50, %v9667_v58  ;;  %v9395_v6 = vld [vmem:[%s17779_s1 + $0x1028] sm:$0xf] }
 0x21b   :  { %5544 = vmatpush.bf16.msra.mxu0 %v9444_v18  ;;  %v11552_v7 = vld [vmem:[%s17779_s1 + $0x1034] sm:$0xf0]  ;;  %v9523_v8 = vld [vmem:[%s17779_s1 + $0x1128] sm:$0xf]  ;;  %v9796_v12 = vor.u32 %v11652_v4, %v9795_v59 }
 0x21c   :  { %5557 = vmatpush.bf16.msra.mxu1 %v9572_v9  ;;  %v11584_v38 = vld [vmem:[%s17779_s1 + $0x1134] sm:$0xf0]  ;;  %v9651_v18 = vld [vmem:[%s17779_s1 + $0x1228] sm:$0xf]  ;;  %v5961_v20 = vrot.slane %v5330_v0, 4  ;;  %v9396_v31 = vor.u32 %v11552_v7, %v9395_v6  ;;  %v5331_v42 = vpop.f32.mrf.mxu3 }
 0x21d   :  { %5570 = vmatpush.bf16.msra.mxu2 %v9700_v33  ;;  %v11616_v19 = vld [vmem:[%s17779_s1 + $0x1234] sm:$0xf0]  ;;  %v9779_v9 = vld [vmem:[%s17779_s1 + $0x1328] sm:$0xf]  ;;  %v9524_v36 = vor.u32 %v11584_v38, %v9523_v8 }
 0x21e   :  { %5583 = vmatpush.bf16.msra.mxu3 %v9828_v34  ;;  %v11648_v33 = vld [vmem:[%s17779_s1 + $0x1334] sm:$0xf0]  ;;  %v9379_v63 = vld [vmem:[%s17779_s1 + $0x1008] sm:$0xf]  ;;  %v5964_v35 = vsel %vm5963_vm0, %v14184_v2, %v5961_v20  ;;  %v9652_v32 = vor.u32 %v11616_v19, %v9651_v18  ;;  %v5318_v46 = vpop.f32.mrf.mxu2 }
 0x21f   :  { %5545 = vmatpush.bf16.msra.mxu0 %v9428_v40  ;;  %v11548_v41 = vld [vmem:[%s17779_s1 + $0x1014] sm:$0xf0]  ;;  %v9507_v34 = vld [vmem:[%s17779_s1 + $0x1108] sm:$0xf]  ;;  %v5989_v40 = vadd.f32 %v5985_v25, %v5964_v35  ;;  %v9780_v43 = vor.u32 %v11648_v33, %v9779_v9 }
 0x220   :  { %5558 = vmatpush.bf16.msra.mxu1 %v9556_v44  ;;  %v11580_v37 = vld [vmem:[%s17779_s1 + $0x1114] sm:$0xf0]  ;;  %v9635_v39 = vld [vmem:[%s17779_s1 + $0x1208] sm:$0xf]  ;;  %v9380_v58 = vor.u32 %v11548_v41, %v9379_v63 }
 0x221   :  { %5571 = vmatpush.bf16.msra.mxu2 %v9684_v45  ;;  %v11612_v15 = vld [vmem:[%s17779_s1 + $0x1214] sm:$0xf0]  ;;  %v9763_v2 = vld [vmem:[%s17779_s1 + $0x1308] sm:$0xf]  ;;  %v5991_v48 = vmax.f32 %v5989_v40, 0.0  ;;  %v9508_v49 = vor.u32 %v11580_v37, %v9507_v34 }
 0x222   :  { %5584 = vmatpush.bf16.msra.mxu3 %v9812_v47  ;;  %v11644_v44 = vld [vmem:[%s17779_s1 + $0x1314] sm:$0xf0]  ;;  %v10003_v45 = vld [vmem:[%s17779_s1 + $0x14e8] sm:$0xf]  ;;  %v9636_v56 = vor.u32 %v11612_v15, %v9635_v39 }
 0x223   :  { %5546 = vmatpush.bf16.msra.mxu0 %v9412_v62  ;;  %v11704_v3 = vld [vmem:[%s17779_s1 + $0x14f4] sm:$0xf0]  ;;  %v10131_v61 = vld [vmem:[%s17779_s1 + $0x15e8] sm:$0xf]  ;;  %5995 = vst [vmem:[#allocation1] ss:$2 sm:$0xff] %v5991_v48  ;;  %v9764_v4 = vor.u32 %v11644_v44, %v9763_v2 }
 0x224   :  { %5559 = vmatpush.bf16.msra.mxu1 %v9540_v1  ;;  %v11736_v47 = vld [vmem:[%s17779_s1 + $0x15f4] sm:$0xf0]  ;;  %v10259_v50 = vld [vmem:[%s17779_s1 + $0x16e8] sm:$0xf]  ;;  %v10004_v60 = vor.u32 %v11704_v3, %v10003_v45 }
 0x225   :  { %5572 = vmatpush.bf16.msra.mxu2 %v9668_v5  ;;  %v11768_v53 = vld [vmem:[%s17779_s1 + $0x16f4] sm:$0xf0]  ;;  %v10387_v57 = vld [vmem:[%s17779_s1 + $0x17e8] sm:$0xf]  ;;  %v10132_v62 = vor.u32 %v11736_v47, %v10131_v61 }
 0x226   :  { %5585 = vmatpush.bf16.msra.mxu3 %v9796_v12  ;;  %v11800_v59 = vld [vmem:[%s17779_s1 + $0x17f4] sm:$0xf0]  ;;  %v10260_v17 = vor.u32 %v11768_v53, %v10259_v50  ;;  %v9987_v0 = vld [vmem:[%s17779_s1 + $0x14c8] sm:$0xf] }
 0x227   :  { %5547 = vmatpush.bf16.msra.mxu0 %v9396_v31  ;;  %v11700_v1 = vld [vmem:[%s17779_s1 + $0x14d4] sm:$0xf0]  ;;  %v10115_v5 = vld [vmem:[%s17779_s1 + $0x15c8] sm:$0xf]  ;;  %v10388_v6 = vor.u32 %v11800_v59, %v10387_v57 }
 0x228   :  { %5560 = vmatpush.bf16.msra.mxu1 %v9524_v36  ;;  %v11732_v7 = vld [vmem:[%s17779_s1 + $0x15d4] sm:$0xf0]  ;;  %v10243_v8 = vld [vmem:[%s17779_s1 + $0x16c8] sm:$0xf]  ;;  %v9988_v19 = vor.u32 %v11700_v1, %v9987_v0 }
 0x229   :  { %5573 = vmatpush.bf16.msra.mxu2 %v9652_v32  ;;  %v11764_v12 = vld [vmem:[%s17779_s1 + $0x16d4] sm:$0xf0]  ;;  %v10371_v38 = vld [vmem:[%s17779_s1 + $0x17c8] sm:$0xf]  ;;  %v10116_v20 = vor.u32 %v11732_v7, %v10115_v5 }
 0x22a   :  { %5586 = vmatpush.bf16.msra.mxu3 %v9780_v43  ;;  %v11796_v18 = vld [vmem:[%s17779_s1 + $0x17d4] sm:$0xf0]  ;;  %v10244_v25 = vor.u32 %v11764_v12, %v10243_v8  ;;  %v9971_v9 = vld [vmem:[%s17779_s1 + $0x14a8] sm:$0xf] }
 0x22b   :  { %5548 = vmatpush.bf16.msra.mxu0 %v9380_v58  ;;  %v11696_v33 = vld [vmem:[%s17779_s1 + $0x14b4] sm:$0xf0]  ;;  %v10099_v31 = vld [vmem:[%s17779_s1 + $0x15a8] sm:$0xf]  ;;  %v10372_v63 = vor.u32 %v11796_v18, %v10371_v38  ;;  %v5342_v50 = vpop.f32.mrf.mxu0 }
 0x22c   :  { %5561 = vmatpush.bf16.msra.mxu1 %v9508_v49  ;;  %v11728_v41 = vld [vmem:[%s17779_s1 + $0x15b4] sm:$0xf0]  ;;  %v10227_v34 = vld [vmem:[%s17779_s1 + $0x16a8] sm:$0xf]  ;;  %v9972_v15 = vor.u32 %v11696_v33, %v9971_v9 }
 0x22d   :  { %5574 = vmatpush.bf16.msra.mxu2 %v9636_v56  ;;  %v11760_v35 = vld [vmem:[%s17779_s1 + $0x16b4] sm:$0xf0]  ;;  %v11970_v36 = vld.sshfl [vmem:[#allocation1 + $0x10] sm:$0xff pattern:$0x73625140]  ;;  %v10100_v40 = vor.u32 %v11728_v41, %v10099_v31 }
 0x22e   :  { %5587 = vmatpush.bf16.msra.mxu3 %v9764_v4  ;;  %5549 = vmatmul.bf16.vlgmr.msra.gmra.mxu0 %v14291_v16  ;;  %v10355_v32 = vld [vmem:[%s17779_s1 + $0x17a8] sm:$0xf]  ;;  %v11792_v37 = vld [vmem:[%s17779_s1 + $0x17b4] sm:$0xf0]  ;;  %v10228_v43 = vor.u32 %v11760_v35, %v10227_v34  ;;  %v5355_v4 = vpop.f32.mrf.mxu1 }
 0x22f   :  { %5593 = vmatpush.bf16.msrb.mxu0 %v10004_v60  ;;  %5562 = vmatmul.bf16.vlgmr.msra.gmra.mxu1 %v14303_v28  ;;  %v11971_v39 = vld.sshfl [vmem:[#allocation1 + $0x18] sm:$0xff pattern:$0x73625140]  ;;  %v9955_v2 = vld [vmem:[%s17779_s1 + $0x1488] sm:$0xf]  ;;  %v10356_v46 = vor.u32 %v11792_v37, %v10355_v32  ;;  %v5356_v1 = vadd.f32 %v5355_v4, %v5342_v50 }
 0x230   :  { %5606 = vmatpush.bf16.msrb.mxu1 %v10132_v62  ;;  %5575 = vmatmul.bf16.vlgmr.msra.gmra.mxu2 %v11970_v36  ;;  %v11692_v44 = vld [vmem:[%s17779_s1 + $0x1494] sm:$0xf0]  ;;  %v10083_v45 = vld [vmem:[%s17779_s1 + $0x1588] sm:$0xf] }
 0x231   :  { %5619 = vmatpush.bf16.msrb.mxu2 %v10260_v17  ;;  %5588 = vmatmul.bf16.vlgmr.msra.gmra.mxu3 %v11971_v39  ;;  %v11724_v3 = vld [vmem:[%s17779_s1 + $0x1594] sm:$0xf0]  ;;  %v10211_v61 = vld [vmem:[%s17779_s1 + $0x1688] sm:$0xf]  ;;  %v9956_v58 = vor.u32 %v11692_v44, %v9955_v2 }
 0x232   :  { %5632 = vmatpush.bf16.msrb.mxu3 %v10388_v6  ;;  %v11756_v47 = vld [vmem:[%s17779_s1 + $0x1694] sm:$0xf0]  ;;  %v10339_v42 = vld [vmem:[%s17779_s1 + $0x1788] sm:$0xf]  ;;  %v10084_v53 = vor.u32 %v11724_v3, %v10083_v45 }
 0x233   :  { %5594 = vmatpush.bf16.msrb.mxu0 %v9988_v19  ;;  %v11788_v48 = vld [vmem:[%s17779_s1 + $0x1794] sm:$0xf0]  ;;  %v10212_v49 = vor.u32 %v11756_v47, %v10211_v61  ;;  %v9939_v56 = vld [vmem:[%s17779_s1 + $0x1468] sm:$0xf]  ;;  %v5344_v37 = vpop.f32.mrf.mxu0 }
 0x234   :  { %5607 = vmatpush.bf16.msrb.mxu1 %v10116_v20  ;;  %v11688_v57 = vld [vmem:[%s17779_s1 + $0x1474] sm:$0xf0]  ;;  %v10067_v59 = vld [vmem:[%s17779_s1 + $0x1568] sm:$0xf]  ;;  %v10340_v60 = vor.u32 %v11788_v48, %v10339_v42  ;;  %v5368_v20 = vpop.f32.mrf.mxu2  ;;  %v5381_v41 = vpop.f32.mrf.mxu3 }
 0x235   :  { %5620 = vmatpush.bf16.msrb.mxu2 %v10244_v25  ;;  %v11720_v62 = vld [vmem:[%s17779_s1 + $0x1574] sm:$0xf0]  ;;  %v10195_v17 = vld [vmem:[%s17779_s1 + $0x1668] sm:$0xf]  ;;  %v9940_v7 = vor.u32 %v11688_v57, %v9939_v56 }
 0x236   :  { %5633 = vmatpush.bf16.msrb.mxu3 %v10372_v63  ;;  %v11752_v0 = vld [vmem:[%s17779_s1 + $0x1674] sm:$0xf0]  ;;  %v10323_v5 = vld [vmem:[%s17779_s1 + $0x1768] sm:$0xf]  ;;  %v10068_v8 = vor.u32 %v11720_v62, %v10067_v59  ;;  %v5369_v63 = vadd.f32 %v5368_v20, %v5356_v1  ;;  %v5357_v44 = vpop.f32.mrf.mxu1 }
 0x237   :  { %5595 = vmatpush.bf16.msrb.mxu0 %v9972_v15  ;;  %v11784_v6 = vld [vmem:[%s17779_s1 + $0x1774] sm:$0xf0]  ;;  %v10196_v12 = vor.u32 %v11752_v0, %v10195_v17  ;;  %v9923_v38 = vld [vmem:[%s17779_s1 + $0x1448] sm:$0xf] }
 0x238   :  { %5608 = vmatpush.bf16.msrb.mxu1 %v10100_v40  ;;  %v11684_v18 = vld [vmem:[%s17779_s1 + $0x1454] sm:$0xf0]  ;;  %v10051_v19 = vld [vmem:[%s17779_s1 + $0x1548] sm:$0xf]  ;;  %v10324_v25 = vor.u32 %v11784_v6, %v10323_v5  ;;  %v15593_v32 = vadd.f32 %v5381_v41, %v5369_v63  ;;  %v11062_v5 = vld [vmem:[%s17779_s1 + $0xec] sm:$0xf] }
 0x239   :  { %5621 = vmatpush.bf16.msrb.mxu2 %v10228_v43  ;;  %v11716_v9 = vld [vmem:[%s17779_s1 + $0x1554] sm:$0xf0]  ;;  %v10179_v33 = vld [vmem:[%s17779_s1 + $0x1648] sm:$0xf]  ;;  %v9924_v36 = vor.u32 %v11684_v18, %v9923_v38  ;;  %v7445_v6 = vld [vmem:[%s17779_s1 + $0xf8] sm:$0xf0] }
 0x23a   :  { %5634 = vmatpush.bf16.msrb.mxu3 %v10356_v46  ;;  %v11748_v31 = vld [vmem:[%s17779_s1 + $0x1654] sm:$0xf0]  ;;  %v10307_v34 = vld [vmem:[%s17779_s1 + $0x1748] sm:$0xf]  ;;  %v10052_v39 = vor.u32 %v11716_v9, %v10051_v19  ;;  %v11126_v38 = vld [vmem:[%s17779_s1 + $0x2ec] sm:$0xf] }
 0x23b   :  { %5596 = vmatpush.bf16.msrb.mxu0 %v9956_v58  ;;  %v11780_v35 = vld [vmem:[%s17779_s1 + $0x1754] sm:$0xf0]  ;;  %v10180_v15 = vor.u32 %v11748_v31, %v10179_v33  ;;  %v9907_v40 = vld [vmem:[%s17779_s1 + $0x1428] sm:$0xf]  ;;  %v7701_v18 = vld [vmem:[%s17779_s1 + $0x2f8] sm:$0xf0]  ;;  %v7448_v31 = vor.u32 %v11062_v5, %v7445_v6 }
 0x23c   :  { %5609 = vmatpush.bf16.msrb.mxu1 %v10084_v53  ;;  %v11680_v43 = vld [vmem:[%s17779_s1 + $0x1434] sm:$0xf0]  ;;  %v10035_v2 = vld [vmem:[%s17779_s1 + $0x1528] sm:$0xf]  ;;  %v10308_v45 = vor.u32 %v11780_v35, %v10307_v34  ;;  %v5370_v4 = vpop.f32.mrf.mxu2  ;;  %v5383_v1 = vpop.f32.mrf.mxu3  ;;  %v7829_v9 = vld [vmem:[%s17779_s1 + $0x3f8] sm:$0xf0]  ;;  %v7704_v41 = vor.u32 %v11126_v38, %v7701_v18 }
 0x23d   :  { %5622 = vmatpush.bf16.msrb.mxu2 %v10212_v49  ;;  %v11712_v46 = vld [vmem:[%s17779_s1 + $0x1534] sm:$0xf0]  ;;  %v10163_v3 = vld [vmem:[%s17779_s1 + $0x1628] sm:$0xf]  ;;  %v9908_v48 = vor.u32 %v11680_v43, %v9907_v40  ;;  %v11058_v34 = vld [vmem:[%s17779_s1 + $0xcc] sm:$0xf] }
 0x23e   :  { %5635 = vmatpush.bf16.msrb.mxu3 %v10340_v60  ;;  %v11744_v61 = vld [vmem:[%s17779_s1 + $0x1634] sm:$0xf0]  ;;  %v10291_v47 = vld [vmem:[%s17779_s1 + $0x1728] sm:$0xf]  ;;  %v10036_v53 = vor.u32 %v11712_v46, %v10035_v2  ;;  %v7429_v35 = vld [vmem:[%s17779_s1 + $0xd8] sm:$0xf0] }
 0x23f   :  { %5597 = vmatpush.bf16.msrb.mxu0 %v9940_v7  ;;  %v11776_v42 = vld [vmem:[%s17779_s1 + $0x1734] sm:$0xf0]  ;;  %v9891_v58 = vld [vmem:[%s17779_s1 + $0x1408] sm:$0xf]  ;;  %v10164_v49 = vor.u32 %v11744_v61, %v10163_v3  ;;  %v11094_v7 = vld [vmem:[%s17779_s1 + $0x1ec] sm:$0xf]  ;;  %v7432_v44 = vor.u32 %v11058_v34, %v7429_v35 }
 0x240   :  { %5610 = vmatpush.bf16.msrb.mxu1 %v10068_v8  ;;  %v11676_v50 = vld [vmem:[%s17779_s1 + $0x1414] sm:$0xf0]  ;;  %v10019_v56 = vld [vmem:[%s17779_s1 + $0x1508] sm:$0xf]  ;;  %v10292_v60 = vor.u32 %v11776_v42, %v10291_v47  ;;  %v7685_v40 = vld [vmem:[%s17779_s1 + $0x2d8] sm:$0xf0] }
 0x241   :  { %5623 = vmatpush.bf16.msrb.mxu2 %v10196_v12  ;;  %v11708_v57 = vld [vmem:[%s17779_s1 + $0x1514] sm:$0xf0]  ;;  %v10147_v59 = vld [vmem:[%s17779_s1 + $0x1608] sm:$0xf]  ;;  %v9892_v8 = vor.u32 %v11676_v50, %v9891_v58  ;;  %v7573_v12 = vld [vmem:[%s17779_s1 + $0x1f8] sm:$0xf0] }
 0x242   :  { %5636 = vmatpush.bf16.msrb.mxu3 %v10324_v25  ;;  %v11740_v62 = vld [vmem:[%s17779_s1 + $0x1614] sm:$0xf0]  ;;  %v10275_v17 = vld [vmem:[%s17779_s1 + $0x1708] sm:$0xf]  ;;  %v10020_v19 = vor.u32 %v11708_v57, %v10019_v56  ;;  %v11158_v25 = vld [vmem:[%s17779_s1 + $0x3ec] sm:$0xf]  ;;  %v7576_v63 = vor.u32 %v11094_v7, %v7573_v12 }
 0x243   :  { %5598 = vmatpush.bf16.msrb.mxu0 %v9924_v36  ;;  %v11772_v0 = vld [vmem:[%s17779_s1 + $0x1714] sm:$0xf0]  ;;  %v10148_v20 = vor.u32 %v11740_v62, %v10147_v59  ;;  %v11090_v36 = vld [vmem:[%s17779_s1 + $0x1cc] sm:$0xf]  ;;  %v7832_v37 = vor.u32 %v11158_v25, %v7829_v9  ;;  %v7813_v2 = vld [vmem:[%s17779_s1 + $0x3d8] sm:$0xf0] }
 0x244   :  { %5611 = vmatpush.bf16.msrb.mxu1 %v10052_v39  ;;  %v10276_v33 = vor.u32 %v11772_v0, %v10275_v17  ;;  %v7557_v39 = vld [vmem:[%s17779_s1 + $0x1d8] sm:$0xf0]  ;;  %v11154_v43 = vld [vmem:[%s17779_s1 + $0x3cc] sm:$0xf] }
 0x245   :  { %5624 = vmatpush.bf16.msrb.mxu2 %v10180_v15  ;;  %v11122_v15 = vld [vmem:[%s17779_s1 + $0x2cc] sm:$0xf]  ;;  %v7413_v61 = vld [vmem:[%s17779_s1 + $0xb8] sm:$0xf0] }
 0x246   :  { %5637 = vmatpush.bf16.msrb.mxu3 %v10308_v45  ;;  %v7560_v45 = vor.u32 %v11090_v36, %v7557_v39  ;;  %v7688_v46 = vor.u32 %v11122_v15, %v7685_v40  ;;  %v11054_v3 = vld [vmem:[%s17779_s1 + $0xac] sm:$0xf]  ;;  %v11972_v42 = vld.sshfl [vmem:[#allocation1 + $0x20] sm:$0xff pattern:$0x73625140] }
 0x247   :  { %5599 = vmatpush.bf16.msrb.mxu0 %v9908_v48  ;;  %v11086_v47 = vld [vmem:[%s17779_s1 + $0x1ac] sm:$0xf]  ;;  %v7816_v48 = vor.u32 %v11154_v43, %v7813_v2  ;;  %v7541_v58 = vld [vmem:[%s17779_s1 + $0x1b8] sm:$0xf0] }
 0x248   :  { %5612 = vmatpush.bf16.msrb.mxu1 %v10036_v53  ;;  %v11118_v50 = vld [vmem:[%s17779_s1 + $0x2ac] sm:$0xf]  ;;  %v7669_v53 = vld [vmem:[%s17779_s1 + $0x2b8] sm:$0xf0]  ;;  %v7544_v62 = vor.u32 %v11086_v47, %v7541_v58 }
 0x249   :  { %5625 = vmatpush.bf16.msrb.mxu2 %v10164_v49  ;;  %v11973_v49 = vld.sshfl [vmem:[#allocation1 + $0x30] sm:$0xff pattern:$0x73625140]  ;;  %v11974_v56 = vld.sshfl [vmem:[#allocation1 + $0x28] sm:$0xff pattern:$0x73625140]  ;;  %v7672_v17 = vor.u32 %v11118_v50, %v7669_v53 }
 0x24a   :  { %5638 = vmatpush.bf16.msrb.mxu3 %v10292_v60  ;;  %v11150_v57 = vld [vmem:[%s17779_s1 + $0x3ac] sm:$0xf]  ;;  %v7797_v59 = vld [vmem:[%s17779_s1 + $0x3b8] sm:$0xf0]  ;;  %v7416_v60 = vor.u32 %v11054_v3, %v7413_v61 }
 0x24b   :  { %5600 = vmatpush.bf16.msrb.mxu0 %v9892_v8  ;;  %v11975_v4 = vld.sshfl [vmem:[#allocation1 + $0x38] sm:$0xff pattern:$0x73625140]  ;;  %v11050_v0 = vld [vmem:[%s17779_s1 + $0x8c] sm:$0xf]  ;;  %v7800_v6 = vor.u32 %v11150_v57, %v7797_v59 }
 0x24c   :  { %5613 = vmatpush.bf16.msrb.mxu1 %v10020_v19  ;;  %v7397_v1 = vld [vmem:[%s17779_s1 + $0x98] sm:$0xf0]  ;;  %v11082_v5 = vld [vmem:[%s17779_s1 + $0x18c] sm:$0xf]  ;;  %v5407_v34 = vpop.f32.mrf.mxu1 }
 0x24d   :  { %5626 = vmatpush.bf16.msrb.mxu2 %v10148_v20  ;;  %v7525_v7 = vld [vmem:[%s17779_s1 + $0x198] sm:$0xf0]  ;;  %v11114_v8 = vld [vmem:[%s17779_s1 + $0x28c] sm:$0xf]  ;;  %v7400_v19 = vor.u32 %v11050_v0, %v7397_v1  ;;  %v5394_v20 = vpop.f32.mrf.mxu0 }
 0x24e   :  { %5639 = vmatpush.bf16.msrb.mxu3 %v10276_v33  ;;  %5601 = vmatmul.bf16.vlgmr.msrb.gmra.mxu0 %v11972_v42  ;;  %v7653_v12 = vld [vmem:[%s17779_s1 + $0x298] sm:$0xf0]  ;;  %v11146_v38 = vld [vmem:[%s17779_s1 + $0x38c] sm:$0xf]  ;;  %v7528_v25 = vor.u32 %v11082_v5, %v7525_v7 }
 0x24f   :  { %5645 = vmatpush.bf16.msra.mxu0 %v7448_v31  ;;  %5614 = vmatmul.bf16.vlgmr.msrb.gmra.mxu1 %v11974_v56  ;;  %v7781_v18 = vld [vmem:[%s17779_s1 + $0x398] sm:$0xf0]  ;;  %v7656_v9 = vor.u32 %v11114_v8, %v7653_v12  ;;  %v11046_v33 = vld [vmem:[%s17779_s1 + $0x6c] sm:$0xf] }
 0x250   :  { %5658 = vmatpush.bf16.msra.mxu1 %v7576_v63  ;;  %5627 = vmatmul.bf16.vlgmr.msrb.gmra.mxu2 %v11973_v49  ;;  %v7381_v31 = vld [vmem:[%s17779_s1 + $0x78] sm:$0xf0]  ;;  %v11078_v63 = vld [vmem:[%s17779_s1 + $0x16c] sm:$0xf]  ;;  %v7784_v35 = vor.u32 %v11146_v38, %v7781_v18 }
 0x251   :  { %5671 = vmatpush.bf16.msra.mxu2 %v7704_v41  ;;  %5640 = vmatmul.bf16.vlgmr.msrb.gmra.mxu3 %v11975_v4  ;;  %v5395_v41 = vadd.f32 %v5394_v20, %v15593_v32  ;;  %v7509_v36 = vld [vmem:[%s17779_s1 + $0x178] sm:$0xf0]  ;;  %v11142_v15 = vld [vmem:[%s17779_s1 + $0x36c] sm:$0xf]  ;;  %v7384_v43 = vor.u32 %v11046_v33, %v7381_v31 }
 0x252   :  { %5684 = vmatpush.bf16.msra.mxu3 %v7832_v37  ;;  %v11110_v37 = vld [vmem:[%s17779_s1 + $0x26c] sm:$0xf]  ;;  %v7637_v39 = vld [vmem:[%s17779_s1 + $0x278] sm:$0xf0]  ;;  %v7512_v2 = vor.u32 %v11078_v63, %v7509_v36 }
 0x253   :  { %5646 = vmatpush.bf16.msra.mxu0 %v7432_v44  ;;  %v7765_v32 = vld [vmem:[%s17779_s1 + $0x378] sm:$0xf0]  ;;  %v5408_v40 = vadd.f32 %v5407_v34, %v5395_v41  ;;  %v7640_v44 = vor.u32 %v11110_v37, %v7637_v39  ;;  %v11074_v3 = vld [vmem:[%s17779_s1 + $0x14c] sm:$0xf]  ;;  %v5420_v61 = vpop.f32.mrf.mxu2 }
 0x254   :  { %5659 = vmatpush.bf16.msra.mxu1 %v7560_v45  ;;  %v11042_v45 = vld [vmem:[%s17779_s1 + $0x4c] sm:$0xf]  ;;  %v7768_v47 = vor.u32 %v11142_v15, %v7765_v32  ;;  %v7493_v42 = vld [vmem:[%s17779_s1 + $0x158] sm:$0xf0]  ;;  %v5433_v53 = vpop.f32.mrf.mxu3  ;;  %v5409_v5 = vpop.f32.mrf.mxu1 }
 0x255   :  { %5672 = vmatpush.bf16.msra.mxu2 %v7688_v46  ;;  %v7365_v46 = vld [vmem:[%s17779_s1 + $0x58] sm:$0xf0]  ;;  %v5421_v50 = vadd.f32 %v5420_v61, %v5408_v40  ;;  %v11138_v49 = vld [vmem:[%s17779_s1 + $0x34c] sm:$0xf]  ;;  %v5396_v4 = vpop.f32.mrf.mxu0 }
 0x256   :  { %5685 = vmatpush.bf16.msra.mxu3 %v7816_v48  ;;  %v11106_v48 = vld [vmem:[%s17779_s1 + $0x24c] sm:$0xf]  ;;  %v7621_v58 = vld [vmem:[%s17779_s1 + $0x258] sm:$0xf0]  ;;  %v7368_v57 = vor.u32 %v11042_v45, %v7365_v46 }
 0x257   :  { %5647 = vmatpush.bf16.msra.mxu0 %v7416_v60  ;;  %v7749_v56 = vld [vmem:[%s17779_s1 + $0x358] sm:$0xf0]  ;;  %v15788_v59 = vadd.f32 %v5433_v53, %v5421_v50  ;;  %v7496_v60 = vor.u32 %v11074_v3, %v7493_v42  ;;  %v11070_v1 = vld [vmem:[%s17779_s1 + $0x12c] sm:$0xf] }
 0x258   :  { %5660 = vmatpush.bf16.msra.mxu1 %v7544_v62  ;;  %v7624_v62 = vor.u32 %v11106_v48, %v7621_v58  ;;  %v7349_v0 = vld [vmem:[%s17779_s1 + $0x38] sm:$0xf0]  ;;  %v11102_v8 = vld [vmem:[%s17779_s1 + $0x22c] sm:$0xf] }
 0x259   :  { %5673 = vmatpush.bf16.msra.mxu2 %v7672_v17  ;;  %v11038_v17 = vld [vmem:[%s17779_s1 + $0x2c] sm:$0xf]  ;;  %v7477_v7 = vld [vmem:[%s17779_s1 + $0x138] sm:$0xf0] }
 0x25a   :  { %5686 = vmatpush.bf16.msra.mxu3 %v7800_v6  ;;  %v7752_v6 = vor.u32 %v11138_v49, %v7749_v56  ;;  %v7605_v12 = vld [vmem:[%s17779_s1 + $0x238] sm:$0xf0]  ;;  %v11134_v38 = vld [vmem:[%s17779_s1 + $0x32c] sm:$0xf] }
 0x25b   :  { %5648 = vmatpush.bf16.msra.mxu0 %v7400_v19  ;;  %v7733_v18 = vld [vmem:[%s17779_s1 + $0x338] sm:$0xf0]  ;;  %v7352_v19 = vor.u32 %v11038_v17, %v7349_v0  ;;  %v11034_v20 = vld [vmem:[%s17779_s1 + $0xc] sm:$0xf]  ;;  %v7608_v33 = vor.u32 %v11102_v8, %v7605_v12  ;;  %v5422_v34 = vpop.f32.mrf.mxu2 }
 0x25c   :  { %5661 = vmatpush.bf16.msra.mxu1 %v7528_v25  ;;  %v7333_v25 = vld [vmem:[%s17779_s1 + $0x18] sm:$0xf0]  ;;  %v11066_v31 = vld [vmem:[%s17779_s1 + $0x10c] sm:$0xf]  ;;  %v5435_v15 = vpop.f32.mrf.mxu3 }
 0x25d   :  { %5674 = vmatpush.bf16.msra.mxu2 %v7656_v9  ;;  %v7480_v9 = vor.u32 %v11070_v1, %v7477_v7  ;;  %v7461_v63 = vld [vmem:[%s17779_s1 + $0x118] sm:$0xf0]  ;;  %v11098_v41 = vld [vmem:[%s17779_s1 + $0x20c] sm:$0xf] }
 0x25e   :  { %5687 = vmatpush.bf16.msra.mxu3 %v7784_v35  ;;  %v7736_v35 = vor.u32 %v11134_v38, %v7733_v18  ;;  %v7589_v36 = vld [vmem:[%s17779_s1 + $0x218] sm:$0xf0]  ;;  %v11130_v37 = vld [vmem:[%s17779_s1 + $0x30c] sm:$0xf]  ;;  %v7464_v3 = vor.u32 %v11066_v31, %v7461_v63 }
 0x25f   :  { %5649 = vmatpush.bf16.msra.mxu0 %v7384_v43  ;;  %v7717_v39 = vld [vmem:[%s17779_s1 + $0x318] sm:$0xf0]  ;;  %v11190_v32 = vld [vmem:[%s17779_s1 + $0x4ec] sm:$0xf]  ;;  %v7592_v61 = vor.u32 %v11098_v41, %v7589_v36 }
 0x260   :  { %5662 = vmatpush.bf16.msra.mxu1 %v7512_v2  ;;  %v7957_v40 = vld [vmem:[%s17779_s1 + $0x4f8] sm:$0xf0]  ;;  %v11222_v43 = vld [vmem:[%s17779_s1 + $0x5ec] sm:$0xf]  ;;  %v7336_v2 = vor.u32 %v11034_v20, %v7333_v25  ;;  %v7720_v48 = vor.u32 %v11130_v37, %v7717_v39 }
 0x261   :  { %5675 = vmatpush.bf16.msra.mxu2 %v7640_v44  ;;  %v8085_v44 = vld [vmem:[%s17779_s1 + $0x5f8] sm:$0xf0]  ;;  %v11254_v45 = vld [vmem:[%s17779_s1 + $0x6ec] sm:$0xf]  ;;  %v7960_v58 = vor.u32 %v11190_v32, %v7957_v40 }
 0x262   :  { %5688 = vmatpush.bf16.msra.mxu3 %v7768_v47  ;;  %v8213_v46 = vld [vmem:[%s17779_s1 + $0x6f8] sm:$0xf0]  ;;  %v11286_v47 = vld [vmem:[%s17779_s1 + $0x7ec] sm:$0xf]  ;;  %v8088_v50 = vor.u32 %v11222_v43, %v8085_v44 }
 0x263   :  { %5650 = vmatpush.bf16.msra.mxu0 %v7368_v57  ;;  %v8341_v42 = vld [vmem:[%s17779_s1 + $0x7f8] sm:$0xf0]  ;;  %v8216_v53 = vor.u32 %v11254_v45, %v8213_v46  ;;  %v11186_v49 = vld [vmem:[%s17779_s1 + $0x4cc] sm:$0xf] }
 0x264   :  { %5663 = vmatpush.bf16.msra.mxu1 %v7496_v60  ;;  %v7941_v56 = vld [vmem:[%s17779_s1 + $0x4d8] sm:$0xf0]  ;;  %v11218_v57 = vld [vmem:[%s17779_s1 + $0x5cc] sm:$0xf]  ;;  %v8344_v4 = vor.u32 %v11286_v47, %v8341_v42 }
 0x265   :  { %5676 = vmatpush.bf16.msra.mxu2 %v7624_v62  ;;  %v8069_v60 = vld [vmem:[%s17779_s1 + $0x5d8] sm:$0xf0]  ;;  %v11250_v62 = vld [vmem:[%s17779_s1 + $0x6cc] sm:$0xf]  ;;  %v7944_v5 = vor.u32 %v11186_v49, %v7941_v56 }
 0x266   :  { %5689 = vmatpush.bf16.msra.mxu3 %v7752_v6  ;;  %v8197_v17 = vld [vmem:[%s17779_s1 + $0x6d8] sm:$0xf0]  ;;  %v11282_v0 = vld [vmem:[%s17779_s1 + $0x7cc] sm:$0xf]  ;;  %v8072_v6 = vor.u32 %v11218_v57, %v8069_v60 }
 0x267   :  { %5651 = vmatpush.bf16.msra.mxu0 %v7352_v19  ;;  %v8325_v1 = vld [vmem:[%s17779_s1 + $0x7d8] sm:$0xf0]  ;;  %v8200_v7 = vor.u32 %v11250_v62, %v8197_v17  ;;  %v11182_v8 = vld [vmem:[%s17779_s1 + $0x4ac] sm:$0xf] }
 0x268   :  { %5664 = vmatpush.bf16.msra.mxu1 %v7480_v9  ;;  %v7925_v12 = vld [vmem:[%s17779_s1 + $0x4b8] sm:$0xf0]  ;;  %v11214_v38 = vld [vmem:[%s17779_s1 + $0x5ac] sm:$0xf]  ;;  %v8328_v18 = vor.u32 %v11282_v0, %v8325_v1 }
 0x269   :  { %5677 = vmatpush.bf16.msra.mxu2 %v7608_v33  ;;  %v8053_v19 = vld [vmem:[%s17779_s1 + $0x5b8] sm:$0xf0]  ;;  %v11246_v20 = vld [vmem:[%s17779_s1 + $0x6ac] sm:$0xf]  ;;  %v7928_v31 = vor.u32 %v11182_v8, %v7925_v12 }
 0x26a   :  { %5690 = vmatpush.bf16.msra.mxu3 %v7736_v35  ;;  %v8181_v25 = vld [vmem:[%s17779_s1 + $0x6b8] sm:$0xf0]  ;;  %v11278_v9 = vld [vmem:[%s17779_s1 + $0x7ac] sm:$0xf]  ;;  %v8056_v63 = vor.u32 %v11214_v38, %v8053_v19 }
 0x26b   :  { %5652 = vmatpush.bf16.msra.mxu0 %v7336_v2  ;;  %v8309_v33 = vld [vmem:[%s17779_s1 + $0x7b8] sm:$0xf0]  ;;  %v11178_v41 = vld [vmem:[%s17779_s1 + $0x48c] sm:$0xf]  ;;  %v5446_v37 = vpop.f32.mrf.mxu0 }
 0x26c   :  { %5665 = vmatpush.bf16.msra.mxu1 %v7464_v3  ;;  %v7909_v34 = vld [vmem:[%s17779_s1 + $0x498] sm:$0xf0]  ;;  %v11242_v35 = vld [vmem:[%s17779_s1 + $0x68c] sm:$0xf]  ;;  %v5447_v32 = vadd.f32 %v5446_v37, %v15788_v59  ;;  %v5459_v43 = vpop.f32.mrf.mxu1 }
 0x26d   :  { %5678 = vmatpush.bf16.msra.mxu2 %v7592_v61  ;;  %v8165_v36 = vld [vmem:[%s17779_s1 + $0x698] sm:$0xf0]  ;;  %v11274_v39 = vld [vmem:[%s17779_s1 + $0x78c] sm:$0xf]  ;;  %v7912_v40 = vor.u32 %v11178_v41, %v7909_v34 }
 0x26e   :  { %5691 = vmatpush.bf16.msra.mxu3 %v7720_v48  ;;  %5653 = vmatmul.bf16.vlgmr.msra.gmra.mxu0 %v12337_v24  ;;  %v11210_v24 = vld [vmem:[%s17779_s1 + $0x58c] sm:$0xf]  ;;  %v8293_v15 = vld [vmem:[%s17779_s1 + $0x798] sm:$0xf0]  ;;  %v8168_v44 = vor.u32 %v11242_v35, %v8165_v36  ;;  %v5460_v61 = vadd.f32 %v5459_v43, %v5447_v32 }
 0x26f   :  { %5697 = vmatpush.bf16.msrb.mxu0 %v7960_v58  ;;  %5666 = vmatmul.bf16.vlgmr.msra.gmra.mxu1 %v12342_v27  ;;  %v8037_v27 = vld [vmem:[%s17779_s1 + $0x598] sm:$0xf0]  ;;  %v11174_v45 = vld [vmem:[%s17779_s1 + $0x46c] sm:$0xf]  ;;  %v8296_v59 = vor.u32 %v11274_v39, %v8293_v15 }
 0x270   :  { %5710 = vmatpush.bf16.msrb.mxu1 %v8088_v50  ;;  %5679 = vmatmul.bf16.vlgmr.msra.gmra.mxu2 %v12335_v23  ;;  %v8184_v23 = vor.u32 %v11246_v20, %v8181_v25  ;;  %v8040_v2 = vor.u32 %v11210_v24, %v8037_v27  ;;  %v7893_v46 = vld [vmem:[%s17779_s1 + $0x478] sm:$0xf0]  ;;  %v11206_v3 = vld [vmem:[%s17779_s1 + $0x56c] sm:$0xf] }
 0x271   :  { %5723 = vmatpush.bf16.msrb.mxu2 %v8216_v53  ;;  %5692 = vmatmul.bf16.vlgmr.msra.gmra.mxu3 %v12340_v26  ;;  %v8312_v26 = vor.u32 %v11278_v9, %v8309_v33  ;;  %v8021_v47 = vld [vmem:[%s17779_s1 + $0x578] sm:$0xf0]  ;;  %v11238_v42 = vld [vmem:[%s17779_s1 + $0x66c] sm:$0xf]  ;;  %v7896_v53 = vor.u32 %v11174_v45, %v7893_v46 }
 0x272   :  { %5736 = vmatpush.bf16.msrb.mxu3 %v8344_v4  ;;  %v8149_v48 = vld [vmem:[%s17779_s1 + $0x678] sm:$0xf0]  ;;  %v11270_v58 = vld [vmem:[%s17779_s1 + $0x76c] sm:$0xf]  ;;  %v8024_v49 = vor.u32 %v11206_v3, %v8021_v47 }
 0x273   :  { %5698 = vmatpush.bf16.msrb.mxu0 %v7944_v5  ;;  %v8277_v50 = vld [vmem:[%s17779_s1 + $0x778] sm:$0xf0]  ;;  %v8152_v56 = vor.u32 %v11238_v42, %v8149_v48  ;;  %v11170_v57 = vld [vmem:[%s17779_s1 + $0x44c] sm:$0xf]  ;;  %v5472_v17 = vpop.f32.mrf.mxu2  ;;  %v5448_v38 = vpop.f32.mrf.mxu0 }
 0x274   :  { %5711 = vmatpush.bf16.msrb.mxu1 %v8072_v6  ;;  %v7877_v4 = vld [vmem:[%s17779_s1 + $0x458] sm:$0xf0]  ;;  %v11202_v60 = vld [vmem:[%s17779_s1 + $0x54c] sm:$0xf]  ;;  %v8280_v62 = vor.u32 %v11270_v58, %v8277_v50  ;;  %v5473_v6 = vadd.f32 %v5472_v17, %v5460_v61  ;;  %v5461_v19 = vpop.f32.mrf.mxu1 }
 0x275   :  { %5724 = vmatpush.bf16.msrb.mxu2 %v8200_v7  ;;  %v8005_v0 = vld [vmem:[%s17779_s1 + $0x558] sm:$0xf0]  ;;  %v11234_v1 = vld [vmem:[%s17779_s1 + $0x64c] sm:$0xf]  ;;  %v5485_v7 = vpop.f32.mrf.mxu3 }
 0x276   :  { %5737 = vmatpush.bf16.msrb.mxu3 %v8328_v18  ;;  %v8133_v5 = vld [vmem:[%s17779_s1 + $0x658] sm:$0xf0]  ;;  %v11266_v8 = vld [vmem:[%s17779_s1 + $0x74c] sm:$0xf]  ;;  %v7880_v18 = vor.u32 %v11170_v57, %v7877_v4  ;;  %v15987_v20 = vadd.f32 %v5485_v7, %v5473_v6  ;;  %v8008_v25 = vor.u32 %v11202_v60, %v8005_v0 }
 0x277   :  { %5699 = vmatpush.bf16.msrb.mxu0 %v7928_v31  ;;  %v8261_v12 = vld [vmem:[%s17779_s1 + $0x758] sm:$0xf0]  ;;  %v8136_v9 = vor.u32 %v11234_v1, %v8133_v5  ;;  %v11166_v33 = vld [vmem:[%s17779_s1 + $0x42c] sm:$0xf] }
 0x278   :  { %5712 = vmatpush.bf16.msrb.mxu1 %v8056_v63  ;;  %v7861_v31 = vld [vmem:[%s17779_s1 + $0x438] sm:$0xf0]  ;;  %v11198_v63 = vld [vmem:[%s17779_s1 + $0x52c] sm:$0xf] }
 0x279   :  { %5725 = vmatpush.bf16.msrb.mxu2 %v8184_v23  ;;  %v8264_v23 = vor.u32 %v11266_v8, %v8261_v12  ;;  %v7989_v41 = vld [vmem:[%s17779_s1 + $0x538] sm:$0xf0]  ;;  %v11230_v34 = vld [vmem:[%s17779_s1 + $0x62c] sm:$0xf]  ;;  %v7864_v35 = vor.u32 %v11166_v33, %v7861_v31 }
 0x27a   :  { %5738 = vmatpush.bf16.msrb.mxu3 %v8312_v26  ;;  %v8117_v24 = vld [vmem:[%s17779_s1 + $0x638] sm:$0xf0]  ;;  %v11262_v26 = vld [vmem:[%s17779_s1 + $0x72c] sm:$0xf]  ;;  %v7992_v39 = vor.u32 %v11198_v63, %v7989_v41 }
 0x27b   :  { %5700 = vmatpush.bf16.msrb.mxu0 %v7912_v40  ;;  %v8245_v27 = vld [vmem:[%s17779_s1 + $0x738] sm:$0xf0]  ;;  %v11162_v36 = vld [vmem:[%s17779_s1 + $0x40c] sm:$0xf]  ;;  %v8120_v15 = vor.u32 %v11230_v34, %v8117_v24  ;;  %v5474_v3 = vpop.f32.mrf.mxu2 }
 0x27c   :  { %5713 = vmatpush.bf16.msrb.mxu1 %v8040_v2  ;;  %v7845_v37 = vld [vmem:[%s17779_s1 + $0x418] sm:$0xf0]  ;;  %v11194_v32 = vld [vmem:[%s17779_s1 + $0x50c] sm:$0xf]  ;;  %v8248_v2 = vor.u32 %v11262_v26, %v8245_v27 }
 0x27d   :  { %5726 = vmatpush.bf16.msrb.mxu2 %v8168_v44  ;;  %v7973_v40 = vld [vmem:[%s17779_s1 + $0x518] sm:$0xf0]  ;;  %v11226_v43 = vld [vmem:[%s17779_s1 + $0x60c] sm:$0xf]  ;;  %v5487_v42 = vpop.f32.mrf.mxu3  ;;  %v7848_v48 = vor.u32 %v11162_v36, %v7845_v37 }
 0x27e   :  { %5739 = vmatpush.bf16.msrb.mxu3 %v8296_v59  ;;  %v8101_v44 = vld [vmem:[%s17779_s1 + $0x618] sm:$0xf0]  ;;  %v11258_v45 = vld [vmem:[%s17779_s1 + $0x70c] sm:$0xf] }
 0x27f   :  { %5701 = vmatpush.bf16.msrb.mxu0 %v7896_v53  ;;  %v8229_v46 = vld [vmem:[%s17779_s1 + $0x718] sm:$0xf0]  ;;  %v11318_v59 = vld [vmem:[%s17779_s1 + $0x8ec] sm:$0xf] }
 0x280   :  { %5714 = vmatpush.bf16.msrb.mxu1 %v8024_v49  ;;  %v8469_v61 = vld [vmem:[%s17779_s1 + $0x8f8] sm:$0xf0]  ;;  %v11350_v47 = vld [vmem:[%s17779_s1 + $0x9ec] sm:$0xf]  ;;  %v7976_v49 = vor.u32 %v11194_v32, %v7973_v40  ;;  %v8232_v60 = vor.u32 %v11258_v45, %v8229_v46 }
 0x281   :  { %5727 = vmatpush.bf16.msrb.mxu2 %v8152_v56  ;;  %v8597_v58 = vld [vmem:[%s17779_s1 + $0x9f8] sm:$0xf0]  ;;  %v11382_v50 = vld [vmem:[%s17779_s1 + $0xaec] sm:$0xf]  ;;  %v8104_v56 = vor.u32 %v11226_v43, %v8101_v44 }
 0x282   :  { %5740 = vmatpush.bf16.msrb.mxu3 %v8280_v62  ;;  %v8725_v53 = vld [vmem:[%s17779_s1 + $0xaf8] sm:$0xf0]  ;;  %v11414_v57 = vld [vmem:[%s17779_s1 + $0xbec] sm:$0xf]  ;;  %v8472_v62 = vor.u32 %v11318_v59, %v8469_v61  ;;  %v8600_v17 = vor.u32 %v11350_v47, %v8597_v58 }
 0x283   :  { %5702 = vmatpush.bf16.msrb.mxu0 %v7880_v18  ;;  %v8853_v4 = vld [vmem:[%s17779_s1 + $0xbf8] sm:$0xf0]  ;;  %v8728_v0 = vor.u32 %v11382_v50, %v8725_v53  ;;  %v11314_v1 = vld [vmem:[%s17779_s1 + $0x8cc] sm:$0xf] }
 0x284   :  { %5715 = vmatpush.bf16.msrb.mxu1 %v8008_v25  ;;  %v8453_v5 = vld [vmem:[%s17779_s1 + $0x8d8] sm:$0xf0]  ;;  %v11346_v6 = vld [vmem:[%s17779_s1 + $0x9cc] sm:$0xf]  ;;  %v8856_v7 = vor.u32 %v11414_v57, %v8853_v4 }
 0x285   :  { %5728 = vmatpush.bf16.msrb.mxu2 %v8136_v9  ;;  %v8581_v8 = vld [vmem:[%s17779_s1 + $0x9d8] sm:$0xf0]  ;;  %v11378_v12 = vld [vmem:[%s17779_s1 + $0xacc] sm:$0xf]  ;;  %v8456_v25 = vor.u32 %v11314_v1, %v8453_v5 }
 0x286   :  { %5741 = vmatpush.bf16.msrb.mxu3 %v8264_v23  ;;  %v8709_v38 = vld [vmem:[%s17779_s1 + $0xad8] sm:$0xf0]  ;;  %v11410_v18 = vld [vmem:[%s17779_s1 + $0xbcc] sm:$0xf]  ;;  %v8584_v9 = vor.u32 %v11346_v6, %v8581_v8 }
 0x287   :  { %5703 = vmatpush.bf16.msrb.mxu0 %v7864_v35  ;;  %v8837_v19 = vld [vmem:[%s17779_s1 + $0xbd8] sm:$0xf0]  ;;  %v8712_v33 = vor.u32 %v11378_v12, %v8709_v38  ;;  %v11310_v31 = vld [vmem:[%s17779_s1 + $0x8ac] sm:$0xf] }
 0x288   :  { %5716 = vmatpush.bf16.msrb.mxu1 %v7992_v39  ;;  %v8437_v63 = vld [vmem:[%s17779_s1 + $0x8b8] sm:$0xf0]  ;;  %v11342_v23 = vld [vmem:[%s17779_s1 + $0x9ac] sm:$0xf]  ;;  %v8840_v41 = vor.u32 %v11410_v18, %v8837_v19 }
 0x289   :  { %5729 = vmatpush.bf16.msrb.mxu2 %v8120_v15  ;;  %v8565_v34 = vld [vmem:[%s17779_s1 + $0x9b8] sm:$0xf0]  ;;  %v11374_v24 = vld [vmem:[%s17779_s1 + $0xaac] sm:$0xf]  ;;  %v8440_v35 = vor.u32 %v11310_v31, %v8437_v63 }
 0x28a   :  { %5742 = vmatpush.bf16.msrb.mxu3 %v8248_v2  ;;  %v8693_v26 = vld [vmem:[%s17779_s1 + $0xab8] sm:$0xf0]  ;;  %v8568_v36 = vor.u32 %v11342_v23, %v8565_v34  ;;  %v11338_v39 = vld [vmem:[%s17779_s1 + $0x98c] sm:$0xf] }
 0x28b   :  { %5704 = vmatpush.bf16.msrb.mxu0 %v7848_v48  ;;  %v8821_v27 = vld [vmem:[%s17779_s1 + $0xbb8] sm:$0xf0]  ;;  %v8696_v37 = vor.u32 %v11374_v24, %v8693_v26  ;;  %v11370_v32 = vld [vmem:[%s17779_s1 + $0xa8c] sm:$0xf]  ;;  %v5498_v43 = vpop.f32.mrf.mxu0 }
 0x28c   :  { %5717 = vmatpush.bf16.msrb.mxu1 %v7976_v49  ;;  %v8677_v40 = vld [vmem:[%s17779_s1 + $0xa98] sm:$0xf0]  ;;  %v11402_v2 = vld [vmem:[%s17779_s1 + $0xb8c] sm:$0xf]  ;;  %v5499_v45 = vadd.f32 %v5498_v43, %v15987_v20  ;;  %v5511_v3 = vpop.f32.mrf.mxu1 }
 0x28d   :  { %5730 = vmatpush.bf16.msrb.mxu2 %v8104_v56  ;;  %v8805_v44 = vld [vmem:[%s17779_s1 + $0xb98] sm:$0xf0]  ;;  %v8680_v61 = vor.u32 %v11370_v32, %v8677_v40  ;;  %v11302_v47 = vld [vmem:[%s17779_s1 + $0x86c] sm:$0xf] }
 0x28e   :  { %5743 = vmatpush.bf16.msrb.mxu3 %v8232_v60  ;;  %5705 = vmatmul.bf16.vlgmr.msrb.gmra.mxu0 %v12469_v22  ;;  %v11306_v22 = vld [vmem:[%s17779_s1 + $0x88c] sm:$0xf]  ;;  %v8405_v42 = vld [vmem:[%s17779_s1 + $0x878] sm:$0xf0]  ;;  %v8808_v20 = vor.u32 %v11402_v2, %v8805_v44  ;;  %v5512_v58 = vadd.f32 %v5511_v3, %v5499_v45 }
 0x28f   :  { %5749 = vmatpush.bf16.msra.mxu0 %v8472_v62  ;;  %5718 = vmatmul.bf16.vlgmr.msrb.gmra.mxu1 %v12473_v30  ;;  %v8549_v30 = vld [vmem:[%s17779_s1 + $0x998] sm:$0xf0]  ;;  %v11334_v48 = vld [vmem:[%s17779_s1 + $0x96c] sm:$0xf]  ;;  %v8408_v4 = vor.u32 %v11302_v47, %v8405_v42 }
 0x290   :  { %5762 = vmatpush.bf16.msra.mxu1 %v8600_v17  ;;  %5731 = vmatmul.bf16.vlgmr.msrb.gmra.mxu2 %v12467_v21  ;;  %v11406_v21 = vld [vmem:[%s17779_s1 + $0xbac] sm:$0xf]  ;;  %v8552_v59 = vor.u32 %v11338_v39, %v8549_v30  ;;  %v8533_v50 = vld [vmem:[%s17779_s1 + $0x978] sm:$0xf0] }
 0x291   :  { %5775 = vmatpush.bf16.msra.mxu2 %v8728_v0  ;;  %5744 = vmatmul.bf16.vlgmr.msrb.gmra.mxu3 %v12471_v29  ;;  %v8421_v29 = vld [vmem:[%s17779_s1 + $0x898] sm:$0xf0]  ;;  %v8824_v15 = vor.u32 %v11406_v21, %v8821_v27  ;;  %v11366_v53 = vld [vmem:[%s17779_s1 + $0xa6c] sm:$0xf]  ;;  %v8536_v60 = vor.u32 %v11334_v48, %v8533_v50 }
 0x292   :  { %5788 = vmatpush.bf16.msra.mxu3 %v8856_v7  ;;  %v8424_v46 = vor.u32 %v11306_v22, %v8421_v29  ;;  %v8661_v49 = vld [vmem:[%s17779_s1 + $0xa78] sm:$0xf0]  ;;  %v11398_v56 = vld [vmem:[%s17779_s1 + $0xb6c] sm:$0xf] }
 0x293   :  { %5750 = vmatpush.bf16.msra.mxu0 %v8456_v25  ;;  %v8789_v57 = vld [vmem:[%s17779_s1 + $0xb78] sm:$0xf0]  ;;  %v8664_v62 = vor.u32 %v11366_v53, %v8661_v49  ;;  %v11298_v17 = vld [vmem:[%s17779_s1 + $0x84c] sm:$0xf]  ;;  %v5524_v6 = vpop.f32.mrf.mxu2 }
 0x294   :  { %5763 = vmatpush.bf16.msra.mxu1 %v8584_v9  ;;  %v8389_v0 = vld [vmem:[%s17779_s1 + $0x858] sm:$0xf0]  ;;  %v11330_v1 = vld [vmem:[%s17779_s1 + $0x94c] sm:$0xf]  ;;  %v8792_v5 = vor.u32 %v11398_v56, %v8789_v57  ;;  %v5525_v38 = vadd.f32 %v5524_v6, %v5512_v58  ;;  %v5537_v18 = vpop.f32.mrf.mxu3  ;;  %v5500_v9 = vpop.f32.mrf.mxu0 }
 0x295   :  { %5776 = vmatpush.bf16.msra.mxu2 %v8712_v33  ;;  %v8517_v7 = vld [vmem:[%s17779_s1 + $0x958] sm:$0xf0]  ;;  %v11362_v8 = vld [vmem:[%s17779_s1 + $0xa4c] sm:$0xf]  ;;  %v8392_v33 = vor.u32 %v11298_v17, %v8389_v0  ;;  %v5513_v31 = vpop.f32.mrf.mxu1 }
 0x296   :  { %5789 = vmatpush.bf16.msra.mxu3 %v8840_v41  ;;  %v8645_v12 = vld [vmem:[%s17779_s1 + $0xa58] sm:$0xf0]  ;;  %v11394_v19 = vld [vmem:[%s17779_s1 + $0xb4c] sm:$0xf]  ;;  %v16186_v63 = vadd.f32 %v5537_v18, %v5525_v38  ;;  %v8520_v23 = vor.u32 %v11330_v1, %v8517_v7 }
 0x297   :  { %5751 = vmatpush.bf16.msra.mxu0 %v8440_v35  ;;  %v8773_v25 = vld [vmem:[%s17779_s1 + $0xb58] sm:$0xf0]  ;;  %v8648_v41 = vor.u32 %v11362_v8, %v8645_v12  ;;  %v11294_v34 = vld [vmem:[%s17779_s1 + $0x82c] sm:$0xf] }
 0x298   :  { %5764 = vmatpush.bf16.msra.mxu1 %v8568_v36  ;;  %v8373_v24 = vld [vmem:[%s17779_s1 + $0x838] sm:$0xf0]  ;;  %v11326_v26 = vld [vmem:[%s17779_s1 + $0x92c] sm:$0xf]  ;;  %v8776_v21 = vor.u32 %v11394_v19, %v8773_v25 }
 0x299   :  { %5777 = vmatpush.bf16.msra.mxu2 %v8696_v37  ;;  %v8501_v27 = vld [vmem:[%s17779_s1 + $0x938] sm:$0xf0]  ;;  %v11358_v35 = vld [vmem:[%s17779_s1 + $0xa2c] sm:$0xf]  ;;  %v8376_v29 = vor.u32 %v11294_v34, %v8373_v24 }
 0x29a   :  { %5790 = vmatpush.bf16.msra.mxu3 %v8824_v15  ;;  %v8629_v36 = vld [vmem:[%s17779_s1 + $0xa38] sm:$0xf0]  ;;  %v11390_v37 = vld [vmem:[%s17779_s1 + $0xb2c] sm:$0xf]  ;;  %v8504_v30 = vor.u32 %v11326_v26, %v8501_v27 }
 0x29b   :  { %5752 = vmatpush.bf16.msra.mxu0 %v8424_v46  ;;  %v8757_v22 = vld [vmem:[%s17779_s1 + $0xb38] sm:$0xf0]  ;;  %v11290_v39 = vld [vmem:[%s17779_s1 + $0x80c] sm:$0xf]  ;;  %v8632_v32 = vor.u32 %v11358_v35, %v8629_v36 }
 0x29c   :  { %5765 = vmatpush.bf16.msra.mxu1 %v8552_v59  ;;  %v8357_v15 = vld [vmem:[%s17779_s1 + $0x818] sm:$0xf0]  ;;  %v11322_v40 = vld [vmem:[%s17779_s1 + $0x90c] sm:$0xf]  ;;  %v8760_v44 = vor.u32 %v11390_v37, %v8757_v22  ;;  %v5526_v59 = vpop.f32.mrf.mxu2  ;;  %v5539_v48 = vpop.f32.mrf.mxu3 }
 0x29d   :  { %5778 = vmatpush.bf16.msra.mxu2 %v8680_v61  ;;  %v8485_v43 = vld [vmem:[%s17779_s1 + $0x918] sm:$0xf0]  ;;  %v11354_v2 = vld [vmem:[%s17779_s1 + $0xa0c] sm:$0xf] }
 0x29e   :  { %5791 = vmatpush.bf16.msra.mxu3 %v8808_v20  ;;  %v8613_v45 = vld [vmem:[%s17779_s1 + $0xa18] sm:$0xf0]  ;;  %v11386_v46 = vld [vmem:[%s17779_s1 + $0xb0c] sm:$0xf]  ;;  %v8360_v20 = vor.u32 %v11290_v39, %v8357_v15  ;;  %v8488_v49 = vor.u32 %v11322_v40, %v8485_v43 }
 0x29f   :  { %5753 = vmatpush.bf16.msra.mxu0 %v8408_v4  ;;  %v8741_v3 = vld [vmem:[%s17779_s1 + $0xb18] sm:$0xf0]  ;;  %v11446_v61 = vld [vmem:[%s17779_s1 + $0xcec] sm:$0xf]  ;;  %v8616_v56 = vor.u32 %v11354_v2, %v8613_v45 }
 0x2a0   :  { %5766 = vmatpush.bf16.msra.mxu1 %v8536_v60  ;;  %v8981_v47 = vld [vmem:[%s17779_s1 + $0xcf8] sm:$0xf0]  ;;  %v11478_v42 = vld [vmem:[%s17779_s1 + $0xdec] sm:$0xf]  ;;  %v8744_v60 = vor.u32 %v11386_v46, %v8741_v3 }
 0x2a1   :  { %5779 = vmatpush.bf16.msra.mxu2 %v8664_v62  ;;  %v9109_v58 = vld [vmem:[%s17779_s1 + $0xdf8] sm:$0xf0]  ;;  %v11510_v50 = vld [vmem:[%s17779_s1 + $0xeec] sm:$0xf]  ;;  %v8984_v62 = vor.u32 %v11446_v61, %v8981_v47 }
 0x2a2   :  { %5792 = vmatpush.bf16.msra.mxu3 %v8792_v5  ;;  %v9237_v53 = vld [vmem:[%s17779_s1 + $0xef8] sm:$0xf0]  ;;  %v11542_v57 = vld [vmem:[%s17779_s1 + $0xfec] sm:$0xf]  ;;  %v9112_v17 = vor.u32 %v11478_v42, %v9109_v58 }
 0x2a3   :  { %5754 = vmatpush.bf16.msra.mxu0 %v8392_v33  ;;  %v9365_v4 = vld [vmem:[%s17779_s1 + $0xff8] sm:$0xf0]  ;;  %v9240_v0 = vor.u32 %v11510_v50, %v9237_v53  ;;  %v11442_v1 = vld [vmem:[%s17779_s1 + $0xccc] sm:$0xf] }
 0x2a4   :  { %5767 = vmatpush.bf16.msra.mxu1 %v8520_v23  ;;  %v8965_v5 = vld [vmem:[%s17779_s1 + $0xcd8] sm:$0xf0]  ;;  %v11474_v6 = vld [vmem:[%s17779_s1 + $0xdcc] sm:$0xf]  ;;  %v9368_v7 = vor.u32 %v11542_v57, %v9365_v4 }
 0x2a5   :  { %5780 = vmatpush.bf16.msra.mxu2 %v8648_v41  ;;  %v9093_v8 = vld [vmem:[%s17779_s1 + $0xdd8] sm:$0xf0]  ;;  %v11506_v12 = vld [vmem:[%s17779_s1 + $0xecc] sm:$0xf]  ;;  %v8968_v25 = vor.u32 %v11442_v1, %v8965_v5 }
 0x2a6   :  { %5793 = vmatpush.bf16.msra.mxu3 %v8776_v21  ;;  %v9221_v38 = vld [vmem:[%s17779_s1 + $0xed8] sm:$0xf0]  ;;  %v11538_v18 = vld [vmem:[%s17779_s1 + $0xfcc] sm:$0xf]  ;;  %v9096_v9 = vor.u32 %v11474_v6, %v9093_v8 }
 0x2a7   :  { %5755 = vmatpush.bf16.msra.mxu0 %v8376_v29  ;;  %v9349_v19 = vld [vmem:[%s17779_s1 + $0xfd8] sm:$0xf0]  ;;  %v9224_v33 = vor.u32 %v11506_v12, %v9221_v38  ;;  %v11438_v31 = vld [vmem:[%s17779_s1 + $0xcac] sm:$0xf] }
 0x2a8   :  { %5768 = vmatpush.bf16.msra.mxu1 %v8504_v30  ;;  %v8949_v23 = vld [vmem:[%s17779_s1 + $0xcb8] sm:$0xf0]  ;;  %v11470_v41 = vld [vmem:[%s17779_s1 + $0xdac] sm:$0xf]  ;;  %v9352_v34 = vor.u32 %v11538_v18, %v9349_v19 }
 0x2a9   :  { %5781 = vmatpush.bf16.msra.mxu2 %v8632_v32  ;;  %v9077_v24 = vld [vmem:[%s17779_s1 + $0xdb8] sm:$0xf0]  ;;  %v11502_v26 = vld [vmem:[%s17779_s1 + $0xeac] sm:$0xf]  ;;  %v8952_v35 = vor.u32 %v11438_v31, %v8949_v23 }
 0x2aa   :  { %5794 = vmatpush.bf16.msra.mxu3 %v8760_v44  ;;  %v9205_v21 = vld [vmem:[%s17779_s1 + $0xeb8] sm:$0xf0]  ;;  %v9080_v36 = vor.u32 %v11470_v41, %v9077_v24  ;;  %v11466_v22 = vld [vmem:[%s17779_s1 + $0xd8c] sm:$0xf] }
 0x2ab   :  { %5756 = vmatpush.bf16.msra.mxu0 %v8360_v20  ;;  %v9333_v27 = vld [vmem:[%s17779_s1 + $0xfb8] sm:$0xf0]  ;;  %v9208_v37 = vor.u32 %v11502_v26, %v9205_v21  ;;  %v11498_v39 = vld [vmem:[%s17779_s1 + $0xe8c] sm:$0xf]  ;;  %v5550_v30 = vpop.f32.mrf.mxu0 }
 0x2ac   :  { %5769 = vmatpush.bf16.msra.mxu1 %v8488_v49  ;;  %v9061_v29 = vld [vmem:[%s17779_s1 + $0xd98] sm:$0xf0]  ;;  %v11530_v32 = vld [vmem:[%s17779_s1 + $0xf8c] sm:$0xf]  ;;  %v5551_v43 = vadd.f32 %v5550_v30, %v16186_v63  ;;  %v5563_v44 = vpop.f32.mrf.mxu1 }
 0x2ad   :  { %5782 = vmatpush.bf16.msra.mxu2 %v8616_v56  ;;  %v9189_v15 = vld [vmem:[%s17779_s1 + $0xe98] sm:$0xf0]  ;;  %v9064_v45 = vor.u32 %v11466_v22, %v9061_v29  ;;  %v11430_v3 = vld [vmem:[%s17779_s1 + $0xc6c] sm:$0xf] }
 0x2ae   :  { %5795 = vmatpush.bf16.msra.mxu3 %v8744_v60  ;;  %5757 = vmatmul.bf16.vlgmr.msra.gmra.mxu0 %v12569_v10  ;;  %v11534_v10 = vld [vmem:[%s17779_s1 + $0xfac] sm:$0xf]  ;;  %v9317_v40 = vld [vmem:[%s17779_s1 + $0xf98] sm:$0xf0]  ;;  %v9192_v46 = vor.u32 %v11498_v39, %v9189_v15  ;;  %v5564_v47 = vadd.f32 %v5563_v44, %v5551_v43 }
 0x2af   :  { %5801 = vmatpush.bf16.msrb.mxu0 %v8984_v62  ;;  %5770 = vmatmul.bf16.vlgmr.msra.gmra.mxu1 %v12573_v13  ;;  %v8933_v13 = vld [vmem:[%s17779_s1 + $0xc98] sm:$0xf0]  ;;  %v11462_v61 = vld [vmem:[%s17779_s1 + $0xd6c] sm:$0xf]  ;;  %v9320_v63 = vor.u32 %v11530_v32, %v9317_v40 }
 0x2b0   :  { %5814 = vmatpush.bf16.msrb.mxu1 %v9112_v17  ;;  %5783 = vmatmul.bf16.vlgmr.msra.gmra.mxu2 %v12571_v11  ;;  %v11434_v11 = vld [vmem:[%s17779_s1 + $0xc8c] sm:$0xf]  ;;  %v8917_v59 = vld [vmem:[%s17779_s1 + $0xc78] sm:$0xf0] }
 0x2b1   :  { %5827 = vmatpush.bf16.msrb.mxu2 %v9240_v0  ;;  %5796 = vmatmul.bf16.vlgmr.msra.gmra.mxu3 %v12575_v14  ;;  %v9336_v14 = vor.u32 %v11534_v10, %v9333_v27  ;;  %v8936_v2 = vor.u32 %v11434_v11, %v8933_v13  ;;  %v9045_v42 = vld [vmem:[%s17779_s1 + $0xd78] sm:$0xf0]  ;;  %v11494_v48 = vld [vmem:[%s17779_s1 + $0xe6c] sm:$0xf]  ;;  %v8920_v53 = vor.u32 %v11430_v3, %v8917_v59 }
 0x2b2   :  { %5840 = vmatpush.bf16.msrb.mxu3 %v9368_v7  ;;  %v9173_v20 = vld [vmem:[%s17779_s1 + $0xe78] sm:$0xf0]  ;;  %v11526_v58 = vld [vmem:[%s17779_s1 + $0xf6c] sm:$0xf]  ;;  %v9048_v49 = vor.u32 %v11462_v61, %v9045_v42 }
 0x2b3   :  { %5802 = vmatpush.bf16.msrb.mxu0 %v8968_v25  ;;  %v9301_v50 = vld [vmem:[%s17779_s1 + $0xf78] sm:$0xf0]  ;;  %v9176_v56 = vor.u32 %v11494_v48, %v9173_v20  ;;  %v11426_v57 = vld [vmem:[%s17779_s1 + $0xc4c] sm:$0xf]  ;;  %v5576_v17 = vpop.f32.mrf.mxu2  ;;  %v5552_v38 = vpop.f32.mrf.mxu0 }
 0x2b4   :  { %5815 = vmatpush.bf16.msrb.mxu1 %v9096_v9  ;;  %v8901_v4 = vld [vmem:[%s17779_s1 + $0xc58] sm:$0xf0]  ;;  %v11458_v60 = vld [vmem:[%s17779_s1 + $0xd4c] sm:$0xf]  ;;  %v9304_v62 = vor.u32 %v11526_v58, %v9301_v50  ;;  %v5577_v6 = vadd.f32 %v5576_v17, %v5564_v47  ;;  %v5589_v7 = vpop.f32.mrf.mxu3  ;;  %v5565_v19 = vpop.f32.mrf.mxu1 }
 0x2b5   :  { %5828 = vmatpush.bf16.msrb.mxu2 %v9224_v33  ;;  %v9029_v0 = vld [vmem:[%s17779_s1 + $0xd58] sm:$0xf0]  ;;  %v11490_v1 = vld [vmem:[%s17779_s1 + $0xe4c] sm:$0xf]  ;;  %v8904_v18 = vor.u32 %v11426_v57, %v8901_v4 }
 0x2b6   :  { %5841 = vmatpush.bf16.msrb.mxu3 %v9352_v34  ;;  %v9157_v5 = vld [vmem:[%s17779_s1 + $0xe58] sm:$0xf0]  ;;  %v11522_v8 = vld [vmem:[%s17779_s1 + $0xf4c] sm:$0xf]  ;;  %v16385_v25 = vadd.f32 %v5589_v7, %v5577_v6  ;;  %v9032_v9 = vor.u32 %v11458_v60, %v9029_v0 }
 0x2b7   :  { %5803 = vmatpush.bf16.msrb.mxu0 %v8952_v35  ;;  %v9285_v12 = vld [vmem:[%s17779_s1 + $0xf58] sm:$0xf0]  ;;  %v9160_v33 = vor.u32 %v11490_v1, %v9157_v5  ;;  %v11422_v31 = vld [vmem:[%s17779_s1 + $0xc2c] sm:$0xf] }
 0x2b8   :  { %5816 = vmatpush.bf16.msrb.mxu1 %v9080_v36  ;;  %v8885_v23 = vld [vmem:[%s17779_s1 + $0xc38] sm:$0xf0]  ;;  %v11454_v41 = vld [vmem:[%s17779_s1 + $0xd2c] sm:$0xf]  ;;  %v9288_v34 = vor.u32 %v11522_v8, %v9285_v12 }
 0x2b9   :  { %5829 = vmatpush.bf16.msrb.mxu2 %v9208_v37  ;;  %v9013_v24 = vld [vmem:[%s17779_s1 + $0xd38] sm:$0xf0]  ;;  %v11486_v26 = vld [vmem:[%s17779_s1 + $0xe2c] sm:$0xf]  ;;  %v8888_v35 = vor.u32 %v11422_v31, %v8885_v23 }
 0x2ba   :  { %5842 = vmatpush.bf16.msrb.mxu3 %v9336_v14  ;;  %v9141_v21 = vld [vmem:[%s17779_s1 + $0xe38] sm:$0xf0]  ;;  %v11518_v10 = vld [vmem:[%s17779_s1 + $0xf2c] sm:$0xf]  ;;  %v9016_v11 = vor.u32 %v11454_v41, %v9013_v24 }
 0x2bb   :  { %5804 = vmatpush.bf16.msrb.mxu0 %v8936_v2  ;;  %v9269_v27 = vld [vmem:[%s17779_s1 + $0xf38] sm:$0xf0]  ;;  %v11418_v36 = vld [vmem:[%s17779_s1 + $0xc0c] sm:$0xf]  ;;  %v9144_v13 = vor.u32 %v11486_v26, %v9141_v21  ;;  %v5578_v40 = vpop.f32.mrf.mxu2 }
 0x2bc   :  { %5817 = vmatpush.bf16.msrb.mxu1 %v9064_v45  ;;  %v8869_v37 = vld [vmem:[%s17779_s1 + $0xc18] sm:$0xf0]  ;;  %v11450_v22 = vld [vmem:[%s17779_s1 + $0xd0c] sm:$0xf]  ;;  %v9272_v39 = vor.u32 %v11518_v10, %v9269_v27  ;;  %v5591_v45 = vpop.f32.mrf.mxu3 }
 0x2bd   :  { %5830 = vmatpush.bf16.msrb.mxu2 %v9192_v46  ;;  %v8997_v14 = vld [vmem:[%s17779_s1 + $0xd18] sm:$0xf0]  ;;  %v11482_v29 = vld [vmem:[%s17779_s1 + $0xe0c] sm:$0xf]  ;;  %v8872_v46 = vor.u32 %v11418_v36, %v8869_v37 }
 0x2be   :  { %5843 = vmatpush.bf16.msrb.mxu3 %v9320_v63  ;;  %v9125_v15 = vld [vmem:[%s17779_s1 + $0xe18] sm:$0xf0]  ;;  %v11514_v30 = vld [vmem:[%s17779_s1 + $0xf0c] sm:$0xf]  ;;  %v9000_v63 = vor.u32 %v11450_v22, %v8997_v14 }
 0x2bf   :  { %5805 = vmatpush.bf16.msrb.mxu0 %v8920_v53  ;;  %v9253_v32 = vld [vmem:[%s17779_s1 + $0xf18] sm:$0xf0]  ;;  %v11574_v43 = vld [vmem:[%s17779_s1 + $0x10ec] sm:$0xf]  ;;  %v9128_v47 = vor.u32 %v11482_v29, %v9125_v15 }
 0x2c0   :  { %5818 = vmatpush.bf16.msrb.mxu1 %v9048_v49  ;;  %v9493_v2 = vld [vmem:[%s17779_s1 + $0x10f8] sm:$0xf0]  ;;  %v11606_v44 = vld [vmem:[%s17779_s1 + $0x11ec] sm:$0xf]  ;;  %v9256_v20 = vor.u32 %v11514_v30, %v9253_v32 }
 0x2c1   :  { %5831 = vmatpush.bf16.msrb.mxu2 %v9176_v56  ;;  %v9621_v3 = vld [vmem:[%s17779_s1 + $0x11f8] sm:$0xf0]  ;;  %v11638_v59 = vld [vmem:[%s17779_s1 + $0x12ec] sm:$0xf]  ;;  %v9496_v58 = vor.u32 %v11574_v43, %v9493_v2 }
 0x2c2   :  { %5844 = vmatpush.bf16.msrb.mxu3 %v9304_v62  ;;  %v9749_v61 = vld [vmem:[%s17779_s1 + $0x12f8] sm:$0xf0]  ;;  %v11670_v42 = vld [vmem:[%s17779_s1 + $0x13ec] sm:$0xf]  ;;  %v9624_v50 = vor.u32 %v11606_v44, %v9621_v3 }
 0x2c3   :  { %5806 = vmatpush.bf16.msrb.mxu0 %v8904_v18  ;;  %v9877_v48 = vld [vmem:[%s17779_s1 + $0x13f8] sm:$0xf0]  ;;  %v9752_v53 = vor.u32 %v11638_v59, %v9749_v61  ;;  %v11570_v49 = vld [vmem:[%s17779_s1 + $0x10cc] sm:$0xf] }
 0x2c4   :  { %5819 = vmatpush.bf16.msrb.mxu1 %v9032_v9  ;;  %v9477_v56 = vld [vmem:[%s17779_s1 + $0x10d8] sm:$0xf0]  ;;  %v11602_v57 = vld [vmem:[%s17779_s1 + $0x11cc] sm:$0xf]  ;;  %v9880_v4 = vor.u32 %v11670_v42, %v9877_v48 }
 0x2c5   :  { %5832 = vmatpush.bf16.msrb.mxu2 %v9160_v33  ;;  %v9605_v60 = vld [vmem:[%s17779_s1 + $0x11d8] sm:$0xf0]  ;;  %v11634_v62 = vld [vmem:[%s17779_s1 + $0x12cc] sm:$0xf]  ;;  %v9480_v5 = vor.u32 %v11570_v49, %v9477_v56 }
 0x2c6   :  { %5845 = vmatpush.bf16.msrb.mxu3 %v9288_v34  ;;  %v9733_v17 = vld [vmem:[%s17779_s1 + $0x12d8] sm:$0xf0]  ;;  %v11666_v0 = vld [vmem:[%s17779_s1 + $0x13cc] sm:$0xf]  ;;  %v9608_v6 = vor.u32 %v11602_v57, %v9605_v60 }
 0x2c7   :  { %5807 = vmatpush.bf16.msrb.mxu0 %v8888_v35  ;;  %v9861_v1 = vld [vmem:[%s17779_s1 + $0x13d8] sm:$0xf0]  ;;  %v9736_v7 = vor.u32 %v11634_v62, %v9733_v17  ;;  %v11566_v8 = vld [vmem:[%s17779_s1 + $0x10ac] sm:$0xf] }
 0x2c8   :  { %5820 = vmatpush.bf16.msrb.mxu1 %v9016_v11  ;;  %v9461_v12 = vld [vmem:[%s17779_s1 + $0x10b8] sm:$0xf0]  ;;  %v11598_v38 = vld [vmem:[%s17779_s1 + $0x11ac] sm:$0xf]  ;;  %v9864_v18 = vor.u32 %v11666_v0, %v9861_v1 }
 0x2c9   :  { %5833 = vmatpush.bf16.msrb.mxu2 %v9144_v13  ;;  %v9589_v19 = vld [vmem:[%s17779_s1 + $0x11b8] sm:$0xf0]  ;;  %v11630_v9 = vld [vmem:[%s17779_s1 + $0x12ac] sm:$0xf]  ;;  %v9464_v23 = vor.u32 %v11566_v8, %v9461_v12 }
 0x2ca   :  { %5846 = vmatpush.bf16.msrb.mxu3 %v9272_v39  ;;  %v9717_v33 = vld [vmem:[%s17779_s1 + $0x12b8] sm:$0xf0]  ;;  %v9592_v41 = vor.u32 %v11598_v38, %v9589_v19  ;;  %v11594_v24 = vld [vmem:[%s17779_s1 + $0x118c] sm:$0xf] }
 0x2cb   :  { %5808 = vmatpush.bf16.msrb.mxu0 %v8872_v46  ;;  %v9845_v31 = vld [vmem:[%s17779_s1 + $0x13b8] sm:$0xf0]  ;;  %v9720_v34 = vor.u32 %v11630_v9, %v9717_v33  ;;  %v11626_v21 = vld [vmem:[%s17779_s1 + $0x128c] sm:$0xf]  ;;  %v5602_v27 = vpop.f32.mrf.mxu0 }
 0x2cc   :  { %5821 = vmatpush.bf16.msrb.mxu1 %v9000_v63  ;;  %v9573_v26 = vld [vmem:[%s17779_s1 + $0x1198] sm:$0xf0]  ;;  %v11658_v35 = vld [vmem:[%s17779_s1 + $0x138c] sm:$0xf]  ;;  %v5603_v37 = vadd.f32 %v5602_v27, %v16385_v25  ;;  %v5615_v13 = vpop.f32.mrf.mxu1 }
 0x2cd   :  { %5834 = vmatpush.bf16.msrb.mxu2 %v9128_v47  ;;  %v9701_v10 = vld [vmem:[%s17779_s1 + $0x1298] sm:$0xf0]  ;;  %v9576_v22 = vor.u32 %v11594_v24, %v9573_v26  ;;  %v11558_v29 = vld [vmem:[%s17779_s1 + $0x106c] sm:$0xf] }
 0x2ce   :  { %5847 = vmatpush.bf16.msrb.mxu3 %v9256_v20  ;;  %5809 = vmatmul.bf16.vlgmr.msrb.gmra.mxu0 %v12743_v51  ;;  %v11662_v51 = vld [vmem:[%s17779_s1 + $0x13ac] sm:$0xf]  ;;  %v9829_v36 = vld [vmem:[%s17779_s1 + $0x1398] sm:$0xf0]  ;;  %v9704_v14 = vor.u32 %v11626_v21, %v9701_v10  ;;  %v5616_v30 = vadd.f32 %v5615_v13, %v5603_v37 }
 0x2cf   :  { %5853 = vmatpush.bf16.msra.mxu0 %v9496_v58  ;;  %5822 = vmatmul.bf16.vlgmr.msrb.gmra.mxu1 %v12747_v54  ;;  %v9445_v54 = vld [vmem:[%s17779_s1 + $0x1098] sm:$0xf0]  ;;  %v11590_v15 = vld [vmem:[%s17779_s1 + $0x116c] sm:$0xf]  ;;  %v9832_v25 = vor.u32 %v11658_v35, %v9829_v36 }
 0x2d0   :  { %5866 = vmatpush.bf16.msra.mxu1 %v9624_v50  ;;  %5835 = vmatmul.bf16.vlgmr.msrb.gmra.mxu2 %v12745_v52  ;;  %v11562_v52 = vld [vmem:[%s17779_s1 + $0x108c] sm:$0xf]  ;;  %v9429_v39 = vld [vmem:[%s17779_s1 + $0x1078] sm:$0xf0] }
 0x2d1   :  { %5879 = vmatpush.bf16.msra.mxu2 %v9752_v53  ;;  %5848 = vmatmul.bf16.vlgmr.msrb.gmra.mxu3 %v12749_v55  ;;  %v9848_v55 = vor.u32 %v11662_v51, %v9845_v31  ;;  %v9448_v11 = vor.u32 %v11562_v52, %v9445_v54  ;;  %v9557_v32 = vld [vmem:[%s17779_s1 + $0x1178] sm:$0xf0]  ;;  %v11622_v40 = vld [vmem:[%s17779_s1 + $0x126c] sm:$0xf]  ;;  %v9432_v45 = vor.u32 %v11558_v29, %v9429_v39 }
 0x2d2   :  { %5892 = vmatpush.bf16.msra.mxu3 %v9880_v4  ;;  %v9685_v43 = vld [vmem:[%s17779_s1 + $0x1278] sm:$0xf0]  ;;  %v11654_v2 = vld [vmem:[%s17779_s1 + $0x136c] sm:$0xf]  ;;  %v9560_v46 = vor.u32 %v11590_v15, %v9557_v32 }
 0x2d3   :  { %5854 = vmatpush.bf16.msra.mxu0 %v9480_v5  ;;  %v9813_v44 = vld [vmem:[%s17779_s1 + $0x1378] sm:$0xf0]  ;;  %v9688_v3 = vor.u32 %v11622_v40, %v9685_v43  ;;  %v11554_v59 = vld [vmem:[%s17779_s1 + $0x104c] sm:$0xf]  ;;  %v5628_v42 = vpop.f32.mrf.mxu2  ;;  %v5604_v57 = vpop.f32.mrf.mxu0 }
 0x2d4   :  { %5867 = vmatpush.bf16.msra.mxu1 %v9608_v6  ;;  %v9413_v61 = vld [vmem:[%s17779_s1 + $0x1058] sm:$0xf0]  ;;  %v11586_v63 = vld [vmem:[%s17779_s1 + $0x114c] sm:$0xf]  ;;  %v9816_v47 = vor.u32 %v11654_v2, %v9813_v44  ;;  %v5629_v50 = vadd.f32 %v5628_v42, %v5616_v30  ;;  %v5641_v53 = vpop.f32.mrf.mxu3  ;;  %v5617_v60 = vpop.f32.mrf.mxu1 }
 0x2d5   :  { %5880 = vmatpush.bf16.msra.mxu2 %v9736_v7  ;;  %v9541_v48 = vld [vmem:[%s17779_s1 + $0x1158] sm:$0xf0]  ;;  %v11618_v20 = vld [vmem:[%s17779_s1 + $0x124c] sm:$0xf]  ;;  %v9416_v4 = vor.u32 %v11554_v59, %v9413_v61 }
 0x2d6   :  { %5893 = vmatpush.bf16.msra.mxu3 %v9864_v18  ;;  %v9669_v58 = vld [vmem:[%s17779_s1 + $0x1258] sm:$0xf0]  ;;  %v11650_v49 = vld [vmem:[%s17779_s1 + $0x134c] sm:$0xf]  ;;  %v16584_v62 = vadd.f32 %v5641_v53, %v5629_v50  ;;  %v9544_v17 = vor.u32 %v11586_v63, %v9541_v48 }
 0x2d7   :  { %5855 = vmatpush.bf16.msra.mxu0 %v9464_v23  ;;  %v9797_v56 = vld [vmem:[%s17779_s1 + $0x1358] sm:$0xf0]  ;;  %v9672_v0 = vor.u32 %v11618_v20, %v9669_v58  ;;  %v11550_v1 = vld [vmem:[%s17779_s1 + $0x102c] sm:$0xf] }
 0x2d8   :  { %5868 = vmatpush.bf16.msra.mxu1 %v9592_v41  ;;  %v9397_v5 = vld [vmem:[%s17779_s1 + $0x1038] sm:$0xf0]  ;;  %v11582_v6 = vld [vmem:[%s17779_s1 + $0x112c] sm:$0xf]  ;;  %v9800_v7 = vor.u32 %v11650_v49, %v9797_v56 }
 0x2d9   :  { %5881 = vmatpush.bf16.msra.mxu2 %v9720_v34  ;;  %v9525_v8 = vld [vmem:[%s17779_s1 + $0x1138] sm:$0xf0]  ;;  %v11614_v12 = vld [vmem:[%s17779_s1 + $0x122c] sm:$0xf]  ;;  %v9400_v9 = vor.u32 %v11550_v1, %v9397_v5 }
 0x2da   :  { %5894 = vmatpush.bf16.msra.mxu3 %v9848_v55  ;;  %v9653_v38 = vld [vmem:[%s17779_s1 + $0x1238] sm:$0xf0]  ;;  %v11646_v18 = vld [vmem:[%s17779_s1 + $0x132c] sm:$0xf]  ;;  %v9528_v31 = vor.u32 %v11582_v6, %v9525_v8 }
 0x2db   :  { %5856 = vmatpush.bf16.msra.mxu0 %v9448_v11  ;;  %v9781_v19 = vld [vmem:[%s17779_s1 + $0x1338] sm:$0xf0]  ;;  %v11546_v33 = vld [vmem:[%s17779_s1 + $0x100c] sm:$0xf]  ;;  %v9656_v23 = vor.u32 %v11614_v12, %v9653_v38  ;;  %v5630_v21 = vpop.f32.mrf.mxu2 }
 0x2dc   :  { %5869 = vmatpush.bf16.msra.mxu1 %v9576_v22  ;;  %v9381_v51 = vld [vmem:[%s17779_s1 + $0x1018] sm:$0xf0]  ;;  %v11578_v41 = vld [vmem:[%s17779_s1 + $0x110c] sm:$0xf]  ;;  %v9784_v54 = vor.u32 %v11646_v18, %v9781_v19  ;;  %v5643_v36 = vpop.f32.mrf.mxu3 }
 0x2dd   :  { %5882 = vmatpush.bf16.msra.mxu2 %v9704_v14  ;;  %v9509_v34 = vld [vmem:[%s17779_s1 + $0x1118] sm:$0xf0]  ;;  %v11610_v52 = vld [vmem:[%s17779_s1 + $0x120c] sm:$0xf]  ;;  %v9384_v37 = vor.u32 %v11546_v33, %v9381_v51 }
 0x2de   :  { %5895 = vmatpush.bf16.msra.mxu3 %v9832_v25  ;;  %v9637_v24 = vld [vmem:[%s17779_s1 + $0x1218] sm:$0xf0]  ;;  %v11642_v55 = vld [vmem:[%s17779_s1 + $0x130c] sm:$0xf]  ;;  %v9512_v14 = vor.u32 %v11578_v41, %v9509_v34 }
 0x2df   :  { %5857 = vmatpush.bf16.msra.mxu0 %v9432_v45  ;;  %v9765_v26 = vld [vmem:[%s17779_s1 + $0x1318] sm:$0xf0]  ;;  %v11702_v10 = vld [vmem:[%s17779_s1 + $0x14ec] sm:$0xf]  ;;  %v9640_v29 = vor.u32 %v11610_v52, %v9637_v24 }
 0x2e0   :  { %5870 = vmatpush.bf16.msra.mxu1 %v9560_v46  ;;  %v10005_v27 = vld [vmem:[%s17779_s1 + $0x14f8] sm:$0xf0]  ;;  %v11734_v35 = vld [vmem:[%s17779_s1 + $0x15ec] sm:$0xf]  ;;  %v9768_v25 = vor.u32 %v11642_v55, %v9765_v26 }
 0x2e1   :  { %5883 = vmatpush.bf16.msra.mxu2 %v9688_v3  ;;  %v10133_v11 = vld [vmem:[%s17779_s1 + $0x15f8] sm:$0xf0]  ;;  %v11766_v13 = vld [vmem:[%s17779_s1 + $0x16ec] sm:$0xf]  ;;  %v10008_v30 = vor.u32 %v11702_v10, %v10005_v27 }
 0x2e2   :  { %5896 = vmatpush.bf16.msra.mxu3 %v9816_v47  ;;  %v10261_v22 = vld [vmem:[%s17779_s1 + $0x16f8] sm:$0xf0]  ;;  %v11798_v39 = vld [vmem:[%s17779_s1 + $0x17ec] sm:$0xf]  ;;  %v10136_v32 = vor.u32 %v11734_v35, %v10133_v11 }
 0x2e3   :  { %5858 = vmatpush.bf16.msra.mxu0 %v9416_v4  ;;  %v10389_v15 = vld [vmem:[%s17779_s1 + $0x17f8] sm:$0xf0]  ;;  %v10264_v40 = vor.u32 %v11766_v13, %v10261_v22  ;;  %v11698_v43 = vld [vmem:[%s17779_s1 + $0x14cc] sm:$0xf] }
 0x2e4   :  { %5871 = vmatpush.bf16.msra.mxu1 %v9544_v17  ;;  %v9989_v2 = vld [vmem:[%s17779_s1 + $0x14d8] sm:$0xf0]  ;;  %v11730_v44 = vld [vmem:[%s17779_s1 + $0x15cc] sm:$0xf]  ;;  %v10392_v45 = vor.u32 %v11798_v39, %v10389_v15 }
 0x2e5   :  { %5884 = vmatpush.bf16.msra.mxu2 %v9672_v0  ;;  %v10117_v46 = vld [vmem:[%s17779_s1 + $0x15d8] sm:$0xf0]  ;;  %v11762_v3 = vld [vmem:[%s17779_s1 + $0x16cc] sm:$0xf]  ;;  %v9992_v47 = vor.u32 %v11698_v43, %v9989_v2 }
 0x2e6   :  { %5897 = vmatpush.bf16.msra.mxu3 %v9800_v7  ;;  %v10245_v59 = vld [vmem:[%s17779_s1 + $0x16d8] sm:$0xf0]  ;;  %v11794_v61 = vld [vmem:[%s17779_s1 + $0x17cc] sm:$0xf]  ;;  %v10120_v42 = vor.u32 %v11730_v44, %v10117_v46 }
 0x2e7   :  { %5859 = vmatpush.bf16.msra.mxu0 %v9400_v9  ;;  %v10373_v63 = vld [vmem:[%s17779_s1 + $0x17d8] sm:$0xf0]  ;;  %v10248_v48 = vor.u32 %v11762_v3, %v10245_v59  ;;  %v11694_v20 = vld [vmem:[%s17779_s1 + $0x14ac] sm:$0xf] }
 0x2e8   :  { %5872 = vmatpush.bf16.msra.mxu1 %v9528_v31  ;;  %v9973_v58 = vld [vmem:[%s17779_s1 + $0x14b8] sm:$0xf0]  ;;  %v11726_v50 = vld [vmem:[%s17779_s1 + $0x15ac] sm:$0xf]  ;;  %v10376_v53 = vor.u32 %v11794_v61, %v10373_v63 }
 0x2e9   :  { %5885 = vmatpush.bf16.msra.mxu2 %v9656_v23  ;;  %v10101_v49 = vld [vmem:[%s17779_s1 + $0x15b8] sm:$0xf0]  ;;  %v11758_v56 = vld [vmem:[%s17779_s1 + $0x16ac] sm:$0xf]  ;;  %v9976_v0 = vor.u32 %v11694_v20, %v9973_v58 }
 0x2ea   :  { %5898 = vmatpush.bf16.msra.mxu3 %v9784_v54  ;;  %v10229_v57 = vld [vmem:[%s17779_s1 + $0x16b8] sm:$0xf0]  ;;  %v11976_v4 = vld.sshfl [vmem:[#allocation1 + $0x10] sm:$0xff pattern:$0x73625140]  ;;  %v10104_v1 = vor.u32 %v11726_v50, %v10101_v49 }
 0x2eb   :  { %5860 = vmatpush.bf16.msra.mxu0 %v9384_v37  ;;  %v10357_v60 = vld [vmem:[%s17779_s1 + $0x17b8] sm:$0xf0]  ;;  %v10232_v5 = vor.u32 %v11758_v56, %v10229_v57  ;;  %v11722_v7 = vld [vmem:[%s17779_s1 + $0x158c] sm:$0xf]  ;;  %v5654_v51 = vpop.f32.mrf.mxu0 }
 0x2ec   :  { %5873 = vmatpush.bf16.msra.mxu1 %v9512_v14  ;;  %v11977_v17 = vld.sshfl [vmem:[#allocation1 + $0x18] sm:$0xff pattern:$0x73625140]  ;;  %v11754_v38 = vld [vmem:[%s17779_s1 + $0x168c] sm:$0xf]  ;;  %v5667_v54 = vpop.f32.mrf.mxu1 }
 0x2ed   :  { %5886 = vmatpush.bf16.msra.mxu2 %v9640_v29  ;;  %v9957_v6 = vld [vmem:[%s17779_s1 + $0x1498] sm:$0xf0]  ;;  %v11786_v19 = vld [vmem:[%s17779_s1 + $0x178c] sm:$0xf]  ;;  %v5668_v10 = vadd.f32 %v5667_v54, %v5654_v51  ;;  %v11827_v54 = vld [vmem:[%s17782_s3 + $0xcc] sm:$0xf0] }
 0x2ee   :  { %5899 = vmatpush.bf16.msra.mxu3 %v9768_v25  ;;  %5861 = vmatmul.bf16.vlgmr.msra.gmra.mxu0 %v14291_v16  ;;  %v11790_v16 = vld [vmem:[%s17779_s1 + $0x17ac] sm:$0xf]  ;;  %v10085_v12 = vld [vmem:[%s17779_s1 + $0x1598] sm:$0xf0] }
 0x2ef   :  { %5905 = vmatpush.bf16.msrb.mxu0 %v10008_v30  ;;  %5874 = vmatmul.bf16.vlgmr.msra.gmra.mxu1 %v14303_v28  ;;  %v11690_v28 = vld [vmem:[%s17779_s1 + $0x148c] sm:$0xf]  ;;  %v10360_v8 = vor.u32 %v11790_v16, %v10357_v60  ;;  %v10213_v18 = vld [vmem:[%s17779_s1 + $0x1698] sm:$0xf0]  ;;  %v10088_v31 = vor.u32 %v11722_v7, %v10085_v12 }
 0x2f0   :  { %5918 = vmatpush.bf16.msrb.mxu1 %v10136_v32  ;;  %5887 = vmatmul.bf16.vlgmr.msra.gmra.mxu2 %v11976_v4  ;;  %v10341_v9 = vld [vmem:[%s17779_s1 + $0x1798] sm:$0xf0]  ;;  %v9960_v33 = vor.u32 %v11690_v28, %v9957_v6  ;;  %v10216_v23 = vor.u32 %v11754_v38, %v10213_v18  ;;  %v11686_v41 = vld [vmem:[%s17779_s1 + $0x146c] sm:$0xf]  ;;  %v10507_v38 = vld [vmem:[%s17782_s3 + $0xe0] sm:$0xf] }
 0x2f1   :  { %5931 = vmatpush.bf16.msrb.mxu2 %v10264_v40  ;;  %5900 = vmatmul.bf16.vlgmr.msra.gmra.mxu3 %v11977_v17  ;;  %v9941_v34 = vld [vmem:[%s17779_s1 + $0x1478] sm:$0xf0]  ;;  %v11718_v52 = vld [vmem:[%s17779_s1 + $0x156c] sm:$0xf]  ;;  %v10344_v24 = vor.u32 %v11786_v19, %v10341_v9  ;;  %v11831_v18 = vld [vmem:[%s17782_s3 + $0xec] sm:$0xf0] }
 0x2f2   :  { %5944 = vmatpush.bf16.msrb.mxu3 %v10392_v45  ;;  %v10069_v55 = vld [vmem:[%s17779_s1 + $0x1578] sm:$0xf0]  ;;  %v11750_v26 = vld [vmem:[%s17779_s1 + $0x166c] sm:$0xf]  ;;  %v9944_v36 = vor.u32 %v11686_v41, %v9941_v34  ;;  %v10635_v9 = vld [vmem:[%s17782_s3 + $0x1e0] sm:$0xf]  ;;  %v10508_v41 = vor.u32 %v11831_v18, %v10507_v38 }
 0x2f3   :  { %5906 = vmatpush.bf16.msrb.mxu0 %v9992_v47  ;;  %v10197_v21 = vld [vmem:[%s17779_s1 + $0x1678] sm:$0xf0]  ;;  %v11782_v27 = vld [vmem:[%s17779_s1 + $0x176c] sm:$0xf]  ;;  %v10072_v37 = vor.u32 %v11718_v52, %v10069_v55  ;;  %v5680_v29 = vpop.f32.mrf.mxu2  ;;  %v5656_v46 = vpop.f32.mrf.mxu0  ;;  %v10491_v52 = vld [vmem:[%s17782_s3 + $0xc0] sm:$0xf] }
 0x2f4   :  { %5919 = vmatpush.bf16.msrb.mxu1 %v10120_v42  ;;  %v10325_v35 = vld [vmem:[%s17779_s1 + $0x1778] sm:$0xf0]  ;;  %v10200_v11 = vor.u32 %v11750_v26, %v10197_v21  ;;  %v11682_v13 = vld [vmem:[%s17779_s1 + $0x144c] sm:$0xf]  ;;  %v5681_v32 = vadd.f32 %v5680_v29, %v5668_v10  ;;  %v5693_v40 = vpop.f32.mrf.mxu3  ;;  %v5669_v42 = vpop.f32.mrf.mxu1  ;;  %v11859_v55 = vld [vmem:[%s17782_s3 + $0x1cc] sm:$0xf0]  ;;  %v10492_v26 = vor.u32 %v11827_v54, %v10491_v52 }
 0x2f5   :  { %5932 = vmatpush.bf16.msrb.mxu2 %v10248_v48  ;;  %v9925_v22 = vld [vmem:[%s17779_s1 + $0x1458] sm:$0xf0]  ;;  %v11714_v14 = vld [vmem:[%s17779_s1 + $0x154c] sm:$0xf]  ;;  %v10328_v39 = vor.u32 %v11782_v27, %v10325_v35  ;;  %v10475_v27 = vld [vmem:[%s17782_s3 + $0xa0] sm:$0xf] }
 0x2f6   :  { %5945 = vmatpush.bf16.msrb.mxu3 %v10376_v53  ;;  %v10053_v15 = vld [vmem:[%s17779_s1 + $0x1558] sm:$0xf0]  ;;  %v11746_v25 = vld [vmem:[%s17779_s1 + $0x164c] sm:$0xf]  ;;  %v9928_v44 = vor.u32 %v11682_v13, %v9925_v22  ;;  %v16780_v45 = vadd.f32 %v5693_v40, %v5681_v32  ;;  %v11823_v35 = vld [vmem:[%s17782_s3 + $0xac] sm:$0xf0] }
 0x2f7   :  { %5907 = vmatpush.bf16.msrb.mxu0 %v9976_v0  ;;  %v10181_v30 = vld [vmem:[%s17779_s1 + $0x1658] sm:$0xf0]  ;;  %v11778_v43 = vld [vmem:[%s17779_s1 + $0x174c] sm:$0xf]  ;;  %v10056_v3 = vor.u32 %v11714_v14, %v10053_v15  ;;  %v11855_v13 = vld [vmem:[%s17782_s3 + $0x1ac] sm:$0xf0]  ;;  %v10476_v14 = vor.u32 %v11823_v35, %v10475_v27 }
 0x2f8   :  { %5920 = vmatpush.bf16.msrb.mxu1 %v10104_v1  ;;  %v10309_v2 = vld [vmem:[%s17779_s1 + $0x1758] sm:$0xf0]  ;;  %v10184_v59 = vor.u32 %v11746_v25, %v10181_v30  ;;  %v11678_v61 = vld [vmem:[%s17779_s1 + $0x142c] sm:$0xf]  ;;  %v11819_v15 = vld [vmem:[%s17782_s3 + $0x8c] sm:$0xf0] }
 0x2f9   :  { %5933 = vmatpush.bf16.msrb.mxu2 %v10232_v5  ;;  %v9909_v63 = vld [vmem:[%s17779_s1 + $0x1438] sm:$0xf0]  ;;  %v11710_v47 = vld [vmem:[%s17779_s1 + $0x152c] sm:$0xf]  ;;  %v10312_v48 = vor.u32 %v11778_v43, %v10309_v2  ;;  %v10587_v25 = vld [vmem:[%s17782_s3 + $0x180] sm:$0xf] }
 0x2fa   :  { %5946 = vmatpush.bf16.msrb.mxu3 %v10360_v8  ;;  %v10037_v20 = vld [vmem:[%s17779_s1 + $0x1538] sm:$0xf0]  ;;  %v11742_v58 = vld [vmem:[%s17779_s1 + $0x162c] sm:$0xf]  ;;  %v9912_v56 = vor.u32 %v11678_v61, %v9909_v63  ;;  %v11851_v30 = vld [vmem:[%s17782_s3 + $0x18c] sm:$0xf0] }
 0x2fb   :  { %5908 = vmatpush.bf16.msrb.mxu0 %v9960_v33  ;;  %v10165_v50 = vld [vmem:[%s17779_s1 + $0x1638] sm:$0xf0]  ;;  %v11774_v53 = vld [vmem:[%s17779_s1 + $0x172c] sm:$0xf]  ;;  %v10040_v4 = vor.u32 %v11710_v47, %v10037_v20  ;;  %v5682_v1 = vpop.f32.mrf.mxu2  ;;  %v11863_v33 = vld [vmem:[%s17782_s3 + $0x1ec] sm:$0xf0]  ;;  %v10588_v43 = vor.u32 %v11851_v30, %v10587_v25 }
 0x2fc   :  { %5921 = vmatpush.bf16.msrb.mxu1 %v10088_v31  ;;  %v10293_v49 = vld [vmem:[%s17779_s1 + $0x1738] sm:$0xf0]  ;;  %v11674_v57 = vld [vmem:[%s17779_s1 + $0x140c] sm:$0xf]  ;;  %v10168_v16 = vor.u32 %v11742_v58, %v10165_v50  ;;  %v5695_v8 = vpop.f32.mrf.mxu3  ;;  %v10636_v34 = vor.u32 %v11863_v33, %v10635_v9  ;;  %v10443_v2 = vld [vmem:[%s17782_s3 + $0x60] sm:$0xf] }
 0x2fd   :  { %5934 = vmatpush.bf16.msrb.mxu2 %v10216_v23  ;;  %v9893_v60 = vld [vmem:[%s17779_s1 + $0x1418] sm:$0xf0]  ;;  %v11706_v17 = vld [vmem:[%s17779_s1 + $0x150c] sm:$0xf]  ;;  %v10296_v5 = vor.u32 %v11774_v53, %v10293_v49  ;;  %v11847_v61 = vld [vmem:[%s17782_s3 + $0x16c] sm:$0xf0] }
 0x2fe   :  { %5947 = vmatpush.bf16.msrb.mxu3 %v10344_v24  ;;  %v10021_v0 = vld [vmem:[%s17779_s1 + $0x1518] sm:$0xf0]  ;;  %v11738_v28 = vld [vmem:[%s17779_s1 + $0x160c] sm:$0xf]  ;;  %v9896_v19 = vor.u32 %v11674_v57, %v9893_v60  ;;  %v10619_v24 = vld [vmem:[%s17782_s3 + $0x1c0] sm:$0xf] }
 0x2ff   :  { %5909 = vmatpush.bf16.msrb.mxu0 %v9944_v36  ;;  %v10149_v6 = vld [vmem:[%s17779_s1 + $0x1618] sm:$0xf0]  ;;  %v11770_v7 = vld [vmem:[%s17779_s1 + $0x170c] sm:$0xf]  ;;  %v10024_v51 = vor.u32 %v11706_v17, %v10021_v0  ;;  %v10620_v10 = vor.u32 %v11859_v55, %v10619_v24  ;;  %v10555_v58 = vld [vmem:[%s17782_s3 + $0x140] sm:$0xf] }
 0x300   :  { %5922 = vmatpush.bf16.msrb.mxu1 %v10072_v37  ;;  %v10277_v12 = vld [vmem:[%s17779_s1 + $0x1718] sm:$0xf0]  ;;  %v10152_v31 = vor.u32 %v11738_v28, %v10149_v6  ;;  %v11978_v21 = vld.sshfl [vmem:[#allocation1 + $0x20] sm:$0xff pattern:$0x73625140] }
 0x301   :  { %5935 = vmatpush.bf16.msrb.mxu2 %v10200_v11  ;;  %v10280_v23 = vor.u32 %v11770_v7, %v10277_v12  ;;  %v11979_v36 = vld.sshfl [vmem:[#allocation1 + $0x28] sm:$0xff pattern:$0x73625140]  ;;  %v11980_v37 = vld.sshfl [vmem:[#allocation1 + $0x30] sm:$0xff pattern:$0x73625140] }
 0x302   :  { %5948 = vmatpush.bf16.msrb.mxu3 %v10328_v39  ;;  %v10603_v11 = vld [vmem:[%s17782_s3 + $0x1a0] sm:$0xf]  ;;  %v11981_v22 = vld.sshfl [vmem:[#allocation1 + $0x38] sm:$0xff pattern:$0x73625140] }
 0x303   :  { %5910 = vmatpush.bf16.msrb.mxu0 %v9928_v44  ;;  %v10604_v29 = vor.u32 %v11855_v13, %v10603_v11  ;;  %v10459_v39 = vld [vmem:[%s17782_s3 + $0x80] sm:$0xf]  ;;  %v11815_v44 = vld [vmem:[%s17782_s3 + $0x6c] sm:$0xf0]  ;;  %v10509_v9 = vld [vmem:[%s17782_s3 + $0xf0] sm:$0xf0] }
 0x304   :  { %5923 = vmatpush.bf16.msrb.mxu1 %v10056_v3  ;;  %v10460_v32 = vor.u32 %v11819_v15, %v10459_v39  ;;  %v10444_v47 = vor.u32 %v11815_v44, %v10443_v2  ;;  %v11843_v50 = vld [vmem:[%s17782_s3 + $0x14c] sm:$0xf0]  ;;  %v10411_v60 = vld [vmem:[%s17782_s3 + $0x20] sm:$0xf]  ;;  %v11825_v55 = vld [vmem:[%s17782_s3 + $0xc4] sm:$0xf] }
 0x305   :  { %5936 = vmatpush.bf16.msrb.mxu2 %v10184_v59  ;;  %v10571_v59 = vld [vmem:[%s17782_s3 + $0x160] sm:$0xf]  ;;  %v11807_v17 = vld [vmem:[%s17782_s3 + $0x2c] sm:$0xf0]  ;;  %v11821_v11 = vld [vmem:[%s17782_s3 + $0xa4] sm:$0xf] }
 0x306   :  { %5949 = vmatpush.bf16.msrb.mxu3 %v10312_v48  ;;  %v10572_v42 = vor.u32 %v11847_v61, %v10571_v59  ;;  %v10427_v48 = vld [vmem:[%s17782_s3 + $0x40] sm:$0xf]  ;;  %v10412_v28 = vor.u32 %v11807_v17, %v10411_v60  ;;  %v11803_v8 = vld [vmem:[%s17782_s3 + $0xc] sm:$0xf0]  ;;  %v10477_v13 = vld [vmem:[%s17782_s3 + $0xb0] sm:$0xf0] }
 0x307   :  { %5911 = vmatpush.bf16.msrb.mxu0 %v9912_v56  ;;  %v10539_v1 = vld [vmem:[%s17782_s3 + $0x120] sm:$0xf]  ;;  %v11835_v18 = vld [vmem:[%s17782_s3 + $0x10c] sm:$0xf0]  ;;  %v11817_v15 = vld [vmem:[%s17782_s3 + $0x84] sm:$0xf] }
 0x308   :  { %5924 = vmatpush.bf16.msrb.mxu1 %v10040_v4  ;;  %v10395_v7 = vld [vmem:[%s17782_s3] sm:$0xf]  ;;  %v5999_v54 = vld.sshfl [vmem:[#allocation1 + $0x8] sm:$0xff pattern:$0x75316420] }
 0x309   :  { %5937 = vmatpush.bf16.msrb.mxu2 %v10168_v16  ;;  %v10556_v16 = vor.u32 %v11843_v50, %v10555_v58  ;;  %v10523_v12 = vld [vmem:[%s17782_s3 + $0x100] sm:$0xf]  ;;  %v10461_v25 = vld [vmem:[%s17782_s3 + $0x90] sm:$0xf0]  ;;  %v11849_v30 = vld [vmem:[%s17782_s3 + $0x184] sm:$0xf] }
 0x30a   :  { %5950 = vmatpush.bf16.msrb.mxu3 %v10296_v5  ;;  %v11839_v5 = vld [vmem:[%s17782_s3 + $0x12c] sm:$0xf0]  ;;  %v5998_v52 = vld.sshfl [vmem:[#allocation1] sm:$0xff pattern:$0x75316420] }
 0x30b   :  { %5912 = vmatpush.bf16.msrb.mxu0 %v9896_v19  ;;  %v5706_v40 = vpop.f32.mrf.mxu0  ;;  %v10540_v6 = vor.u32 %v11839_v5, %v10539_v1  ;;  %v11829_v19 = vld [vmem:[%s17782_s3 + $0xe4] sm:$0xf]  ;;  %v16951_v27 = vpack.c.bf16 %v5998_v52, %v5998_v52  ;;  %v10445_v59 = vld [vmem:[%s17782_s3 + $0x70] sm:$0xf0] }
 0x30c   :  { %5925 = vmatpush.bf16.msrb.mxu1 %v10024_v51  ;;  %v5707_v46 = vadd.f32 %v5706_v40, %v16780_v45  ;;  %v5719_v3 = vpop.f32.mrf.mxu1  ;;  %v11811_v45 = vld [vmem:[%s17782_s3 + $0x4c] sm:$0xf0]  ;;  %v11861_v51 = vld [vmem:[%s17782_s3 + $0x1e4] sm:$0xf]  ;;  %v10557_v50 = vld [vmem:[%s17782_s3 + $0x150] sm:$0xf0] }
 0x30d   :  { %5938 = vmatpush.bf16.msrb.mxu2 %v10152_v31  ;;  %v10428_v56 = vor.u32 %v11811_v45, %v10427_v48  ;;  %v10637_v31 = vld [vmem:[%s17782_s3 + $0x1f0] sm:$0xf0]  ;;  %v11845_v61 = vld [vmem:[%s17782_s3 + $0x164] sm:$0xf] }
 0x30e   :  { %5951 = vmatpush.bf16.msrb.mxu3 %v10280_v23  ;;  %5913 = vmatmul.bf16.vlgmr.msrb.gmra.mxu0 %v11978_v21  ;;  %v5720_v63 = vadd.f32 %v5719_v3, %v5707_v46  ;;  %v10396_v23 = vor.u32 %v11803_v8, %v10395_v7  ;;  %v10640_v24 = vor.u32 %v11861_v51, %v10637_v31  ;;  %v11857_v21 = vld [vmem:[%s17782_s3 + $0x1c4] sm:$0xf]  ;;  %v10413_v17 = vld [vmem:[%s17782_s3 + $0x30] sm:$0xf0]  ;;  %v11864_v51 = vld [vmem:[%s17782_s3 + $0x1f4] sm:$0xf0] }
 0x30f   :  { %6788 = vmatpush.bf16.msra.mxu0 %v10508_v41  ;;  %5926 = vmatmul.bf16.vlgmr.msrb.gmra.mxu1 %v11979_v36  ;;  %v10524_v41 = vor.u32 %v11835_v18, %v10523_v12  ;;  %v16953_v36 = vpack.c.bf16 %v5999_v54, %v5999_v54  ;;  %v11813_v3 = vld [vmem:[%s17782_s3 + $0x64] sm:$0xf]  ;;  %v10397_v12 = vld [vmem:[%s17782_s3 + $0x10] sm:$0xf0] }
 0x310   :  { %6801 = vmatpush.bf16.msra.mxu1 %v10636_v34  ;;  %5939 = vmatmul.bf16.vlgmr.msrb.gmra.mxu2 %v11980_v37  ;;  %v10512_v34 = vor.u32 %v11829_v19, %v10509_v9  ;;  %v11809_v45 = vld [vmem:[%s17782_s3 + $0x44] sm:$0xf]  ;;  %v10525_v18 = vld [vmem:[%s17782_s3 + $0x110] sm:$0xf0]  ;;  %v10515_v19 = vld [vmem:[%s17782_s3 + $0xe8] sm:$0xf] }
 0x311   :  { %5952 = vmatmul.bf16.vlgmr.msrb.gmra.mxu3 %v11981_v22  ;;  %v11853_v22 = vld [vmem:[%s17782_s3 + $0x1a4] sm:$0xf]  ;;  %v11832_v9 = vld [vmem:[%s17782_s3 + $0xf4] sm:$0xf0] }
 0x312   :  { %v11841_v58 = vld [vmem:[%s17782_s3 + $0x144] sm:$0xf]  ;;  %v10516_v52 = vor.u32 %v11832_v9, %v10515_v19  ;;  %v10419_v19 = vld [vmem:[%s17782_s3 + $0x28] sm:$0xf]  ;;  %v11808_v9 = vld [vmem:[%s17782_s3 + $0x34] sm:$0xf0] }
 0x313   :  { %6789 = vmatpush.bf16.msra.mxu0 %v10492_v26  ;;  %v5732_v20 = vpop.f32.mrf.mxu2  ;;  %v5708_v4 = vpop.f32.mrf.mxu0  ;;  %v10493_v26 = vld [vmem:[%s17782_s3 + $0xd0] sm:$0xf0]  ;;  %v11805_v60 = vld [vmem:[%s17782_s3 + $0x24] sm:$0xf] }
 0x314   :  { %6802 = vmatpush.bf16.msra.mxu1 %v10620_v10  ;;  %v5733_v53 = vadd.f32 %v5732_v20, %v5720_v63  ;;  %v5745_v49 = vpop.f32.mrf.mxu3  ;;  %v5721_v0 = vpop.f32.mrf.mxu1  ;;  %v10621_v10 = vld [vmem:[%s17782_s3 + $0x1d0] sm:$0xf0]  ;;  %v10496_v35 = vor.u32 %v11825_v55, %v10493_v26  ;;  %v11837_v5 = vld [vmem:[%s17782_s3 + $0x124] sm:$0xf]  ;;  %v11828_v55 = vld [vmem:[%s17782_s3 + $0xd4] sm:$0xf0] }
 0x315   :  { %v10624_v37 = vor.u32 %v11857_v21, %v10621_v10  ;;  %v10573_v63 = vld [vmem:[%s17782_s3 + $0x170] sm:$0xf0]  ;;  %v11801_v8 = vld [vmem:[%s17782_s3 + $0x4] sm:$0xf]  ;;  %v10627_v26 = vld [vmem:[%s17782_s3 + $0x1c8] sm:$0xf] }
 0x316   :  { %v5746_v57 = vadd.f32 %v5745_v49, %v5733_v53  ;;  %v10576_v48 = vor.u32 %v11845_v61, %v10573_v63  ;;  %v10429_v20 = vld [vmem:[%s17782_s3 + $0x50] sm:$0xf0]  ;;  %v11860_v21 = vld [vmem:[%s17782_s3 + $0x1d4] sm:$0xf0] }
 0x317   :  { %6790 = vmatpush.bf16.msra.mxu0 %v10476_v14  ;;  %v10605_v14 = vld [vmem:[%s17782_s3 + $0x1b0] sm:$0xf0]  ;;  %v11816_v61 = vld [vmem:[%s17782_s3 + $0x74] sm:$0xf0] }
 0x318   :  { %6803 = vmatpush.bf16.msra.mxu1 %v10604_v29  ;;  %v10480_v29 = vor.u32 %v11821_v11, %v10477_v13  ;;  %v10608_v39 = vor.u32 %v11853_v22, %v10605_v14  ;;  %v11824_v11 = vld [vmem:[%s17782_s3 + $0xb4] sm:$0xf0]  ;;  %v10611_v13 = vld [vmem:[%s17782_s3 + $0x1a8] sm:$0xf] }
 0x319   :  { %v11856_v22 = vld [vmem:[%s17782_s3 + $0x1b4] sm:$0xf0] }
 0x31b   :  { %6791 = vmatpush.bf16.msra.mxu0 %v10460_v32  ;;  %v5734_v38 = vpop.f32.mrf.mxu2  ;;  %v10589_v32 = vld [vmem:[%s17782_s3 + $0x190] sm:$0xf0] }
 0x31c   :  { %6804 = vmatpush.bf16.msra.mxu1 %v10588_v43  ;;  %v5747_v33 = vpop.f32.mrf.mxu3  ;;  %v10464_v43 = vor.u32 %v11817_v15, %v10461_v25  ;;  %v10592_v44 = vor.u32 %v11849_v30, %v10589_v32  ;;  %v11833_v38 = vld [vmem:[%s17782_s3 + $0x104] sm:$0xf]  ;;  %v10612_v15 = vor.u32 %v11856_v22, %v10611_v13  ;;  %v10763_v25 = vld [vmem:[%s17782_s3 + $0x2e0] sm:$0xf]  ;;  %v11895_v30 = vld [vmem:[%s17782_s3 + $0x2ec] sm:$0xf0] }
 0x31d   :  { %v10643_v33 = vld [vmem:[%s17782_s3 + $0x1e8] sm:$0xf]  ;;  %v10891_v32 = vld [vmem:[%s17782_s3 + $0x3e0] sm:$0xf]  ;;  %v11836_v13 = vld [vmem:[%s17782_s3 + $0x114] sm:$0xf0] }
 0x31e   :  { %v10644_v54 = vor.u32 %v11864_v51, %v10643_v33 }
 0x31f   :  { %6792 = vmatpush.bf16.msra.mxu0 %v10444_v47 }
 0x320   :  { %6805 = vmatpush.bf16.msra.mxu1 %v10572_v42  ;;  %v10448_v42 = vor.u32 %v11813_v3, %v10445_v59  ;;  %v10451_v59 = vld [vmem:[%s17782_s3 + $0x68] sm:$0xf] }
 0x323   :  { %6793 = vmatpush.bf16.msra.mxu0 %v10428_v56 }
 0x324   :  { %6806 = vmatpush.bf16.msra.mxu1 %v10556_v16  ;;  %v10560_v16 = vor.u32 %v11841_v58, %v10557_v50  ;;  %v10579_v58 = vld [vmem:[%s17782_s3 + $0x168] sm:$0xf]  ;;  %v11848_v50 = vld [vmem:[%s17782_s3 + $0x174] sm:$0xf0] }
 0x327   :  { %6794 = vmatpush.bf16.msra.mxu0 %v10412_v28  ;;  %v10541_v28 = vld [vmem:[%s17782_s3 + $0x130] sm:$0xf0] }
 0x328   :  { %6807 = vmatpush.bf16.msra.mxu1 %v10540_v6  ;;  %v10416_v6 = vor.u32 %v11805_v60, %v10413_v17  ;;  %v10544_v7 = vor.u32 %v11837_v5, %v10541_v28  ;;  %v10580_v60 = vor.u32 %v11848_v50, %v10579_v58  ;;  %v10731_v17 = vld [vmem:[%s17782_s3 + $0x2a0] sm:$0xf]  ;;  %v10563_v28 = vld [vmem:[%s17782_s3 + $0x148] sm:$0xf]  ;;  %v11826_v58 = vld [vmem:[%s17782_s3 + $0xcc] sm:$0xf] }
 0x329   :  { %v10859_v5 = vld [vmem:[%s17782_s3 + $0x3a0] sm:$0xf]  ;;  %v10501_v50 = vld [vmem:[%s17782_s3 + $0xd8] sm:$0xf0] }
 0x32b   :  { %6795 = vmatpush.bf16.msra.mxu0 %v10396_v23  ;;  %v5758_v40 = vpop.f32.mrf.mxu0  ;;  %v10400_v23 = vor.u32 %v11801_v8, %v10397_v12  ;;  %v11919_v8 = vld [vmem:[%s17782_s3 + $0x3ac] sm:$0xf0] }
 0x32c   :  { %6808 = vmatpush.bf16.msra.mxu1 %v10524_v41  ;;  %v5759_v2 = vadd.f32 %v5758_v40, %v5746_v57  ;;  %v5771_v46 = vpop.f32.mrf.mxu1  ;;  %v10432_v57 = vor.u32 %v11809_v45, %v10429_v20  ;;  %v10595_v40 = vld [vmem:[%s17782_s3 + $0x188] sm:$0xf]  ;;  %v10875_v45 = vld [vmem:[%s17782_s3 + $0x3c0] sm:$0xf]  ;;  %v10860_v12 = vor.u32 %v11919_v8, %v10859_v5  ;;  %v10613_v5 = vld [vmem:[%s17782_s3 + $0x1b8] sm:$0xf0] }
 0x32e   :  { %6796 = vmatmul.bf16.vlgmr.msra.gmra.mxu0 %v16951_v27  ;;  %v5772_v47 = vadd.f32 %v5771_v46, %v5759_v2  ;;  %v10764_v2 = vor.u32 %v11895_v30, %v10763_v25  ;;  %v10517_v25 = vld [vmem:[%s17782_s3 + $0xf8] sm:$0xf0] }
 0x32f   :  { %6840 = vmatpush.bf16.msrb.mxu0 %v10512_v34  ;;  %6809 = vmatmul.bf16.vlgmr.msra.gmra.mxu1 %v16953_v36  ;;  %v10528_v34 = vor.u32 %v11833_v38, %v10525_v18 }
 0x330   :  { %6853 = vmatpush.bf16.msrb.mxu1 %v10640_v24  ;;  %v10499_v24 = vld [vmem:[%s17782_s3 + $0xc8] sm:$0xf]  ;;  %6814 = vmatpush.bf16.msra.mxu2 %v10764_v2 }
 0x331   :  { %v10500_v10 = vor.u32 %v11828_v55, %v10499_v24 }
 0x333   :  { %6841 = vmatpush.bf16.msrb.mxu0 %v10496_v35  ;;  %v5784_v53 = vpop.f32.mrf.mxu2  ;;  %v5760_v4 = vpop.f32.mrf.mxu0  ;;  %v10628_v35 = vor.u32 %v11860_v21, %v10627_v26  ;;  %v11915_v26 = vld [vmem:[%s17782_s3 + $0x38c] sm:$0xf0]  ;;  %v10403_v21 = vld [vmem:[%s17782_s3 + $0x8] sm:$0xf] }
 0x334   :  { %6854 = vmatpush.bf16.msrb.mxu1 %v10624_v37  ;;  %v5785_v49 = vadd.f32 %v5784_v53, %v5772_v47  ;;  %v5797_v56 = vpop.f32.mrf.mxu3  ;;  %v5773_v0 = vpop.f32.mrf.mxu1  ;;  %v10483_v37 = vld [vmem:[%s17782_s3 + $0xa8] sm:$0xf] }
 0x335   :  { %v10484_v14 = vor.u32 %v11824_v11, %v10483_v37  ;;  %v10435_v4 = vld [vmem:[%s17782_s3 + $0x48] sm:$0xf]  ;;  %v11887_v0 = vld [vmem:[%s17782_s3 + $0x2ac] sm:$0xf0]  ;;  %v11804_v37 = vld [vmem:[%s17782_s3 + $0x14] sm:$0xf0] }
 0x336   :  { %v17011_v1 = vadd.f32 %v5797_v56, %v5785_v49  ;;  %v11923_v49 = vld [vmem:[%s17782_s3 + $0x3cc] sm:$0xf0]  ;;  %v10531_v11 = vld [vmem:[%s17782_s3 + $0x108] sm:$0xf] }
 0x337   :  { %6842 = vmatpush.bf16.msrb.mxu0 %v10480_v29  ;;  %v10467_v29 = vld [vmem:[%s17782_s3 + $0x88] sm:$0xf]  ;;  %v10876_v56 = vor.u32 %v11923_v49, %v10875_v45  ;;  %v11907_v49 = vld [vmem:[%s17782_s3 + $0x34c] sm:$0xf0] }
 0x338   :  { %6855 = vmatpush.bf16.msrb.mxu1 %v10608_v39  ;;  %v11820_v39 = vld [vmem:[%s17782_s3 + $0x94] sm:$0xf0] }
 0x339   :  { %v10468_v3 = vor.u32 %v11820_v39, %v10467_v29  ;;  %v11879_v29 = vld [vmem:[%s17782_s3 + $0x26c] sm:$0xf0]  ;;  %v10827_v39 = vld [vmem:[%s17782_s3 + $0x360] sm:$0xf] }
 0x33b   :  { %6843 = vmatpush.bf16.msrb.mxu0 %v10464_v43  ;;  %v5786_v31 = vpop.f32.mrf.mxu2  ;;  %v11852_v43 = vld [vmem:[%s17782_s3 + $0x194] sm:$0xf0] }
 0x33c   :  { %6856 = vmatpush.bf16.msrb.mxu1 %v10592_v44  ;;  %v5799_v41 = vpop.f32.mrf.mxu3  ;;  %v11927_v44 = vld [vmem:[%s17782_s3 + $0x3ec] sm:$0xf0]  ;;  %v10596_v47 = vor.u32 %v11852_v43, %v10595_v40  ;;  %v11862_v40 = vld [vmem:[%s17782_s3 + $0x1ec] sm:$0xf]  ;;  %v10645_v43 = vld [vmem:[%s17782_s3 + $0x1f8] sm:$0xf0] }
 0x33d   :  { %v10892_v46 = vor.u32 %v11927_v44, %v10891_v32  ;;  %v11883_v41 = vld [vmem:[%s17782_s3 + $0x28c] sm:$0xf0]  ;;  %v10404_v44 = vor.u32 %v11804_v37, %v10403_v21  ;;  %v10648_v45 = vor.u32 %v11862_v40, %v10645_v43  ;;  %v11846_v43 = vld [vmem:[%s17782_s3 + $0x16c] sm:$0xf] }
 0x33e   :  { %v11911_v32 = vld [vmem:[%s17782_s3 + $0x36c] sm:$0xf0] }
 0x33f   :  { %6844 = vmatpush.bf16.msrb.mxu0 %v10448_v42  ;;  %6827 = vmatpush.bf16.msra.mxu3 %v10892_v46  ;;  %v10747_v42 = vld [vmem:[%s17782_s3 + $0x2c0] sm:$0xf]  ;;  %v10828_v2 = vor.u32 %v11911_v32, %v10827_v39  ;;  %v10453_v39 = vld [vmem:[%s17782_s3 + $0x78] sm:$0xf0]  ;;  %v11921_v32 = vld [vmem:[%s17782_s3 + $0x3c4] sm:$0xf] }
 0x340   :  { %6857 = vmatpush.bf16.msrb.mxu1 %v10576_v48  ;;  %v11891_v48 = vld [vmem:[%s17782_s3 + $0x2cc] sm:$0xf0] }
 0x341   :  { %v10748_v53 = vor.u32 %v11891_v48, %v10747_v42  ;;  %v11875_v42 = vld [vmem:[%s17782_s3 + $0x24c] sm:$0xf0]  ;;  %v10811_v48 = vld [vmem:[%s17782_s3 + $0x340] sm:$0xf] }
 0x343   :  { %6845 = vmatpush.bf16.msrb.mxu0 %v10432_v57  ;;  %v10452_v57 = vor.u32 %v11816_v61, %v10451_v59  ;;  %6815 = vmatpush.bf16.msra.mxu2 %v10748_v53 }
 0x344   :  { %6858 = vmatpush.bf16.msrb.mxu1 %v10560_v16  ;;  %v11812_v16 = vld [vmem:[%s17782_s3 + $0x54] sm:$0xf0]  ;;  %6828 = vmatpush.bf16.msra.mxu3 %v10876_v56  ;;  %v11858_v56 = vld [vmem:[%s17782_s3 + $0x1cc] sm:$0xf] }
 0x345   :  { %v10436_v18 = vor.u32 %v11812_v16, %v10435_v4  ;;  %v10812_v4 = vor.u32 %v11907_v49, %v10811_v48  ;;  %v11822_v16 = vld [vmem:[%s17782_s3 + $0xac] sm:$0xf]  ;;  %v10565_v49 = vld [vmem:[%s17782_s3 + $0x158] sm:$0xf0] }
 0x347   :  { %6846 = vmatpush.bf16.msrb.mxu0 %v10416_v6  ;;  %v11844_v6 = vld [vmem:[%s17782_s3 + $0x154] sm:$0xf0] }
 0x348   :  { %6859 = vmatpush.bf16.msrb.mxu1 %v10544_v7  ;;  %v10732_v7 = vor.u32 %v11887_v0, %v10731_v17  ;;  %v10564_v51 = vor.u32 %v11844_v6, %v10563_v28  ;;  %6829 = vmatpush.bf16.msra.mxu3 %v10860_v12  ;;  %v10504_v17 = vor.u32 %v11826_v58, %v10501_v50  ;;  %v11854_v0 = vld [vmem:[%s17782_s3 + $0x1ac] sm:$0xf]  ;;  %v10667_v28 = vld [vmem:[%s17782_s3 + $0x220] sm:$0xf]  ;;  %v11871_v6 = vld [vmem:[%s17782_s3 + $0x22c] sm:$0xf0] }
 0x349   :  { %v10668_v12 = vor.u32 %v11871_v6, %v10667_v28  ;;  %v10616_v21 = vor.u32 %v11854_v0, %v10613_v5  ;;  %v10733_v58 = vld [vmem:[%s17782_s3 + $0x2b0] sm:$0xf0]  ;;  %v11917_v50 = vld [vmem:[%s17782_s3 + $0x3a4] sm:$0xf] }
 0x34a   :  { %6816 = vmatpush.bf16.msra.mxu2 %v10732_v7  ;;  %v10795_v7 = vld [vmem:[%s17782_s3 + $0x320] sm:$0xf]  ;;  %v11881_v6 = vld [vmem:[%s17782_s3 + $0x284] sm:$0xf] }
 0x34b   :  { %6847 = vmatpush.bf16.msrb.mxu0 %v10400_v23  ;;  %v17099_v63 = vpop.f32.mrf.mxu0  ;;  %v10715_v23 = vld [vmem:[%s17782_s3 + $0x280] sm:$0xf] }
 0x34c   :  { %6860 = vmatpush.bf16.msrb.mxu1 %v10528_v34  ;;  %v17110_v20 = vpop.f32.mrf.mxu1  ;;  %v10843_v34 = vld [vmem:[%s17782_s3 + $0x380] sm:$0xf]  ;;  %v10716_v55 = vor.u32 %v11883_v41, %v10715_v23  ;;  %v11899_v23 = vld [vmem:[%s17782_s3 + $0x30c] sm:$0xf0]  ;;  %v11893_v41 = vld [vmem:[%s17782_s3 + $0x2e4] sm:$0xf]  ;;  %v5811_v0 = vadd.f32 %v17099_v63, %v17011_v1 }
 0x34d   :  { %v11838_v1 = vld [vmem:[%s17782_s3 + $0x12c] sm:$0xf]  ;;  %v10549_v63 = vld [vmem:[%s17782_s3 + $0x138] sm:$0xf0] }
 0x34e   :  { %6848 = vmatmul.bf16.vlgmr.msrb.gmra.mxu0 %v16951_v27  ;;  %6817 = vmatpush.bf16.msra.mxu2 %v10716_v55 }
 0x34f   :  { %6892 = vmatpush.bf16.msra.mxu0 %v10516_v52  ;;  %6861 = vmatmul.bf16.vlgmr.msrb.gmra.mxu1 %v16953_v36  ;;  %v10547_v52 = vld [vmem:[%s17782_s3 + $0x128] sm:$0xf] }
 0x350   :  { %6905 = vmatpush.bf16.msra.mxu1 %v10644_v54  ;;  %v11840_v54 = vld [vmem:[%s17782_s3 + $0x134] sm:$0xf0] }
 0x351   :  { %v10548_v22 = vor.u32 %v11840_v54, %v10547_v52  ;;  %v10765_v52 = vld [vmem:[%s17782_s3 + $0x2f0] sm:$0xf0]  ;;  %v11925_v54 = vld [vmem:[%s17782_s3 + $0x3e4] sm:$0xf] }
 0x353   :  { %6893 = vmatpush.bf16.msra.mxu0 %v10500_v10  ;;  %v17145_v38 = vpop.f32.mrf.mxu2  ;;  %v5812_v31 = vpop.f32.mrf.mxu0  ;;  %v10844_v10 = vor.u32 %v11915_v26, %v10843_v34  ;;  %v10768_v26 = vor.u32 %v11893_v41, %v10765_v52  ;;  %v11802_v41 = vld [vmem:[%s17782_s3 + $0xc] sm:$0xf]  ;;  %v5824_v52 = vadd.f32 %v17110_v20, %v5811_v0  ;;  %v10533_v20 = vld [vmem:[%s17782_s3 + $0x118] sm:$0xf0] }
 0x354   :  { %6906 = vmatpush.bf16.msra.mxu1 %v10628_v35  ;;  %v17153_v33 = vpop.f32.mrf.mxu3  ;;  %v5825_v24 = vpop.f32.mrf.mxu1  ;;  %v10420_v35 = vor.u32 %v11808_v9, %v10419_v19  ;;  %v10651_v19 = vld [vmem:[%s17782_s3 + $0x200] sm:$0xf]  ;;  %v11867_v9 = vld [vmem:[%s17782_s3 + $0x20c] sm:$0xf0] }
 0x355   :  { %6830 = vmatpush.bf16.msra.mxu3 %v10844_v10  ;;  %v10779_v31 = vld [vmem:[%s17782_s3 + $0x300] sm:$0xf]  ;;  %v10652_v34 = vor.u32 %v11867_v9, %v10651_v19  ;;  %v10893_v24 = vld [vmem:[%s17782_s3 + $0x3f0] sm:$0xf0]  ;;  %v11818_v10 = vld [vmem:[%s17782_s3 + $0x8c] sm:$0xf] }
 0x356   :  { %v10780_v37 = vor.u32 %v11899_v23, %v10779_v31  ;;  %v10845_v9 = vld [vmem:[%s17782_s3 + $0x390] sm:$0xf0] }
 0x357   :  { %6894 = vmatpush.bf16.msra.mxu0 %v10484_v14  ;;  %v10699_v14 = vld [vmem:[%s17782_s3 + $0x260] sm:$0xf] }
 0x358   :  { %6907 = vmatpush.bf16.msra.mxu1 %v10612_v15  ;;  %v11830_v15 = vld [vmem:[%s17782_s3 + $0xec] sm:$0xf]  ;;  %v10700_v30 = vor.u32 %v11879_v29, %v10699_v14 }
 0x359   :  { %v10520_v59 = vor.u32 %v11830_v15, %v10517_v25  ;;  %6831 = vmatpush.bf16.msra.mxu3 %v10828_v2  ;;  %v11814_v29 = vld [vmem:[%s17782_s3 + $0x6c] sm:$0xf]  ;;  %v11889_v25 = vld [vmem:[%s17782_s3 + $0x2c4] sm:$0xf]  ;;  %v10581_v2 = vld [vmem:[%s17782_s3 + $0x178] sm:$0xf0] }
 0x35a   :  { %6818 = vmatpush.bf16.msra.mxu2 %v10700_v30  ;;  %v10749_v30 = vld [vmem:[%s17782_s3 + $0x2d0] sm:$0xf0]  ;;  %v10584_v48 = vor.u32 %v11846_v43, %v10581_v2 }
 0x35b   :  { %6895 = vmatpush.bf16.msra.mxu0 %v10468_v3  ;;  %v5838_v46 = vpop.f32.mrf.mxu2  ;;  %v10532_v3 = vor.u32 %v11836_v13, %v10531_v11  ;;  %v11850_v11 = vld [vmem:[%s17782_s3 + $0x18c] sm:$0xf]  ;;  %v10597_v13 = vld [vmem:[%s17782_s3 + $0x198] sm:$0xf0]  ;;  %v10669_v43 = vld [vmem:[%s17782_s3 + $0x230] sm:$0xf0] }
 0x35c   :  { %6908 = vmatpush.bf16.msra.mxu1 %v10596_v47  ;;  %v5851_v61 = vpop.f32.mrf.mxu3  ;;  %v10683_v47 = vld [vmem:[%s17782_s3 + $0x240] sm:$0xf]  ;;  %v10600_v15 = vor.u32 %v11850_v11, %v10597_v13  ;;  %v10877_v46 = vld [vmem:[%s17782_s3 + $0x3d0] sm:$0xf0] }
 0x35d   :  { %v10684_v53 = vor.u32 %v11875_v42, %v10683_v47  ;;  %6832 = vmatpush.bf16.msra.mxu3 %v10812_v4  ;;  %v10456_v61 = vor.u32 %v11814_v29, %v10453_v39  ;;  %v11810_v47 = vld [vmem:[%s17782_s3 + $0x4c] sm:$0xf]  ;;  %v10437_v42 = vld [vmem:[%s17782_s3 + $0x58] sm:$0xf0]  ;;  %v11873_v29 = vld [vmem:[%s17782_s3 + $0x244] sm:$0xf] }
 0x35e   :  { %v10685_v39 = vld [vmem:[%s17782_s3 + $0x250] sm:$0xf0] }
 0x35f   :  { %6896 = vmatpush.bf16.msra.mxu0 %v10452_v57  ;;  %v10629_v57 = vld [vmem:[%s17782_s3 + $0x1d8] sm:$0xf0]  ;;  %6819 = vmatpush.bf16.msra.mxu2 %v10684_v53  ;;  %v11842_v53 = vld [vmem:[%s17782_s3 + $0x14c] sm:$0xf] }
 0x360   :  { %6909 = vmatpush.bf16.msra.mxu1 %v10580_v60  ;;  %v10485_v60 = vld [vmem:[%s17782_s3 + $0xb8] sm:$0xf0]  ;;  %v10632_v8 = vor.u32 %v11858_v56, %v10629_v57  ;;  %v10861_v57 = vld [vmem:[%s17782_s3 + $0x3b0] sm:$0xf0]  ;;  %v10568_v28 = vor.u32 %v11842_v53, %v10565_v49 }
 0x361   :  { %v10488_v55 = vor.u32 %v11822_v16, %v10485_v60  ;;  %v10864_v4 = vor.u32 %v11917_v50, %v10861_v57  ;;  %v10440_v16 = vor.u32 %v11810_v47, %v10437_v42  ;;  %v11806_v60 = vld [vmem:[%s17782_s3 + $0x2c] sm:$0xf]  ;;  %v11865_v42 = vld [vmem:[%s17782_s3 + $0x204] sm:$0xf] }
 0x363   :  { %6897 = vmatpush.bf16.msra.mxu0 %v10436_v18  ;;  %v11903_v18 = vld [vmem:[%s17782_s3 + $0x32c] sm:$0xf0]  ;;  %6820 = vmatpush.bf16.msra.mxu2 %v10668_v12 }
 0x364   :  { %6910 = vmatpush.bf16.msra.mxu1 %v10564_v51  ;;  %v10796_v51 = vor.u32 %v11903_v18, %v10795_v7  ;;  %v10717_v7 = vld [vmem:[%s17782_s3 + $0x290] sm:$0xf0] }
 0x365   :  { %v10720_v19 = vor.u32 %v11881_v6, %v10717_v7 }
 0x366   :  { %6833 = vmatpush.bf16.msra.mxu3 %v10796_v51 }
 0x367   :  { %6898 = vmatpush.bf16.msra.mxu0 %v10420_v35  ;;  %v10469_v35 = vld [vmem:[%s17782_s3 + $0x98] sm:$0xf0]  ;;  %6821 = vmatpush.bf16.msra.mxu2 %v10652_v34 }
 0x368   :  { %6911 = vmatpush.bf16.msra.mxu1 %v10548_v22  ;;  %v10896_v22 = vor.u32 %v11925_v54, %v10893_v24  ;;  %v10472_v14 = vor.u32 %v11818_v10, %v10469_v35  ;;  %v10405_v34 = vld [vmem:[%s17782_s3 + $0x18] sm:$0xf0]  ;;  %v10552_v54 = vor.u32 %v11838_v1, %v10549_v63  ;;  %v11877_v24 = vld [vmem:[%s17782_s3 + $0x264] sm:$0xf]  ;;  %v10829_v35 = vld [vmem:[%s17782_s3 + $0x370] sm:$0xf0] }
 0x369   :  { %v10408_v13 = vor.u32 %v11802_v41, %v10405_v34  ;;  %v11896_v41 = vld [vmem:[%s17782_s3 + $0x2f4] sm:$0xf0] }
 0x36a   :  { %6834 = vmatpush.bf16.msra.mxu3 %v10780_v37  ;;  %v5837_v37 = vadd.f32 %v17145_v38, %v5824_v52  ;;  %v11928_v34 = vld [vmem:[%s17782_s3 + $0x3f4] sm:$0xf0] }
 0x36b   :  { %6899 = vmatpush.bf16.msra.mxu0 %v10404_v44  ;;  %6866 = vmatpush.bf16.msrb.mxu2 %v10768_v26  ;;  %v17310_v40 = vpop.f32.mrf.mxu0  ;;  %v10752_v44 = vor.u32 %v11889_v25, %v10749_v30  ;;  %v11909_v26 = vld [vmem:[%s17782_s3 + $0x364] sm:$0xf]  ;;  %v10688_v25 = vor.u32 %v11873_v29, %v10685_v39  ;;  %v10813_v30 = vld [vmem:[%s17782_s3 + $0x350] sm:$0xf0]  ;;  %v10739_v29 = vld [vmem:[%s17782_s3 + $0x2a8] sm:$0xf] }
 0x36c   :  { %6912 = vmatpush.bf16.msra.mxu1 %v10532_v3  ;;  %v17321_v3 = vpop.f32.mrf.mxu1  ;;  %v10832_v11 = vor.u32 %v11909_v26, %v10829_v35  ;;  %v5850_v2 = vadd.f32 %v17153_v33, %v5837_v37  ;;  %v10653_v33 = vld [vmem:[%s17782_s3 + $0x210] sm:$0xf0]  ;;  %v11892_v35 = vld [vmem:[%s17782_s3 + $0x2d4] sm:$0xf0]  ;;  %v10883_v37 = vld [vmem:[%s17782_s3 + $0x3c8] sm:$0xf] }
 0x36e   :  { %6900 = vmatmul.bf16.vlgmr.msra.gmra.mxu0 %v16951_v27  ;;  %6879 = vmatpush.bf16.msrb.mxu3 %v10896_v22  ;;  %v5863_v47 = vadd.f32 %v17310_v40, %v5850_v2  ;;  %v10781_v40 = vld [vmem:[%s17782_s3 + $0x310] sm:$0xf0] }
 0x36f   :  { %6944 = vmatpush.bf16.msrb.mxu0 %v10520_v59  ;;  %6913 = vmatmul.bf16.vlgmr.msra.gmra.mxu1 %v16953_v36  ;;  %v10880_v59 = vor.u32 %v11921_v32, %v10877_v46  ;;  %v11869_v32 = vld [vmem:[%s17782_s3 + $0x224] sm:$0xf] }
 0x370   :  { %6957 = vmatpush.bf16.msrb.mxu1 %v10648_v45  ;;  %6867 = vmatpush.bf16.msrb.mxu2 %v10752_v44  ;;  %v11885_v45 = vld [vmem:[%s17782_s3 + $0x2a4] sm:$0xf]  ;;  %v5876_v50 = vadd.f32 %v17321_v3, %v5863_v47 }
 0x371   :  { %v10736_v56 = vor.u32 %v11885_v45, %v10733_v58  ;;  %v11901_v46 = vld [vmem:[%s17782_s3 + $0x324] sm:$0xf]  ;;  %v10656_v58 = vor.u32 %v11865_v42, %v10653_v33 }
 0x372   :  { %6880 = vmatpush.bf16.msrb.mxu3 %v10880_v59  ;;  %v10797_v59 = vld [vmem:[%s17782_s3 + $0x330] sm:$0xf0]  ;;  %v11897_v45 = vld [vmem:[%s17782_s3 + $0x304] sm:$0xf] }
 0x373   :  { %6945 = vmatpush.bf16.msrb.mxu0 %v10504_v17  ;;  %v10421_v17 = vld [vmem:[%s17782_s3 + $0x38] sm:$0xf0]  ;;  %v17355_v5 = vpop.f32.mrf.mxu2  ;;  %v5864_v18 = vpop.f32.mrf.mxu0  ;;  %v10784_v53 = vor.u32 %v11897_v45, %v10781_v40  ;;  %v11880_v40 = vld [vmem:[%s17782_s3 + $0x274] sm:$0xf0] }
 0x374   :  { %6958 = vmatpush.bf16.msrb.mxu1 %v10632_v8  ;;  %6868 = vmatpush.bf16.msrb.mxu2 %v10736_v56  ;;  %v11913_v8 = vld [vmem:[%s17782_s3 + $0x384] sm:$0xf]  ;;  %v17366_v12 = vpop.f32.mrf.mxu3  ;;  %v5877_v51 = vpop.f32.mrf.mxu1  ;;  %v10424_v23 = vor.u32 %v11806_v60, %v10421_v17  ;;  %v5889_v49 = vadd.f32 %v17355_v5, %v5876_v50  ;;  %v11912_v50 = vld [vmem:[%s17782_s3 + $0x374] sm:$0xf0] }
 0x375   :  { %v10848_v31 = vor.u32 %v11913_v8, %v10845_v9 }
 0x376   :  { %6881 = vmatpush.bf16.msrb.mxu3 %v10864_v4 }
 0x377   :  { %6946 = vmatpush.bf16.msrb.mxu0 %v10488_v55  ;;  %v10701_v55 = vld [vmem:[%s17782_s3 + $0x270] sm:$0xf0] }
 0x378   :  { %6959 = vmatpush.bf16.msrb.mxu1 %v10616_v21  ;;  %6869 = vmatpush.bf16.msrb.mxu2 %v10720_v19  ;;  %v11834_v21 = vld [vmem:[%s17782_s3 + $0x10c] sm:$0xf]  ;;  %v10704_v10 = vor.u32 %v11877_v24, %v10701_v55 }
 0x379   :  { %v10536_v22 = vor.u32 %v11834_v21, %v10533_v20 }
 0x37a   :  { %6882 = vmatpush.bf16.msrb.mxu3 %v10848_v31  ;;  %v10771_v31 = vld [vmem:[%s17782_s3 + $0x2e8] sm:$0xf] }
 0x37b   :  { %6947 = vmatpush.bf16.msrb.mxu0 %v10472_v14  ;;  %v5890_v14 = vpop.f32.mrf.mxu2  ;;  %v10772_v26 = vor.u32 %v11896_v41, %v10771_v31 }
 0x37c   :  { %6960 = vmatpush.bf16.msrb.mxu1 %v10600_v15  ;;  %6870 = vmatpush.bf16.msrb.mxu2 %v10704_v10  ;;  %v11905_v15 = vld [vmem:[%s17782_s3 + $0x344] sm:$0xf]  ;;  %v5903_v38 = vpop.f32.mrf.mxu3 }
 0x37d   :  { %v10816_v44 = vor.u32 %v11905_v15, %v10813_v30  ;;  %v11888_v38 = vld [vmem:[%s17782_s3 + $0x2b4] sm:$0xf0] }
 0x37e   :  { %6883 = vmatpush.bf16.msrb.mxu3 %v10832_v11  ;;  %v11924_v11 = vld [vmem:[%s17782_s3 + $0x3d4] sm:$0xf0] }
 0x37f   :  { %6948 = vmatpush.bf16.msrb.mxu0 %v10456_v61  ;;  %v10672_v61 = vor.u32 %v11869_v32, %v10669_v43  ;;  %v10884_v14 = vor.u32 %v11924_v11, %v10883_v37  ;;  %v11920_v30 = vld [vmem:[%s17782_s3 + $0x3b4] sm:$0xf0]  ;;  %v10740_v43 = vor.u32 %v11888_v38, %v10739_v29  ;;  %v11882_v38 = vld [vmem:[%s17782_s3 + $0x28c] sm:$0xf] }
 0x380   :  { %6961 = vmatpush.bf16.msrb.mxu1 %v10584_v48  ;;  %6871 = vmatpush.bf16.msrb.mxu2 %v10688_v25  ;;  %v10800_v48 = vor.u32 %v11901_v46, %v10797_v59  ;;  %v10867_v25 = vld [vmem:[%s17782_s3 + $0x3a8] sm:$0xf]  ;;  %v11884_v46 = vld [vmem:[%s17782_s3 + $0x294] sm:$0xf0] }
 0x381   :  { %v10868_v2 = vor.u32 %v11920_v30, %v10867_v25  ;;  %v10851_v59 = vld [vmem:[%s17782_s3 + $0x388] sm:$0xf]  ;;  %v10725_v25 = vld [vmem:[%s17782_s3 + $0x298] sm:$0xf0]  ;;  %v11914_v30 = vld [vmem:[%s17782_s3 + $0x38c] sm:$0xf] }
 0x382   :  { %6884 = vmatpush.bf16.msrb.mxu3 %v10816_v44  ;;  %v10723_v44 = vld [vmem:[%s17782_s3 + $0x288] sm:$0xf] }
 0x383   :  { %6949 = vmatpush.bf16.msrb.mxu0 %v10440_v16  ;;  %v11982_v16 = vld [vmem:[%s17781_s2] sm:$0xf]  ;;  %v10724_v42 = vor.u32 %v11884_v46, %v10723_v44  ;;  %v10728_v44 = vor.u32 %v11882_v38, %v10725_v25  ;;  %v11938_v38 = vld [vmem:[%s17784_s5 + $0x48] sm:$0xff] }
 0x384   :  { %6962 = vmatpush.bf16.msrb.mxu1 %v10568_v28  ;;  %6872 = vmatpush.bf16.msrb.mxu2 %v10672_v61  ;;  %v5981_v28 = vperm.slane %v11982_v16, 2  ;;  %v11916_v61 = vld [vmem:[%s17782_s3 + $0x394] sm:$0xf0]  ;;  %v11950_v25 = vld [vmem:[%s17784_s5 + $0xa8] sm:$0xff] }
 0x385   :  { %v10852_v33 = vor.u32 %v11916_v61, %v10851_v59  ;;  %v11878_v59 = vld [vmem:[%s17782_s3 + $0x26c] sm:$0xf] }
 0x386   :  { %6885 = vmatpush.bf16.msrb.mxu3 %v10800_v48  ;;  %v10707_v48 = vld [vmem:[%s17782_s3 + $0x268] sm:$0xf] }
 0x387   :  { %6950 = vmatpush.bf16.msrb.mxu0 %v10424_v23  ;;  %v17458_v23 = vld [vmem:[%s17783_s4] sm:$0xf] }
 0x388   :  { %6963 = vmatpush.bf16.msrb.mxu1 %v10552_v54  ;;  %6873 = vmatpush.bf16.msrb.mxu2 %v10656_v58  ;;  %v6140_v52 = vperm.slane %v17458_v23, 0  ;;  %v10755_v54 = vld [vmem:[%s17782_s3 + $0x2c8] sm:$0xf] }
 0x389   :  { %v10835_v58 = vld [vmem:[%s17782_s3 + $0x368] sm:$0xf] }
 0x38a   :  { %6886 = vmatpush.bf16.msrb.mxu3 %v10784_v53  ;;  %v10708_v53 = vor.u32 %v11880_v40, %v10707_v48  ;;  %v11874_v40 = vld [vmem:[%s17782_s3 + $0x24c] sm:$0xf] }
 0x38b   :  { %6951 = vmatpush.bf16.msrb.mxu0 %v10408_v13  ;;  %v5914_v56 = vpop.f32.mrf.mxu0 }
 0x38c   :  { %6964 = vmatpush.bf16.msrb.mxu1 %v10536_v22  ;;  %v5927_v57 = vpop.f32.mrf.mxu1  ;;  %v10756_v22 = vor.u32 %v11892_v35, %v10755_v54  ;;  %v11922_v54 = vld [vmem:[%s17782_s3 + $0x3cc] sm:$0xf] }
 0x38d   :  { %v11886_v35 = vld [vmem:[%s17782_s3 + $0x2ac] sm:$0xf] }
 0x38e   :  { %6952 = vmatmul.bf16.vlgmr.msrb.gmra.mxu0 %v16951_v27  ;;  %v5902_v27 = vadd.f32 %v17366_v12, %v5889_v49  ;;  %v10836_v49 = vor.u32 %v11912_v50, %v10835_v58  ;;  %v10693_v58 = vld [vmem:[%s17782_s3 + $0x258] sm:$0xf0]  ;;  %v11906_v50 = vld [vmem:[%s17782_s3 + $0x34c] sm:$0xf] }
 0x38f   :  { %6965 = vmatmul.bf16.vlgmr.msrb.gmra.mxu1 %v16953_v36  ;;  %v5982_v36 = vperm.slane %v11982_v16, 3 }
 0x390   :  { %v5915_v4 = vadd.f32 %v5914_v56, %v5902_v27  ;;  %v10691_v27 = vld [vmem:[%s17782_s3 + $0x248] sm:$0xf]  ;;  %v11876_v56 = vld [vmem:[%s17782_s3 + $0x254] sm:$0xf0] }
 0x391   :  { %v5984_v6 = vrot.slane %v5982_v36, 4  ;;  %v10692_v16 = vor.u32 %v11876_v56, %v10691_v27  ;;  %v11870_v56 = vld [vmem:[%s17782_s3 + $0x22c] sm:$0xf] }
 0x392   :  { %v5928_v60 = vadd.f32 %v5927_v57, %v5915_v4  ;;  %v10819_v57 = vld [vmem:[%s17782_s3 + $0x348] sm:$0xf]  ;;  %v11908_v4 = vld [vmem:[%s17782_s3 + $0x354] sm:$0xf0] }
 0x393   :  { %v5940_v17 = vpop.f32.mrf.mxu2  ;;  %v5916_v7 = vpop.f32.mrf.mxu0  ;;  %v5986_v12 = vsel %vm5963_vm0, %v5981_v28, %v5984_v6  ;;  %v10820_v36 = vor.u32 %v11908_v4, %v10819_v57  ;;  %v10677_v57 = vld [vmem:[%s17782_s3 + $0x238] sm:$0xf0]  ;;  %v11902_v4 = vld [vmem:[%s17782_s3 + $0x32c] sm:$0xf] }
 0x394   :  { %v5941_v0 = vadd.f32 %v5940_v17, %v5928_v60  ;;  %v5953_v3 = vpop.f32.mrf.mxu3  ;;  %v5929_v5 = vpop.f32.mrf.mxu1  ;;  %v10675_v60 = vld [vmem:[%s17782_s3 + $0x228] sm:$0xf]  ;;  %v11872_v17 = vld [vmem:[%s17782_s3 + $0x234] sm:$0xf0] }
 0x395   :  { %v10676_v28 = vor.u32 %v11872_v17, %v10675_v60  ;;  %v10659_v7 = vld [vmem:[%s17782_s3 + $0x208] sm:$0xf]  ;;  %v11868_v5 = vld [vmem:[%s17782_s3 + $0x214] sm:$0xf0]  ;;  %v11866_v17 = vld [vmem:[%s17782_s3 + $0x20c] sm:$0xf] }
 0x396   :  { %v5954_v8 = vadd.f32 %v5953_v3, %v5941_v0  ;;  %v10803_v0 = vld [vmem:[%s17782_s3 + $0x328] sm:$0xf]  ;;  %v11904_v3 = vld [vmem:[%s17782_s3 + $0x334] sm:$0xf0] }
 0x397   :  { %v10804_v6 = vor.u32 %v11904_v3, %v10803_v0  ;;  %v10661_v0 = vld [vmem:[%s17782_s3 + $0x218] sm:$0xf0]  ;;  %v11898_v3 = vld [vmem:[%s17782_s3 + $0x30c] sm:$0xf] }
 0x398   :  { %v5962_v1 = vrot.slane %v5954_v8, 4  ;;  %v10787_v8 = vld [vmem:[%s17782_s3 + $0x308] sm:$0xf] }
 0x39a   :  { %v5965_v63 = vsel %vm5963_vm0, %v16584_v62, %v5962_v1  ;;  %v10899_v62 = vld [vmem:[%s17782_s3 + $0x3e8] sm:$0xf]  ;;  %v11900_v1 = vld [vmem:[%s17782_s3 + $0x314] sm:$0xf0] }
 0x39b   :  { %v5990_v18 = vadd.f32 %v5986_v12, %v5965_v63  ;;  %v5942_v19 = vpop.f32.mrf.mxu2  ;;  %v10900_v21 = vor.u32 %v11928_v34, %v10899_v62  ;;  %v11894_v12 = vld [vmem:[%s17782_s3 + $0x2ec] sm:$0xf]  ;;  %v10773_v63 = vld [vmem:[%s17782_s3 + $0x2f8] sm:$0xf0]  ;;  %v6141_v62 = vperm.slane %v17458_v23, 1 }
 0x39c   :  { %v5955_v9 = vpop.f32.mrf.mxu3  ;;  %v10901_v19 = vld [vmem:[%s17782_s3 + $0x3f8] sm:$0xf0]  ;;  %v10776_v31 = vor.u32 %v11894_v12, %v10773_v63  ;;  %v11890_v34 = vld [vmem:[%s17782_s3 + $0x2cc] sm:$0xf] }
 0x39d   :  { %v5992_v51 = vmax.f32 %v5990_v18, 0.0  ;;  %v11926_v18 = vld [vmem:[%s17782_s3 + $0x3ec] sm:$0xf]  ;;  %v10660_v9 = vor.u32 %v11868_v5, %v10659_v7  ;;  %v6142_v5 = vperm.slane %v17458_v23, 2 }
 0x39e   :  { %v10904_v41 = vor.u32 %v11926_v18, %v10901_v19  ;;  %v11936_v18 = vld [vmem:[%s17784_s5 + $0x38] sm:$0xff] }
 0x39f   :  { %5997 = vst [vmem:[#allocation1 + $0x10] ss:$2 sm:$0xff] %v5992_v51  ;;  %v10788_v51 = vor.u32 %v11900_v1, %v10787_v8  ;;  %v11944_v19 = vld [vmem:[%s17784_s5 + $0x78] sm:$0xff]  ;;  %7264 = vmatpush.bf16.msra.mxu0 %v11936_v18 }
 0x3a0   :  { %7277 = vmatpush.bf16.msra.mxu1 %v11944_v19 }
 0x3a6   :  { %v6000_v24 = vld.sshfl [vmem:[#allocation1 + $0x10] sm:$0xff pattern:$0x75316420]  ;;  %v6001_v55 = vld.sshfl [vmem:[#allocation1 + $0x18] sm:$0xff pattern:$0x75316420] }
 0x3a7   :  { %v17473_v20 = vpack.c.bf16 %v6000_v24, %v6000_v24  ;;  %v17475_v10 = vpack.c.bf16 %v6001_v55, %v6001_v55  ;;  %v10885_v24 = vld [vmem:[%s17782_s3 + $0x3d8] sm:$0xf0] }
 0x3a9   :  { %6822 = vmatmul.bf16.vlgmr.msra.gmra.mxu2 %v17473_v20  ;;  %6835 = vmatmul.bf16.vlgmr.msra.gmra.mxu3 %v17475_v10 }
 0x3aa   :  { %6918 = vmatpush.bf16.msra.mxu2 %v10772_v26  ;;  %6931 = vmatpush.bf16.msra.mxu3 %v10900_v21  ;;  %v10888_v21 = vor.u32 %v11922_v54, %v10885_v24 }
 0x3ab   :  { %v6797_v13 = vpop.f32.mrf.mxu0 }
 0x3ac   :  { %v6798_v39 = vadd.f32 %v6797_v13, %v6140_v52  ;;  %v6810_v15 = vpop.f32.mrf.mxu1  ;;  %v10757_v52 = vld [vmem:[%s17782_s3 + $0x2d8] sm:$0xf0] }
 0x3ad   :  { %v10760_v26 = vor.u32 %v11890_v34, %v10757_v52  ;;  %v10741_v13 = vld [vmem:[%s17782_s3 + $0x2b8] sm:$0xf0]  ;;  %v11931_v34 = vld [vmem:[%s17784_s5 + $0x10] sm:$0xff]  ;;  %v6143_v52 = vperm.slane %v17458_v23, 3  ;;  %v11929_v23 = vld [vmem:[%s17784_s5] sm:$0xff] }
 0x3ae   :  { %v17500_v32 = vadd.f32 %v6810_v15, %v6798_v39  ;;  %6919 = vmatpush.bf16.msra.mxu2 %v10756_v22  ;;  %6932 = vmatpush.bf16.msra.mxu3 %v10884_v14  ;;  %v11918_v22 = vld [vmem:[%s17782_s3 + $0x3ac] sm:$0xf]  ;;  %v10869_v14 = vld [vmem:[%s17782_s3 + $0x3b8] sm:$0xf0]  ;;  %v10744_v39 = vor.u32 %v11886_v35, %v10741_v13  ;;  %v11941_v13 = vld [vmem:[%s17784_s5 + $0x60] sm:$0xff] }
 0x3af   :  { %v10872_v15 = vor.u32 %v11918_v22, %v10869_v14  ;;  %v11940_v22 = vld [vmem:[%s17784_s5 + $0x58] sm:$0xff] }
 0x3b0   :  { %v11952_v14 = vld [vmem:[%s17784_s5 + $0xb8] sm:$0xff] }
 0x3b2   :  { %6920 = vmatpush.bf16.msra.mxu2 %v10740_v43  ;;  %6933 = vmatpush.bf16.msra.mxu3 %v10868_v2  ;;  %v10853_v43 = vld [vmem:[%s17782_s3 + $0x398] sm:$0xf0] }
 0x3b3   :  { %v6799_v47 = vpop.f32.mrf.mxu0  ;;  %v10856_v46 = vor.u32 %v11914_v30, %v10853_v43  ;;  %v11937_v30 = vld [vmem:[%s17784_s5 + $0x40] sm:$0xff] }
 0x3b4   :  { %v6812_v45 = vpop.f32.mrf.mxu1  ;;  %v10709_v47 = vld [vmem:[%s17782_s3 + $0x278] sm:$0xf0]  ;;  %v11949_v43 = vld [vmem:[%s17784_s5 + $0xa0] sm:$0xff] }
 0x3b5   :  { %v10712_v48 = vor.u32 %v11878_v59, %v10709_v47  ;;  %v11946_v47 = vld [vmem:[%s17784_s5 + $0x88] sm:$0xff] }
 0x3b6   :  { %6921 = vmatpush.bf16.msra.mxu2 %v10724_v42  ;;  %6934 = vmatpush.bf16.msra.mxu3 %v10852_v33  ;;  %v11910_v42 = vld [vmem:[%s17782_s3 + $0x36c] sm:$0xf]  ;;  %v10837_v33 = vld [vmem:[%s17782_s3 + $0x378] sm:$0xf0] }
 0x3b7   :  { %v10840_v45 = vor.u32 %v11910_v42, %v10837_v33 }
 0x3b9   :  { %6874 = vmatmul.bf16.vlgmr.msrb.gmra.mxu2 %v17473_v20  ;;  %6887 = vmatmul.bf16.vlgmr.msrb.gmra.mxu3 %v17475_v10 }
 0x3ba   :  { %6922 = vmatpush.bf16.msra.mxu2 %v10708_v53  ;;  %6935 = vmatpush.bf16.msra.mxu3 %v10836_v49  ;;  %v10821_v53 = vld [vmem:[%s17782_s3 + $0x358] sm:$0xf0]  ;;  %v10696_v49 = vor.u32 %v11874_v40, %v10693_v58 }
 0x3bb   :  { %v10824_v27 = vor.u32 %v11906_v50, %v10821_v53  ;;  %v11959_v50 = vld [vmem:[%s17784_s5 + $0xf0] sm:$0xff]  ;;  %v11958_v53 = vld [vmem:[%s17784_s5 + $0xe8] sm:$0xff] }
 0x3be   :  { %6923 = vmatpush.bf16.msra.mxu2 %v10692_v16  ;;  %6936 = vmatpush.bf16.msra.mxu3 %v10820_v36  ;;  %v10805_v16 = vld [vmem:[%s17782_s3 + $0x338] sm:$0xf0]  ;;  %v10680_v36 = vor.u32 %v11870_v56, %v10677_v57 }
 0x3bf   :  { %v10808_v60 = vor.u32 %v11902_v4, %v10805_v16  ;;  %v11956_v16 = vld [vmem:[%s17784_s5 + $0xd8] sm:$0xff] }
 0x3c2   :  { %6924 = vmatpush.bf16.msra.mxu2 %v10676_v28  ;;  %6937 = vmatpush.bf16.msra.mxu3 %v10804_v6  ;;  %v10789_v28 = vld [vmem:[%s17782_s3 + $0x318] sm:$0xf0]  ;;  %v10664_v6 = vor.u32 %v11866_v17, %v10661_v0  ;;  %v11955_v17 = vld [vmem:[%s17784_s5 + $0xd0] sm:$0xff] }
 0x3c3   :  { %v10792_v7 = vor.u32 %v11898_v3, %v10789_v28 }
 0x3c6   :  { %6925 = vmatpush.bf16.msra.mxu2 %v10660_v9  ;;  %6938 = vmatpush.bf16.msra.mxu3 %v10788_v51  ;;  %v11935_v51 = vld [vmem:[%s17784_s5 + $0x30] sm:$0xff] }
 0x3c7   :  { %7265 = vmatpush.bf16.msra.mxu0 %v11935_v51 }
 0x3c9   :  { %6926 = vmatmul.bf16.vlgmr.msra.gmra.mxu2 %v17473_v20  ;;  %6939 = vmatmul.bf16.vlgmr.msra.gmra.mxu3 %v17475_v10 }
 0x3ca   :  { %6970 = vmatpush.bf16.msrb.mxu2 %v10776_v31  ;;  %6983 = vmatpush.bf16.msrb.mxu3 %v10904_v41  ;;  %v11933_v41 = vld [vmem:[%s17784_s5 + $0x20] sm:$0xff] }
 0x3cb   :  { %v6849_v55 = vpop.f32.mrf.mxu0 }
 0x3cc   :  { %v6850_v37 = vadd.f32 %v6849_v55, %v6141_v62  ;;  %v6862_v11 = vpop.f32.mrf.mxu1  ;;  %v11932_v62 = vld [vmem:[%s17784_s5 + $0x18] sm:$0xff] }
 0x3ce   :  { %v17603_v29 = vadd.f32 %v6862_v11, %v6850_v37  ;;  %6971 = vmatpush.bf16.msrb.mxu2 %v10760_v26  ;;  %6984 = vmatpush.bf16.msrb.mxu3 %v10888_v21  ;;  %v11930_v37 = vld [vmem:[%s17784_s5 + $0x8] sm:$0xff] }
 0x3cf   :  { %v11942_v11 = vld [vmem:[%s17784_s5 + $0x68] sm:$0xff] }
 0x3d2   :  { %6972 = vmatpush.bf16.msrb.mxu2 %v10744_v39  ;;  %6985 = vmatpush.bf16.msrb.mxu3 %v10872_v15  ;;  %v11939_v39 = vld [vmem:[%s17784_s5 + $0x50] sm:$0xff] }
 0x3d3   :  { %v6851_v2 = vpop.f32.mrf.mxu0  ;;  %v11951_v15 = vld [vmem:[%s17784_s5 + $0xb0] sm:$0xff] }
 0x3d4   :  { %v6864_v61 = vpop.f32.mrf.mxu1  ;;  %v11948_v2 = vld [vmem:[%s17784_s5 + $0x98] sm:$0xff] }
 0x3d6   :  { %6973 = vmatpush.bf16.msrb.mxu2 %v10728_v44  ;;  %6986 = vmatpush.bf16.msrb.mxu3 %v10856_v46  ;;  %v11947_v44 = vld [vmem:[%s17784_s5 + $0x90] sm:$0xff] }
 0x3da   :  { %6974 = vmatpush.bf16.msrb.mxu2 %v10712_v48  ;;  %6987 = vmatpush.bf16.msrb.mxu3 %v10840_v45  ;;  %v11945_v48 = vld [vmem:[%s17784_s5 + $0x80] sm:$0xff]  ;;  %v11960_v45 = vld [vmem:[%s17784_s5 + $0xf8] sm:$0xff] }
 0x3de   :  { %6975 = vmatpush.bf16.msrb.mxu2 %v10696_v49  ;;  %6988 = vmatpush.bf16.msrb.mxu3 %v10824_v27  ;;  %v11957_v49 = vld [vmem:[%s17784_s5 + $0xe0] sm:$0xff] }
 0x3e2   :  { %6976 = vmatpush.bf16.msrb.mxu2 %v10680_v36  ;;  %6989 = vmatpush.bf16.msrb.mxu3 %v10808_v60 }
 0x3e6   :  { %6977 = vmatpush.bf16.msrb.mxu2 %v10664_v6  ;;  %6990 = vmatpush.bf16.msrb.mxu3 %v10792_v7 }
 0x3e9   :  { %6978 = vmatmul.bf16.vlgmr.msrb.gmra.mxu2 %v17473_v20  ;;  %6991 = vmatmul.bf16.vlgmr.msrb.gmra.mxu3 %v17475_v10  ;;  %v11943_v20 = vld [vmem:[%s17784_s5 + $0x70] sm:$0xff]  ;;  %v11934_v10 = vld [vmem:[%s17784_s5 + $0x28] sm:$0xff] }
 0x3ea   :  { %7278 = vmatpush.bf16.msra.mxu1 %v11943_v20  ;;  %7266 = vmatpush.bf16.msra.mxu0 %v11934_v10 }
 0x3eb   :  { %v6901_v8 = vpop.f32.mrf.mxu0  ;;  %7290 = vmatpush.bf16.msra.mxu2 %v11952_v14  ;;  %7303 = vmatpush.bf16.msra.mxu3 %v11960_v45 }
 0x3ec   :  { %v6902_v1 = vadd.f32 %v6901_v8, %v6142_v5  ;;  %v6914_v12 = vpop.f32.mrf.mxu1  ;;  %v11953_v5 = vld [vmem:[%s17784_s5 + $0xc0] sm:$0xff] }
 0x3ee   :  { %v17668_v63 = vadd.f32 %v6914_v12, %v6902_v1  ;;  %7267 = vmatpush.bf16.msra.mxu0 %v11933_v41  ;;  %7279 = vmatpush.bf16.msra.mxu1 %v11942_v11 }
 0x3ef   :  { %7291 = vmatpush.bf16.msra.mxu2 %v11951_v15  ;;  %7304 = vmatpush.bf16.msra.mxu3 %v11959_v50 }
 0x3f2   :  { %7268 = vmatpush.bf16.msra.mxu0 %v11932_v62  ;;  %7280 = vmatpush.bf16.msra.mxu1 %v11941_v13 }
 0x3f3   :  { %v6903_v9 = vpop.f32.mrf.mxu0  ;;  %7292 = vmatpush.bf16.msra.mxu2 %v11950_v25  ;;  %7305 = vmatpush.bf16.msra.mxu3 %v11958_v53 }
 0x3f4   :  { %v6916_v31 = vpop.f32.mrf.mxu1 }
 0x3f6   :  { %7269 = vmatpush.bf16.msra.mxu0 %v11931_v34  ;;  %7281 = vmatpush.bf16.msra.mxu1 %v11940_v22 }
 0x3f7   :  { %7293 = vmatpush.bf16.msra.mxu2 %v11949_v43  ;;  %7306 = vmatpush.bf16.msra.mxu3 %v11957_v49 }
 0x3fa   :  { %7270 = vmatpush.bf16.msra.mxu0 %v11930_v37  ;;  %7282 = vmatpush.bf16.msra.mxu1 %v11939_v39 }
 0x3fb   :  { %7294 = vmatpush.bf16.msra.mxu2 %v11948_v2  ;;  %7307 = vmatpush.bf16.msra.mxu3 %v11956_v16 }
 0x3fe   :  { %7271 = vmatpush.bf16.msra.mxu0 %v11929_v23  ;;  %7283 = vmatpush.bf16.msra.mxu1 %v11938_v38 }
 0x3ff   :  { %7295 = vmatpush.bf16.msra.mxu2 %v11947_v44  ;;  %7308 = vmatpush.bf16.msra.mxu3 %v11955_v17 }
 0x402   :  { %7284 = vmatpush.bf16.msra.mxu1 %v11937_v30 }
 0x403   :  { %7296 = vmatpush.bf16.msra.mxu2 %v11946_v47 }
 0x407   :  { %7297 = vmatpush.bf16.msra.mxu2 %v11945_v48 }
 0x40b   :  { %v6953_v54 = vpop.f32.mrf.mxu0 }
 0x40c   :  { %v6954_v24 = vadd.f32 %v6953_v54, %v6143_v52  ;;  %v6966_v55 = vpop.f32.mrf.mxu1 }
 0x40e   :  { %v17695_v26 = vadd.f32 %v6966_v55, %v6954_v24 }
 0x413   :  { %v6955_v21 = vpop.f32.mrf.mxu0 }
 0x414   :  { %v6968_v35 = vpop.f32.mrf.mxu1 }
 0x415   :  { %v11961_v35 = vld [vmem:[%s17785_s6] ss:$0 sm:$0xff] }
 0x42c   :  { %v6823_v46 = vpop.f32.mrf.mxu2  ;;  %v6836_v59 = vpop.f32.mrf.mxu3 }
 0x42d   :  { %v6824_v61 = vadd.f32 %v6823_v46, %v17500_v32 }
 0x42f   :  { %v6837_v42 = vadd.f32 %v6836_v59, %v6824_v61 }
 0x431   :  { %v6996_v33 = vmax.f32 %v6837_v42, 0.0 }
 0x433   :  { %v7000_v40 = vpack.c.bf16 %v6996_v33, %v6996_v33 }
 0x434   :  { %v6825_v58 = vpop.f32.mrf.mxu2  ;;  %v6838_v32 = vpop.f32.mrf.mxu3 }
 0x435   :  { %7272 = vmatmul.bf16.vlgmr.msra.gmra.mxu0 %v7000_v40 }
 0x43c   :  { %v6875_v27 = vpop.f32.mrf.mxu2  ;;  %v6888_v56 = vpop.f32.mrf.mxu3 }
 0x43d   :  { %v6876_v57 = vadd.f32 %v6875_v27, %v17603_v29  ;;  %v11954_v29 = vld [vmem:[%s17784_s5 + $0xc8] sm:$0xff] }
 0x43e   :  { %7309 = vmatpush.bf16.msra.mxu3 %v11954_v29 }
 0x43f   :  { %v6889_v4 = vadd.f32 %v6888_v56, %v6876_v57 }
 0x441   :  { %v6997_v36 = vmax.f32 %v6889_v4, 0.0 }
 0x442   :  { %7310 = vmatpush.bf16.msra.mxu3 %v11953_v5 }
 0x443   :  { %v7001_v60 = vpack.c.bf16 %v6997_v36, %v6997_v36 }
 0x444   :  { %v6877_v0 = vpop.f32.mrf.mxu2  ;;  %v6890_v3 = vpop.f32.mrf.mxu3 }
 0x445   :  { %7285 = vmatmul.bf16.vlgmr.msra.gmra.mxu1 %v7001_v60 }
 0x44c   :  { %v6927_v28 = vpop.f32.mrf.mxu2  ;;  %v6940_v6 = vpop.f32.mrf.mxu3 }
 0x44d   :  { %v6928_v7 = vadd.f32 %v6927_v28, %v17668_v63 }
 0x44f   :  { %v6941_v8 = vadd.f32 %v6940_v6, %v6928_v7 }
 0x451   :  { %v6998_v1 = vmax.f32 %v6941_v8, 0.0 }
 0x453   :  { %v7002_v12 = vpack.c.bf16 %v6998_v1, %v6998_v1 }
 0x454   :  { %v6929_v18 = vpop.f32.mrf.mxu2  ;;  %v6942_v19 = vpop.f32.mrf.mxu3 }
 0x455   :  { %7298 = vmatmul.bf16.vlgmr.msra.gmra.mxu2 %v7002_v12 }
 0x46c   :  { %v6979_v9 = vpop.f32.mrf.mxu2  ;;  %v6992_v51 = vpop.f32.mrf.mxu3 }
 0x46d   :  { %v6980_v31 = vadd.f32 %v6979_v9, %v17695_v26 }
 0x46f   :  { %v6993_v20 = vadd.f32 %v6992_v51, %v6980_v31 }
 0x471   :  { %v6999_v10 = vmax.f32 %v6993_v20, 0.0 }
 0x473   :  { %v7003_v41 = vpack.c.bf16 %v6999_v10, %v6999_v10 }
 0x474   :  { %v6981_v62 = vpop.f32.mrf.mxu2  ;;  %v6994_v63 = vpop.f32.mrf.mxu3 }
 0x475   :  { %7311 = vmatmul.bf16.vlgmr.msra.gmra.mxu3 %v7003_v41 }
 0x4b2   :  { %v7273_v34 = vpop.f32.mrf.mxu0 }
 0x4b3   :  { %v7274_v37 = vadd.f32 %v11961_v35, %v7273_v34 }
 0x4ba   :  { %v7275_v52 = vpop.f32.mrf.mxu0 }
 0x4c2   :  { %v7286_v54 = vpop.f32.mrf.mxu1 }
 0x4c3   :  { %v7287_v11 = vadd.f32 %v7286_v54, %v7274_v37 }
 0x4ca   :  { %v7288_v24 = vpop.f32.mrf.mxu1 }
 0x4d8   :  { %v7299_v55 = vpop.f32.mrf.mxu2 }
 0x4d9   :  { %v7300_v23 = vadd.f32 %v7299_v55, %v7287_v11 }
 0x4e0   :  { %v7301_v21 = vpop.f32.mrf.mxu2 }
 0x4f8   :  { %v7312_v26 = vpop.f32.mrf.mxu3 }
 0x4f9   :  { %v7313_v13 = vadd.f32 %v7312_v26, %v7300_v23 }
 0x4fb   :  { %7316 = vst [vmem:[%s17786_s7] sm:$0xf] %v7313_v13 }
 0x500   :  { %v7314_v22 = vpop.f32.mrf.mxu3 }

</bundles_post_ra>
